<compile_context>
chip_gen: v7x
topology: tpu7x:2x2x1
jax: 0.10.0
libtpu: 0.0.40
codegen_flags: <defaults>
</compile_context>

<pallas_src>
import functools

import jax
import jax.numpy as jnp
from jax.experimental import pallas as pl
from jax.experimental.pallas import tpu as pltpu


# ---------------------------------------------------------------------------
# Fused kernel: conv1a -> conv1b -> conv2a -> conv2b  (k == 0, cached in VMEM)
#               conv3(tile) -> maxpool -> fc(tile)    (every grid step)
# ---------------------------------------------------------------------------
def _fused_kernel(x_ref, sp_ref, sn_ref,
                  w1a_ref, b1a_ref,
                  w1b_ref, b1b_ref,
                  w2a_ref, b2a_ref,
                  w2b_ref, b2b_ref,
                  w3_ref, b3_ref,
                  wl_ref, bl_ref,
                  o_ref, h_scratch, *, B, T):
    k = pl.program_id(0)

    def conv_same(h_bf, w_ref, b_ref, relu):
        # h_bf: (BT, Cin) bf16.  w_ref: (3, Cin, Cout) bf16 taps
        # [W[t-1], W[t], W[t+1]].  b_ref: (1, Cout) f32.
        # Shifted taps via tiny block-diagonal 0/1 shift matrices; boundary
        # rows come out exactly zero == 'same' zero padding.
        prev = jnp.dot(sp_ref[...], h_bf,
                       preferred_element_type=jnp.float32).astype(jnp.bfloat16)
        nxt = jnp.dot(sn_ref[...], h_bf,
                      preferred_element_type=jnp.float32).astype(jnp.bfloat16)
        out = jnp.dot(prev, w_ref[0], preferred_element_type=jnp.float32)
        out += jnp.dot(h_bf, w_ref[1], preferred_element_type=jnp.float32)
        out += jnp.dot(nxt, w_ref[2], preferred_element_type=jnp.float32)
        out += b_ref[...]
        if relu:
            out = jnp.maximum(out, 0.0)
        return out

    # Front layers only once; result persists in VMEM scratch across the
    # conv3-Cout grid so the later weight-tile DMAs overlap this compute.
    @pl.when(k == 0)
    def _():
        h = x_ref[...].astype(jnp.bfloat16)
        h = conv_same(h, w1a_ref, b1a_ref, relu=True).astype(jnp.bfloat16)
        h = conv_same(h, w1b_ref, b1b_ref, relu=True).astype(jnp.bfloat16)
        # drop1: identity (inference)
        h = conv_same(h, w2a_ref, b2a_ref, relu=True).astype(jnp.bfloat16)
        h = conv_same(h, w2b_ref, b2b_ref, relu=True).astype(jnp.bfloat16)
        # drop2: identity (inference)
        h_scratch[...] = h

    # conv3 for this Cout tile, global max-pool over time, partial FC.
    h = h_scratch[...]                                         # (BT, 512) bf16
    c3 = conv_same(h, w3_ref, b3_ref, relu=False)              # (BT, tile_c)
    pooled = jnp.max(c3.reshape(B, T, c3.shape[-1]), axis=1)   # (B, tile_c)
    partial = jnp.dot(pooled.astype(jnp.bfloat16), wl_ref[...],
                      preferred_element_type=jnp.float32)      # (B, 512)

    @pl.when(k == 0)
    def _():
        o_ref[...] = bl_ref[...] + partial

    @pl.when(k != 0)
    def _():
        o_ref[...] = o_ref[...] + partial


# ---------------------------------------------------------------------------
# Wrapper
# ---------------------------------------------------------------------------
def embed_model_1d_forward(params, x, *, tile_c=512):
    """x: (B, n_frames, n_freq) float32 -> (B, 512) float32."""
    B, T, n_freq = x.shape
    BT = B * T
    c_mid = params["conv1a_w"].shape[-1]           # 512
    c3 = params["conv3_w"].shape[-1]               # 2048
    n_out = params["line3_w"].shape[-1]            # 512
    cin0 = ((n_freq + 127) // 128) * 128           # lane-align first Cin
    assert c3 % tile_c == 0
    n_tiles = c3 // tile_c

    # Tiny one-time boundary ops: pad channels, fold batch into the M dim.
    x2 = jnp.pad(x, ((0, 0), (0, 0), (0, cin0 - n_freq))).reshape(BT, cin0)

    # Block-diagonal shift matrices: prev[i] = h[i-1] (0 at t == 0),
    # next[i] = h[i+1] (0 at t == T-1).  Exact 0/1 values in bf16.
    i = jnp.arange(BT)[:, None]
    j = jnp.arange(BT)[None, :]
    sp = ((j == i - 1) & (i % T != 0)).astype(jnp.bfloat16)
    sn = ((j == i + 1) & (i % T != T - 1)).astype(jnp.bfloat16)

    def conv_w(w, pad_cin_to=None):
        # (3, Cin, Cout) tap-major layout, bf16.
        if pad_cin_to is not None and pad_cin_to != w.shape[1]:
            w = jnp.pad(w, ((0, 0), (0, pad_cin_to - w.shape[1]), (0, 0)))
        return w.astype(jnp.bfloat16)

    def bias_2d(b):
        return b.reshape(1, -1).astype(jnp.float32)

    w1a = conv_w(params["conv1a_w"], pad_cin_to=cin0)
    w1b = conv_w(params["conv1b_w"])
    w2a = conv_w(params["conv2a_w"])
    w2b = conv_w(params["conv2b_w"])
    w3 = conv_w(params["conv3_w"])
    # TODO(synk): Linear(4096, 512) vs 2048 pooled features mismatch in the
    # original module; use the first 2048 input rows of the linear weight.
    wl = params["line3_w"][:c3, :].astype(jnp.bfloat16)

    grid_spec = pltpu.PrefetchScalarGridSpec(
        num_scalar_prefetch=0,
        grid=(n_tiles,),
        in_specs=[
            pl.BlockSpec((BT, cin0), lambda k: (0, 0)),             # x
            pl.BlockSpec((BT, BT), lambda k: (0, 0)),               # shift prev
            pl.BlockSpec((BT, BT), lambda k: (0, 0)),               # shift next
            pl.BlockSpec((3, cin0, c_mid), lambda k: (0, 0, 0)),    # conv1a w
            pl.BlockSpec((1, c_mid), lambda k: (0, 0)),             # conv1a b
            pl.BlockSpec((3, c_mid, c_mid), lambda k: (0, 0, 0)),   # conv1b w
            pl.BlockSpec((1, c_mid), lambda k: (0, 0)),             # conv1b b
            pl.BlockSpec((3, c_mid, c_mid), lambda k: (0, 0, 0)),   # conv2a w
            pl.BlockSpec((1, c_mid), lambda k: (0, 0)),             # conv2a b
            pl.BlockSpec((3, c_mid, c_mid), lambda k: (0, 0, 0)),   # conv2b w
            pl.BlockSpec((1, c_mid), lambda k: (0, 0)),             # conv2b b
            pl.BlockSpec((3, c_mid, tile_c), lambda k: (0, 0, k)),  # conv3 w tile
            pl.BlockSpec((1, tile_c), lambda k: (0, k)),            # conv3 b tile
            pl.BlockSpec((tile_c, n_out), lambda k: (k, 0)),        # fc w tile
            pl.BlockSpec((1, n_out), lambda k: (0, 0)),             # fc b
        ],
        out_specs=pl.BlockSpec((B, n_out), lambda k: (0, 0)),
        scratch_shapes=[pltpu.VMEM((BT, c_mid), jnp.bfloat16)],
    )

    kernel = functools.partial(_fused_kernel, B=B, T=T)
    return pl.pallas_call(
        kernel,
        out_shape=jax.ShapeDtypeStruct((B, n_out), jnp.float32),
        grid_spec=grid_spec,
        compiler_params=pltpu.CompilerParams(
            dimension_semantics=("arbitrary",),
            vmem_limit_bytes=32 * 1024 * 1024),
    )(x2, sp, sn,
      w1a, bias_2d(params["conv1a_b"]),
      w1b, bias_2d(params["conv1b_b"]),
      w2a, bias_2d(params["conv2a_b"]),
      w2b, bias_2d(params["conv2b_b"]),
      w3, bias_2d(params["conv3_b"]),
      wl, bias_2d(params["line3_b"]))


# ---------------------------------------------------------------------------
# Parameters (deterministic, synthetic), stored (3, Cin, Cout) tap-major f32.
# ---------------------------------------------------------------------------
def init_params(key, n_freq):
    def conv_w(k, cin, cout):
        scale = 1.0 / jnp.sqrt(3.0 * cin)
        return jax.random.uniform(k, (3, cin, cout), jnp.float32, -scale, scale)

    def vec(k, n, fan_in):
        scale = 1.0 / jnp.sqrt(float(fan_in))
        return jax.random.uniform(k, (n,), jnp.float32, -scale, scale)

    ks = jax.random.split(key, 12)
    return {
        "conv1a_w": conv_w(ks[0], n_freq, 512), "conv1a_b": vec(ks[1], 512, 3 * n_freq),
        "conv1b_w": conv_w(ks[2], 512, 512),    "conv1b_b": vec(ks[3], 512, 3 * 512),
        "conv2a_w": conv_w(ks[4], 512, 512),    "conv2a_b": vec(ks[5], 512, 3 * 512),
        "conv2b_w": conv_w(ks[6], 512, 512),    "conv2b_b": vec(ks[7], 512, 3 * 512),
        "conv3_w":  conv_w(ks[8], 512, 2048),   "conv3_b":  vec(ks[9], 2048, 3 * 512),
        # Declared Linear(4096, 512): weight stored input-major (4096, 512).
        "line3_w": jax.random.uniform(ks[10], (4096, 512), jnp.float32,
                                      -1.0 / 64.0, 1.0 / 64.0),
        "line3_b": vec(ks[11], 512, 4096),
    }


if __name__ == "__main__":
    key = jax.random.PRNGKey(0)
    n_freq, n_frames, batch = 80, 16, 2

    k_param, k_x = jax.random.split(key)
    params = init_params(k_param, n_freq)
    x = jax.random.normal(k_x, (batch, n_frames, n_freq), jnp.float32)

    out = jax.jit(embed_model_1d_forward)(params, x)
    out = jax.block_until_ready(out)
    assert out.shape == (batch, 512) and out.dtype == jnp.float32
    print("KERNEL_OK")
</pallas_src>

<mosaic_0001>
module attributes {stable_mosaic.version = 11 : i64} {
  func.func @_fused_kernel(%arg0: i32, %arg1: memref<32x128xf32, #tpu.memory_space<vmem>>, %arg2: memref<32x32xbf16, #tpu.memory_space<vmem>>, %arg3: memref<32x32xbf16, #tpu.memory_space<vmem>>, %arg4: memref<3x128x512xbf16, #tpu.memory_space<vmem>>, %arg5: memref<1x512xf32, #tpu.memory_space<vmem>>, %arg6: memref<3x512x512xbf16, #tpu.memory_space<vmem>>, %arg7: memref<1x512xf32, #tpu.memory_space<vmem>>, %arg8: memref<3x512x512xbf16, #tpu.memory_space<vmem>>, %arg9: memref<1x512xf32, #tpu.memory_space<vmem>>, %arg10: memref<3x512x512xbf16, #tpu.memory_space<vmem>>, %arg11: memref<1x512xf32, #tpu.memory_space<vmem>>, %arg12: memref<3x512x512xbf16, #tpu.memory_space<vmem>>, %arg13: memref<1x512xf32, #tpu.memory_space<vmem>>, %arg14: memref<512x512xbf16, #tpu.memory_space<vmem>>, %arg15: memref<1x512xf32, #tpu.memory_space<vmem>>, %arg16: memref<2x512xf32, #tpu.memory_space<vmem>>, %arg17: memref<32x512xbf16, #tpu.memory_space<vmem>>) attributes {dimension_semantics = [#tpu.dimension_semantics<arbitrary>], iteration_bounds = array<i64: 4>, scalar_prefetch = 0 : i64, scratch_operands = 1 : i64, tpu.core_type = #tpu.core_type<tc>, window_params = [{pipeline_mode = #tpu.pipeline_mode<synchronous>, transform_indices = @transform_0, window_bounds = array<i64: 32, 128>}, {pipeline_mode = #tpu.pipeline_mode<synchronous>, transform_indices = @transform_1, window_bounds = array<i64: 32, 32>}, {pipeline_mode = #tpu.pipeline_mode<synchronous>, transform_indices = @transform_2, window_bounds = array<i64: 32, 32>}, {pipeline_mode = #tpu.pipeline_mode<synchronous>, transform_indices = @transform_3, window_bounds = array<i64: 3, 128, 512>}, {pipeline_mode = #tpu.pipeline_mode<synchronous>, transform_indices = @transform_4, window_bounds = array<i64: 1, 512>}, {pipeline_mode = #tpu.pipeline_mode<synchronous>, transform_indices = @transform_5, window_bounds = array<i64: 3, 512, 512>}, {pipeline_mode = #tpu.pipeline_mode<synchronous>, transform_indices = @transform_6, window_bounds = array<i64: 1, 512>}, {pipeline_mode = #tpu.pipeline_mode<synchronous>, transform_indices = @transform_7, window_bounds = array<i64: 3, 512, 512>}, {pipeline_mode = #tpu.pipeline_mode<synchronous>, transform_indices = @transform_8, window_bounds = array<i64: 1, 512>}, {pipeline_mode = #tpu.pipeline_mode<synchronous>, transform_indices = @transform_9, window_bounds = array<i64: 3, 512, 512>}, {pipeline_mode = #tpu.pipeline_mode<synchronous>, transform_indices = @transform_10, window_bounds = array<i64: 1, 512>}, {transform_indices = @transform_11, window_bounds = array<i64: 3, 512, 512>}, {transform_indices = @transform_12, window_bounds = array<i64: 1, 512>}, {transform_indices = @transform_13, window_bounds = array<i64: 512, 512>}, {pipeline_mode = #tpu.pipeline_mode<synchronous>, transform_indices = @transform_14, window_bounds = array<i64: 1, 512>}, {pipeline_mode = #tpu.pipeline_mode<synchronous>, transform_indices = @transform_15, window_bounds = array<i64: 2, 512>}]} {
    %c0_i32 = arith.constant 0 : i32
    %0 = arith.cmpi eq, %arg0, %c0_i32 : i32
    %1 = arith.extui %0 : i1 to i32
    %c0_i32_0 = arith.constant 0 : i32
    %2 = arith.cmpi ne, %1, %c0_i32_0 : i32
    scf.if %2 {
      %c0_27 = arith.constant 0 : index
      %c0_28 = arith.constant 0 : index
      %35 = vector.load %arg1[%c0_27, %c0_28] : memref<32x128xf32, #tpu.memory_space<vmem>>, vector<32x128xf32>
      %36 = arith.truncf %35 : vector<32x128xf32> to vector<32x128xbf16>
      %c0_29 = arith.constant 0 : index
      %c0_30 = arith.constant 0 : index
      %37 = vector.load %arg2[%c0_29, %c0_30] : memref<32x32xbf16, #tpu.memory_space<vmem>>, vector<32x32xbf16>
      %cst_31 = arith.constant dense<0.000000e+00> : vector<32x128xf32>
      %38 = tpu.matmul %37, %36, %cst_31 {dimension_numbers = #tpu.dot_dimension_numbers<[1], [0], [0], [1], [0, 0, 1, 1], [], []>} : vector<32x32xbf16>, vector<32x128xbf16>, vector<32x128xf32> -> vector<32x128xf32>
      %39 = arith.truncf %38 : vector<32x128xf32> to vector<32x128xbf16>
      %c0_32 = arith.constant 0 : index
      %c0_33 = arith.constant 0 : index
      %40 = vector.load %arg3[%c0_32, %c0_33] : memref<32x32xbf16, #tpu.memory_space<vmem>>, vector<32x32xbf16>
      %cst_34 = arith.constant dense<0.000000e+00> : vector<32x128xf32>
      %41 = tpu.matmul %40, %36, %cst_34 {dimension_numbers = #tpu.dot_dimension_numbers<[1], [0], [0], [1], [0, 0, 1, 1], [], []>} : vector<32x32xbf16>, vector<32x128xbf16>, vector<32x128xf32> -> vector<32x128xf32>
      %42 = arith.truncf %41 : vector<32x128xf32> to vector<32x128xbf16>
      %c0_35 = arith.constant 0 : index
      %c0_36 = arith.constant 0 : index
      %c0_37 = arith.constant 0 : index
      %43 = vector.load %arg4[%c0_35, %c0_36, %c0_37] : memref<3x128x512xbf16, #tpu.memory_space<vmem>>, vector<1x128x512xbf16>
      %44 = vector.shape_cast %43 : vector<1x128x512xbf16> to vector<128x512xbf16>
      %cst_38 = arith.constant dense<0.000000e+00> : vector<32x512xf32>
      %45 = tpu.matmul %39, %44, %cst_38 {dimension_numbers = #tpu.dot_dimension_numbers<[1], [0], [0], [1], [0, 0, 1, 1], [], []>} : vector<32x128xbf16>, vector<128x512xbf16>, vector<32x512xf32> -> vector<32x512xf32>
      %c1_39 = arith.constant 1 : index
      %c0_40 = arith.constant 0 : index
      %c0_41 = arith.constant 0 : index
      %46 = vector.load %arg4[%c1_39, %c0_40, %c0_41] : memref<3x128x512xbf16, #tpu.memory_space<vmem>>, vector<1x128x512xbf16>
      %47 = vector.shape_cast %46 : vector<1x128x512xbf16> to vector<128x512xbf16>
      %cst_42 = arith.constant dense<0.000000e+00> : vector<32x512xf32>
      %48 = tpu.matmul %36, %47, %cst_42 {dimension_numbers = #tpu.dot_dimension_numbers<[1], [0], [0], [1], [0, 0, 1, 1], [], []>} : vector<32x128xbf16>, vector<128x512xbf16>, vector<32x512xf32> -> vector<32x512xf32>
      %49 = arith.addf %45, %48 : vector<32x512xf32>
      %c2_43 = arith.constant 2 : index
      %c0_44 = arith.constant 0 : index
      %c0_45 = arith.constant 0 : index
      %50 = vector.load %arg4[%c2_43, %c0_44, %c0_45] : memref<3x128x512xbf16, #tpu.memory_space<vmem>>, vector<1x128x512xbf16>
      %51 = vector.shape_cast %50 : vector<1x128x512xbf16> to vector<128x512xbf16>
      %cst_46 = arith.constant dense<0.000000e+00> : vector<32x512xf32>
      %52 = tpu.matmul %42, %51, %cst_46 {dimension_numbers = #tpu.dot_dimension_numbers<[1], [0], [0], [1], [0, 0, 1, 1], [], []>} : vector<32x128xbf16>, vector<128x512xbf16>, vector<32x512xf32> -> vector<32x512xf32>
      %53 = arith.addf %49, %52 : vector<32x512xf32>
      %c0_47 = arith.constant 0 : index
      %c0_48 = arith.constant 0 : index
      %54 = vector.load %arg5[%c0_47, %c0_48] : memref<1x512xf32, #tpu.memory_space<vmem>>, vector<1x512xf32>
      %55 = vector.broadcast %54 : vector<1x512xf32> to vector<32x512xf32>
      %56 = arith.addf %53, %55 : vector<32x512xf32>
      %cst_49 = arith.constant 0.000000e+00 : f32
      %57 = vector.broadcast %cst_49 : f32 to vector<32x512xf32>
      %58 = arith.maximumf %56, %57 : vector<32x512xf32>
      %59 = arith.truncf %58 : vector<32x512xf32> to vector<32x512xbf16>
      %c0_50 = arith.constant 0 : index
      %c0_51 = arith.constant 0 : index
      %60 = vector.load %arg2[%c0_50, %c0_51] : memref<32x32xbf16, #tpu.memory_space<vmem>>, vector<32x32xbf16>
      %cst_52 = arith.constant dense<0.000000e+00> : vector<32x512xf32>
      %61 = tpu.matmul %60, %59, %cst_52 {dimension_numbers = #tpu.dot_dimension_numbers<[1], [0], [0], [1], [0, 0, 1, 1], [], []>} : vector<32x32xbf16>, vector<32x512xbf16>, vector<32x512xf32> -> vector<32x512xf32>
      %62 = arith.truncf %61 : vector<32x512xf32> to vector<32x512xbf16>
      %c0_53 = arith.constant 0 : index
      %c0_54 = arith.constant 0 : index
      %63 = vector.load %arg3[%c0_53, %c0_54] : memref<32x32xbf16, #tpu.memory_space<vmem>>, vector<32x32xbf16>
      %cst_55 = arith.constant dense<0.000000e+00> : vector<32x512xf32>
      %64 = tpu.matmul %63, %59, %cst_55 {dimension_numbers = #tpu.dot_dimension_numbers<[1], [0], [0], [1], [0, 0, 1, 1], [], []>} : vector<32x32xbf16>, vector<32x512xbf16>, vector<32x512xf32> -> vector<32x512xf32>
      %65 = arith.truncf %64 : vector<32x512xf32> to vector<32x512xbf16>
      %c0_56 = arith.constant 0 : index
      %c0_57 = arith.constant 0 : index
      %c0_58 = arith.constant 0 : index
      %66 = vector.load %arg6[%c0_56, %c0_57, %c0_58] : memref<3x512x512xbf16, #tpu.memory_space<vmem>>, vector<1x512x512xbf16>
      %67 = vector.shape_cast %66 : vector<1x512x512xbf16> to vector<512x512xbf16>
      %cst_59 = arith.constant dense<0.000000e+00> : vector<32x512xf32>
      %68 = tpu.matmul %62, %67, %cst_59 {dimension_numbers = #tpu.dot_dimension_numbers<[1], [0], [0], [1], [0, 0, 1, 1], [], []>} : vector<32x512xbf16>, vector<512x512xbf16>, vector<32x512xf32> -> vector<32x512xf32>
      %c1_60 = arith.constant 1 : index
      %c0_61 = arith.constant 0 : index
      %c0_62 = arith.constant 0 : index
      %69 = vector.load %arg6[%c1_60, %c0_61, %c0_62] : memref<3x512x512xbf16, #tpu.memory_space<vmem>>, vector<1x512x512xbf16>
      %70 = vector.shape_cast %69 : vector<1x512x512xbf16> to vector<512x512xbf16>
      %cst_63 = arith.constant dense<0.000000e+00> : vector<32x512xf32>
      %71 = tpu.matmul %59, %70, %cst_63 {dimension_numbers = #tpu.dot_dimension_numbers<[1], [0], [0], [1], [0, 0, 1, 1], [], []>} : vector<32x512xbf16>, vector<512x512xbf16>, vector<32x512xf32> -> vector<32x512xf32>
      %72 = arith.addf %68, %71 : vector<32x512xf32>
      %c2_64 = arith.constant 2 : index
      %c0_65 = arith.constant 0 : index
      %c0_66 = arith.constant 0 : index
      %73 = vector.load %arg6[%c2_64, %c0_65, %c0_66] : memref<3x512x512xbf16, #tpu.memory_space<vmem>>, vector<1x512x512xbf16>
      %74 = vector.shape_cast %73 : vector<1x512x512xbf16> to vector<512x512xbf16>
      %cst_67 = arith.constant dense<0.000000e+00> : vector<32x512xf32>
      %75 = tpu.matmul %65, %74, %cst_67 {dimension_numbers = #tpu.dot_dimension_numbers<[1], [0], [0], [1], [0, 0, 1, 1], [], []>} : vector<32x512xbf16>, vector<512x512xbf16>, vector<32x512xf32> -> vector<32x512xf32>
      %76 = arith.addf %72, %75 : vector<32x512xf32>
      %c0_68 = arith.constant 0 : index
      %c0_69 = arith.constant 0 : index
      %77 = vector.load %arg7[%c0_68, %c0_69] : memref<1x512xf32, #tpu.memory_space<vmem>>, vector<1x512xf32>
      %78 = vector.broadcast %77 : vector<1x512xf32> to vector<32x512xf32>
      %79 = arith.addf %76, %78 : vector<32x512xf32>
      %cst_70 = arith.constant 0.000000e+00 : f32
      %80 = vector.broadcast %cst_70 : f32 to vector<32x512xf32>
      %81 = arith.maximumf %79, %80 : vector<32x512xf32>
      %82 = arith.truncf %81 : vector<32x512xf32> to vector<32x512xbf16>
      %c0_71 = arith.constant 0 : index
      %c0_72 = arith.constant 0 : index
      %83 = vector.load %arg2[%c0_71, %c0_72] : memref<32x32xbf16, #tpu.memory_space<vmem>>, vector<32x32xbf16>
      %cst_73 = arith.constant dense<0.000000e+00> : vector<32x512xf32>
      %84 = tpu.matmul %83, %82, %cst_73 {dimension_numbers = #tpu.dot_dimension_numbers<[1], [0], [0], [1], [0, 0, 1, 1], [], []>} : vector<32x32xbf16>, vector<32x512xbf16>, vector<32x512xf32> -> vector<32x512xf32>
      %85 = arith.truncf %84 : vector<32x512xf32> to vector<32x512xbf16>
      %c0_74 = arith.constant 0 : index
      %c0_75 = arith.constant 0 : index
      %86 = vector.load %arg3[%c0_74, %c0_75] : memref<32x32xbf16, #tpu.memory_space<vmem>>, vector<32x32xbf16>
      %cst_76 = arith.constant dense<0.000000e+00> : vector<32x512xf32>
      %87 = tpu.matmul %86, %82, %cst_76 {dimension_numbers = #tpu.dot_dimension_numbers<[1], [0], [0], [1], [0, 0, 1, 1], [], []>} : vector<32x32xbf16>, vector<32x512xbf16>, vector<32x512xf32> -> vector<32x512xf32>
      %88 = arith.truncf %87 : vector<32x512xf32> to vector<32x512xbf16>
      %c0_77 = arith.constant 0 : index
      %c0_78 = arith.constant 0 : index
      %c0_79 = arith.constant 0 : index
      %89 = vector.load %arg8[%c0_77, %c0_78, %c0_79] : memref<3x512x512xbf16, #tpu.memory_space<vmem>>, vector<1x512x512xbf16>
      %90 = vector.shape_cast %89 : vector<1x512x512xbf16> to vector<512x512xbf16>
      %cst_80 = arith.constant dense<0.000000e+00> : vector<32x512xf32>
      %91 = tpu.matmul %85, %90, %cst_80 {dimension_numbers = #tpu.dot_dimension_numbers<[1], [0], [0], [1], [0, 0, 1, 1], [], []>} : vector<32x512xbf16>, vector<512x512xbf16>, vector<32x512xf32> -> vector<32x512xf32>
      %c1_81 = arith.constant 1 : index
      %c0_82 = arith.constant 0 : index
      %c0_83 = arith.constant 0 : index
      %92 = vector.load %arg8[%c1_81, %c0_82, %c0_83] : memref<3x512x512xbf16, #tpu.memory_space<vmem>>, vector<1x512x512xbf16>
      %93 = vector.shape_cast %92 : vector<1x512x512xbf16> to vector<512x512xbf16>
      %cst_84 = arith.constant dense<0.000000e+00> : vector<32x512xf32>
      %94 = tpu.matmul %82, %93, %cst_84 {dimension_numbers = #tpu.dot_dimension_numbers<[1], [0], [0], [1], [0, 0, 1, 1], [], []>} : vector<32x512xbf16>, vector<512x512xbf16>, vector<32x512xf32> -> vector<32x512xf32>
      %95 = arith.addf %91, %94 : vector<32x512xf32>
      %c2_85 = arith.constant 2 : index
      %c0_86 = arith.constant 0 : index
      %c0_87 = arith.constant 0 : index
      %96 = vector.load %arg8[%c2_85, %c0_86, %c0_87] : memref<3x512x512xbf16, #tpu.memory_space<vmem>>, vector<1x512x512xbf16>
      %97 = vector.shape_cast %96 : vector<1x512x512xbf16> to vector<512x512xbf16>
      %cst_88 = arith.constant dense<0.000000e+00> : vector<32x512xf32>
      %98 = tpu.matmul %88, %97, %cst_88 {dimension_numbers = #tpu.dot_dimension_numbers<[1], [0], [0], [1], [0, 0, 1, 1], [], []>} : vector<32x512xbf16>, vector<512x512xbf16>, vector<32x512xf32> -> vector<32x512xf32>
      %99 = arith.addf %95, %98 : vector<32x512xf32>
      %c0_89 = arith.constant 0 : index
      %c0_90 = arith.constant 0 : index
      %100 = vector.load %arg9[%c0_89, %c0_90] : memref<1x512xf32, #tpu.memory_space<vmem>>, vector<1x512xf32>
      %101 = vector.broadcast %100 : vector<1x512xf32> to vector<32x512xf32>
      %102 = arith.addf %99, %101 : vector<32x512xf32>
      %cst_91 = arith.constant 0.000000e+00 : f32
      %103 = vector.broadcast %cst_91 : f32 to vector<32x512xf32>
      %104 = arith.maximumf %102, %103 : vector<32x512xf32>
      %105 = arith.truncf %104 : vector<32x512xf32> to vector<32x512xbf16>
      %c0_92 = arith.constant 0 : index
      %c0_93 = arith.constant 0 : index
      %106 = vector.load %arg2[%c0_92, %c0_93] : memref<32x32xbf16, #tpu.memory_space<vmem>>, vector<32x32xbf16>
      %cst_94 = arith.constant dense<0.000000e+00> : vector<32x512xf32>
      %107 = tpu.matmul %106, %105, %cst_94 {dimension_numbers = #tpu.dot_dimension_numbers<[1], [0], [0], [1], [0, 0, 1, 1], [], []>} : vector<32x32xbf16>, vector<32x512xbf16>, vector<32x512xf32> -> vector<32x512xf32>
      %108 = arith.truncf %107 : vector<32x512xf32> to vector<32x512xbf16>
      %c0_95 = arith.constant 0 : index
      %c0_96 = arith.constant 0 : index
      %109 = vector.load %arg3[%c0_95, %c0_96] : memref<32x32xbf16, #tpu.memory_space<vmem>>, vector<32x32xbf16>
      %cst_97 = arith.constant dense<0.000000e+00> : vector<32x512xf32>
      %110 = tpu.matmul %109, %105, %cst_97 {dimension_numbers = #tpu.dot_dimension_numbers<[1], [0], [0], [1], [0, 0, 1, 1], [], []>} : vector<32x32xbf16>, vector<32x512xbf16>, vector<32x512xf32> -> vector<32x512xf32>
      %111 = arith.truncf %110 : vector<32x512xf32> to vector<32x512xbf16>
      %c0_98 = arith.constant 0 : index
      %c0_99 = arith.constant 0 : index
      %c0_100 = arith.constant 0 : index
      %112 = vector.load %arg10[%c0_98, %c0_99, %c0_100] : memref<3x512x512xbf16, #tpu.memory_space<vmem>>, vector<1x512x512xbf16>
      %113 = vector.shape_cast %112 : vector<1x512x512xbf16> to vector<512x512xbf16>
      %cst_101 = arith.constant dense<0.000000e+00> : vector<32x512xf32>
      %114 = tpu.matmul %108, %113, %cst_101 {dimension_numbers = #tpu.dot_dimension_numbers<[1], [0], [0], [1], [0, 0, 1, 1], [], []>} : vector<32x512xbf16>, vector<512x512xbf16>, vector<32x512xf32> -> vector<32x512xf32>
      %c1_102 = arith.constant 1 : index
      %c0_103 = arith.constant 0 : index
      %c0_104 = arith.constant 0 : index
      %115 = vector.load %arg10[%c1_102, %c0_103, %c0_104] : memref<3x512x512xbf16, #tpu.memory_space<vmem>>, vector<1x512x512xbf16>
      %116 = vector.shape_cast %115 : vector<1x512x512xbf16> to vector<512x512xbf16>
      %cst_105 = arith.constant dense<0.000000e+00> : vector<32x512xf32>
      %117 = tpu.matmul %105, %116, %cst_105 {dimension_numbers = #tpu.dot_dimension_numbers<[1], [0], [0], [1], [0, 0, 1, 1], [], []>} : vector<32x512xbf16>, vector<512x512xbf16>, vector<32x512xf32> -> vector<32x512xf32>
      %118 = arith.addf %114, %117 : vector<32x512xf32>
      %c2_106 = arith.constant 2 : index
      %c0_107 = arith.constant 0 : index
      %c0_108 = arith.constant 0 : index
      %119 = vector.load %arg10[%c2_106, %c0_107, %c0_108] : memref<3x512x512xbf16, #tpu.memory_space<vmem>>, vector<1x512x512xbf16>
      %120 = vector.shape_cast %119 : vector<1x512x512xbf16> to vector<512x512xbf16>
      %cst_109 = arith.constant dense<0.000000e+00> : vector<32x512xf32>
      %121 = tpu.matmul %111, %120, %cst_109 {dimension_numbers = #tpu.dot_dimension_numbers<[1], [0], [0], [1], [0, 0, 1, 1], [], []>} : vector<32x512xbf16>, vector<512x512xbf16>, vector<32x512xf32> -> vector<32x512xf32>
      %122 = arith.addf %118, %121 : vector<32x512xf32>
      %c0_110 = arith.constant 0 : index
      %c0_111 = arith.constant 0 : index
      %123 = vector.load %arg11[%c0_110, %c0_111] : memref<1x512xf32, #tpu.memory_space<vmem>>, vector<1x512xf32>
      %124 = vector.broadcast %123 : vector<1x512xf32> to vector<32x512xf32>
      %125 = arith.addf %122, %124 : vector<32x512xf32>
      %cst_112 = arith.constant 0.000000e+00 : f32
      %126 = vector.broadcast %cst_112 : f32 to vector<32x512xf32>
      %127 = arith.maximumf %125, %126 : vector<32x512xf32>
      %128 = arith.truncf %127 : vector<32x512xf32> to vector<32x512xbf16>
      %c0_113 = arith.constant 0 : index
      %c0_114 = arith.constant 0 : index
      %129 = vector.load %arg17[%c0_113, %c0_114] : memref<32x512xbf16, #tpu.memory_space<vmem>>, vector<32x512xbf16>
      tpu.vector_store %arg17[%c0_113, %c0_114], %128 {strides = array<i32>} : memref<32x512xbf16, #tpu.memory_space<vmem>>, vector<32x512xbf16>,
    } else {
    }
    %c0 = arith.constant 0 : index
    %c0_1 = arith.constant 0 : index
    %3 = vector.load %arg17[%c0, %c0_1] : memref<32x512xbf16, #tpu.memory_space<vmem>>, vector<32x512xbf16>
    %c0_2 = arith.constant 0 : index
    %c0_3 = arith.constant 0 : index
    %4 = vector.load %arg2[%c0_2, %c0_3] : memref<32x32xbf16, #tpu.memory_space<vmem>>, vector<32x32xbf16>
    %cst = arith.constant dense<0.000000e+00> : vector<32x512xf32>
    %5 = tpu.matmul %4, %3, %cst {dimension_numbers = #tpu.dot_dimension_numbers<[1], [0], [0], [1], [0, 0, 1, 1], [], []>} : vector<32x32xbf16>, vector<32x512xbf16>, vector<32x512xf32> -> vector<32x512xf32>
    %6 = arith.truncf %5 : vector<32x512xf32> to vector<32x512xbf16>
    %c0_4 = arith.constant 0 : index
    %c0_5 = arith.constant 0 : index
    %7 = vector.load %arg3[%c0_4, %c0_5] : memref<32x32xbf16, #tpu.memory_space<vmem>>, vector<32x32xbf16>
    %cst_6 = arith.constant dense<0.000000e+00> : vector<32x512xf32>
    %8 = tpu.matmul %7, %3, %cst_6 {dimension_numbers = #tpu.dot_dimension_numbers<[1], [0], [0], [1], [0, 0, 1, 1], [], []>} : vector<32x32xbf16>, vector<32x512xbf16>, vector<32x512xf32> -> vector<32x512xf32>
    %9 = arith.truncf %8 : vector<32x512xf32> to vector<32x512xbf16>
    %c0_7 = arith.constant 0 : index
    %c0_8 = arith.constant 0 : index
    %c0_9 = arith.constant 0 : index
    %10 = vector.load %arg12[%c0_7, %c0_8, %c0_9] : memref<3x512x512xbf16, #tpu.memory_space<vmem>>, vector<1x512x512xbf16>
    %11 = vector.shape_cast %10 : vector<1x512x512xbf16> to vector<512x512xbf16>
    %cst_10 = arith.constant dense<0.000000e+00> : vector<32x512xf32>
    %12 = tpu.matmul %6, %11, %cst_10 {dimension_numbers = #tpu.dot_dimension_numbers<[1], [0], [0], [1], [0, 0, 1, 1], [], []>} : vector<32x512xbf16>, vector<512x512xbf16>, vector<32x512xf32> -> vector<32x512xf32>
    %c1 = arith.constant 1 : index
    %c0_11 = arith.constant 0 : index
    %c0_12 = arith.constant 0 : index
    %13 = vector.load %arg12[%c1, %c0_11, %c0_12] : memref<3x512x512xbf16, #tpu.memory_space<vmem>>, vector<1x512x512xbf16>
    %14 = vector.shape_cast %13 : vector<1x512x512xbf16> to vector<512x512xbf16>
    %cst_13 = arith.constant dense<0.000000e+00> : vector<32x512xf32>
    %15 = tpu.matmul %3, %14, %cst_13 {dimension_numbers = #tpu.dot_dimension_numbers<[1], [0], [0], [1], [0, 0, 1, 1], [], []>} : vector<32x512xbf16>, vector<512x512xbf16>, vector<32x512xf32> -> vector<32x512xf32>
    %16 = arith.addf %12, %15 : vector<32x512xf32>
    %c2 = arith.constant 2 : index
    %c0_14 = arith.constant 0 : index
    %c0_15 = arith.constant 0 : index
    %17 = vector.load %arg12[%c2, %c0_14, %c0_15] : memref<3x512x512xbf16, #tpu.memory_space<vmem>>, vector<1x512x512xbf16>
    %18 = vector.shape_cast %17 : vector<1x512x512xbf16> to vector<512x512xbf16>
    %cst_16 = arith.constant dense<0.000000e+00> : vector<32x512xf32>
    %19 = tpu.matmul %9, %18, %cst_16 {dimension_numbers = #tpu.dot_dimension_numbers<[1], [0], [0], [1], [0, 0, 1, 1], [], []>} : vector<32x512xbf16>, vector<512x512xbf16>, vector<32x512xf32> -> vector<32x512xf32>
    %20 = arith.addf %16, %19 : vector<32x512xf32>
    %c0_17 = arith.constant 0 : index
    %c0_18 = arith.constant 0 : index
    %21 = vector.load %arg13[%c0_17, %c0_18] : memref<1x512xf32, #tpu.memory_space<vmem>>, vector<1x512xf32>
    %22 = vector.broadcast %21 : vector<1x512xf32> to vector<32x512xf32>
    %23 = arith.addf %20, %22 : vector<32x512xf32>
    %24 = vector.shape_cast %23 : vector<32x512xf32> to vector<2x16x512xf32>
    %cst_19 = arith.constant dense<0xFF800000> : vector<2x512xf32>
    %25 = vector.multi_reduction <maximumf>, %24, %cst_19 [1] : vector<2x16x512xf32> to vector<2x512xf32>
    %26 = arith.truncf %25 : vector<2x512xf32> to vector<2x512xbf16>
    %c0_20 = arith.constant 0 : index
    %c0_21 = arith.constant 0 : index
    %27 = vector.load %arg14[%c0_20, %c0_21] : memref<512x512xbf16, #tpu.memory_space<vmem>>, vector<512x512xbf16>
    %cst_22 = arith.constant dense<0.000000e+00> : vector<2x512xf32>
    %28 = tpu.matmul %26, %27, %cst_22 {dimension_numbers = #tpu.dot_dimension_numbers<[1], [0], [0], [1], [0, 0, 1, 1], [], []>} : vector<2x512xbf16>, vector<512x512xbf16>, vector<2x512xf32> -> vector<2x512xf32>
    %c0_i32_23 = arith.constant 0 : i32
    %29 = arith.cmpi eq, %arg0, %c0_i32_23 : i32
    %30 = arith.extui %29 : i1 to i32
    %c0_i32_24 = arith.constant 0 : i32
    %31 = arith.cmpi ne, %30, %c0_i32_24 : i32
    scf.if %31 {
      %c0_27 = arith.constant 0 : index
      %c0_28 = arith.constant 0 : index
      %35 = vector.load %arg15[%c0_27, %c0_28] : memref<1x512xf32, #tpu.memory_space<vmem>>, vector<1x512xf32>
      %36 = vector.broadcast %35 : vector<1x512xf32> to vector<2x512xf32>
      %37 = arith.addf %36, %28 : vector<2x512xf32>
      %c0_29 = arith.constant 0 : index
      %c0_30 = arith.constant 0 : index
      %38 = vector.load %arg16[%c0_29, %c0_30] : memref<2x512xf32, #tpu.memory_space<vmem>>, vector<2x512xf32>
      tpu.vector_store %arg16[%c0_29, %c0_30], %37 {strides = array<i32>} : memref<2x512xf32, #tpu.memory_space<vmem>>, vector<2x512xf32>,
    } else {
    }
    %c0_i32_25 = arith.constant 0 : i32
    %32 = arith.cmpi ne, %arg0, %c0_i32_25 : i32
    %33 = arith.extui %32 : i1 to i32
    %c0_i32_26 = arith.constant 0 : i32
    %34 = arith.cmpi ne, %33, %c0_i32_26 : i32
    scf.if %34 {
      %c0_27 = arith.constant 0 : index
      %c0_28 = arith.constant 0 : index
      %35 = vector.load %arg16[%c0_27, %c0_28] : memref<2x512xf32, #tpu.memory_space<vmem>>, vector<2x512xf32>
      %36 = arith.addf %35, %28 : vector<2x512xf32>
      %c0_29 = arith.constant 0 : index
      %c0_30 = arith.constant 0 : index
      %37 = vector.load %arg16[%c0_29, %c0_30] : memref<2x512xf32, #tpu.memory_space<vmem>>, vector<2x512xf32>
      tpu.vector_store %arg16[%c0_29, %c0_30], %36 {strides = array<i32>} : memref<2x512xf32, #tpu.memory_space<vmem>>, vector<2x512xf32>,
    } else {
    }
    return
  }
  func.func @transform_0(%arg0: i32) -> (i32, i32) {
    %c0_i32 = arith.constant 0 : i32
    %c0_i32_0 = arith.constant 0 : i32
    %c0_i32_1 = arith.constant 0 : i32
    return %c0_i32, %c0_i32_0 : i32, i32
  }
  func.func @transform_1(%arg0: i32) -> (i32, i32) {
    %c0_i32 = arith.constant 0 : i32
    %c0_i32_0 = arith.constant 0 : i32
    %c0_i32_1 = arith.constant 0 : i32
    return %c0_i32, %c0_i32_0 : i32, i32
  }
  func.func @transform_2(%arg0: i32) -> (i32, i32) {
    %c0_i32 = arith.constant 0 : i32
    %c0_i32_0 = arith.constant 0 : i32
    %c0_i32_1 = arith.constant 0 : i32
    return %c0_i32, %c0_i32_0 : i32, i32
  }
  func.func @transform_3(%arg0: i32) -> (i32, i32, i32) {
    %c0_i32 = arith.constant 0 : i32
    %c0_i32_0 = arith.constant 0 : i32
    %c0_i32_1 = arith.constant 0 : i32
    %c0_i32_2 = arith.constant 0 : i32
    return %c0_i32, %c0_i32_0, %c0_i32_1 : i32, i32, i32
  }
  func.func @transform_4(%arg0: i32) -> (i32, i32) {
    %c0_i32 = arith.constant 0 : i32
    %c0_i32_0 = arith.constant 0 : i32
    %c0_i32_1 = arith.constant 0 : i32
    return %c0_i32, %c0_i32_0 : i32, i32
  }
  func.func @transform_5(%arg0: i32) -> (i32, i32, i32) {
    %c0_i32 = arith.constant 0 : i32
    %c0_i32_0 = arith.constant 0 : i32
    %c0_i32_1 = arith.constant 0 : i32
    %c0_i32_2 = arith.constant 0 : i32
    return %c0_i32, %c0_i32_0, %c0_i32_1 : i32, i32, i32
  }
  func.func @transform_6(%arg0: i32) -> (i32, i32) {
    %c0_i32 = arith.constant 0 : i32
    %c0_i32_0 = arith.constant 0 : i32
    %c0_i32_1 = arith.constant 0 : i32
    return %c0_i32, %c0_i32_0 : i32, i32
  }
  func.func @transform_7(%arg0: i32) -> (i32, i32, i32) {
    %c0_i32 = arith.constant 0 : i32
    %c0_i32_0 = arith.constant 0 : i32
    %c0_i32_1 = arith.constant 0 : i32
    %c0_i32_2 = arith.constant 0 : i32
    return %c0_i32, %c0_i32_0, %c0_i32_1 : i32, i32, i32
  }
  func.func @transform_8(%arg0: i32) -> (i32, i32) {
    %c0_i32 = arith.constant 0 : i32
    %c0_i32_0 = arith.constant 0 : i32
    %c0_i32_1 = arith.constant 0 : i32
    return %c0_i32, %c0_i32_0 : i32, i32
  }
  func.func @transform_9(%arg0: i32) -> (i32, i32, i32) {
    %c0_i32 = arith.constant 0 : i32
    %c0_i32_0 = arith.constant 0 : i32
    %c0_i32_1 = arith.constant 0 : i32
    %c0_i32_2 = arith.constant 0 : i32
    return %c0_i32, %c0_i32_0, %c0_i32_1 : i32, i32, i32
  }
  func.func @transform_10(%arg0: i32) -> (i32, i32) {
    %c0_i32 = arith.constant 0 : i32
    %c0_i32_0 = arith.constant 0 : i32
    %c0_i32_1 = arith.constant 0 : i32
    return %c0_i32, %c0_i32_0 : i32, i32
  }
  func.func @transform_11(%arg0: i32) -> (i32, i32, i32) {
    %c0_i32 = arith.constant 0 : i32
    %c0_i32_0 = arith.constant 0 : i32
    %c0_i32_1 = arith.constant 0 : i32
    return %c0_i32, %c0_i32_0, %arg0 : i32, i32, i32
  }
  func.func @transform_12(%arg0: i32) -> (i32, i32) {
    %c0_i32 = arith.constant 0 : i32
    %c0_i32_0 = arith.constant 0 : i32
    return %c0_i32, %arg0 : i32, i32
  }
  func.func @transform_13(%arg0: i32) -> (i32, i32) {
    %c0_i32 = arith.constant 0 : i32
    %c0_i32_0 = arith.constant 0 : i32
    return %arg0, %c0_i32 : i32, i32
  }
  func.func @transform_14(%arg0: i32) -> (i32, i32) {
    %c0_i32 = arith.constant 0 : i32
    %c0_i32_0 = arith.constant 0 : i32
    %c0_i32_1 = arith.constant 0 : i32
    return %c0_i32, %c0_i32_0 : i32, i32
  }
  func.func @transform_15(%arg0: i32) -> (i32, i32) {
    %c0_i32 = arith.constant 0 : i32
    %c0_i32_0 = arith.constant 0 : i32
    %c0_i32_1 = arith.constant 0 : i32
    return %c0_i32, %c0_i32_0 : i32, i32
  }
}

</mosaic_0001>

<bundles_post_ra>
// kernel: embed_model_1d_forward.1
= control target key start
LH: loop header
LB: loop body
LE: loop exit
PB: predicated region body
PF: predicated region fallthrough
CT: control target
= control target key end

     0   :  { %s28505_s0 = inlined_call_operand.vmem [shape: f32[32,128], index: 0, kind: input, shape index: {}]   ;;  %s28506_s1 = inlined_call_operand.vmem [shape: bf16[32,32], index: 1, kind: input, shape index: {}]   ;;  %s28507_s2 = inlined_call_operand.vmem [shape: bf16[32,32], index: 2, kind: input, shape index: {}]   ;;  %s28508_s3 = inlined_call_operand.vmem [shape: bf16[3,128,512], index: 3, kind: input, shape index: {}]   ;;  %s28509_s4 = inlined_call_operand.vmem [shape: f32[1,512], index: 4, kind: input, shape index: {}]   ;;  %s28510_s5 = inlined_call_operand.vmem [shape: bf16[3,512,512], index: 5, kind: input, shape index: {}]   ;;  %s28511_s6 = inlined_call_operand.vmem [shape: f32[1,512], index: 6, kind: input, shape index: {}]   ;;  %s28512_s7 = inlined_call_operand.vmem [shape: bf16[3,512,512], index: 7, kind: input, shape index: {}]   ;;  %s28513_s8 = inlined_call_operand.vmem [shape: f32[1,512], index: 8, kind: input, shape index: {}]   ;;  %s28514_s9 = inlined_call_operand.vmem [shape: bf16[3,512,512], index: 9, kind: input, shape index: {}]   ;;  %s28515_s10 = inlined_call_operand.vmem [shape: f32[1,512], index: 10, kind: input, shape index: {}]   ;;  %s28516_s11 = inlined_call_operand.vmem [shape: bf16[3,512,2048], index: 11, kind: input, shape index: {}]   ;;  %s28517_s12 = inlined_call_operand.vmem [shape: f32[1,2048], index: 12, kind: input, shape index: {}]   ;;  %s28518_s13 = inlined_call_operand.vmem [shape: bf16[2048,512], index: 13, kind: input, shape index: {}]   ;;  %s28519_s14 = inlined_call_operand.vmem [shape: f32[1,512], index: 14, kind: input, shape index: {}]   ;;  %s28520_s15 = inlined_call_operand.hbm [shape: f32[2,512], index: 15, kind: output, shape index: {}]  }
   0x1   :  { %28522 = sst [smem:[#allocation9_spill]] %s28516_s11 }
   0x2   :  { %20 = vsyncpa [#allocation5], 0  ;;  %s22778_s18 = smov 0   ;;  %s22780_s19 = smov 0  }
   0x3   :  { %s22782_s20 = smov 0  }
   0x4 LB: > { %28523 = sst [smem:[#allocation7_spill]] %s22687_s19  ;;  %s22794_s21 = sadd.s32 4294967295, %s22691_s20   ;;  %s22691_s20 = sphi %s22782_s20, %s28528_s20   ;;  %s22687_s19 = sphi %s22780_s19, %s28527_s19   ;;  %s22683_s18 = sphi %s22778_s18, %s28526_s18  }
   0x5   : > { %s22797_s22 = sadd.s32 1, %s22691_s20   ;;  %s264_s24 = sadd.s32 1, %s22687_s19 }
   0x6   : > { %s261_s23 = ssub.s32 %s22691_s20, %s22797_s22  ;;  %p271_p1 = scmp.ne.s32.totalorder %s22687_s19, %s22683_s18 }
   0x7   : > { %p262_p0 = scmp.eq.s32.totalorder %s261_s23, 0  ;;  %p272_p2 = scmp.eq.s32.totalorder %s22691_s20, 0 }
   0x8   : > { %p16646_p4 = scmp.ge.s32.totalorder %s22691_s20, 4 }
   0x9   : > { %s22806_s25 = scalar_select %p262_p0, %s22687_s19, %s264_s24  }
   0xa   : > { %p273_p3 = por %p272_p2, %p271_p1  ;;  %427 = sbr.rel (%p16646_p4) target bundleno = 219 (0xdb), region = 64 }
   0xb   : > { %28524 = sst [smem:[#allocation8_spill]] %s22806_s25 }
  0x11   : > { %430 = sbr.rel (!%p273_p3) target bundleno = 219 (0xdb), region = 68  ;;  %s432_s26 = sand.u32 (%p273_p3), 1, %s22687_s19  }
  0x12   : > { %s19553_s27 = sshll.u32 (%p273_p3), %s22691_s20, 4  ;;  %s19939_s28 = smul.u32 (%p273_p3), 3072, %s432_s26 }
  0x13   : > { %s28525_s11 = sld [smem:[#allocation9_spill]] (%p273_p3) }
  0x14   : > { %s22822_s17 = scalar_lea.vmem (%p273_p3), [#allocation3], %s19939_s28 }
  0x19   : > { %s22814_s16 = scalar_lea.vmem %s28525_s11, %s19553_s27 }
  0x1a   : > { %v450_v0 = vld [vmem:[%s22814_s16] sm:$0xff]  ;;  %v452_v1 = vld [vmem:[%s22814_s16 + $0x8] sm:$0xff] }
  0x1b   : > { %v454_v2 = vld [vmem:[%s22814_s16 + $0x40] sm:$0xff]  ;;  %v456_v3 = vld [vmem:[%s22814_s16 + $0x48] sm:$0xff]  ;;  %451 = vst [vmem:[%s22822_s17] sm:$0xff] %v450_v0  ;;  %453 = vst [vmem:[%s22822_s17 + $0x8] sm:$0xff] %v452_v1 }
  0x1c   : > { %v458_v4 = vld [vmem:[%s22814_s16 + $0x80] sm:$0xff]  ;;  %v460_v5 = vld [vmem:[%s22814_s16 + $0x88] sm:$0xff]  ;;  %455 = vst [vmem:[%s22822_s17 + $0x10] sm:$0xff] %v454_v2  ;;  %457 = vst [vmem:[%s22822_s17 + $0x18] sm:$0xff] %v456_v3 }
  0x1d   : > { %459 = vst [vmem:[%s22822_s17 + $0x20] sm:$0xff] %v458_v4  ;;  %461 = vst [vmem:[%s22822_s17 + $0x28] sm:$0xff] %v460_v5  ;;  %v462_v6 = vld [vmem:[%s22814_s16 + $0xc0] sm:$0xff]  ;;  %v464_v7 = vld [vmem:[%s22814_s16 + $0xc8] sm:$0xff] }
  0x1e   : > { %v466_v8 = vld [vmem:[%s22814_s16 + $0x100] sm:$0xff]  ;;  %463 = vst [vmem:[%s22822_s17 + $0x30] sm:$0xff] %v462_v6  ;;  %465 = vst [vmem:[%s22822_s17 + $0x38] sm:$0xff] %v464_v7  ;;  %v468_v9 = vld [vmem:[%s22814_s16 + $0x108] sm:$0xff] }
  0x1f   : > { %467 = vst [vmem:[%s22822_s17 + $0x40] sm:$0xff] %v466_v8  ;;  %v470_v10 = vld [vmem:[%s22814_s16 + $0x140] sm:$0xff]  ;;  %v472_v11 = vld [vmem:[%s22814_s16 + $0x148] sm:$0xff]  ;;  %469 = vst [vmem:[%s22822_s17 + $0x48] sm:$0xff] %v468_v9 }
  0x20   : > { %471 = vst [vmem:[%s22822_s17 + $0x50] sm:$0xff] %v470_v10  ;;  %473 = vst [vmem:[%s22822_s17 + $0x58] sm:$0xff] %v472_v11  ;;  %v474_v12 = vld [vmem:[%s22814_s16 + $0x180] sm:$0xff]  ;;  %v476_v13 = vld [vmem:[%s22814_s16 + $0x188] sm:$0xff] }
  0x21   : > { %v478_v14 = vld [vmem:[%s22814_s16 + $0x1c0] sm:$0xff]  ;;  %475 = vst [vmem:[%s22822_s17 + $0x60] sm:$0xff] %v474_v12  ;;  %477 = vst [vmem:[%s22822_s17 + $0x68] sm:$0xff] %v476_v13  ;;  %v480_v15 = vld [vmem:[%s22814_s16 + $0x1c8] sm:$0xff] }
  0x22   : > { %479 = vst [vmem:[%s22822_s17 + $0x70] sm:$0xff] %v478_v14  ;;  %v482_v16 = vld [vmem:[%s22814_s16 + $0x200] sm:$0xff]  ;;  %v484_v17 = vld [vmem:[%s22814_s16 + $0x208] sm:$0xff]  ;;  %481 = vst [vmem:[%s22822_s17 + $0x78] sm:$0xff] %v480_v15 }
  0x23   : > { %483 = vst [vmem:[%s22822_s17 + $0x80] sm:$0xff] %v482_v16  ;;  %485 = vst [vmem:[%s22822_s17 + $0x88] sm:$0xff] %v484_v17  ;;  %v486_v18 = vld [vmem:[%s22814_s16 + $0x240] sm:$0xff]  ;;  %v488_v19 = vld [vmem:[%s22814_s16 + $0x248] sm:$0xff] }
  0x24   : > { %v490_v20 = vld [vmem:[%s22814_s16 + $0x280] sm:$0xff]  ;;  %487 = vst [vmem:[%s22822_s17 + $0x90] sm:$0xff] %v486_v18  ;;  %489 = vst [vmem:[%s22822_s17 + $0x98] sm:$0xff] %v488_v19  ;;  %v492_v21 = vld [vmem:[%s22814_s16 + $0x288] sm:$0xff] }
  0x25   : > { %491 = vst [vmem:[%s22822_s17 + $0xa0] sm:$0xff] %v490_v20  ;;  %v494_v22 = vld [vmem:[%s22814_s16 + $0x2c0] sm:$0xff]  ;;  %v496_v23 = vld [vmem:[%s22814_s16 + $0x2c8] sm:$0xff]  ;;  %493 = vst [vmem:[%s22822_s17 + $0xa8] sm:$0xff] %v492_v21 }
  0x26   : > { %495 = vst [vmem:[%s22822_s17 + $0xb0] sm:$0xff] %v494_v22  ;;  %497 = vst [vmem:[%s22822_s17 + $0xb8] sm:$0xff] %v496_v23  ;;  %v498_v24 = vld [vmem:[%s22814_s16 + $0x300] sm:$0xff]  ;;  %v500_v25 = vld [vmem:[%s22814_s16 + $0x308] sm:$0xff] }
  0x27   : > { %v502_v26 = vld [vmem:[%s22814_s16 + $0x340] sm:$0xff]  ;;  %499 = vst [vmem:[%s22822_s17 + $0xc0] sm:$0xff] %v498_v24  ;;  %501 = vst [vmem:[%s22822_s17 + $0xc8] sm:$0xff] %v500_v25  ;;  %v504_v27 = vld [vmem:[%s22814_s16 + $0x348] sm:$0xff] }
  0x28   : > { %503 = vst [vmem:[%s22822_s17 + $0xd0] sm:$0xff] %v502_v26  ;;  %v506_v28 = vld [vmem:[%s22814_s16 + $0x380] sm:$0xff]  ;;  %v508_v29 = vld [vmem:[%s22814_s16 + $0x388] sm:$0xff]  ;;  %505 = vst [vmem:[%s22822_s17 + $0xd8] sm:$0xff] %v504_v27 }
  0x29   : > { %507 = vst [vmem:[%s22822_s17 + $0xe0] sm:$0xff] %v506_v28  ;;  %509 = vst [vmem:[%s22822_s17 + $0xe8] sm:$0xff] %v508_v29  ;;  %v510_v30 = vld [vmem:[%s22814_s16 + $0x3c0] sm:$0xff]  ;;  %v512_v31 = vld [vmem:[%s22814_s16 + $0x3c8] sm:$0xff] }
  0x2a   : > { %v514_v32 = vld [vmem:[%s22814_s16 + $0x400] sm:$0xff]  ;;  %511 = vst [vmem:[%s22822_s17 + $0xf0] sm:$0xff] %v510_v30  ;;  %513 = vst [vmem:[%s22822_s17 + $0xf8] sm:$0xff] %v512_v31  ;;  %v516_v33 = vld [vmem:[%s22814_s16 + $0x408] sm:$0xff] }
  0x2b   : > { %515 = vst [vmem:[%s22822_s17 + $0x100] sm:$0xff] %v514_v32  ;;  %v518_v34 = vld [vmem:[%s22814_s16 + $0x440] sm:$0xff]  ;;  %v520_v35 = vld [vmem:[%s22814_s16 + $0x448] sm:$0xff]  ;;  %517 = vst [vmem:[%s22822_s17 + $0x108] sm:$0xff] %v516_v33 }
  0x2c   : > { %519 = vst [vmem:[%s22822_s17 + $0x110] sm:$0xff] %v518_v34  ;;  %521 = vst [vmem:[%s22822_s17 + $0x118] sm:$0xff] %v520_v35  ;;  %v522_v36 = vld [vmem:[%s22814_s16 + $0x480] sm:$0xff]  ;;  %v524_v37 = vld [vmem:[%s22814_s16 + $0x488] sm:$0xff] }
  0x2d   : > { %v526_v38 = vld [vmem:[%s22814_s16 + $0x4c0] sm:$0xff]  ;;  %523 = vst [vmem:[%s22822_s17 + $0x120] sm:$0xff] %v522_v36  ;;  %525 = vst [vmem:[%s22822_s17 + $0x128] sm:$0xff] %v524_v37  ;;  %v528_v39 = vld [vmem:[%s22814_s16 + $0x4c8] sm:$0xff] }
  0x2e   : > { %527 = vst [vmem:[%s22822_s17 + $0x130] sm:$0xff] %v526_v38  ;;  %v530_v40 = vld [vmem:[%s22814_s16 + $0x500] sm:$0xff]  ;;  %v532_v41 = vld [vmem:[%s22814_s16 + $0x508] sm:$0xff]  ;;  %529 = vst [vmem:[%s22822_s17 + $0x138] sm:$0xff] %v528_v39 }
  0x2f   : > { %531 = vst [vmem:[%s22822_s17 + $0x140] sm:$0xff] %v530_v40  ;;  %533 = vst [vmem:[%s22822_s17 + $0x148] sm:$0xff] %v532_v41  ;;  %v534_v42 = vld [vmem:[%s22814_s16 + $0x540] sm:$0xff]  ;;  %v536_v43 = vld [vmem:[%s22814_s16 + $0x548] sm:$0xff] }
  0x30   : > { %v538_v44 = vld [vmem:[%s22814_s16 + $0x580] sm:$0xff]  ;;  %535 = vst [vmem:[%s22822_s17 + $0x150] sm:$0xff] %v534_v42  ;;  %537 = vst [vmem:[%s22822_s17 + $0x158] sm:$0xff] %v536_v43  ;;  %v540_v45 = vld [vmem:[%s22814_s16 + $0x588] sm:$0xff] }
  0x31   : > { %539 = vst [vmem:[%s22822_s17 + $0x160] sm:$0xff] %v538_v44  ;;  %v542_v46 = vld [vmem:[%s22814_s16 + $0x5c0] sm:$0xff]  ;;  %v544_v47 = vld [vmem:[%s22814_s16 + $0x5c8] sm:$0xff]  ;;  %541 = vst [vmem:[%s22822_s17 + $0x168] sm:$0xff] %v540_v45 }
  0x32   : > { %543 = vst [vmem:[%s22822_s17 + $0x170] sm:$0xff] %v542_v46  ;;  %545 = vst [vmem:[%s22822_s17 + $0x178] sm:$0xff] %v544_v47  ;;  %v546_v48 = vld [vmem:[%s22814_s16 + $0x600] sm:$0xff]  ;;  %v548_v49 = vld [vmem:[%s22814_s16 + $0x608] sm:$0xff] }
  0x33   : > { %v550_v50 = vld [vmem:[%s22814_s16 + $0x640] sm:$0xff]  ;;  %547 = vst [vmem:[%s22822_s17 + $0x180] sm:$0xff] %v546_v48  ;;  %549 = vst [vmem:[%s22822_s17 + $0x188] sm:$0xff] %v548_v49  ;;  %v552_v51 = vld [vmem:[%s22814_s16 + $0x648] sm:$0xff] }
  0x34   : > { %551 = vst [vmem:[%s22822_s17 + $0x190] sm:$0xff] %v550_v50  ;;  %v554_v52 = vld [vmem:[%s22814_s16 + $0x680] sm:$0xff]  ;;  %v556_v53 = vld [vmem:[%s22814_s16 + $0x688] sm:$0xff]  ;;  %553 = vst [vmem:[%s22822_s17 + $0x198] sm:$0xff] %v552_v51 }
  0x35   : > { %555 = vst [vmem:[%s22822_s17 + $0x1a0] sm:$0xff] %v554_v52  ;;  %557 = vst [vmem:[%s22822_s17 + $0x1a8] sm:$0xff] %v556_v53  ;;  %v558_v54 = vld [vmem:[%s22814_s16 + $0x6c0] sm:$0xff]  ;;  %v560_v55 = vld [vmem:[%s22814_s16 + $0x6c8] sm:$0xff] }
  0x36   : > { %v562_v56 = vld [vmem:[%s22814_s16 + $0x700] sm:$0xff]  ;;  %559 = vst [vmem:[%s22822_s17 + $0x1b0] sm:$0xff] %v558_v54  ;;  %561 = vst [vmem:[%s22822_s17 + $0x1b8] sm:$0xff] %v560_v55  ;;  %v564_v57 = vld [vmem:[%s22814_s16 + $0x708] sm:$0xff] }
  0x37   : > { %563 = vst [vmem:[%s22822_s17 + $0x1c0] sm:$0xff] %v562_v56  ;;  %v566_v58 = vld [vmem:[%s22814_s16 + $0x740] sm:$0xff]  ;;  %v568_v59 = vld [vmem:[%s22814_s16 + $0x748] sm:$0xff]  ;;  %565 = vst [vmem:[%s22822_s17 + $0x1c8] sm:$0xff] %v564_v57 }
  0x38   : > { %567 = vst [vmem:[%s22822_s17 + $0x1d0] sm:$0xff] %v566_v58  ;;  %569 = vst [vmem:[%s22822_s17 + $0x1d8] sm:$0xff] %v568_v59  ;;  %v570_v60 = vld [vmem:[%s22814_s16 + $0x780] sm:$0xff]  ;;  %v572_v61 = vld [vmem:[%s22814_s16 + $0x788] sm:$0xff] }
  0x39   : > { %v574_v62 = vld [vmem:[%s22814_s16 + $0x7c0] sm:$0xff]  ;;  %571 = vst [vmem:[%s22822_s17 + $0x1e0] sm:$0xff] %v570_v60  ;;  %573 = vst [vmem:[%s22822_s17 + $0x1e8] sm:$0xff] %v572_v61  ;;  %v576_v63 = vld [vmem:[%s22814_s16 + $0x7c8] sm:$0xff] }
  0x3a   : > { %575 = vst [vmem:[%s22822_s17 + $0x1f0] sm:$0xff] %v574_v62  ;;  %v578_v0 = vld [vmem:[%s22814_s16 + $0x800] sm:$0xff]  ;;  %v580_v1 = vld [vmem:[%s22814_s16 + $0x808] sm:$0xff]  ;;  %577 = vst [vmem:[%s22822_s17 + $0x1f8] sm:$0xff] %v576_v63 }
  0x3b   : > { %579 = vst [vmem:[%s22822_s17 + $0x200] sm:$0xff] %v578_v0  ;;  %581 = vst [vmem:[%s22822_s17 + $0x208] sm:$0xff] %v580_v1  ;;  %v582_v2 = vld [vmem:[%s22814_s16 + $0x840] sm:$0xff]  ;;  %v584_v3 = vld [vmem:[%s22814_s16 + $0x848] sm:$0xff] }
  0x3c   : > { %v586_v4 = vld [vmem:[%s22814_s16 + $0x880] sm:$0xff]  ;;  %583 = vst [vmem:[%s22822_s17 + $0x210] sm:$0xff] %v582_v2  ;;  %585 = vst [vmem:[%s22822_s17 + $0x218] sm:$0xff] %v584_v3  ;;  %v588_v5 = vld [vmem:[%s22814_s16 + $0x888] sm:$0xff] }
  0x3d   : > { %587 = vst [vmem:[%s22822_s17 + $0x220] sm:$0xff] %v586_v4  ;;  %v590_v6 = vld [vmem:[%s22814_s16 + $0x8c0] sm:$0xff]  ;;  %v592_v7 = vld [vmem:[%s22814_s16 + $0x8c8] sm:$0xff]  ;;  %589 = vst [vmem:[%s22822_s17 + $0x228] sm:$0xff] %v588_v5 }
  0x3e   : > { %591 = vst [vmem:[%s22822_s17 + $0x230] sm:$0xff] %v590_v6  ;;  %593 = vst [vmem:[%s22822_s17 + $0x238] sm:$0xff] %v592_v7  ;;  %v594_v8 = vld [vmem:[%s22814_s16 + $0x900] sm:$0xff]  ;;  %v596_v9 = vld [vmem:[%s22814_s16 + $0x908] sm:$0xff] }
  0x3f   : > { %v598_v10 = vld [vmem:[%s22814_s16 + $0x940] sm:$0xff]  ;;  %595 = vst [vmem:[%s22822_s17 + $0x240] sm:$0xff] %v594_v8  ;;  %597 = vst [vmem:[%s22822_s17 + $0x248] sm:$0xff] %v596_v9  ;;  %v600_v11 = vld [vmem:[%s22814_s16 + $0x948] sm:$0xff] }
  0x40   : > { %599 = vst [vmem:[%s22822_s17 + $0x250] sm:$0xff] %v598_v10  ;;  %v602_v12 = vld [vmem:[%s22814_s16 + $0x980] sm:$0xff]  ;;  %v604_v13 = vld [vmem:[%s22814_s16 + $0x988] sm:$0xff]  ;;  %601 = vst [vmem:[%s22822_s17 + $0x258] sm:$0xff] %v600_v11 }
  0x41   : > { %603 = vst [vmem:[%s22822_s17 + $0x260] sm:$0xff] %v602_v12  ;;  %605 = vst [vmem:[%s22822_s17 + $0x268] sm:$0xff] %v604_v13  ;;  %v606_v14 = vld [vmem:[%s22814_s16 + $0x9c0] sm:$0xff]  ;;  %v608_v15 = vld [vmem:[%s22814_s16 + $0x9c8] sm:$0xff] }
  0x42   : > { %v610_v16 = vld [vmem:[%s22814_s16 + $0xa00] sm:$0xff]  ;;  %607 = vst [vmem:[%s22822_s17 + $0x270] sm:$0xff] %v606_v14  ;;  %609 = vst [vmem:[%s22822_s17 + $0x278] sm:$0xff] %v608_v15  ;;  %v612_v17 = vld [vmem:[%s22814_s16 + $0xa08] sm:$0xff] }
  0x43   : > { %611 = vst [vmem:[%s22822_s17 + $0x280] sm:$0xff] %v610_v16  ;;  %v614_v18 = vld [vmem:[%s22814_s16 + $0xa40] sm:$0xff]  ;;  %v616_v19 = vld [vmem:[%s22814_s16 + $0xa48] sm:$0xff]  ;;  %613 = vst [vmem:[%s22822_s17 + $0x288] sm:$0xff] %v612_v17 }
  0x44   : > { %615 = vst [vmem:[%s22822_s17 + $0x290] sm:$0xff] %v614_v18  ;;  %617 = vst [vmem:[%s22822_s17 + $0x298] sm:$0xff] %v616_v19  ;;  %v618_v20 = vld [vmem:[%s22814_s16 + $0xa80] sm:$0xff]  ;;  %v620_v21 = vld [vmem:[%s22814_s16 + $0xa88] sm:$0xff] }
  0x45   : > { %v622_v22 = vld [vmem:[%s22814_s16 + $0xac0] sm:$0xff]  ;;  %619 = vst [vmem:[%s22822_s17 + $0x2a0] sm:$0xff] %v618_v20  ;;  %621 = vst [vmem:[%s22822_s17 + $0x2a8] sm:$0xff] %v620_v21  ;;  %v624_v23 = vld [vmem:[%s22814_s16 + $0xac8] sm:$0xff] }
  0x46   : > { %623 = vst [vmem:[%s22822_s17 + $0x2b0] sm:$0xff] %v622_v22  ;;  %v626_v24 = vld [vmem:[%s22814_s16 + $0xb00] sm:$0xff]  ;;  %v628_v25 = vld [vmem:[%s22814_s16 + $0xb08] sm:$0xff]  ;;  %625 = vst [vmem:[%s22822_s17 + $0x2b8] sm:$0xff] %v624_v23 }
  0x47   : > { %627 = vst [vmem:[%s22822_s17 + $0x2c0] sm:$0xff] %v626_v24  ;;  %629 = vst [vmem:[%s22822_s17 + $0x2c8] sm:$0xff] %v628_v25  ;;  %v630_v26 = vld [vmem:[%s22814_s16 + $0xb40] sm:$0xff]  ;;  %v632_v27 = vld [vmem:[%s22814_s16 + $0xb48] sm:$0xff] }
  0x48   : > { %v634_v28 = vld [vmem:[%s22814_s16 + $0xb80] sm:$0xff]  ;;  %631 = vst [vmem:[%s22822_s17 + $0x2d0] sm:$0xff] %v630_v26  ;;  %633 = vst [vmem:[%s22822_s17 + $0x2d8] sm:$0xff] %v632_v27  ;;  %v636_v29 = vld [vmem:[%s22814_s16 + $0xb88] sm:$0xff] }
  0x49   : > { %635 = vst [vmem:[%s22822_s17 + $0x2e0] sm:$0xff] %v634_v28  ;;  %v638_v30 = vld [vmem:[%s22814_s16 + $0xbc0] sm:$0xff]  ;;  %v640_v31 = vld [vmem:[%s22814_s16 + $0xbc8] sm:$0xff]  ;;  %637 = vst [vmem:[%s22822_s17 + $0x2e8] sm:$0xff] %v636_v29 }
  0x4a   : > { %639 = vst [vmem:[%s22822_s17 + $0x2f0] sm:$0xff] %v638_v30  ;;  %641 = vst [vmem:[%s22822_s17 + $0x2f8] sm:$0xff] %v640_v31  ;;  %v642_v32 = vld [vmem:[%s22814_s16 + $0xc00] sm:$0xff]  ;;  %v644_v33 = vld [vmem:[%s22814_s16 + $0xc08] sm:$0xff] }
  0x4b   : > { %v646_v34 = vld [vmem:[%s22814_s16 + $0xc40] sm:$0xff]  ;;  %643 = vst [vmem:[%s22822_s17 + $0x300] sm:$0xff] %v642_v32  ;;  %645 = vst [vmem:[%s22822_s17 + $0x308] sm:$0xff] %v644_v33  ;;  %v648_v35 = vld [vmem:[%s22814_s16 + $0xc48] sm:$0xff] }
  0x4c   : > { %647 = vst [vmem:[%s22822_s17 + $0x310] sm:$0xff] %v646_v34  ;;  %v650_v36 = vld [vmem:[%s22814_s16 + $0xc80] sm:$0xff]  ;;  %v652_v37 = vld [vmem:[%s22814_s16 + $0xc88] sm:$0xff]  ;;  %649 = vst [vmem:[%s22822_s17 + $0x318] sm:$0xff] %v648_v35 }
  0x4d   : > { %651 = vst [vmem:[%s22822_s17 + $0x320] sm:$0xff] %v650_v36  ;;  %653 = vst [vmem:[%s22822_s17 + $0x328] sm:$0xff] %v652_v37  ;;  %v654_v38 = vld [vmem:[%s22814_s16 + $0xcc0] sm:$0xff]  ;;  %v656_v39 = vld [vmem:[%s22814_s16 + $0xcc8] sm:$0xff] }
  0x4e   : > { %v658_v40 = vld [vmem:[%s22814_s16 + $0xd00] sm:$0xff]  ;;  %655 = vst [vmem:[%s22822_s17 + $0x330] sm:$0xff] %v654_v38  ;;  %657 = vst [vmem:[%s22822_s17 + $0x338] sm:$0xff] %v656_v39  ;;  %v660_v41 = vld [vmem:[%s22814_s16 + $0xd08] sm:$0xff] }
  0x4f   : > { %659 = vst [vmem:[%s22822_s17 + $0x340] sm:$0xff] %v658_v40  ;;  %v662_v42 = vld [vmem:[%s22814_s16 + $0xd40] sm:$0xff]  ;;  %v664_v43 = vld [vmem:[%s22814_s16 + $0xd48] sm:$0xff]  ;;  %661 = vst [vmem:[%s22822_s17 + $0x348] sm:$0xff] %v660_v41 }
  0x50   : > { %663 = vst [vmem:[%s22822_s17 + $0x350] sm:$0xff] %v662_v42  ;;  %665 = vst [vmem:[%s22822_s17 + $0x358] sm:$0xff] %v664_v43  ;;  %v666_v44 = vld [vmem:[%s22814_s16 + $0xd80] sm:$0xff]  ;;  %v668_v45 = vld [vmem:[%s22814_s16 + $0xd88] sm:$0xff] }
  0x51   : > { %v670_v46 = vld [vmem:[%s22814_s16 + $0xdc0] sm:$0xff]  ;;  %667 = vst [vmem:[%s22822_s17 + $0x360] sm:$0xff] %v666_v44  ;;  %669 = vst [vmem:[%s22822_s17 + $0x368] sm:$0xff] %v668_v45  ;;  %v672_v47 = vld [vmem:[%s22814_s16 + $0xdc8] sm:$0xff] }
  0x52   : > { %671 = vst [vmem:[%s22822_s17 + $0x370] sm:$0xff] %v670_v46  ;;  %v674_v48 = vld [vmem:[%s22814_s16 + $0xe00] sm:$0xff]  ;;  %v676_v49 = vld [vmem:[%s22814_s16 + $0xe08] sm:$0xff]  ;;  %673 = vst [vmem:[%s22822_s17 + $0x378] sm:$0xff] %v672_v47 }
  0x53   : > { %675 = vst [vmem:[%s22822_s17 + $0x380] sm:$0xff] %v674_v48  ;;  %677 = vst [vmem:[%s22822_s17 + $0x388] sm:$0xff] %v676_v49  ;;  %v678_v50 = vld [vmem:[%s22814_s16 + $0xe40] sm:$0xff]  ;;  %v680_v51 = vld [vmem:[%s22814_s16 + $0xe48] sm:$0xff] }
  0x54   : > { %v682_v52 = vld [vmem:[%s22814_s16 + $0xe80] sm:$0xff]  ;;  %679 = vst [vmem:[%s22822_s17 + $0x390] sm:$0xff] %v678_v50  ;;  %681 = vst [vmem:[%s22822_s17 + $0x398] sm:$0xff] %v680_v51  ;;  %v684_v53 = vld [vmem:[%s22814_s16 + $0xe88] sm:$0xff] }
  0x55   : > { %683 = vst [vmem:[%s22822_s17 + $0x3a0] sm:$0xff] %v682_v52  ;;  %v686_v54 = vld [vmem:[%s22814_s16 + $0xec0] sm:$0xff]  ;;  %v688_v55 = vld [vmem:[%s22814_s16 + $0xec8] sm:$0xff]  ;;  %685 = vst [vmem:[%s22822_s17 + $0x3a8] sm:$0xff] %v684_v53 }
  0x56   : > { %687 = vst [vmem:[%s22822_s17 + $0x3b0] sm:$0xff] %v686_v54  ;;  %689 = vst [vmem:[%s22822_s17 + $0x3b8] sm:$0xff] %v688_v55  ;;  %v690_v56 = vld [vmem:[%s22814_s16 + $0xf00] sm:$0xff]  ;;  %v692_v57 = vld [vmem:[%s22814_s16 + $0xf08] sm:$0xff] }
  0x57   : > { %v694_v58 = vld [vmem:[%s22814_s16 + $0xf40] sm:$0xff]  ;;  %691 = vst [vmem:[%s22822_s17 + $0x3c0] sm:$0xff] %v690_v56  ;;  %693 = vst [vmem:[%s22822_s17 + $0x3c8] sm:$0xff] %v692_v57  ;;  %v696_v59 = vld [vmem:[%s22814_s16 + $0xf48] sm:$0xff] }
  0x58   : > { %695 = vst [vmem:[%s22822_s17 + $0x3d0] sm:$0xff] %v694_v58  ;;  %v698_v60 = vld [vmem:[%s22814_s16 + $0xf80] sm:$0xff]  ;;  %v700_v61 = vld [vmem:[%s22814_s16 + $0xf88] sm:$0xff]  ;;  %697 = vst [vmem:[%s22822_s17 + $0x3d8] sm:$0xff] %v696_v59 }
  0x59   : > { %699 = vst [vmem:[%s22822_s17 + $0x3e0] sm:$0xff] %v698_v60  ;;  %701 = vst [vmem:[%s22822_s17 + $0x3e8] sm:$0xff] %v700_v61  ;;  %v702_v62 = vld [vmem:[%s22814_s16 + $0xfc0] sm:$0xff]  ;;  %v704_v63 = vld [vmem:[%s22814_s16 + $0xfc8] sm:$0xff] }
  0x5a   : > { %v706_v0 = vld [vmem:[%s22814_s16 + $0x1000] sm:$0xff]  ;;  %703 = vst [vmem:[%s22822_s17 + $0x3f0] sm:$0xff] %v702_v62  ;;  %705 = vst [vmem:[%s22822_s17 + $0x3f8] sm:$0xff] %v704_v63  ;;  %v708_v1 = vld [vmem:[%s22814_s16 + $0x1008] sm:$0xff] }
  0x5b   : > { %707 = vst [vmem:[%s22822_s17 + $0x400] sm:$0xff] %v706_v0  ;;  %v710_v2 = vld [vmem:[%s22814_s16 + $0x1040] sm:$0xff]  ;;  %v712_v3 = vld [vmem:[%s22814_s16 + $0x1048] sm:$0xff]  ;;  %709 = vst [vmem:[%s22822_s17 + $0x408] sm:$0xff] %v708_v1 }
  0x5c   : > { %711 = vst [vmem:[%s22822_s17 + $0x410] sm:$0xff] %v710_v2  ;;  %713 = vst [vmem:[%s22822_s17 + $0x418] sm:$0xff] %v712_v3  ;;  %v714_v4 = vld [vmem:[%s22814_s16 + $0x1080] sm:$0xff]  ;;  %v716_v5 = vld [vmem:[%s22814_s16 + $0x1088] sm:$0xff] }
  0x5d   : > { %v718_v6 = vld [vmem:[%s22814_s16 + $0x10c0] sm:$0xff]  ;;  %715 = vst [vmem:[%s22822_s17 + $0x420] sm:$0xff] %v714_v4  ;;  %717 = vst [vmem:[%s22822_s17 + $0x428] sm:$0xff] %v716_v5  ;;  %v720_v7 = vld [vmem:[%s22814_s16 + $0x10c8] sm:$0xff] }
  0x5e   : > { %719 = vst [vmem:[%s22822_s17 + $0x430] sm:$0xff] %v718_v6  ;;  %v722_v8 = vld [vmem:[%s22814_s16 + $0x1100] sm:$0xff]  ;;  %v724_v9 = vld [vmem:[%s22814_s16 + $0x1108] sm:$0xff]  ;;  %721 = vst [vmem:[%s22822_s17 + $0x438] sm:$0xff] %v720_v7 }
  0x5f   : > { %723 = vst [vmem:[%s22822_s17 + $0x440] sm:$0xff] %v722_v8  ;;  %725 = vst [vmem:[%s22822_s17 + $0x448] sm:$0xff] %v724_v9  ;;  %v726_v10 = vld [vmem:[%s22814_s16 + $0x1140] sm:$0xff]  ;;  %v728_v11 = vld [vmem:[%s22814_s16 + $0x1148] sm:$0xff] }
  0x60   : > { %v730_v12 = vld [vmem:[%s22814_s16 + $0x1180] sm:$0xff]  ;;  %727 = vst [vmem:[%s22822_s17 + $0x450] sm:$0xff] %v726_v10  ;;  %729 = vst [vmem:[%s22822_s17 + $0x458] sm:$0xff] %v728_v11  ;;  %v732_v13 = vld [vmem:[%s22814_s16 + $0x1188] sm:$0xff] }
  0x61   : > { %731 = vst [vmem:[%s22822_s17 + $0x460] sm:$0xff] %v730_v12  ;;  %v734_v14 = vld [vmem:[%s22814_s16 + $0x11c0] sm:$0xff]  ;;  %v736_v15 = vld [vmem:[%s22814_s16 + $0x11c8] sm:$0xff]  ;;  %733 = vst [vmem:[%s22822_s17 + $0x468] sm:$0xff] %v732_v13 }
  0x62   : > { %735 = vst [vmem:[%s22822_s17 + $0x470] sm:$0xff] %v734_v14  ;;  %737 = vst [vmem:[%s22822_s17 + $0x478] sm:$0xff] %v736_v15  ;;  %v738_v16 = vld [vmem:[%s22814_s16 + $0x1200] sm:$0xff]  ;;  %v740_v17 = vld [vmem:[%s22814_s16 + $0x1208] sm:$0xff] }
  0x63   : > { %v742_v18 = vld [vmem:[%s22814_s16 + $0x1240] sm:$0xff]  ;;  %739 = vst [vmem:[%s22822_s17 + $0x480] sm:$0xff] %v738_v16  ;;  %741 = vst [vmem:[%s22822_s17 + $0x488] sm:$0xff] %v740_v17  ;;  %v744_v19 = vld [vmem:[%s22814_s16 + $0x1248] sm:$0xff] }
  0x64   : > { %743 = vst [vmem:[%s22822_s17 + $0x490] sm:$0xff] %v742_v18  ;;  %v746_v20 = vld [vmem:[%s22814_s16 + $0x1280] sm:$0xff]  ;;  %v748_v21 = vld [vmem:[%s22814_s16 + $0x1288] sm:$0xff]  ;;  %745 = vst [vmem:[%s22822_s17 + $0x498] sm:$0xff] %v744_v19 }
  0x65   : > { %747 = vst [vmem:[%s22822_s17 + $0x4a0] sm:$0xff] %v746_v20  ;;  %749 = vst [vmem:[%s22822_s17 + $0x4a8] sm:$0xff] %v748_v21  ;;  %v750_v22 = vld [vmem:[%s22814_s16 + $0x12c0] sm:$0xff]  ;;  %v752_v23 = vld [vmem:[%s22814_s16 + $0x12c8] sm:$0xff] }
  0x66   : > { %v754_v24 = vld [vmem:[%s22814_s16 + $0x1300] sm:$0xff]  ;;  %751 = vst [vmem:[%s22822_s17 + $0x4b0] sm:$0xff] %v750_v22  ;;  %753 = vst [vmem:[%s22822_s17 + $0x4b8] sm:$0xff] %v752_v23  ;;  %v756_v25 = vld [vmem:[%s22814_s16 + $0x1308] sm:$0xff] }
  0x67   : > { %755 = vst [vmem:[%s22822_s17 + $0x4c0] sm:$0xff] %v754_v24  ;;  %v758_v26 = vld [vmem:[%s22814_s16 + $0x1340] sm:$0xff]  ;;  %v760_v27 = vld [vmem:[%s22814_s16 + $0x1348] sm:$0xff]  ;;  %757 = vst [vmem:[%s22822_s17 + $0x4c8] sm:$0xff] %v756_v25 }
  0x68   : > { %759 = vst [vmem:[%s22822_s17 + $0x4d0] sm:$0xff] %v758_v26  ;;  %761 = vst [vmem:[%s22822_s17 + $0x4d8] sm:$0xff] %v760_v27  ;;  %v762_v28 = vld [vmem:[%s22814_s16 + $0x1380] sm:$0xff]  ;;  %v764_v29 = vld [vmem:[%s22814_s16 + $0x1388] sm:$0xff] }
  0x69   : > { %v766_v30 = vld [vmem:[%s22814_s16 + $0x13c0] sm:$0xff]  ;;  %763 = vst [vmem:[%s22822_s17 + $0x4e0] sm:$0xff] %v762_v28  ;;  %765 = vst [vmem:[%s22822_s17 + $0x4e8] sm:$0xff] %v764_v29  ;;  %v768_v31 = vld [vmem:[%s22814_s16 + $0x13c8] sm:$0xff] }
  0x6a   : > { %767 = vst [vmem:[%s22822_s17 + $0x4f0] sm:$0xff] %v766_v30  ;;  %v770_v32 = vld [vmem:[%s22814_s16 + $0x1400] sm:$0xff]  ;;  %v772_v33 = vld [vmem:[%s22814_s16 + $0x1408] sm:$0xff]  ;;  %769 = vst [vmem:[%s22822_s17 + $0x4f8] sm:$0xff] %v768_v31 }
  0x6b   : > { %771 = vst [vmem:[%s22822_s17 + $0x500] sm:$0xff] %v770_v32  ;;  %773 = vst [vmem:[%s22822_s17 + $0x508] sm:$0xff] %v772_v33  ;;  %v774_v34 = vld [vmem:[%s22814_s16 + $0x1440] sm:$0xff]  ;;  %v776_v35 = vld [vmem:[%s22814_s16 + $0x1448] sm:$0xff] }
  0x6c   : > { %v778_v36 = vld [vmem:[%s22814_s16 + $0x1480] sm:$0xff]  ;;  %775 = vst [vmem:[%s22822_s17 + $0x510] sm:$0xff] %v774_v34  ;;  %777 = vst [vmem:[%s22822_s17 + $0x518] sm:$0xff] %v776_v35  ;;  %v780_v37 = vld [vmem:[%s22814_s16 + $0x1488] sm:$0xff] }
  0x6d   : > { %779 = vst [vmem:[%s22822_s17 + $0x520] sm:$0xff] %v778_v36  ;;  %v782_v38 = vld [vmem:[%s22814_s16 + $0x14c0] sm:$0xff]  ;;  %v784_v39 = vld [vmem:[%s22814_s16 + $0x14c8] sm:$0xff]  ;;  %781 = vst [vmem:[%s22822_s17 + $0x528] sm:$0xff] %v780_v37 }
  0x6e   : > { %783 = vst [vmem:[%s22822_s17 + $0x530] sm:$0xff] %v782_v38  ;;  %785 = vst [vmem:[%s22822_s17 + $0x538] sm:$0xff] %v784_v39  ;;  %v786_v40 = vld [vmem:[%s22814_s16 + $0x1500] sm:$0xff]  ;;  %v788_v41 = vld [vmem:[%s22814_s16 + $0x1508] sm:$0xff] }
  0x6f   : > { %v790_v42 = vld [vmem:[%s22814_s16 + $0x1540] sm:$0xff]  ;;  %787 = vst [vmem:[%s22822_s17 + $0x540] sm:$0xff] %v786_v40  ;;  %789 = vst [vmem:[%s22822_s17 + $0x548] sm:$0xff] %v788_v41  ;;  %v792_v43 = vld [vmem:[%s22814_s16 + $0x1548] sm:$0xff] }
  0x70   : > { %791 = vst [vmem:[%s22822_s17 + $0x550] sm:$0xff] %v790_v42  ;;  %v794_v44 = vld [vmem:[%s22814_s16 + $0x1580] sm:$0xff]  ;;  %v796_v45 = vld [vmem:[%s22814_s16 + $0x1588] sm:$0xff]  ;;  %793 = vst [vmem:[%s22822_s17 + $0x558] sm:$0xff] %v792_v43 }
  0x71   : > { %795 = vst [vmem:[%s22822_s17 + $0x560] sm:$0xff] %v794_v44  ;;  %797 = vst [vmem:[%s22822_s17 + $0x568] sm:$0xff] %v796_v45  ;;  %v798_v46 = vld [vmem:[%s22814_s16 + $0x15c0] sm:$0xff]  ;;  %v800_v47 = vld [vmem:[%s22814_s16 + $0x15c8] sm:$0xff] }
  0x72   : > { %v802_v48 = vld [vmem:[%s22814_s16 + $0x1600] sm:$0xff]  ;;  %799 = vst [vmem:[%s22822_s17 + $0x570] sm:$0xff] %v798_v46  ;;  %801 = vst [vmem:[%s22822_s17 + $0x578] sm:$0xff] %v800_v47  ;;  %v804_v49 = vld [vmem:[%s22814_s16 + $0x1608] sm:$0xff] }
  0x73   : > { %803 = vst [vmem:[%s22822_s17 + $0x580] sm:$0xff] %v802_v48  ;;  %v806_v50 = vld [vmem:[%s22814_s16 + $0x1640] sm:$0xff]  ;;  %v808_v51 = vld [vmem:[%s22814_s16 + $0x1648] sm:$0xff]  ;;  %805 = vst [vmem:[%s22822_s17 + $0x588] sm:$0xff] %v804_v49 }
  0x74   : > { %807 = vst [vmem:[%s22822_s17 + $0x590] sm:$0xff] %v806_v50  ;;  %809 = vst [vmem:[%s22822_s17 + $0x598] sm:$0xff] %v808_v51  ;;  %v810_v52 = vld [vmem:[%s22814_s16 + $0x1680] sm:$0xff]  ;;  %v812_v53 = vld [vmem:[%s22814_s16 + $0x1688] sm:$0xff] }
  0x75   : > { %v814_v54 = vld [vmem:[%s22814_s16 + $0x16c0] sm:$0xff]  ;;  %811 = vst [vmem:[%s22822_s17 + $0x5a0] sm:$0xff] %v810_v52  ;;  %813 = vst [vmem:[%s22822_s17 + $0x5a8] sm:$0xff] %v812_v53  ;;  %v816_v55 = vld [vmem:[%s22814_s16 + $0x16c8] sm:$0xff] }
  0x76   : > { %815 = vst [vmem:[%s22822_s17 + $0x5b0] sm:$0xff] %v814_v54  ;;  %v818_v56 = vld [vmem:[%s22814_s16 + $0x1700] sm:$0xff]  ;;  %v820_v57 = vld [vmem:[%s22814_s16 + $0x1708] sm:$0xff]  ;;  %817 = vst [vmem:[%s22822_s17 + $0x5b8] sm:$0xff] %v816_v55 }
  0x77   : > { %819 = vst [vmem:[%s22822_s17 + $0x5c0] sm:$0xff] %v818_v56  ;;  %821 = vst [vmem:[%s22822_s17 + $0x5c8] sm:$0xff] %v820_v57  ;;  %v822_v58 = vld [vmem:[%s22814_s16 + $0x1740] sm:$0xff]  ;;  %v824_v59 = vld [vmem:[%s22814_s16 + $0x1748] sm:$0xff] }
  0x78   : > { %v826_v60 = vld [vmem:[%s22814_s16 + $0x1780] sm:$0xff]  ;;  %823 = vst [vmem:[%s22822_s17 + $0x5d0] sm:$0xff] %v822_v58  ;;  %825 = vst [vmem:[%s22822_s17 + $0x5d8] sm:$0xff] %v824_v59  ;;  %v828_v61 = vld [vmem:[%s22814_s16 + $0x1788] sm:$0xff] }
  0x79   : > { %827 = vst [vmem:[%s22822_s17 + $0x5e0] sm:$0xff] %v826_v60  ;;  %v830_v62 = vld [vmem:[%s22814_s16 + $0x17c0] sm:$0xff]  ;;  %v832_v63 = vld [vmem:[%s22814_s16 + $0x17c8] sm:$0xff]  ;;  %829 = vst [vmem:[%s22822_s17 + $0x5e8] sm:$0xff] %v828_v61 }
  0x7a   : > { %831 = vst [vmem:[%s22822_s17 + $0x5f0] sm:$0xff] %v830_v62  ;;  %833 = vst [vmem:[%s22822_s17 + $0x5f8] sm:$0xff] %v832_v63  ;;  %v834_v0 = vld [vmem:[%s22814_s16 + $0x1800] sm:$0xff]  ;;  %v836_v1 = vld [vmem:[%s22814_s16 + $0x1808] sm:$0xff] }
  0x7b   : > { %v838_v2 = vld [vmem:[%s22814_s16 + $0x1840] sm:$0xff]  ;;  %835 = vst [vmem:[%s22822_s17 + $0x600] sm:$0xff] %v834_v0  ;;  %837 = vst [vmem:[%s22822_s17 + $0x608] sm:$0xff] %v836_v1  ;;  %v840_v3 = vld [vmem:[%s22814_s16 + $0x1848] sm:$0xff] }
  0x7c   : > { %839 = vst [vmem:[%s22822_s17 + $0x610] sm:$0xff] %v838_v2  ;;  %v842_v4 = vld [vmem:[%s22814_s16 + $0x1880] sm:$0xff]  ;;  %v844_v5 = vld [vmem:[%s22814_s16 + $0x1888] sm:$0xff]  ;;  %841 = vst [vmem:[%s22822_s17 + $0x618] sm:$0xff] %v840_v3 }
  0x7d   : > { %843 = vst [vmem:[%s22822_s17 + $0x620] sm:$0xff] %v842_v4  ;;  %845 = vst [vmem:[%s22822_s17 + $0x628] sm:$0xff] %v844_v5  ;;  %v846_v6 = vld [vmem:[%s22814_s16 + $0x18c0] sm:$0xff]  ;;  %v848_v7 = vld [vmem:[%s22814_s16 + $0x18c8] sm:$0xff] }
  0x7e   : > { %v850_v8 = vld [vmem:[%s22814_s16 + $0x1900] sm:$0xff]  ;;  %847 = vst [vmem:[%s22822_s17 + $0x630] sm:$0xff] %v846_v6  ;;  %849 = vst [vmem:[%s22822_s17 + $0x638] sm:$0xff] %v848_v7  ;;  %v852_v9 = vld [vmem:[%s22814_s16 + $0x1908] sm:$0xff] }
  0x7f   : > { %851 = vst [vmem:[%s22822_s17 + $0x640] sm:$0xff] %v850_v8  ;;  %v854_v10 = vld [vmem:[%s22814_s16 + $0x1940] sm:$0xff]  ;;  %v856_v11 = vld [vmem:[%s22814_s16 + $0x1948] sm:$0xff]  ;;  %853 = vst [vmem:[%s22822_s17 + $0x648] sm:$0xff] %v852_v9 }
  0x80   : > { %855 = vst [vmem:[%s22822_s17 + $0x650] sm:$0xff] %v854_v10  ;;  %857 = vst [vmem:[%s22822_s17 + $0x658] sm:$0xff] %v856_v11  ;;  %v858_v12 = vld [vmem:[%s22814_s16 + $0x1980] sm:$0xff]  ;;  %v860_v13 = vld [vmem:[%s22814_s16 + $0x1988] sm:$0xff] }
  0x81   : > { %v862_v14 = vld [vmem:[%s22814_s16 + $0x19c0] sm:$0xff]  ;;  %859 = vst [vmem:[%s22822_s17 + $0x660] sm:$0xff] %v858_v12  ;;  %861 = vst [vmem:[%s22822_s17 + $0x668] sm:$0xff] %v860_v13  ;;  %v864_v15 = vld [vmem:[%s22814_s16 + $0x19c8] sm:$0xff] }
  0x82   : > { %863 = vst [vmem:[%s22822_s17 + $0x670] sm:$0xff] %v862_v14  ;;  %v866_v16 = vld [vmem:[%s22814_s16 + $0x1a00] sm:$0xff]  ;;  %v868_v17 = vld [vmem:[%s22814_s16 + $0x1a08] sm:$0xff]  ;;  %865 = vst [vmem:[%s22822_s17 + $0x678] sm:$0xff] %v864_v15 }
  0x83   : > { %867 = vst [vmem:[%s22822_s17 + $0x680] sm:$0xff] %v866_v16  ;;  %869 = vst [vmem:[%s22822_s17 + $0x688] sm:$0xff] %v868_v17  ;;  %v870_v18 = vld [vmem:[%s22814_s16 + $0x1a40] sm:$0xff]  ;;  %v872_v19 = vld [vmem:[%s22814_s16 + $0x1a48] sm:$0xff] }
  0x84   : > { %v874_v20 = vld [vmem:[%s22814_s16 + $0x1a80] sm:$0xff]  ;;  %871 = vst [vmem:[%s22822_s17 + $0x690] sm:$0xff] %v870_v18  ;;  %873 = vst [vmem:[%s22822_s17 + $0x698] sm:$0xff] %v872_v19  ;;  %v876_v21 = vld [vmem:[%s22814_s16 + $0x1a88] sm:$0xff] }
  0x85   : > { %875 = vst [vmem:[%s22822_s17 + $0x6a0] sm:$0xff] %v874_v20  ;;  %v878_v22 = vld [vmem:[%s22814_s16 + $0x1ac0] sm:$0xff]  ;;  %v880_v23 = vld [vmem:[%s22814_s16 + $0x1ac8] sm:$0xff]  ;;  %877 = vst [vmem:[%s22822_s17 + $0x6a8] sm:$0xff] %v876_v21 }
  0x86   : > { %879 = vst [vmem:[%s22822_s17 + $0x6b0] sm:$0xff] %v878_v22  ;;  %881 = vst [vmem:[%s22822_s17 + $0x6b8] sm:$0xff] %v880_v23  ;;  %v882_v24 = vld [vmem:[%s22814_s16 + $0x1b00] sm:$0xff]  ;;  %v884_v25 = vld [vmem:[%s22814_s16 + $0x1b08] sm:$0xff] }
  0x87   : > { %v886_v26 = vld [vmem:[%s22814_s16 + $0x1b40] sm:$0xff]  ;;  %883 = vst [vmem:[%s22822_s17 + $0x6c0] sm:$0xff] %v882_v24  ;;  %885 = vst [vmem:[%s22822_s17 + $0x6c8] sm:$0xff] %v884_v25  ;;  %v888_v27 = vld [vmem:[%s22814_s16 + $0x1b48] sm:$0xff] }
  0x88   : > { %887 = vst [vmem:[%s22822_s17 + $0x6d0] sm:$0xff] %v886_v26  ;;  %v890_v28 = vld [vmem:[%s22814_s16 + $0x1b80] sm:$0xff]  ;;  %v892_v29 = vld [vmem:[%s22814_s16 + $0x1b88] sm:$0xff]  ;;  %889 = vst [vmem:[%s22822_s17 + $0x6d8] sm:$0xff] %v888_v27 }
  0x89   : > { %891 = vst [vmem:[%s22822_s17 + $0x6e0] sm:$0xff] %v890_v28  ;;  %893 = vst [vmem:[%s22822_s17 + $0x6e8] sm:$0xff] %v892_v29  ;;  %v894_v30 = vld [vmem:[%s22814_s16 + $0x1bc0] sm:$0xff]  ;;  %v896_v31 = vld [vmem:[%s22814_s16 + $0x1bc8] sm:$0xff] }
  0x8a   : > { %v898_v32 = vld [vmem:[%s22814_s16 + $0x1c00] sm:$0xff]  ;;  %895 = vst [vmem:[%s22822_s17 + $0x6f0] sm:$0xff] %v894_v30  ;;  %897 = vst [vmem:[%s22822_s17 + $0x6f8] sm:$0xff] %v896_v31  ;;  %v900_v33 = vld [vmem:[%s22814_s16 + $0x1c08] sm:$0xff] }
  0x8b   : > { %899 = vst [vmem:[%s22822_s17 + $0x700] sm:$0xff] %v898_v32  ;;  %v902_v34 = vld [vmem:[%s22814_s16 + $0x1c40] sm:$0xff]  ;;  %v904_v35 = vld [vmem:[%s22814_s16 + $0x1c48] sm:$0xff]  ;;  %901 = vst [vmem:[%s22822_s17 + $0x708] sm:$0xff] %v900_v33 }
  0x8c   : > { %903 = vst [vmem:[%s22822_s17 + $0x710] sm:$0xff] %v902_v34  ;;  %905 = vst [vmem:[%s22822_s17 + $0x718] sm:$0xff] %v904_v35  ;;  %v906_v36 = vld [vmem:[%s22814_s16 + $0x1c80] sm:$0xff]  ;;  %v908_v37 = vld [vmem:[%s22814_s16 + $0x1c88] sm:$0xff] }
  0x8d   : > { %v910_v38 = vld [vmem:[%s22814_s16 + $0x1cc0] sm:$0xff]  ;;  %907 = vst [vmem:[%s22822_s17 + $0x720] sm:$0xff] %v906_v36  ;;  %909 = vst [vmem:[%s22822_s17 + $0x728] sm:$0xff] %v908_v37  ;;  %v912_v39 = vld [vmem:[%s22814_s16 + $0x1cc8] sm:$0xff] }
  0x8e   : > { %911 = vst [vmem:[%s22822_s17 + $0x730] sm:$0xff] %v910_v38  ;;  %v914_v40 = vld [vmem:[%s22814_s16 + $0x1d00] sm:$0xff]  ;;  %v916_v41 = vld [vmem:[%s22814_s16 + $0x1d08] sm:$0xff]  ;;  %913 = vst [vmem:[%s22822_s17 + $0x738] sm:$0xff] %v912_v39 }
  0x8f   : > { %915 = vst [vmem:[%s22822_s17 + $0x740] sm:$0xff] %v914_v40  ;;  %917 = vst [vmem:[%s22822_s17 + $0x748] sm:$0xff] %v916_v41  ;;  %v918_v42 = vld [vmem:[%s22814_s16 + $0x1d40] sm:$0xff]  ;;  %v920_v43 = vld [vmem:[%s22814_s16 + $0x1d48] sm:$0xff] }
  0x90   : > { %v922_v44 = vld [vmem:[%s22814_s16 + $0x1d80] sm:$0xff]  ;;  %919 = vst [vmem:[%s22822_s17 + $0x750] sm:$0xff] %v918_v42  ;;  %921 = vst [vmem:[%s22822_s17 + $0x758] sm:$0xff] %v920_v43  ;;  %v924_v45 = vld [vmem:[%s22814_s16 + $0x1d88] sm:$0xff] }
  0x91   : > { %923 = vst [vmem:[%s22822_s17 + $0x760] sm:$0xff] %v922_v44  ;;  %v926_v46 = vld [vmem:[%s22814_s16 + $0x1dc0] sm:$0xff]  ;;  %v928_v47 = vld [vmem:[%s22814_s16 + $0x1dc8] sm:$0xff]  ;;  %925 = vst [vmem:[%s22822_s17 + $0x768] sm:$0xff] %v924_v45 }
  0x92   : > { %927 = vst [vmem:[%s22822_s17 + $0x770] sm:$0xff] %v926_v46  ;;  %929 = vst [vmem:[%s22822_s17 + $0x778] sm:$0xff] %v928_v47  ;;  %v930_v48 = vld [vmem:[%s22814_s16 + $0x1e00] sm:$0xff]  ;;  %v932_v49 = vld [vmem:[%s22814_s16 + $0x1e08] sm:$0xff] }
  0x93   : > { %v934_v50 = vld [vmem:[%s22814_s16 + $0x1e40] sm:$0xff]  ;;  %931 = vst [vmem:[%s22822_s17 + $0x780] sm:$0xff] %v930_v48  ;;  %933 = vst [vmem:[%s22822_s17 + $0x788] sm:$0xff] %v932_v49  ;;  %v936_v51 = vld [vmem:[%s22814_s16 + $0x1e48] sm:$0xff] }
  0x94   : > { %935 = vst [vmem:[%s22822_s17 + $0x790] sm:$0xff] %v934_v50  ;;  %v938_v52 = vld [vmem:[%s22814_s16 + $0x1e80] sm:$0xff]  ;;  %v940_v53 = vld [vmem:[%s22814_s16 + $0x1e88] sm:$0xff]  ;;  %937 = vst [vmem:[%s22822_s17 + $0x798] sm:$0xff] %v936_v51 }
  0x95   : > { %939 = vst [vmem:[%s22822_s17 + $0x7a0] sm:$0xff] %v938_v52  ;;  %941 = vst [vmem:[%s22822_s17 + $0x7a8] sm:$0xff] %v940_v53  ;;  %v942_v54 = vld [vmem:[%s22814_s16 + $0x1ec0] sm:$0xff]  ;;  %v944_v55 = vld [vmem:[%s22814_s16 + $0x1ec8] sm:$0xff] }
  0x96   : > { %v946_v56 = vld [vmem:[%s22814_s16 + $0x1f00] sm:$0xff]  ;;  %943 = vst [vmem:[%s22822_s17 + $0x7b0] sm:$0xff] %v942_v54  ;;  %945 = vst [vmem:[%s22822_s17 + $0x7b8] sm:$0xff] %v944_v55  ;;  %v948_v57 = vld [vmem:[%s22814_s16 + $0x1f08] sm:$0xff] }
  0x97   : > { %947 = vst [vmem:[%s22822_s17 + $0x7c0] sm:$0xff] %v946_v56  ;;  %v950_v58 = vld [vmem:[%s22814_s16 + $0x1f40] sm:$0xff]  ;;  %v952_v59 = vld [vmem:[%s22814_s16 + $0x1f48] sm:$0xff]  ;;  %949 = vst [vmem:[%s22822_s17 + $0x7c8] sm:$0xff] %v948_v57 }
  0x98   : > { %951 = vst [vmem:[%s22822_s17 + $0x7d0] sm:$0xff] %v950_v58  ;;  %953 = vst [vmem:[%s22822_s17 + $0x7d8] sm:$0xff] %v952_v59  ;;  %v954_v60 = vld [vmem:[%s22814_s16 + $0x1f80] sm:$0xff]  ;;  %v956_v61 = vld [vmem:[%s22814_s16 + $0x1f88] sm:$0xff] }
  0x99   : > { %v958_v62 = vld [vmem:[%s22814_s16 + $0x1fc0] sm:$0xff]  ;;  %955 = vst [vmem:[%s22822_s17 + $0x7e0] sm:$0xff] %v954_v60  ;;  %957 = vst [vmem:[%s22822_s17 + $0x7e8] sm:$0xff] %v956_v61  ;;  %v960_v63 = vld [vmem:[%s22814_s16 + $0x1fc8] sm:$0xff] }
  0x9a   : > { %959 = vst [vmem:[%s22822_s17 + $0x7f0] sm:$0xff] %v958_v62  ;;  %v962_v0 = vld [vmem:[%s22814_s16 + $0x2000] sm:$0xff]  ;;  %v964_v1 = vld [vmem:[%s22814_s16 + $0x2008] sm:$0xff]  ;;  %961 = vst [vmem:[%s22822_s17 + $0x7f8] sm:$0xff] %v960_v63 }
  0x9b   : > { %963 = vst [vmem:[%s22822_s17 + $0x800] sm:$0xff] %v962_v0  ;;  %965 = vst [vmem:[%s22822_s17 + $0x808] sm:$0xff] %v964_v1  ;;  %v966_v2 = vld [vmem:[%s22814_s16 + $0x2040] sm:$0xff]  ;;  %v968_v3 = vld [vmem:[%s22814_s16 + $0x2048] sm:$0xff] }
  0x9c   : > { %v970_v4 = vld [vmem:[%s22814_s16 + $0x2080] sm:$0xff]  ;;  %967 = vst [vmem:[%s22822_s17 + $0x810] sm:$0xff] %v966_v2  ;;  %969 = vst [vmem:[%s22822_s17 + $0x818] sm:$0xff] %v968_v3  ;;  %v972_v5 = vld [vmem:[%s22814_s16 + $0x2088] sm:$0xff] }
  0x9d   : > { %971 = vst [vmem:[%s22822_s17 + $0x820] sm:$0xff] %v970_v4  ;;  %v974_v6 = vld [vmem:[%s22814_s16 + $0x20c0] sm:$0xff]  ;;  %v976_v7 = vld [vmem:[%s22814_s16 + $0x20c8] sm:$0xff]  ;;  %973 = vst [vmem:[%s22822_s17 + $0x828] sm:$0xff] %v972_v5 }
  0x9e   : > { %975 = vst [vmem:[%s22822_s17 + $0x830] sm:$0xff] %v974_v6  ;;  %977 = vst [vmem:[%s22822_s17 + $0x838] sm:$0xff] %v976_v7  ;;  %v978_v8 = vld [vmem:[%s22814_s16 + $0x2100] sm:$0xff]  ;;  %v980_v9 = vld [vmem:[%s22814_s16 + $0x2108] sm:$0xff] }
  0x9f   : > { %v982_v10 = vld [vmem:[%s22814_s16 + $0x2140] sm:$0xff]  ;;  %979 = vst [vmem:[%s22822_s17 + $0x840] sm:$0xff] %v978_v8  ;;  %981 = vst [vmem:[%s22822_s17 + $0x848] sm:$0xff] %v980_v9  ;;  %v984_v11 = vld [vmem:[%s22814_s16 + $0x2148] sm:$0xff] }
  0xa0   : > { %983 = vst [vmem:[%s22822_s17 + $0x850] sm:$0xff] %v982_v10  ;;  %v986_v12 = vld [vmem:[%s22814_s16 + $0x2180] sm:$0xff]  ;;  %v988_v13 = vld [vmem:[%s22814_s16 + $0x2188] sm:$0xff]  ;;  %985 = vst [vmem:[%s22822_s17 + $0x858] sm:$0xff] %v984_v11 }
  0xa1   : > { %987 = vst [vmem:[%s22822_s17 + $0x860] sm:$0xff] %v986_v12  ;;  %989 = vst [vmem:[%s22822_s17 + $0x868] sm:$0xff] %v988_v13  ;;  %v990_v14 = vld [vmem:[%s22814_s16 + $0x21c0] sm:$0xff]  ;;  %v992_v15 = vld [vmem:[%s22814_s16 + $0x21c8] sm:$0xff] }
  0xa2   : > { %v994_v16 = vld [vmem:[%s22814_s16 + $0x2200] sm:$0xff]  ;;  %991 = vst [vmem:[%s22822_s17 + $0x870] sm:$0xff] %v990_v14  ;;  %993 = vst [vmem:[%s22822_s17 + $0x878] sm:$0xff] %v992_v15  ;;  %v996_v17 = vld [vmem:[%s22814_s16 + $0x2208] sm:$0xff] }
  0xa3   : > { %995 = vst [vmem:[%s22822_s17 + $0x880] sm:$0xff] %v994_v16  ;;  %v998_v18 = vld [vmem:[%s22814_s16 + $0x2240] sm:$0xff]  ;;  %v1000_v19 = vld [vmem:[%s22814_s16 + $0x2248] sm:$0xff]  ;;  %997 = vst [vmem:[%s22822_s17 + $0x888] sm:$0xff] %v996_v17 }
  0xa4   : > { %999 = vst [vmem:[%s22822_s17 + $0x890] sm:$0xff] %v998_v18  ;;  %1001 = vst [vmem:[%s22822_s17 + $0x898] sm:$0xff] %v1000_v19  ;;  %v1002_v20 = vld [vmem:[%s22814_s16 + $0x2280] sm:$0xff]  ;;  %v1004_v21 = vld [vmem:[%s22814_s16 + $0x2288] sm:$0xff] }
  0xa5   : > { %v1006_v22 = vld [vmem:[%s22814_s16 + $0x22c0] sm:$0xff]  ;;  %1003 = vst [vmem:[%s22822_s17 + $0x8a0] sm:$0xff] %v1002_v20  ;;  %1005 = vst [vmem:[%s22822_s17 + $0x8a8] sm:$0xff] %v1004_v21  ;;  %v1008_v23 = vld [vmem:[%s22814_s16 + $0x22c8] sm:$0xff] }
  0xa6   : > { %1007 = vst [vmem:[%s22822_s17 + $0x8b0] sm:$0xff] %v1006_v22  ;;  %v1010_v24 = vld [vmem:[%s22814_s16 + $0x2300] sm:$0xff]  ;;  %v1012_v25 = vld [vmem:[%s22814_s16 + $0x2308] sm:$0xff]  ;;  %1009 = vst [vmem:[%s22822_s17 + $0x8b8] sm:$0xff] %v1008_v23 }
  0xa7   : > { %1011 = vst [vmem:[%s22822_s17 + $0x8c0] sm:$0xff] %v1010_v24  ;;  %1013 = vst [vmem:[%s22822_s17 + $0x8c8] sm:$0xff] %v1012_v25  ;;  %v1014_v26 = vld [vmem:[%s22814_s16 + $0x2340] sm:$0xff]  ;;  %v1016_v27 = vld [vmem:[%s22814_s16 + $0x2348] sm:$0xff] }
  0xa8   : > { %v1018_v28 = vld [vmem:[%s22814_s16 + $0x2380] sm:$0xff]  ;;  %1015 = vst [vmem:[%s22822_s17 + $0x8d0] sm:$0xff] %v1014_v26  ;;  %1017 = vst [vmem:[%s22822_s17 + $0x8d8] sm:$0xff] %v1016_v27  ;;  %v1020_v29 = vld [vmem:[%s22814_s16 + $0x2388] sm:$0xff] }
  0xa9   : > { %1019 = vst [vmem:[%s22822_s17 + $0x8e0] sm:$0xff] %v1018_v28  ;;  %v1022_v30 = vld [vmem:[%s22814_s16 + $0x23c0] sm:$0xff]  ;;  %v1024_v31 = vld [vmem:[%s22814_s16 + $0x23c8] sm:$0xff]  ;;  %1021 = vst [vmem:[%s22822_s17 + $0x8e8] sm:$0xff] %v1020_v29 }
  0xaa   : > { %1023 = vst [vmem:[%s22822_s17 + $0x8f0] sm:$0xff] %v1022_v30  ;;  %1025 = vst [vmem:[%s22822_s17 + $0x8f8] sm:$0xff] %v1024_v31  ;;  %v1026_v32 = vld [vmem:[%s22814_s16 + $0x2400] sm:$0xff]  ;;  %v1028_v33 = vld [vmem:[%s22814_s16 + $0x2408] sm:$0xff] }
  0xab   : > { %v1030_v34 = vld [vmem:[%s22814_s16 + $0x2440] sm:$0xff]  ;;  %1027 = vst [vmem:[%s22822_s17 + $0x900] sm:$0xff] %v1026_v32  ;;  %1029 = vst [vmem:[%s22822_s17 + $0x908] sm:$0xff] %v1028_v33  ;;  %v1032_v35 = vld [vmem:[%s22814_s16 + $0x2448] sm:$0xff] }
  0xac   : > { %1031 = vst [vmem:[%s22822_s17 + $0x910] sm:$0xff] %v1030_v34  ;;  %v1034_v36 = vld [vmem:[%s22814_s16 + $0x2480] sm:$0xff]  ;;  %v1036_v37 = vld [vmem:[%s22814_s16 + $0x2488] sm:$0xff]  ;;  %1033 = vst [vmem:[%s22822_s17 + $0x918] sm:$0xff] %v1032_v35 }
  0xad   : > { %1035 = vst [vmem:[%s22822_s17 + $0x920] sm:$0xff] %v1034_v36  ;;  %1037 = vst [vmem:[%s22822_s17 + $0x928] sm:$0xff] %v1036_v37  ;;  %v1038_v38 = vld [vmem:[%s22814_s16 + $0x24c0] sm:$0xff]  ;;  %v1040_v39 = vld [vmem:[%s22814_s16 + $0x24c8] sm:$0xff] }
  0xae   : > { %v1042_v40 = vld [vmem:[%s22814_s16 + $0x2500] sm:$0xff]  ;;  %1039 = vst [vmem:[%s22822_s17 + $0x930] sm:$0xff] %v1038_v38  ;;  %1041 = vst [vmem:[%s22822_s17 + $0x938] sm:$0xff] %v1040_v39  ;;  %v1044_v41 = vld [vmem:[%s22814_s16 + $0x2508] sm:$0xff] }
  0xaf   : > { %1043 = vst [vmem:[%s22822_s17 + $0x940] sm:$0xff] %v1042_v40  ;;  %v1046_v42 = vld [vmem:[%s22814_s16 + $0x2540] sm:$0xff]  ;;  %v1048_v43 = vld [vmem:[%s22814_s16 + $0x2548] sm:$0xff]  ;;  %1045 = vst [vmem:[%s22822_s17 + $0x948] sm:$0xff] %v1044_v41 }
  0xb0   : > { %1047 = vst [vmem:[%s22822_s17 + $0x950] sm:$0xff] %v1046_v42  ;;  %1049 = vst [vmem:[%s22822_s17 + $0x958] sm:$0xff] %v1048_v43  ;;  %v1050_v44 = vld [vmem:[%s22814_s16 + $0x2580] sm:$0xff]  ;;  %v1052_v45 = vld [vmem:[%s22814_s16 + $0x2588] sm:$0xff] }
  0xb1   : > { %v1054_v46 = vld [vmem:[%s22814_s16 + $0x25c0] sm:$0xff]  ;;  %1051 = vst [vmem:[%s22822_s17 + $0x960] sm:$0xff] %v1050_v44  ;;  %1053 = vst [vmem:[%s22822_s17 + $0x968] sm:$0xff] %v1052_v45  ;;  %v1056_v47 = vld [vmem:[%s22814_s16 + $0x25c8] sm:$0xff] }
  0xb2   : > { %1055 = vst [vmem:[%s22822_s17 + $0x970] sm:$0xff] %v1054_v46  ;;  %v1058_v48 = vld [vmem:[%s22814_s16 + $0x2600] sm:$0xff]  ;;  %v1060_v49 = vld [vmem:[%s22814_s16 + $0x2608] sm:$0xff]  ;;  %1057 = vst [vmem:[%s22822_s17 + $0x978] sm:$0xff] %v1056_v47 }
  0xb3   : > { %1059 = vst [vmem:[%s22822_s17 + $0x980] sm:$0xff] %v1058_v48  ;;  %1061 = vst [vmem:[%s22822_s17 + $0x988] sm:$0xff] %v1060_v49  ;;  %v1062_v50 = vld [vmem:[%s22814_s16 + $0x2640] sm:$0xff]  ;;  %v1064_v51 = vld [vmem:[%s22814_s16 + $0x2648] sm:$0xff] }
  0xb4   : > { %v1066_v52 = vld [vmem:[%s22814_s16 + $0x2680] sm:$0xff]  ;;  %1063 = vst [vmem:[%s22822_s17 + $0x990] sm:$0xff] %v1062_v50  ;;  %1065 = vst [vmem:[%s22822_s17 + $0x998] sm:$0xff] %v1064_v51  ;;  %v1068_v53 = vld [vmem:[%s22814_s16 + $0x2688] sm:$0xff] }
  0xb5   : > { %1067 = vst [vmem:[%s22822_s17 + $0x9a0] sm:$0xff] %v1066_v52  ;;  %v1070_v54 = vld [vmem:[%s22814_s16 + $0x26c0] sm:$0xff]  ;;  %v1072_v55 = vld [vmem:[%s22814_s16 + $0x26c8] sm:$0xff]  ;;  %1069 = vst [vmem:[%s22822_s17 + $0x9a8] sm:$0xff] %v1068_v53 }
  0xb6   : > { %1071 = vst [vmem:[%s22822_s17 + $0x9b0] sm:$0xff] %v1070_v54  ;;  %1073 = vst [vmem:[%s22822_s17 + $0x9b8] sm:$0xff] %v1072_v55  ;;  %v1074_v56 = vld [vmem:[%s22814_s16 + $0x2700] sm:$0xff]  ;;  %v1076_v57 = vld [vmem:[%s22814_s16 + $0x2708] sm:$0xff] }
  0xb7   : > { %v1078_v58 = vld [vmem:[%s22814_s16 + $0x2740] sm:$0xff]  ;;  %1075 = vst [vmem:[%s22822_s17 + $0x9c0] sm:$0xff] %v1074_v56  ;;  %1077 = vst [vmem:[%s22822_s17 + $0x9c8] sm:$0xff] %v1076_v57  ;;  %v1080_v59 = vld [vmem:[%s22814_s16 + $0x2748] sm:$0xff] }
  0xb8   : > { %1079 = vst [vmem:[%s22822_s17 + $0x9d0] sm:$0xff] %v1078_v58  ;;  %v1082_v60 = vld [vmem:[%s22814_s16 + $0x2780] sm:$0xff]  ;;  %v1084_v61 = vld [vmem:[%s22814_s16 + $0x2788] sm:$0xff]  ;;  %1081 = vst [vmem:[%s22822_s17 + $0x9d8] sm:$0xff] %v1080_v59 }
  0xb9   : > { %1083 = vst [vmem:[%s22822_s17 + $0x9e0] sm:$0xff] %v1082_v60  ;;  %1085 = vst [vmem:[%s22822_s17 + $0x9e8] sm:$0xff] %v1084_v61  ;;  %v1086_v62 = vld [vmem:[%s22814_s16 + $0x27c0] sm:$0xff]  ;;  %v1088_v63 = vld [vmem:[%s22814_s16 + $0x27c8] sm:$0xff] }
  0xba   : > { %v1090_v0 = vld [vmem:[%s22814_s16 + $0x2800] sm:$0xff]  ;;  %1087 = vst [vmem:[%s22822_s17 + $0x9f0] sm:$0xff] %v1086_v62  ;;  %1089 = vst [vmem:[%s22822_s17 + $0x9f8] sm:$0xff] %v1088_v63  ;;  %v1092_v1 = vld [vmem:[%s22814_s16 + $0x2808] sm:$0xff] }
  0xbb   : > { %1091 = vst [vmem:[%s22822_s17 + $0xa00] sm:$0xff] %v1090_v0  ;;  %v1094_v2 = vld [vmem:[%s22814_s16 + $0x2840] sm:$0xff]  ;;  %v1096_v3 = vld [vmem:[%s22814_s16 + $0x2848] sm:$0xff]  ;;  %1093 = vst [vmem:[%s22822_s17 + $0xa08] sm:$0xff] %v1092_v1 }
  0xbc   : > { %1095 = vst [vmem:[%s22822_s17 + $0xa10] sm:$0xff] %v1094_v2  ;;  %1097 = vst [vmem:[%s22822_s17 + $0xa18] sm:$0xff] %v1096_v3  ;;  %v1098_v4 = vld [vmem:[%s22814_s16 + $0x2880] sm:$0xff]  ;;  %v1100_v5 = vld [vmem:[%s22814_s16 + $0x2888] sm:$0xff] }
  0xbd   : > { %v1102_v6 = vld [vmem:[%s22814_s16 + $0x28c0] sm:$0xff]  ;;  %1099 = vst [vmem:[%s22822_s17 + $0xa20] sm:$0xff] %v1098_v4  ;;  %1101 = vst [vmem:[%s22822_s17 + $0xa28] sm:$0xff] %v1100_v5  ;;  %v1104_v7 = vld [vmem:[%s22814_s16 + $0x28c8] sm:$0xff] }
  0xbe   : > { %1103 = vst [vmem:[%s22822_s17 + $0xa30] sm:$0xff] %v1102_v6  ;;  %v1106_v8 = vld [vmem:[%s22814_s16 + $0x2900] sm:$0xff]  ;;  %v1108_v9 = vld [vmem:[%s22814_s16 + $0x2908] sm:$0xff]  ;;  %1105 = vst [vmem:[%s22822_s17 + $0xa38] sm:$0xff] %v1104_v7 }
  0xbf   : > { %1107 = vst [vmem:[%s22822_s17 + $0xa40] sm:$0xff] %v1106_v8  ;;  %1109 = vst [vmem:[%s22822_s17 + $0xa48] sm:$0xff] %v1108_v9  ;;  %v1110_v10 = vld [vmem:[%s22814_s16 + $0x2940] sm:$0xff]  ;;  %v1112_v11 = vld [vmem:[%s22814_s16 + $0x2948] sm:$0xff] }
  0xc0   : > { %v1114_v12 = vld [vmem:[%s22814_s16 + $0x2980] sm:$0xff]  ;;  %1111 = vst [vmem:[%s22822_s17 + $0xa50] sm:$0xff] %v1110_v10  ;;  %1113 = vst [vmem:[%s22822_s17 + $0xa58] sm:$0xff] %v1112_v11  ;;  %v1116_v13 = vld [vmem:[%s22814_s16 + $0x2988] sm:$0xff] }
  0xc1   : > { %1115 = vst [vmem:[%s22822_s17 + $0xa60] sm:$0xff] %v1114_v12  ;;  %v1118_v14 = vld [vmem:[%s22814_s16 + $0x29c0] sm:$0xff]  ;;  %v1120_v15 = vld [vmem:[%s22814_s16 + $0x29c8] sm:$0xff]  ;;  %1117 = vst [vmem:[%s22822_s17 + $0xa68] sm:$0xff] %v1116_v13 }
  0xc2   : > { %1119 = vst [vmem:[%s22822_s17 + $0xa70] sm:$0xff] %v1118_v14  ;;  %1121 = vst [vmem:[%s22822_s17 + $0xa78] sm:$0xff] %v1120_v15  ;;  %v1122_v16 = vld [vmem:[%s22814_s16 + $0x2a00] sm:$0xff]  ;;  %v1124_v17 = vld [vmem:[%s22814_s16 + $0x2a08] sm:$0xff] }
  0xc3   : > { %v1126_v18 = vld [vmem:[%s22814_s16 + $0x2a40] sm:$0xff]  ;;  %1123 = vst [vmem:[%s22822_s17 + $0xa80] sm:$0xff] %v1122_v16  ;;  %1125 = vst [vmem:[%s22822_s17 + $0xa88] sm:$0xff] %v1124_v17  ;;  %v1128_v19 = vld [vmem:[%s22814_s16 + $0x2a48] sm:$0xff] }
  0xc4   : > { %1127 = vst [vmem:[%s22822_s17 + $0xa90] sm:$0xff] %v1126_v18  ;;  %v1130_v20 = vld [vmem:[%s22814_s16 + $0x2a80] sm:$0xff]  ;;  %v1132_v21 = vld [vmem:[%s22814_s16 + $0x2a88] sm:$0xff]  ;;  %1129 = vst [vmem:[%s22822_s17 + $0xa98] sm:$0xff] %v1128_v19 }
  0xc5   : > { %1131 = vst [vmem:[%s22822_s17 + $0xaa0] sm:$0xff] %v1130_v20  ;;  %1133 = vst [vmem:[%s22822_s17 + $0xaa8] sm:$0xff] %v1132_v21  ;;  %v1134_v22 = vld [vmem:[%s22814_s16 + $0x2ac0] sm:$0xff]  ;;  %v1136_v23 = vld [vmem:[%s22814_s16 + $0x2ac8] sm:$0xff] }
  0xc6   : > { %v1138_v24 = vld [vmem:[%s22814_s16 + $0x2b00] sm:$0xff]  ;;  %1135 = vst [vmem:[%s22822_s17 + $0xab0] sm:$0xff] %v1134_v22  ;;  %1137 = vst [vmem:[%s22822_s17 + $0xab8] sm:$0xff] %v1136_v23  ;;  %v1140_v25 = vld [vmem:[%s22814_s16 + $0x2b08] sm:$0xff] }
  0xc7   : > { %1139 = vst [vmem:[%s22822_s17 + $0xac0] sm:$0xff] %v1138_v24  ;;  %v1142_v26 = vld [vmem:[%s22814_s16 + $0x2b40] sm:$0xff]  ;;  %v1144_v27 = vld [vmem:[%s22814_s16 + $0x2b48] sm:$0xff]  ;;  %1141 = vst [vmem:[%s22822_s17 + $0xac8] sm:$0xff] %v1140_v25 }
  0xc8   : > { %1143 = vst [vmem:[%s22822_s17 + $0xad0] sm:$0xff] %v1142_v26  ;;  %1145 = vst [vmem:[%s22822_s17 + $0xad8] sm:$0xff] %v1144_v27  ;;  %v1146_v28 = vld [vmem:[%s22814_s16 + $0x2b80] sm:$0xff]  ;;  %v1148_v29 = vld [vmem:[%s22814_s16 + $0x2b88] sm:$0xff] }
  0xc9   : > { %v1150_v30 = vld [vmem:[%s22814_s16 + $0x2bc0] sm:$0xff]  ;;  %1147 = vst [vmem:[%s22822_s17 + $0xae0] sm:$0xff] %v1146_v28  ;;  %1149 = vst [vmem:[%s22822_s17 + $0xae8] sm:$0xff] %v1148_v29  ;;  %v1152_v31 = vld [vmem:[%s22814_s16 + $0x2bc8] sm:$0xff] }
  0xca   : > { %1151 = vst [vmem:[%s22822_s17 + $0xaf0] sm:$0xff] %v1150_v30  ;;  %v1154_v32 = vld [vmem:[%s22814_s16 + $0x2c00] sm:$0xff]  ;;  %v1156_v33 = vld [vmem:[%s22814_s16 + $0x2c08] sm:$0xff]  ;;  %1153 = vst [vmem:[%s22822_s17 + $0xaf8] sm:$0xff] %v1152_v31 }
  0xcb   : > { %1155 = vst [vmem:[%s22822_s17 + $0xb00] sm:$0xff] %v1154_v32  ;;  %1157 = vst [vmem:[%s22822_s17 + $0xb08] sm:$0xff] %v1156_v33  ;;  %v1158_v34 = vld [vmem:[%s22814_s16 + $0x2c40] sm:$0xff]  ;;  %v1160_v35 = vld [vmem:[%s22814_s16 + $0x2c48] sm:$0xff] }
  0xcc   : > { %v1162_v36 = vld [vmem:[%s22814_s16 + $0x2c80] sm:$0xff]  ;;  %1159 = vst [vmem:[%s22822_s17 + $0xb10] sm:$0xff] %v1158_v34  ;;  %1161 = vst [vmem:[%s22822_s17 + $0xb18] sm:$0xff] %v1160_v35  ;;  %v1164_v37 = vld [vmem:[%s22814_s16 + $0x2c88] sm:$0xff] }
  0xcd   : > { %1163 = vst [vmem:[%s22822_s17 + $0xb20] sm:$0xff] %v1162_v36  ;;  %v1166_v38 = vld [vmem:[%s22814_s16 + $0x2cc0] sm:$0xff]  ;;  %v1168_v39 = vld [vmem:[%s22814_s16 + $0x2cc8] sm:$0xff]  ;;  %1165 = vst [vmem:[%s22822_s17 + $0xb28] sm:$0xff] %v1164_v37 }
  0xce   : > { %1167 = vst [vmem:[%s22822_s17 + $0xb30] sm:$0xff] %v1166_v38  ;;  %1169 = vst [vmem:[%s22822_s17 + $0xb38] sm:$0xff] %v1168_v39  ;;  %v1170_v40 = vld [vmem:[%s22814_s16 + $0x2d00] sm:$0xff]  ;;  %v1172_v41 = vld [vmem:[%s22814_s16 + $0x2d08] sm:$0xff] }
  0xcf   : > { %v1174_v42 = vld [vmem:[%s22814_s16 + $0x2d40] sm:$0xff]  ;;  %1171 = vst [vmem:[%s22822_s17 + $0xb40] sm:$0xff] %v1170_v40  ;;  %1173 = vst [vmem:[%s22822_s17 + $0xb48] sm:$0xff] %v1172_v41  ;;  %v1176_v43 = vld [vmem:[%s22814_s16 + $0x2d48] sm:$0xff] }
  0xd0   : > { %1175 = vst [vmem:[%s22822_s17 + $0xb50] sm:$0xff] %v1174_v42  ;;  %v1178_v44 = vld [vmem:[%s22814_s16 + $0x2d80] sm:$0xff]  ;;  %v1180_v45 = vld [vmem:[%s22814_s16 + $0x2d88] sm:$0xff]  ;;  %1177 = vst [vmem:[%s22822_s17 + $0xb58] sm:$0xff] %v1176_v43 }
  0xd1   : > { %1179 = vst [vmem:[%s22822_s17 + $0xb60] sm:$0xff] %v1178_v44  ;;  %1181 = vst [vmem:[%s22822_s17 + $0xb68] sm:$0xff] %v1180_v45  ;;  %v1182_v46 = vld [vmem:[%s22814_s16 + $0x2dc0] sm:$0xff]  ;;  %v1184_v47 = vld [vmem:[%s22814_s16 + $0x2dc8] sm:$0xff] }
  0xd2   : > { %v1186_v48 = vld [vmem:[%s22814_s16 + $0x2e00] sm:$0xff]  ;;  %1183 = vst [vmem:[%s22822_s17 + $0xb70] sm:$0xff] %v1182_v46  ;;  %1185 = vst [vmem:[%s22822_s17 + $0xb78] sm:$0xff] %v1184_v47  ;;  %v1188_v49 = vld [vmem:[%s22814_s16 + $0x2e08] sm:$0xff] }
  0xd3   : > { %1187 = vst [vmem:[%s22822_s17 + $0xb80] sm:$0xff] %v1186_v48  ;;  %v1190_v50 = vld [vmem:[%s22814_s16 + $0x2e40] sm:$0xff]  ;;  %v1192_v51 = vld [vmem:[%s22814_s16 + $0x2e48] sm:$0xff]  ;;  %1189 = vst [vmem:[%s22822_s17 + $0xb88] sm:$0xff] %v1188_v49 }
  0xd4   : > { %1191 = vst [vmem:[%s22822_s17 + $0xb90] sm:$0xff] %v1190_v50  ;;  %1193 = vst [vmem:[%s22822_s17 + $0xb98] sm:$0xff] %v1192_v51  ;;  %v1194_v52 = vld [vmem:[%s22814_s16 + $0x2e80] sm:$0xff]  ;;  %v1196_v53 = vld [vmem:[%s22814_s16 + $0x2e88] sm:$0xff] }
  0xd5   : > { %v1198_v54 = vld [vmem:[%s22814_s16 + $0x2ec0] sm:$0xff]  ;;  %1195 = vst [vmem:[%s22822_s17 + $0xba0] sm:$0xff] %v1194_v52  ;;  %1197 = vst [vmem:[%s22822_s17 + $0xba8] sm:$0xff] %v1196_v53  ;;  %v1200_v55 = vld [vmem:[%s22814_s16 + $0x2ec8] sm:$0xff] }
  0xd6   : > { %1199 = vst [vmem:[%s22822_s17 + $0xbb0] sm:$0xff] %v1198_v54  ;;  %v1202_v56 = vld [vmem:[%s22814_s16 + $0x2f00] sm:$0xff]  ;;  %v1204_v57 = vld [vmem:[%s22814_s16 + $0x2f08] sm:$0xff]  ;;  %1201 = vst [vmem:[%s22822_s17 + $0xbb8] sm:$0xff] %v1200_v55 }
  0xd7   : > { %1203 = vst [vmem:[%s22822_s17 + $0xbc0] sm:$0xff] %v1202_v56  ;;  %1205 = vst [vmem:[%s22822_s17 + $0xbc8] sm:$0xff] %v1204_v57  ;;  %v1206_v58 = vld [vmem:[%s22814_s16 + $0x2f40] sm:$0xff]  ;;  %v1208_v59 = vld [vmem:[%s22814_s16 + $0x2f48] sm:$0xff] }
  0xd8   : > { %v1210_v60 = vld [vmem:[%s22814_s16 + $0x2f80] sm:$0xff]  ;;  %1207 = vst [vmem:[%s22822_s17 + $0xbd0] sm:$0xff] %v1206_v58  ;;  %1209 = vst [vmem:[%s22822_s17 + $0xbd8] sm:$0xff] %v1208_v59  ;;  %v1212_v61 = vld [vmem:[%s22814_s16 + $0x2f88] sm:$0xff] }
  0xd9   : > { %1211 = vst [vmem:[%s22822_s17 + $0xbe0] sm:$0xff] %v1210_v60  ;;  %v1214_v62 = vld [vmem:[%s22814_s16 + $0x2fc0] sm:$0xff]  ;;  %v1216_v63 = vld [vmem:[%s22814_s16 + $0x2fc8] sm:$0xff]  ;;  %1213 = vst [vmem:[%s22822_s17 + $0xbe8] sm:$0xff] %v1212_v61 }
  0xda   : > { %1215 = vst [vmem:[%s22822_s17 + $0xbf0] sm:$0xff] %v1214_v62  ;;  %1217 = vst [vmem:[%s22822_s17 + $0xbf8] sm:$0xff] %v1216_v63 }
  0xdb PF: > { %p16649_p5 = scmp.ge.s32.totalorder %s22691_s20, 1  ;;  %p1240_p6 = scmp.lt.s32.totalorder %s22691_s20, 5 }
  0xdd   : > { %p1241_p7 = pnand %p16649_p5, %p1240_p6 }
  0xde   : > { %s1247_s23 = sand.u32 (!%p1241_p7), 1, %s22683_s18   ;;  %s16650_s24 = sshll.u32 (!%p1241_p7), %s22794_s21, 2 }
  0xdf   : > { %1244 = sbr.rel (%p1241_p7) target bundleno = 3648 (0xe40), region = 99  ;;  %p1301_p8 = scmp.lt.s32.totalorder (!%p1241_p7), %s16650_s24, 15 }
  0xe0   : > { %s19940_s26 = smul.u32 (!%p1241_p7), 3072, %s1247_s23  ;;  %s16651_s27 = sshll.u32 (!%p1241_p7), %s22794_s21, 6 }
  0xe1   : > { %p1306_p9 = scmp.lt.s32.totalorder (!%p1241_p7), %s16651_s27, 255  ;;  %p16654_p10 = scmp.ne.s32.totalorder (!%p1241_p7), %s22794_s21, 0 }
  0xe2   : > { %s23602_s18 = scalar_lea.vmem (!%p1241_p7), [#allocation3], %s19940_s26 }
  0xe6   : > { %s28530_s24 = smov (!%p1301_p8, %s16650_s24), 15  ;;  %s28532_s27 = smov (!%p1306_p9, %s16651_s27), 255 }
  0xe7   : > { %s1303_s30 = scalar_lea.vmem %s28517_s12, %s28530_s24  ;;  %s19554_s20 = sshll.u32 %s28532_s27, 4  ;;  %v1317_v0 = vld [vmem:[%s28505_s0] sm:$0xff] (!%p16654_p10)  ;;  %v1318_v1 = vld [vmem:[%s28505_s0 + $0x8] sm:$0xff] (!%p16654_p10)  ;;  %v1319_v2 = vld [vmem:[%s28505_s0 + $0x10] sm:$0xff] (!%p16654_p10)  ;;  %vm1337_vm0 = vcmask (!%p16654_p10), 261120   ;;  %v22693_v20 = vmov (!%p16654_p10), 0  }
  0xe8   : > { %s23600_s11 = scalar_lea.vmem %s28518_s13, %s19554_s20  ;;  %1316 = sbr.rel (%p16654_p10) target bundleno = 2654 (0xa5e), region = 107  ;;  %v23616_v3 = vpack.c.bf16 (!%p16654_p10), %v1318_v1, %v1317_v0  ;;  %v1320_v4 = vld [vmem:[%s28505_s0 + $0x18] sm:$0xff] (!%p16654_p10)  ;;  %v19976_v6 = vld [vmem:[%s28506_s1] sm:$0xff] (!%p16654_p10)   ;;  %v19977_v8 = vld [vmem:[%s28506_s1 + $0x8] sm:$0xff] (!%p16654_p10)  }
  0xe9   : > { %v23621_v5 = vpack.c.bf16 (!%p16654_p10), %v1320_v4, %v1319_v2  ;;  %19567 = vmatprep.mubr.msk.bf16.mxu0 (!%p16654_p10), %vm1337_vm0, %v19976_v6  ;;  %v19978_v7 = vld [vmem:[%s28507_s2] sm:$0xff] (!%p16654_p10)   ;;  %v19979_v9 = vld [vmem:[%s28507_s2 + $0x8] sm:$0xff] (!%p16654_p10)  }
  0xea   : > { %19563 = vmatprep.subr.bf16.mxu0 (!%p16654_p10), %v23616_v3  ;;  %19571 = vmatprep.subr.bf16.mxu1 (!%p16654_p10), %v23616_v3  ;;  %v19982_v10 = vld [vmem:[%s28508_s3 + $0x104] ss:$16 sps:$4 sm:$0xff] (!%p16654_p10)   ;;  %v19980_v11 = vld [vmem:[%s28508_s3 + $0x100] ss:$16 sps:$4 sm:$0xff] (!%p16654_p10)   ;;  %v19985_v12 = vld [vmem:[%s28508_s3 + $0x10c] ss:$16 sps:$4 sm:$0xff] (!%p16654_p10)  }
  0xeb   : > { %19564 = vmatpush3.bf16.msra.mxu0 (!%p16654_p10), %v23616_v3  ;;  %19572 = vmatpush3.bf16.msra.mxu1 (!%p16654_p10), %v23616_v3  ;;  %v19983_v13 = vld [vmem:[%s28508_s3 + $0x108] ss:$16 sps:$4 sm:$0xff] (!%p16654_p10)   ;;  %v19988_v14 = vld [vmem:[%s28508_s3 + $0x124] ss:$16 sps:$4 sm:$0xff] (!%p16654_p10)   ;;  %v19991_v15 = vld [vmem:[%s28508_s3 + $0x12c] ss:$16 sps:$4 sm:$0xff] (!%p16654_p10)  }
  0xec   : > { %19565 = vmatprep.subr.bf16.mxu0 (!%p16654_p10), %v23621_v5  ;;  %19573 = vmatprep.subr.bf16.mxu1 (!%p16654_p10), %v23621_v5  ;;  %v19986_v16 = vld [vmem:[%s28508_s3 + $0x120] ss:$16 sps:$4 sm:$0xff] (!%p16654_p10)   ;;  %v19989_v17 = vld [vmem:[%s28508_s3 + $0x128] ss:$16 sps:$4 sm:$0xff] (!%p16654_p10)   ;;  %v19994_v18 = vld [vmem:[%s28508_s3 + $0x144] ss:$16 sps:$4 sm:$0xff] (!%p16654_p10)  }
  0xed   : > { %19575 = vmatprep.mubr.msk.bf16.mxu1 (!%p16654_p10), %vm1337_vm0, %v19978_v7  ;;  %v19997_v19 = vld [vmem:[%s28508_s3 + $0x14c] ss:$16 sps:$4 sm:$0xff] (!%p16654_p10)   ;;  %v19992_v21 = vld [vmem:[%s28508_s3 + $0x140] ss:$16 sps:$4 sm:$0xff] (!%p16654_p10)   ;;  %v19995_v22 = vld [vmem:[%s28508_s3 + $0x148] ss:$16 sps:$4 sm:$0xff] (!%p16654_p10)  }
  0xee   : > { %v20000_v23 = vld [vmem:[%s28508_s3 + $0x164] ss:$16 sps:$4 sm:$0xff] (!%p16654_p10)   ;;  %v20003_v24 = vld [vmem:[%s28508_s3 + $0x16c] ss:$16 sps:$4 sm:$0xff] (!%p16654_p10)   ;;  %v19998_v25 = vld [vmem:[%s28508_s3 + $0x160] ss:$16 sps:$4 sm:$0xff] (!%p16654_p10)  }
  0xef   : > { %19566 = vmatpush3.bf16.msra.mxu0 %v23621_v5  ;;  %19574 = vmatpush3.bf16.msra.mxu1 %v23621_v5  ;;  %v20001_v26 = vld [vmem:[%s28508_s3 + $0x168] ss:$16 sps:$4 sm:$0xff]   ;;  %v20006_v27 = vld [vmem:[%s28508_s3 + $0x184] ss:$16 sps:$4 sm:$0xff]   ;;  %v20009_v28 = vld [vmem:[%s28508_s3 + $0x18c] ss:$16 sps:$4 sm:$0xff]  }
  0xf0   : > { %1691 = vmatprep.subr.bf16.mxu0 %v19982_v10  ;;  %1744 = vmatprep.subr.bf16.mxu1 %v19985_v12  ;;  %v20004_v29 = vld [vmem:[%s28508_s3 + $0x180] ss:$16 sps:$4 sm:$0xff]   ;;  %v20007_v30 = vld [vmem:[%s28508_s3 + $0x188] ss:$16 sps:$4 sm:$0xff]   ;;  %v20012_v31 = vld [vmem:[%s28508_s3 + $0x1a4] ss:$16 sps:$4 sm:$0xff]  }
  0xf1   : > { %v20015_v32 = vld [vmem:[%s28508_s3 + $0x1ac] ss:$16 sps:$4 sm:$0xff]   ;;  %v20010_v33 = vld [vmem:[%s28508_s3 + $0x1a0] ss:$16 sps:$4 sm:$0xff]   ;;  %v20013_v34 = vld [vmem:[%s28508_s3 + $0x1a8] ss:$16 sps:$4 sm:$0xff]  }
  0xf2   : > { %19568 = vmatmul.mubr.msk.bf16.vlgmr.msra.gmra.mrb[0].mxu0 %vm1337_vm0, %v19977_v8  ;;  %19576 = vmatmul.mubr.msk.bf16.vlgmr.msra.gmra.mrb[0].mxu1 %vm1337_vm0, %v19979_v9  ;;  %v20018_v35 = vld [vmem:[%s28508_s3 + $0x1c4] ss:$16 sps:$4 sm:$0xff]   ;;  %v20021_v36 = vld [vmem:[%s28508_s3 + $0x1cc] ss:$16 sps:$4 sm:$0xff]   ;;  %v20016_v37 = vld [vmem:[%s28508_s3 + $0x1c0] ss:$16 sps:$4 sm:$0xff]  }
  0xf3   : > { %1692 = vmatpush1.bf16.msra.mxu0 %v19980_v11  ;;  %1745 = vmatpush1.bf16.msra.mxu1 %v19983_v13  ;;  %v20019_v38 = vld [vmem:[%s28508_s3 + $0x1c8] ss:$16 sps:$4 sm:$0xff]   ;;  %v20024_v39 = vld [vmem:[%s28508_s3 + $0x1e4] ss:$16 sps:$4 sm:$0xff]   ;;  %v20027_v40 = vld [vmem:[%s28508_s3 + $0x1ec] ss:$16 sps:$4 sm:$0xff]  }
  0xf4   : > { %1693 = vmatprep.subr.bf16.mxu0 %v19988_v14  ;;  %1746 = vmatprep.subr.bf16.mxu1 %v19991_v15  ;;  %v20022_v41 = vld [vmem:[%s28508_s3 + $0x1e0] ss:$16 sps:$4 sm:$0xff]   ;;  %v20025_v42 = vld [vmem:[%s28508_s3 + $0x1e8] ss:$16 sps:$4 sm:$0xff]   ;;  %v20030_v43 = vld [vmem:[%s28508_s3 + $0x4] ss:$16 sps:$4 sm:$0xff]  }
  0xf5   : > { %1723 = vmatprep.mubr.bf16.mxu0 %v22693_v20  ;;  %1776 = vmatprep.mubr.bf16.mxu1 %v22693_v20  ;;  %v20033_v44 = vld [vmem:[%s28508_s3 + $0xc] ss:$16 sps:$4 sm:$0xff]   ;;  %v20028_v45 = vld [vmem:[%s28508_s3] ss:$16 sps:$4 sm:$0xff]   ;;  %v20031_v46 = vld [vmem:[%s28508_s3 + $0x8] ss:$16 sps:$4 sm:$0xff]  }
  0xf6   : > { %v20036_v47 = vld [vmem:[%s28508_s3 + $0x24] ss:$16 sps:$4 sm:$0xff]   ;;  %v20039_v48 = vld [vmem:[%s28508_s3 + $0x2c] ss:$16 sps:$4 sm:$0xff]   ;;  %v20034_v49 = vld [vmem:[%s28508_s3 + $0x20] ss:$16 sps:$4 sm:$0xff]  }
  0xf7   : > { %1694 = vmatpush1.bf16.msra.mxu0 %v19986_v16  ;;  %1747 = vmatpush1.bf16.msra.mxu1 %v19989_v17  ;;  %v20037_v50 = vld [vmem:[%s28508_s3 + $0x28] ss:$16 sps:$4 sm:$0xff]   ;;  %v20042_v51 = vld [vmem:[%s28508_s3 + $0x44] ss:$16 sps:$4 sm:$0xff]   ;;  %v20045_v52 = vld [vmem:[%s28508_s3 + $0x4c] ss:$16 sps:$4 sm:$0xff]  }
  0xf8   : > { %1695 = vmatprep.subr.bf16.mxu0 %v19994_v18  ;;  %1748 = vmatprep.subr.bf16.mxu1 %v19997_v19  ;;  %v20040_v53 = vld [vmem:[%s28508_s3 + $0x40] ss:$16 sps:$4 sm:$0xff]   ;;  %v20043_v54 = vld [vmem:[%s28508_s3 + $0x48] ss:$16 sps:$4 sm:$0xff]   ;;  %v20048_v55 = vld [vmem:[%s28508_s3 + $0x64] ss:$16 sps:$4 sm:$0xff]  }
  0xf9   : > { %v20051_v56 = vld [vmem:[%s28508_s3 + $0x6c] ss:$16 sps:$4 sm:$0xff]   ;;  %v20046_v57 = vld [vmem:[%s28508_s3 + $0x60] ss:$16 sps:$4 sm:$0xff]   ;;  %v20049_v58 = vld [vmem:[%s28508_s3 + $0x68] ss:$16 sps:$4 sm:$0xff]  }
  0xfa   : > { %v20054_v59 = vld [vmem:[%s28508_s3 + $0x84] ss:$16 sps:$4 sm:$0xff]   ;;  %v20057_v60 = vld [vmem:[%s28508_s3 + $0x8c] ss:$16 sps:$4 sm:$0xff]   ;;  %v20052_v61 = vld [vmem:[%s28508_s3 + $0x80] ss:$16 sps:$4 sm:$0xff]  }
  0xfb   : > { %1696 = vmatpush1.bf16.msra.mxu0 %v19992_v21  ;;  %1749 = vmatpush1.bf16.msra.mxu1 %v19995_v22  ;;  %v20055_v62 = vld [vmem:[%s28508_s3 + $0x88] ss:$16 sps:$4 sm:$0xff]   ;;  %v20060_v63 = vld [vmem:[%s28508_s3 + $0xa4] ss:$16 sps:$4 sm:$0xff]   ;;  %v20063_v0 = vld [vmem:[%s28508_s3 + $0xac] ss:$16 sps:$4 sm:$0xff]  }
  0xfc   : > { %1697 = vmatprep.subr.bf16.mxu0 %v20000_v23  ;;  %1750 = vmatprep.subr.bf16.mxu1 %v20003_v24  ;;  %v20058_v1 = vld [vmem:[%s28508_s3 + $0xa0] ss:$16 sps:$4 sm:$0xff]   ;;  %v20061_v2 = vld [vmem:[%s28508_s3 + $0xa8] ss:$16 sps:$4 sm:$0xff]   ;;  %v20069_v4 = vld [vmem:[%s28508_s3 + $0xcc] ss:$16 sps:$4 sm:$0xff]  }
  0xfd   : > { %v20067_v6 = vld [vmem:[%s28508_s3 + $0xc8] ss:$16 sps:$4 sm:$0xff]   ;;  %v20072_v7 = vld [vmem:[%s28508_s3 + $0xe4] ss:$16 sps:$4 sm:$0xff]   ;;  %v20075_v8 = vld [vmem:[%s28508_s3 + $0xec] ss:$16 sps:$4 sm:$0xff]  }
  0xfe   : > { %v20070_v9 = vld [vmem:[%s28508_s3 + $0xe0] ss:$16 sps:$4 sm:$0xff]   ;;  %v20073_v10 = vld [vmem:[%s28508_s3 + $0xe8] ss:$16 sps:$4 sm:$0xff]   ;;  %v20078_v11 = vld [vmem:[%s28508_s3 + $0x204] ss:$16 sps:$4 sm:$0xff]  }
  0xff   : > { %1698 = vmatpush1.bf16.msra.mxu0 %v19998_v25  ;;  %1751 = vmatpush1.bf16.msra.mxu1 %v20001_v26  ;;  %v20081_v12 = vld [vmem:[%s28508_s3 + $0x20c] ss:$16 sps:$4 sm:$0xff]   ;;  %v20076_v15 = vld [vmem:[%s28508_s3 + $0x200] ss:$16 sps:$4 sm:$0xff]   ;;  %v20079_v16 = vld [vmem:[%s28508_s3 + $0x208] ss:$16 sps:$4 sm:$0xff]  }
 0x100   : > { %1699 = vmatprep.subr.bf16.mxu0 %v20006_v27  ;;  %1752 = vmatprep.subr.bf16.mxu1 %v20009_v28  ;;  %v20084_v19 = vld [vmem:[%s28508_s3 + $0x224] ss:$16 sps:$4 sm:$0xff]   ;;  %v20087_v21 = vld [vmem:[%s28508_s3 + $0x22c] ss:$16 sps:$4 sm:$0xff]  }
 0x103   : > { %1700 = vmatpush1.bf16.msra.mxu0 %v20004_v29  ;;  %1753 = vmatpush1.bf16.msra.mxu1 %v20007_v30  ;;  %v20082_v29 = vld [vmem:[%s28508_s3 + $0x220] ss:$16 sps:$4 sm:$0xff]   ;;  %v20085_v30 = vld [vmem:[%s28508_s3 + $0x228] ss:$16 sps:$4 sm:$0xff]  }
 0x104   : > { %1701 = vmatprep.subr.bf16.mxu0 %v20012_v31  ;;  %1754 = vmatprep.subr.bf16.mxu1 %v20015_v32  ;;  %v20090_v32 = vld [vmem:[%s28508_s3 + $0x244] ss:$16 sps:$4 sm:$0xff]  }
 0x107   : > { %1702 = vmatpush1.bf16.msra.mxu0 %v20010_v33  ;;  %1755 = vmatpush1.bf16.msra.mxu1 %v20013_v34  ;;  %v20093_v33 = vld [vmem:[%s28508_s3 + $0x24c] ss:$16 sps:$4 sm:$0xff]   ;;  %v20088_v34 = vld [vmem:[%s28508_s3 + $0x240] ss:$16 sps:$4 sm:$0xff]  }
 0x108   : > { %1703 = vmatprep.subr.bf16.mxu0 %v20018_v35  ;;  %1756 = vmatprep.subr.bf16.mxu1 %v20021_v36  ;;  %v20091_v35 = vld [vmem:[%s28508_s3 + $0x248] ss:$16 sps:$4 sm:$0xff]   ;;  %v20096_v36 = vld [vmem:[%s28508_s3 + $0x264] ss:$16 sps:$4 sm:$0xff]  }
 0x10b   : > { %1704 = vmatpush1.bf16.msra.mxu0 %v20016_v37  ;;  %1757 = vmatpush1.bf16.msra.mxu1 %v20019_v38  ;;  %v20099_v37 = vld [vmem:[%s28508_s3 + $0x26c] ss:$16 sps:$4 sm:$0xff]   ;;  %v20094_v38 = vld [vmem:[%s28508_s3 + $0x260] ss:$16 sps:$4 sm:$0xff]  }
 0x10c   : > { %1705 = vmatprep.subr.bf16.mxu0 %v20024_v39  ;;  %1758 = vmatprep.subr.bf16.mxu1 %v20027_v40  ;;  %v20097_v39 = vld [vmem:[%s28508_s3 + $0x268] ss:$16 sps:$4 sm:$0xff]   ;;  %v20102_v40 = vld [vmem:[%s28508_s3 + $0x284] ss:$16 sps:$4 sm:$0xff]  }
 0x10f   : > { %1706 = vmatpush1.bf16.msra.mxu0 %v20022_v41  ;;  %1759 = vmatpush1.bf16.msra.mxu1 %v20025_v42  ;;  %v20105_v41 = vld [vmem:[%s28508_s3 + $0x28c] ss:$16 sps:$4 sm:$0xff]   ;;  %v20100_v42 = vld [vmem:[%s28508_s3 + $0x280] ss:$16 sps:$4 sm:$0xff]  }
 0x110   : > { %1957 = vmatprep.subr.bf16.mxu0 %v20030_v43  ;;  %2010 = vmatprep.subr.bf16.mxu1 %v20033_v44  ;;  %v20103_v43 = vld [vmem:[%s28508_s3 + $0x288] ss:$16 sps:$4 sm:$0xff]   ;;  %v20108_v44 = vld [vmem:[%s28508_s3 + $0x2a4] ss:$16 sps:$4 sm:$0xff]  }
 0x112   : > { %1724 = vmatmul.mubr.bf16.vlgmr.msra.gmra.mrb[4].mxu0 %v23616_v3  ;;  %1777 = vmatmul.mubr.bf16.vlgmr.msra.gmra.mrb[4].mxu1 %v23616_v3  ;;  %v20066_v3 = vld [vmem:[%s28508_s3 + $0xc4] ss:$16 sps:$4 sm:$0xff]  }
 0x113   : > { %1958 = vmatpush1.bf16.msra.mxu0 %v20028_v45  ;;  %2011 = vmatpush1.bf16.msra.mxu1 %v20031_v46  ;;  %v20111_v45 = vld [vmem:[%s28508_s3 + $0x2ac] ss:$16 sps:$4 sm:$0xff]   ;;  %v20106_v46 = vld [vmem:[%s28508_s3 + $0x2a0] ss:$16 sps:$4 sm:$0xff]  }
 0x114   : > { %1959 = vmatprep.subr.bf16.mxu0 %v20036_v47  ;;  %2012 = vmatprep.subr.bf16.mxu1 %v20039_v48  ;;  %v20109_v47 = vld [vmem:[%s28508_s3 + $0x2a8] ss:$16 sps:$4 sm:$0xff]   ;;  %v20114_v48 = vld [vmem:[%s28508_s3 + $0x2c4] ss:$16 sps:$4 sm:$0xff]  }
 0x115   : > { %1733 = vmatprep.mubr.bf16.mxu0 %v22693_v20  ;;  %1786 = vmatprep.mubr.bf16.mxu1 %v22693_v20 }
 0x117   : > { %1960 = vmatpush1.bf16.msra.mxu0 %v20034_v49  ;;  %2013 = vmatpush1.bf16.msra.mxu1 %v20037_v50  ;;  %v20117_v49 = vld [vmem:[%s28508_s3 + $0x2cc] ss:$16 sps:$4 sm:$0xff]   ;;  %v20112_v50 = vld [vmem:[%s28508_s3 + $0x2c0] ss:$16 sps:$4 sm:$0xff]  }
 0x118   : > { %1961 = vmatprep.subr.bf16.mxu0 %v20042_v51  ;;  %2014 = vmatprep.subr.bf16.mxu1 %v20045_v52  ;;  %v20115_v51 = vld [vmem:[%s28508_s3 + $0x2c8] ss:$16 sps:$4 sm:$0xff]   ;;  %v20120_v52 = vld [vmem:[%s28508_s3 + $0x2e4] ss:$16 sps:$4 sm:$0xff]  }
 0x11a   : > { %1734 = vmatmul.mubr.bf16.gmra.mrb[8].mxu0 %v23621_v5  ;;  %1787 = vmatmul.mubr.bf16.gmra.mrb[8].mxu1 %v23621_v5  ;;  %v20064_v5 = vld [vmem:[%s28508_s3 + $0xc0] ss:$16 sps:$4 sm:$0xff]  }
 0x11b   : > { %1962 = vmatpush1.bf16.msra.mxu0 %v20040_v53  ;;  %2015 = vmatpush1.bf16.msra.mxu1 %v20043_v54  ;;  %v20123_v53 = vld [vmem:[%s28508_s3 + $0x2ec] ss:$16 sps:$4 sm:$0xff]   ;;  %v20118_v54 = vld [vmem:[%s28508_s3 + $0x2e0] ss:$16 sps:$4 sm:$0xff]  }
 0x11c   : > { %1963 = vmatprep.subr.bf16.mxu0 %v20048_v55  ;;  %2016 = vmatprep.subr.bf16.mxu1 %v20051_v56  ;;  %v20121_v55 = vld [vmem:[%s28508_s3 + $0x2e8] ss:$16 sps:$4 sm:$0xff]   ;;  %v2380_v56 = vlaneseq }
 0x11d   : > { %1989 = vmatprep.mubr.bf16.mxu0 %v22693_v20  ;;  %2042 = vmatprep.mubr.bf16.mxu1 %v22693_v20 }
 0x11f   : > { %1964 = vmatpush1.bf16.msra.mxu0 %v20046_v57  ;;  %2017 = vmatpush1.bf16.msra.mxu1 %v20049_v58  ;;  %v2381_v57 = vshrl.u32 %v2380_v56, 7  ;;  %v2378_v58 = vld [vmem:[%s28509_s4] sm:$0xf] }
 0x120   : > { %1965 = vmatprep.subr.bf16.mxu0 %v20054_v59  ;;  %2018 = vmatprep.subr.bf16.mxu1 %v20057_v60 }
 0x121   : > { %v23964_v59 = vsub.s32 0, %v2381_v57  ;;  %v23966_v60 = vsub.s32 2, %v2381_v57 }
 0x123   : > { %1966 = vmatpush1.bf16.msra.mxu0 %v20052_v61  ;;  %2019 = vmatpush1.bf16.msra.mxu1 %v20055_v62  ;;  %v23968_v61 = vsub.s32 1, %v2381_v57  ;;  %v23970_v62 = vsub.s32 3, %v2381_v57 }
 0x124   : > { %1967 = vmatprep.subr.bf16.mxu0 %v20060_v63  ;;  %2020 = vmatprep.subr.bf16.mxu1 %v20063_v0  ;;  %v2383_v63 = vrot.slane %v2378_v58, %v23964_v59  ;;  %v2391_v0 = vrot.slane %v2378_v58, %v23966_v60 }
 0x127   : > { %1968 = vmatpush1.bf16.msra.mxu0 %v20058_v1  ;;  %2021 = vmatpush1.bf16.msra.mxu1 %v20061_v2  ;;  %v2387_v1 = vrot.slane %v2378_v58, %v23968_v61  ;;  %v2395_v2 = vrot.slane %v2378_v58, %v23970_v62 }
 0x128   : > { %1969 = vmatprep.subr.bf16.mxu0 %v20066_v3  ;;  %2022 = vmatprep.subr.bf16.mxu1 %v20069_v4 }
 0x12b   : > { %1970 = vmatpush1.bf16.msra.mxu0 %v20064_v5  ;;  %2023 = vmatpush1.bf16.msra.mxu1 %v20067_v6 }
 0x12c   : > { %1971 = vmatprep.subr.bf16.mxu0 %v20072_v7  ;;  %2024 = vmatprep.subr.bf16.mxu1 %v20075_v8 }
 0x12f   : > { %1972 = vmatpush1.bf16.msra.mxu0 %v20070_v9  ;;  %2025 = vmatpush1.bf16.msra.mxu1 %v20073_v10 }
 0x130   : > { %2256 = vmatprep.subr.bf16.mxu0 %v20078_v11  ;;  %2309 = vmatprep.subr.bf16.mxu1 %v20081_v12 }
 0x1c5   : > { %v19569_v13 = vpop.f32.mrb[0].mxu0  ;;  %v19577_v17 = vpop.f32.mrb[0].mxu1 }
 0x1c6   : > { %v1378_v14 = vpop.f32.mrb[1].mxu0  ;;  %v1449_v22 = vpop.f32.mrb[1].mxu1 }
 0x1c7   : > { %v19570_v18 = vpop.f32.mrb[2].mxu0  ;;  %v19578_v25 = vpop.f32.mrb[2].mxu1 }
 0x1c8   : > { %v1394_v23 = vpack.c.bf16 %v19570_v18, %v19569_v13  ;;  %v1381_v24 = vpop.f32.mrb[3].mxu0  ;;  %v23867_v27 = vpack.c.bf16 %v19578_v25, %v19577_v17  ;;  %v1452_v28 = vpop.f32.mrb[3].mxu1 }
 0x1c9   : > { %v1393_v26 = vpack.c.bf16 %v1381_v24, %v1378_v14  ;;  %v23875_v31 = vpack.c.bf16 %v1452_v28, %v1449_v22 }
 0x1cb   : > { %1990 = vmatmul.mubr.bf16.vlgmr.msra.gmra.mrb[4].mxu0 %v1393_v26  ;;  %2043 = vmatmul.mubr.bf16.vlgmr.msra.gmra.mrb[4].mxu1 %v1393_v26 }
 0x1cc   : > { %2257 = vmatpush1.bf16.msra.mxu0 %v20076_v15  ;;  %2310 = vmatpush1.bf16.msra.mxu1 %v20079_v16 }
 0x1cd   : > { %2258 = vmatprep.subr.bf16.mxu0 %v20084_v19  ;;  %2311 = vmatprep.subr.bf16.mxu1 %v20087_v21 }
 0x1ce   : > { %1999 = vmatprep.mubr.bf16.mxu0 %v22693_v20  ;;  %2052 = vmatprep.mubr.bf16.mxu1 %v22693_v20 }
 0x1d0   : > { %2259 = vmatpush1.bf16.msra.mxu0 %v20082_v29  ;;  %2312 = vmatpush1.bf16.msra.mxu1 %v20085_v30 }
 0x1d1   : > { %2260 = vmatprep.subr.bf16.mxu0 %v20090_v32  ;;  %2313 = vmatprep.subr.bf16.mxu1 %v20093_v33 }
 0x1d3   : > { %2000 = vmatmul.mubr.bf16.gmra.mrb[8].mxu0 %v1394_v23  ;;  %2053 = vmatmul.mubr.bf16.gmra.mrb[8].mxu1 %v1394_v23 }
 0x1d4   : > { %2261 = vmatpush1.bf16.msra.mxu0 %v20088_v34  ;;  %2314 = vmatpush1.bf16.msra.mxu1 %v20091_v35 }
 0x1d5   : > { %2262 = vmatprep.subr.bf16.mxu0 %v20096_v36  ;;  %2315 = vmatprep.subr.bf16.mxu1 %v20099_v37 }
 0x1d6   : > { %2288 = vmatprep.mubr.bf16.mxu0 %v22693_v20  ;;  %2341 = vmatprep.mubr.bf16.mxu1 %v22693_v20 }
 0x1d8   : > { %2263 = vmatpush1.bf16.msra.mxu0 %v20094_v38  ;;  %2316 = vmatpush1.bf16.msra.mxu1 %v20097_v39 }
 0x1d9   : > { %2264 = vmatprep.subr.bf16.mxu0 %v20102_v40  ;;  %2317 = vmatprep.subr.bf16.mxu1 %v20105_v41 }
 0x1dc   : > { %2265 = vmatpush1.bf16.msra.mxu0 %v20100_v42  ;;  %2318 = vmatpush1.bf16.msra.mxu1 %v20103_v43 }
 0x1dd   : > { %2266 = vmatprep.subr.bf16.mxu0 %v20108_v44  ;;  %2319 = vmatprep.subr.bf16.mxu1 %v20111_v45 }
 0x1e0   : > { %2267 = vmatpush1.bf16.msra.mxu0 %v20106_v46  ;;  %2320 = vmatpush1.bf16.msra.mxu1 %v20109_v47 }
 0x1e1   : > { %2268 = vmatprep.subr.bf16.mxu0 %v20114_v48  ;;  %2321 = vmatprep.subr.bf16.mxu1 %v20117_v49 }
 0x1e4   : > { %2269 = vmatpush1.bf16.msra.mxu0 %v20112_v50  ;;  %2322 = vmatpush1.bf16.msra.mxu1 %v20115_v51 }
 0x1e5   : > { %2270 = vmatprep.subr.bf16.mxu0 %v20120_v52  ;;  %2323 = vmatprep.subr.bf16.mxu1 %v20123_v53 }
 0x1e8   : > { %2271 = vmatpush1.bf16.msra.mxu0 %v20118_v54  ;;  %2324 = vmatpush1.bf16.msra.mxu1 %v20121_v55 }
 0x1eb   : > { %2289 = vmatmul.mubr.bf16.vlgmr.msra.gmra.mrb[4].mxu0 %v23875_v31  ;;  %2342 = vmatmul.mubr.bf16.vlgmr.msra.gmra.mrb[4].mxu1 %v23875_v31 }
 0x1ec   : > { %2298 = vmatprep.mubr.bf16.mxu0 %v22693_v20  ;;  %2351 = vmatprep.mubr.bf16.mxu1 %v22693_v20 }
 0x1f3   : > { %2299 = vmatmul.mubr.bf16.gmra.mrb[8].mxu0 %v23867_v27  ;;  %2352 = vmatmul.mubr.bf16.gmra.mrb[8].mxu1 %v23867_v27 }
 0x1f4   : > { %2472 = vmatprep.mubr.bf16.mxu0 %v22693_v20  ;;  %2525 = vmatprep.mubr.bf16.mxu1 %v22693_v20 }
 0x2be   : > { %v2290_v3 = vpop.f32.mrb[4].mxu0  ;;  %v2343_v4 = vpop.f32.mrb[4].mxu1 }
 0x2bf   : > { %v2400_v5 = vadd.f32 %v2383_v63, %v2290_v3  ;;  %v2402_v6 = vadd.f32 %v2391_v0, %v2343_v4  ;;  %v2292_v7 = vpop.f32.mrb[5].mxu0  ;;  %v2345_v8 = vpop.f32.mrb[5].mxu1  ;;  %v21853_v3 = vld [vmem:[%s28506_s1 + $0x8] sm:$0xff]   ;;  %v20124_v4 = vld [vmem:[%s28510_s5 + $0x400] ss:$16 sps:$4 sm:$0xff]  }
 0x2c0   : > { %v2401_v9 = vadd.f32 %v2387_v1, %v2292_v7  ;;  %v2403_v10 = vadd.f32 %v2395_v2, %v2345_v8  ;;  %v2294_v11 = vpop.f32.mrb[6].mxu0  ;;  %v2347_v12 = vpop.f32.mrb[6].mxu1  ;;  %v20135_v7 = vld [vmem:[%s28510_s5 + $0x42c] ss:$16 sps:$4 sm:$0xff]   ;;  %v21854_v8 = vld [vmem:[%s28507_s2] sm:$0xff]  }
 0x2c1   : > { %v2404_v13 = vadd.f32 %v2383_v63, %v2294_v11  ;;  %v2406_v14 = vadd.f32 %v2391_v0, %v2347_v12  ;;  %v2296_v15 = vpop.f32.mrb[7].mxu0  ;;  %v2349_v16 = vpop.f32.mrb[7].mxu1  ;;  %v2416_v17 = vmax.f32 %v2400_v5, 0.0  ;;  %v2418_v21 = vmax.f32 %v2402_v6, 0.0  ;;  %v20127_v5 = vld [vmem:[%s28510_s5 + $0x408] ss:$16 sps:$4 sm:$0xff]  }
 0x2c2   : > { %v2405_v18 = vadd.f32 %v2387_v1, %v2296_v15  ;;  %v2407_v19 = vadd.f32 %v2395_v2, %v2349_v16  ;;  %v2417_v22 = vmax.f32 %v2401_v9, 0.0  ;;  %v2419_v25 = vmax.f32 %v2403_v10, 0.0  ;;  %v20132_v6 = vld [vmem:[%s28510_s5 + $0x424] ss:$16 sps:$4 sm:$0xff]   ;;  %v20130_v9 = vld [vmem:[%s28510_s5 + $0x420] ss:$16 sps:$4 sm:$0xff]  }
 0x2c3   : > { %v2420_v23 = vmax.f32 %v2404_v13, 0.0  ;;  %v2422_v24 = vmax.f32 %v2406_v14, 0.0  ;;  %v20133_v10 = vld [vmem:[%s28510_s5 + $0x428] ss:$16 sps:$4 sm:$0xff]   ;;  %v20138_v11 = vld [vmem:[%s28510_s5 + $0x444] ss:$16 sps:$4 sm:$0xff]  }
 0x2c4   : > { %v2421_v26 = vmax.f32 %v2405_v18, 0.0  ;;  %v2423_v27 = vmax.f32 %v2407_v19, 0.0  ;;  %v20141_v12 = vld [vmem:[%s28510_s5 + $0x44c] ss:$16 sps:$4 sm:$0xff]   ;;  %v20136_v13 = vld [vmem:[%s28510_s5 + $0x440] ss:$16 sps:$4 sm:$0xff]  }
 0x2c5   : > { %v23976_v28 = vpack.c.bf16 %v2420_v23, %v2416_v17  ;;  %v23978_v29 = vpack.c.bf16 %v2422_v24, %v2418_v21  ;;  %v20139_v14 = vld [vmem:[%s28510_s5 + $0x448] ss:$16 sps:$4 sm:$0xff]   ;;  %v20144_v15 = vld [vmem:[%s28510_s5 + $0x464] ss:$16 sps:$4 sm:$0xff]   ;;  %v20147_v16 = vld [vmem:[%s28510_s5 + $0x46c] ss:$16 sps:$4 sm:$0xff]  }
 0x2c6   : > { %v23980_v30 = vpack.c.bf16 %v2421_v26, %v2417_v22  ;;  %v23982_v31 = vpack.c.bf16 %v2423_v27, %v2419_v25  ;;  %v2300_v32 = vpop.f32.mrb[8].mxu0  ;;  %v2353_v33 = vpop.f32.mrb[8].mxu1  ;;  %v21855_v17 = vld [vmem:[%s28507_s2 + $0x8] sm:$0xff]   ;;  %v20142_v18 = vld [vmem:[%s28510_s5 + $0x460] ss:$16 sps:$4 sm:$0xff]  }
 0x2c7   : > { %v2408_v34 = vadd.f32 %v2383_v63, %v2300_v32  ;;  %v2410_v35 = vadd.f32 %v2391_v0, %v2353_v33  ;;  %v2302_v36 = vpop.f32.mrb[9].mxu0  ;;  %v2355_v37 = vpop.f32.mrb[9].mxu1  ;;  %v20145_v19 = vld [vmem:[%s28510_s5 + $0x468] ss:$16 sps:$4 sm:$0xff]   ;;  %v20150_v21 = vld [vmem:[%s28510_s5 + $0x484] ss:$16 sps:$4 sm:$0xff]  }
 0x2c8   : > { %v2409_v38 = vadd.f32 %v2387_v1, %v2302_v36  ;;  %v2411_v39 = vadd.f32 %v2395_v2, %v2355_v37  ;;  %v2304_v40 = vpop.f32.mrb[10].mxu0  ;;  %v2357_v41 = vpop.f32.mrb[10].mxu1  ;;  %2440 = vmatprep.subr.bf16.mxu0 %v23980_v30  ;;  %2493 = vmatprep.subr.bf16.mxu1 %v23982_v31  ;;  %v20153_v22 = vld [vmem:[%s28510_s5 + $0x48c] ss:$16 sps:$4 sm:$0xff]   ;;  %v20148_v23 = vld [vmem:[%s28510_s5 + $0x480] ss:$16 sps:$4 sm:$0xff]  }
 0x2c9   : > { %v2412_v42 = vadd.f32 %v2383_v63, %v2304_v40  ;;  %v2414_v43 = vadd.f32 %v2391_v0, %v2357_v41  ;;  %v2306_v44 = vpop.f32.mrb[11].mxu0  ;;  %v2359_v45 = vpop.f32.mrb[11].mxu1  ;;  %2441 = vmatpush1.bf16.msra.mxu0 %v23976_v28  ;;  %2494 = vmatpush1.bf16.msra.mxu1 %v23978_v29  ;;  %v2424_v46 = vmax.f32 %v2408_v34, 0.0  ;;  %v2426_v49 = vmax.f32 %v2410_v35, 0.0  ;;  %v21852_v0 = vld [vmem:[%s28506_s1] sm:$0xff]  }
 0x2ca   : > { %v2413_v47 = vadd.f32 %v2387_v1, %v2306_v44  ;;  %v2415_v48 = vadd.f32 %v2395_v2, %v2359_v45  ;;  %v2425_v50 = vmax.f32 %v2409_v38, 0.0  ;;  %v2427_v53 = vmax.f32 %v2411_v39, 0.0  ;;  %v20126_v1 = vld [vmem:[%s28510_s5 + $0x404] ss:$16 sps:$4 sm:$0xff]   ;;  %v20129_v2 = vld [vmem:[%s28510_s5 + $0x40c] ss:$16 sps:$4 sm:$0xff]  }
 0x2cb   : > { %v2428_v51 = vmax.f32 %v2412_v42, 0.0  ;;  %v2430_v52 = vmax.f32 %v2414_v43, 0.0  ;;  %v20151_v24 = vld [vmem:[%s28510_s5 + $0x488] ss:$16 sps:$4 sm:$0xff]   ;;  %v20156_v25 = vld [vmem:[%s28510_s5 + $0x4a4] ss:$16 sps:$4 sm:$0xff]  }
 0x2cc   : > { %v2429_v54 = vmax.f32 %v2413_v47, 0.0  ;;  %v2431_v55 = vmax.f32 %v2415_v48, 0.0  ;;  %v20159_v26 = vld [vmem:[%s28510_s5 + $0x4ac] ss:$16 sps:$4 sm:$0xff]   ;;  %v20154_v27 = vld [vmem:[%s28510_s5 + $0x4a0] ss:$16 sps:$4 sm:$0xff]  }
 0x2cd   : > { %v23988_v56 = vpack.c.bf16 %v2428_v51, %v2424_v46  ;;  %v23990_v57 = vpack.c.bf16 %v2430_v52, %v2426_v49  ;;  %v20162_v32 = vld [vmem:[%s28510_s5 + $0x4c4] ss:$16 sps:$4 sm:$0xff]   ;;  %v20165_v33 = vld [vmem:[%s28510_s5 + $0x4cc] ss:$16 sps:$4 sm:$0xff]   ;;  %v20160_v34 = vld [vmem:[%s28510_s5 + $0x4c0] ss:$16 sps:$4 sm:$0xff]  }
 0x2ce   : > { %v23992_v58 = vpack.c.bf16 %v2429_v54, %v2425_v50  ;;  %v23994_v63 = vpack.c.bf16 %v2431_v55, %v2427_v53  ;;  %v20163_v35 = vld [vmem:[%s28510_s5 + $0x4c8] ss:$16 sps:$4 sm:$0xff]   ;;  %v20168_v36 = vld [vmem:[%s28510_s5 + $0x4e4] ss:$16 sps:$4 sm:$0xff]   ;;  %v20171_v37 = vld [vmem:[%s28510_s5 + $0x4ec] ss:$16 sps:$4 sm:$0xff]  }
 0x2cf   : > { %v20166_v38 = vld [vmem:[%s28510_s5 + $0x4e0] ss:$16 sps:$4 sm:$0xff]   ;;  %v20169_v39 = vld [vmem:[%s28510_s5 + $0x4e8] ss:$16 sps:$4 sm:$0xff]   ;;  %v20174_v40 = vld [vmem:[%s28510_s5 + $0x504] ss:$16 sps:$4 sm:$0xff]  }
 0x2d0   : > { %2442 = vmatprep.subr.bf16.mxu0 %v23992_v58  ;;  %2495 = vmatprep.subr.bf16.mxu1 %v23994_v63  ;;  %v20177_v41 = vld [vmem:[%s28510_s5 + $0x50c] ss:$16 sps:$4 sm:$0xff]   ;;  %v20172_v42 = vld [vmem:[%s28510_s5 + $0x500] ss:$16 sps:$4 sm:$0xff]   ;;  %v20175_v43 = vld [vmem:[%s28510_s5 + $0x508] ss:$16 sps:$4 sm:$0xff]  }
 0x2d1   : > { %2443 = vmatpush1.bf16.msra.mxu0 %v23988_v56  ;;  %2496 = vmatpush1.bf16.msra.mxu1 %v23990_v57  ;;  %v20180_v44 = vld [vmem:[%s28510_s5 + $0x524] ss:$16 sps:$4 sm:$0xff]   ;;  %v20183_v45 = vld [vmem:[%s28510_s5 + $0x52c] ss:$16 sps:$4 sm:$0xff]   ;;  %v20178_v46 = vld [vmem:[%s28510_s5 + $0x520] ss:$16 sps:$4 sm:$0xff]  }
 0x2d2   : > { %2554 = vmatprep.subr.bf16.mxu0 %v23980_v30  ;;  %2607 = vmatprep.subr.bf16.mxu1 %v23982_v31  ;;  %v20181_v47 = vld [vmem:[%s28510_s5 + $0x528] ss:$16 sps:$4 sm:$0xff]   ;;  %v20186_v48 = vld [vmem:[%s28510_s5 + $0x544] ss:$16 sps:$4 sm:$0xff]   ;;  %v20189_v49 = vld [vmem:[%s28510_s5 + $0x54c] ss:$16 sps:$4 sm:$0xff]  }
 0x2d3   : > { %v20184_v50 = vld [vmem:[%s28510_s5 + $0x540] ss:$16 sps:$4 sm:$0xff]   ;;  %v20187_v51 = vld [vmem:[%s28510_s5 + $0x548] ss:$16 sps:$4 sm:$0xff]   ;;  %v20192_v52 = vld [vmem:[%s28510_s5 + $0x564] ss:$16 sps:$4 sm:$0xff]  }
 0x2d4   : > { %16823 = vmatmul.mubr.msk.bf16.vlgmr.msra.gmra.mrb[12].mxu0 %vm1337_vm0, %v21852_v0  ;;  %16825 = vmatmul.mubr.msk.bf16.vlgmr.msra.gmra.mrb[12].mxu1 %vm1337_vm0, %v21852_v0  ;;  %v20195_v53 = vld [vmem:[%s28510_s5 + $0x56c] ss:$16 sps:$4 sm:$0xff]   ;;  %v20190_v54 = vld [vmem:[%s28510_s5 + $0x560] ss:$16 sps:$4 sm:$0xff]   ;;  %v20193_v55 = vld [vmem:[%s28510_s5 + $0x568] ss:$16 sps:$4 sm:$0xff]  }
 0x2d5   : > { %2555 = vmatpush1.bf16.msra.mxu0 %v23976_v28  ;;  %2608 = vmatpush1.bf16.msra.mxu1 %v23978_v29  ;;  %v20198_v0 = vld [vmem:[%s28510_s5 + $0x584] ss:$16 sps:$4 sm:$0xff]  }
 0x2d6   : > { %2556 = vmatprep.subr.bf16.mxu0 %v23992_v58  ;;  %2609 = vmatprep.subr.bf16.mxu1 %v23994_v63 }
 0x2d7   : > { %2482 = vmatprep.mubr.bf16.mxu0 %v22693_v20  ;;  %2535 = vmatprep.mubr.bf16.mxu1 %v22693_v20 }
 0x2d9   : > { %2557 = vmatpush1.bf16.msra.mxu0 %v23988_v56  ;;  %2610 = vmatpush1.bf16.msra.mxu1 %v23990_v57 }
 0x2da   : > { %3565 = vmatprep.subr.bf16.mxu0 %v20126_v1  ;;  %3671 = vmatprep.subr.bf16.mxu1 %v20129_v2  ;;  %v20201_v1 = vld [vmem:[%s28510_s5 + $0x58c] ss:$16 sps:$4 sm:$0xff]   ;;  %v20196_v2 = vld [vmem:[%s28510_s5 + $0x580] ss:$16 sps:$4 sm:$0xff]  }
 0x2dc   : > { %16824 = vmatmul.mubr.msk.bf16.gmra.mrb[16].mxu0 %vm1337_vm0, %v21853_v3  ;;  %16826 = vmatmul.mubr.msk.bf16.gmra.mrb[16].mxu1 %vm1337_vm0, %v21853_v3  ;;  %v20199_v3 = vld [vmem:[%s28510_s5 + $0x588] ss:$16 sps:$4 sm:$0xff]  }
 0x2dd   : > { %2586 = vmatprep.mubr.bf16.mxu0 %v22693_v20  ;;  %2639 = vmatprep.mubr.bf16.mxu1 %v22693_v20 }
 0x2e4   : > { %16827 = vmatmul.mubr.msk.bf16.vlgmr.msra.gmra.mrb[20].mxu0 %vm1337_vm0, %v21854_v8  ;;  %16829 = vmatmul.mubr.msk.bf16.vlgmr.msra.gmra.mrb[20].mxu1 %vm1337_vm0, %v21854_v8  ;;  %v20210_v8 = vld [vmem:[%s28510_s5 + $0x5c4] ss:$16 sps:$4 sm:$0xff]  }
 0x2e5   : > { %3566 = vmatpush1.bf16.msra.mxu0 %v20124_v4  ;;  %3672 = vmatpush1.bf16.msra.mxu1 %v20127_v5  ;;  %v20204_v4 = vld [vmem:[%s28510_s5 + $0x5a4] ss:$16 sps:$4 sm:$0xff]   ;;  %v20207_v5 = vld [vmem:[%s28510_s5 + $0x5ac] ss:$16 sps:$4 sm:$0xff]  }
 0x2e6   : > { %3567 = vmatprep.subr.bf16.mxu0 %v20132_v6  ;;  %3673 = vmatprep.subr.bf16.mxu1 %v20135_v7  ;;  %v20202_v6 = vld [vmem:[%s28510_s5 + $0x5a0] ss:$16 sps:$4 sm:$0xff]   ;;  %v20205_v7 = vld [vmem:[%s28510_s5 + $0x5a8] ss:$16 sps:$4 sm:$0xff]  }
 0x2e7   : > { %2596 = vmatprep.mubr.bf16.mxu0 %v22693_v20  ;;  %2649 = vmatprep.mubr.bf16.mxu1 %v22693_v20 }
 0x2e9   : > { %3568 = vmatpush1.bf16.msra.mxu0 %v20130_v9  ;;  %3674 = vmatpush1.bf16.msra.mxu1 %v20133_v10  ;;  %v20213_v9 = vld [vmem:[%s28510_s5 + $0x5cc] ss:$16 sps:$4 sm:$0xff]   ;;  %v20208_v10 = vld [vmem:[%s28510_s5 + $0x5c0] ss:$16 sps:$4 sm:$0xff]  }
 0x2ea   : > { %3569 = vmatprep.subr.bf16.mxu0 %v20138_v11  ;;  %3675 = vmatprep.subr.bf16.mxu1 %v20141_v12  ;;  %v20211_v11 = vld [vmem:[%s28510_s5 + $0x5c8] ss:$16 sps:$4 sm:$0xff]   ;;  %v20216_v12 = vld [vmem:[%s28510_s5 + $0x5e4] ss:$16 sps:$4 sm:$0xff]  }
 0x2ec   : > { %16828 = vmatmul.mubr.msk.bf16.gmra.mrb[24].mxu0 %vm1337_vm0, %v21855_v17  ;;  %16830 = vmatmul.mubr.msk.bf16.gmra.mrb[24].mxu1 %vm1337_vm0, %v21855_v17  ;;  %v20225_v17 = vld [vmem:[%s28510_s5 + $0x60c] ss:$16 sps:$4 sm:$0xff]  }
 0x2ed   : > { %3570 = vmatpush1.bf16.msra.mxu0 %v20136_v13  ;;  %3676 = vmatpush1.bf16.msra.mxu1 %v20139_v14  ;;  %v20219_v13 = vld [vmem:[%s28510_s5 + $0x5ec] ss:$16 sps:$4 sm:$0xff]   ;;  %v20214_v14 = vld [vmem:[%s28510_s5 + $0x5e0] ss:$16 sps:$4 sm:$0xff]  }
 0x2ee   : > { %3597 = vmatprep.mubr.bf16.mxu0 %v23980_v30  ;;  %3703 = vmatprep.mubr.bf16.mxu1 %v23980_v30  ;;  %v20157_v30 = vld [vmem:[%s28510_s5 + $0x4a8] ss:$16 sps:$4 sm:$0xff]  }
 0x2ef   : > { %3571 = vmatprep.subr.bf16.mxu0 %v20144_v15  ;;  %3677 = vmatprep.subr.bf16.mxu1 %v20147_v16  ;;  %v20217_v15 = vld [vmem:[%s28510_s5 + $0x5e8] ss:$16 sps:$4 sm:$0xff]   ;;  %v20222_v16 = vld [vmem:[%s28510_s5 + $0x604] ss:$16 sps:$4 sm:$0xff]  }
 0x2f1   : > { %3572 = vmatpush1.bf16.msra.mxu0 %v20142_v18  ;;  %3678 = vmatpush1.bf16.msra.mxu1 %v20145_v19  ;;  %v20220_v18 = vld [vmem:[%s28510_s5 + $0x600] ss:$16 sps:$4 sm:$0xff]   ;;  %v20223_v19 = vld [vmem:[%s28510_s5 + $0x608] ss:$16 sps:$4 sm:$0xff]  }
 0x2f2   : > { %3573 = vmatprep.subr.bf16.mxu0 %v20150_v21  ;;  %3679 = vmatprep.subr.bf16.mxu1 %v20153_v22  ;;  %v20228_v21 = vld [vmem:[%s28510_s5 + $0x624] ss:$16 sps:$4 sm:$0xff]   ;;  %v20231_v22 = vld [vmem:[%s28510_s5 + $0x62c] ss:$16 sps:$4 sm:$0xff]  }
 0x2f5   : > { %3574 = vmatpush1.bf16.msra.mxu0 %v20148_v23  ;;  %3680 = vmatpush1.bf16.msra.mxu1 %v20151_v24  ;;  %v20226_v23 = vld [vmem:[%s28510_s5 + $0x620] ss:$16 sps:$4 sm:$0xff]   ;;  %v20229_v24 = vld [vmem:[%s28510_s5 + $0x628] ss:$16 sps:$4 sm:$0xff]  }
 0x2f6   : > { %3575 = vmatprep.subr.bf16.mxu0 %v20156_v25  ;;  %3681 = vmatprep.subr.bf16.mxu1 %v20159_v26  ;;  %v20234_v25 = vld [vmem:[%s28510_s5 + $0x644] ss:$16 sps:$4 sm:$0xff]   ;;  %v20235_v26 = vld [vmem:[%s28510_s5 + $0x648] ss:$16 sps:$4 sm:$0xff]  }
 0x2f9   : > { %3576 = vmatpush1.bf16.msra.mxu0 %v20154_v27  ;;  %3682 = vmatpush1.bf16.msra.mxu1 %v20157_v30  ;;  %v20240_v27 = vld [vmem:[%s28510_s5 + $0x664] ss:$16 sps:$4 sm:$0xff]   ;;  %v20243_v30 = vld [vmem:[%s28510_s5 + $0x66c] ss:$16 sps:$4 sm:$0xff]  }
 0x2fa   : > { %3577 = vmatprep.subr.bf16.mxu0 %v20162_v32  ;;  %3683 = vmatprep.subr.bf16.mxu1 %v20165_v33  ;;  %v20238_v32 = vld [vmem:[%s28510_s5 + $0x660] ss:$16 sps:$4 sm:$0xff]   ;;  %v20241_v33 = vld [vmem:[%s28510_s5 + $0x668] ss:$16 sps:$4 sm:$0xff]  }
 0x2fd   : > { %3578 = vmatpush1.bf16.msra.mxu0 %v20160_v34  ;;  %3684 = vmatpush1.bf16.msra.mxu1 %v20163_v35  ;;  %v20246_v34 = vld [vmem:[%s28510_s5 + $0x684] ss:$16 sps:$4 sm:$0xff]   ;;  %v20244_v35 = vld [vmem:[%s28510_s5 + $0x680] ss:$16 sps:$4 sm:$0xff]  }
 0x2fe   : > { %3579 = vmatprep.subr.bf16.mxu0 %v20168_v36  ;;  %3685 = vmatprep.subr.bf16.mxu1 %v20171_v37  ;;  %v20252_v36 = vld [vmem:[%s28510_s5 + $0x6a4] ss:$16 sps:$4 sm:$0xff]   ;;  %v20255_v37 = vld [vmem:[%s28510_s5 + $0x6ac] ss:$16 sps:$4 sm:$0xff]  }
 0x301   : > { %3580 = vmatpush1.bf16.msra.mxu0 %v20166_v38  ;;  %3686 = vmatpush1.bf16.msra.mxu1 %v20169_v39  ;;  %v20250_v38 = vld [vmem:[%s28510_s5 + $0x6a0] ss:$16 sps:$4 sm:$0xff]   ;;  %v20253_v39 = vld [vmem:[%s28510_s5 + $0x6a8] ss:$16 sps:$4 sm:$0xff]  }
 0x302   : > { %3581 = vmatprep.subr.bf16.mxu0 %v20174_v40  ;;  %3687 = vmatprep.subr.bf16.mxu1 %v20177_v41  ;;  %v20258_v40 = vld [vmem:[%s28510_s5 + $0x6c4] ss:$16 sps:$4 sm:$0xff]   ;;  %v20261_v41 = vld [vmem:[%s28510_s5 + $0x6cc] ss:$16 sps:$4 sm:$0xff]  }
 0x305   : > { %3582 = vmatpush1.bf16.msra.mxu0 %v20172_v42  ;;  %3688 = vmatpush1.bf16.msra.mxu1 %v20175_v43  ;;  %v20256_v42 = vld [vmem:[%s28510_s5 + $0x6c0] ss:$16 sps:$4 sm:$0xff]   ;;  %v20259_v43 = vld [vmem:[%s28510_s5 + $0x6c8] ss:$16 sps:$4 sm:$0xff]  }
 0x306   : > { %3583 = vmatprep.subr.bf16.mxu0 %v20180_v44  ;;  %3689 = vmatprep.subr.bf16.mxu1 %v20183_v45  ;;  %v20264_v44 = vld [vmem:[%s28510_s5 + $0x6e4] ss:$16 sps:$4 sm:$0xff]   ;;  %v20267_v45 = vld [vmem:[%s28510_s5 + $0x6ec] ss:$16 sps:$4 sm:$0xff]  }
 0x309   : > { %3584 = vmatpush1.bf16.msra.mxu0 %v20178_v46  ;;  %3690 = vmatpush1.bf16.msra.mxu1 %v20181_v47  ;;  %v20262_v46 = vld [vmem:[%s28510_s5 + $0x6e0] ss:$16 sps:$4 sm:$0xff]   ;;  %v20265_v47 = vld [vmem:[%s28510_s5 + $0x6e8] ss:$16 sps:$4 sm:$0xff]  }
 0x30a   : > { %3585 = vmatprep.subr.bf16.mxu0 %v20186_v48  ;;  %3691 = vmatprep.subr.bf16.mxu1 %v20189_v49  ;;  %v20270_v48 = vld [vmem:[%s28510_s5 + $0x704] ss:$16 sps:$4 sm:$0xff]   ;;  %v20273_v49 = vld [vmem:[%s28510_s5 + $0x70c] ss:$16 sps:$4 sm:$0xff]  }
 0x30d   : > { %3586 = vmatpush1.bf16.msra.mxu0 %v20184_v50  ;;  %3692 = vmatpush1.bf16.msra.mxu1 %v20187_v51  ;;  %v20268_v50 = vld [vmem:[%s28510_s5 + $0x700] ss:$16 sps:$4 sm:$0xff]   ;;  %v20271_v51 = vld [vmem:[%s28510_s5 + $0x708] ss:$16 sps:$4 sm:$0xff]  }
 0x30e   : > { %3587 = vmatprep.subr.bf16.mxu0 %v20192_v52  ;;  %3693 = vmatprep.subr.bf16.mxu1 %v20195_v53  ;;  %v20276_v52 = vld [vmem:[%s28510_s5 + $0x724] ss:$16 sps:$4 sm:$0xff]   ;;  %v20279_v53 = vld [vmem:[%s28510_s5 + $0x72c] ss:$16 sps:$4 sm:$0xff]  }
 0x311   : > { %3588 = vmatpush1.bf16.msra.mxu0 %v20190_v54  ;;  %3694 = vmatpush1.bf16.msra.mxu1 %v20193_v55  ;;  %v20274_v54 = vld [vmem:[%s28510_s5 + $0x720] ss:$16 sps:$4 sm:$0xff]   ;;  %v20277_v55 = vld [vmem:[%s28510_s5 + $0x728] ss:$16 sps:$4 sm:$0xff]  }
 0x312   : > { %3589 = vmatprep.subr.bf16.mxu0 %v20198_v0  ;;  %3695 = vmatprep.subr.bf16.mxu1 %v20201_v1  ;;  %v20282_v0 = vld [vmem:[%s28510_s5 + $0x744] ss:$16 sps:$4 sm:$0xff]   ;;  %v20285_v1 = vld [vmem:[%s28510_s5 + $0x74c] ss:$16 sps:$4 sm:$0xff]  }
 0x315   : > { %3590 = vmatpush1.bf16.msra.mxu0 %v20196_v2  ;;  %3696 = vmatpush1.bf16.msra.mxu1 %v20199_v3  ;;  %v20280_v2 = vld [vmem:[%s28510_s5 + $0x740] ss:$16 sps:$4 sm:$0xff]   ;;  %v20283_v3 = vld [vmem:[%s28510_s5 + $0x748] ss:$16 sps:$4 sm:$0xff]  }
 0x316   : > { %3591 = vmatprep.subr.bf16.mxu0 %v20204_v4  ;;  %3697 = vmatprep.subr.bf16.mxu1 %v20207_v5  ;;  %v20288_v4 = vld [vmem:[%s28510_s5 + $0x764] ss:$16 sps:$4 sm:$0xff]   ;;  %v20291_v5 = vld [vmem:[%s28510_s5 + $0x76c] ss:$16 sps:$4 sm:$0xff]  }
 0x319   : > { %3592 = vmatpush1.bf16.msra.mxu0 %v20202_v6  ;;  %3698 = vmatpush1.bf16.msra.mxu1 %v20205_v7  ;;  %v20286_v6 = vld [vmem:[%s28510_s5 + $0x760] ss:$16 sps:$4 sm:$0xff]   ;;  %v20289_v7 = vld [vmem:[%s28510_s5 + $0x768] ss:$16 sps:$4 sm:$0xff]  }
 0x31a   : > { %3593 = vmatprep.subr.bf16.mxu0 %v20210_v8  ;;  %3699 = vmatprep.subr.bf16.mxu1 %v20213_v9  ;;  %v20294_v8 = vld [vmem:[%s28510_s5 + $0x784] ss:$16 sps:$4 sm:$0xff]   ;;  %v20297_v9 = vld [vmem:[%s28510_s5 + $0x78c] ss:$16 sps:$4 sm:$0xff]  }
 0x31d   : > { %3594 = vmatpush1.bf16.msra.mxu0 %v20208_v10  ;;  %3700 = vmatpush1.bf16.msra.mxu1 %v20211_v11  ;;  %v20292_v10 = vld [vmem:[%s28510_s5 + $0x780] ss:$16 sps:$4 sm:$0xff]   ;;  %v20295_v11 = vld [vmem:[%s28510_s5 + $0x788] ss:$16 sps:$4 sm:$0xff]  }
 0x31e   : > { %3595 = vmatprep.subr.bf16.mxu0 %v20216_v12  ;;  %3701 = vmatprep.subr.bf16.mxu1 %v20219_v13  ;;  %v20300_v12 = vld [vmem:[%s28510_s5 + $0x7a4] ss:$16 sps:$4 sm:$0xff]   ;;  %v20303_v13 = vld [vmem:[%s28510_s5 + $0x7ac] ss:$16 sps:$4 sm:$0xff]  }
 0x321   : > { %3596 = vmatpush1.bf16.msra.mxu0 %v20214_v14  ;;  %3702 = vmatpush1.bf16.msra.mxu1 %v20217_v15  ;;  %v20298_v14 = vld [vmem:[%s28510_s5 + $0x7a0] ss:$16 sps:$4 sm:$0xff]   ;;  %v20301_v15 = vld [vmem:[%s28510_s5 + $0x7a8] ss:$16 sps:$4 sm:$0xff]  }
 0x322   : > { %3618 = vmatprep.subr.bf16.mxu0 %v20222_v16  ;;  %3724 = vmatprep.subr.bf16.mxu1 %v20225_v17  ;;  %v20306_v16 = vld [vmem:[%s28510_s5 + $0x7c4] ss:$16 sps:$4 sm:$0xff]   ;;  %v20309_v17 = vld [vmem:[%s28510_s5 + $0x7cc] ss:$16 sps:$4 sm:$0xff]  }
 0x324   : > { %3598 = vmatmul.mubr.bf16.vlgmr.msra.gmra.mrb[28].mxu0 %v23976_v28  ;;  %3704 = vmatmul.mubr.bf16.vlgmr.msra.gmra.mrb[28].mxu1 %v23976_v28  ;;  %v20237_v28 = vld [vmem:[%s28510_s5 + $0x64c] ss:$16 sps:$4 sm:$0xff]  }
 0x325   : > { %3607 = vmatprep.mubr.bf16.mxu0 %v23992_v58  ;;  %3619 = vmatpush1.bf16.msra.mxu0 %v20220_v18  ;;  %v20304_v18 = vld [vmem:[%s28510_s5 + $0x7c0] ss:$16 sps:$4 sm:$0xff]  }
 0x326   : > { %3713 = vmatprep.mubr.bf16.mxu1 %v23992_v58  ;;  %3725 = vmatpush1.bf16.msra.mxu1 %v20223_v19  ;;  %v20232_v58 = vld [vmem:[%s28510_s5 + $0x640] ss:$16 sps:$4 sm:$0xff]   ;;  %v20307_v19 = vld [vmem:[%s28510_s5 + $0x7c8] ss:$16 sps:$4 sm:$0xff]  }
 0x327   : > { %3620 = vmatprep.subr.bf16.mxu0 %v20228_v21  ;;  %3726 = vmatprep.subr.bf16.mxu1 %v20231_v22  ;;  %v20312_v21 = vld [vmem:[%s28510_s5 + $0x7e4] ss:$16 sps:$4 sm:$0xff]   ;;  %v20315_v22 = vld [vmem:[%s28510_s5 + $0x7ec] ss:$16 sps:$4 sm:$0xff]  }
 0x329   : > { %3621 = vmatpush1.bf16.msra.mxu0 %v20226_v23  ;;  %v20310_v23 = vld [vmem:[%s28510_s5 + $0x7e0] ss:$16 sps:$4 sm:$0xff]  }
 0x32a   : > { %3727 = vmatpush1.bf16.msra.mxu1 %v20229_v24  ;;  %3622 = vmatprep.subr.bf16.mxu0 %v20234_v25  ;;  %v20313_v24 = vld [vmem:[%s28510_s5 + $0x7e8] ss:$16 sps:$4 sm:$0xff]   ;;  %v20318_v25 = vld [vmem:[%s28510_s5 + $0x4] ss:$16 sps:$4 sm:$0xff]  }
 0x32b   : > { %3728 = vmatprep.subr.bf16.mxu1 %v20237_v28  ;;  %v20321_v28 = vld [vmem:[%s28510_s5 + $0xc] ss:$16 sps:$4 sm:$0xff]  }
 0x32c   : > { %3608 = vmatmul.mubr.bf16.gmra.mrb[32].mxu0 %v23988_v56  ;;  %3714 = vmatmul.mubr.bf16.gmra.mrb[32].mxu1 %v23988_v56  ;;  %v20249_v56 = vld [vmem:[%s28510_s5 + $0x68c] ss:$16 sps:$4 sm:$0xff]  }
 0x32d   : > { %3623 = vmatpush1.bf16.msra.mxu0 %v20232_v58  ;;  %3650 = vmatprep.mubr.bf16.mxu0 %v23982_v31  ;;  %v20316_v58 = vld [vmem:[%s28510_s5] ss:$16 sps:$4 sm:$0xff]  }
 0x32e   : > { %3729 = vmatpush1.bf16.msra.mxu1 %v20235_v26  ;;  %3756 = vmatprep.mubr.bf16.mxu1 %v23982_v31  ;;  %v20247_v31 = vld [vmem:[%s28510_s5 + $0x688] ss:$16 sps:$4 sm:$0xff]  }
 0x32f   : > { %3624 = vmatprep.subr.bf16.mxu0 %v20240_v27  ;;  %3730 = vmatprep.subr.bf16.mxu1 %v20243_v30  ;;  %v20319_v26 = vld [vmem:[%s28510_s5 + $0x8] ss:$16 sps:$4 sm:$0xff]   ;;  %v20324_v27 = vld [vmem:[%s28510_s5 + $0x24] ss:$16 sps:$4 sm:$0xff]   ;;  %v20327_v30 = vld [vmem:[%s28510_s5 + $0x2c] ss:$16 sps:$4 sm:$0xff]  }
 0x331   : > { %3625 = vmatpush1.bf16.msra.mxu0 %v20238_v32  ;;  %v20322_v32 = vld [vmem:[%s28510_s5 + $0x20] ss:$16 sps:$4 sm:$0xff]  }
 0x332   : > { %3731 = vmatpush1.bf16.msra.mxu1 %v20241_v33  ;;  %3626 = vmatprep.subr.bf16.mxu0 %v20246_v34  ;;  %v20325_v33 = vld [vmem:[%s28510_s5 + $0x28] ss:$16 sps:$4 sm:$0xff]   ;;  %v20330_v34 = vld [vmem:[%s28510_s5 + $0x44] ss:$16 sps:$4 sm:$0xff]  }
 0x333   : > { %3732 = vmatprep.subr.bf16.mxu1 %v20249_v56  ;;  %v20331_v56 = vld [vmem:[%s28510_s5 + $0x48] ss:$16 sps:$4 sm:$0xff]  }
 0x335   : > { %3627 = vmatpush1.bf16.msra.mxu0 %v20244_v35  ;;  %v20336_v35 = vld [vmem:[%s28510_s5 + $0x64] ss:$16 sps:$4 sm:$0xff]  }
 0x336   : > { %3733 = vmatpush1.bf16.msra.mxu1 %v20247_v31  ;;  %3628 = vmatprep.subr.bf16.mxu0 %v20252_v36  ;;  %v20339_v31 = vld [vmem:[%s28510_s5 + $0x6c] ss:$16 sps:$4 sm:$0xff]   ;;  %v20334_v36 = vld [vmem:[%s28510_s5 + $0x60] ss:$16 sps:$4 sm:$0xff]  }
 0x337   : > { %3734 = vmatprep.subr.bf16.mxu1 %v20255_v37  ;;  %v20337_v37 = vld [vmem:[%s28510_s5 + $0x68] ss:$16 sps:$4 sm:$0xff]  }
 0x339   : > { %3629 = vmatpush1.bf16.msra.mxu0 %v20250_v38  ;;  %v20342_v38 = vld [vmem:[%s28510_s5 + $0x84] ss:$16 sps:$4 sm:$0xff]  }
 0x33a   : > { %3735 = vmatpush1.bf16.msra.mxu1 %v20253_v39  ;;  %3630 = vmatprep.subr.bf16.mxu0 %v20258_v40  ;;  %v20340_v39 = vld [vmem:[%s28510_s5 + $0x80] ss:$16 sps:$4 sm:$0xff]   ;;  %v20343_v40 = vld [vmem:[%s28510_s5 + $0x88] ss:$16 sps:$4 sm:$0xff]  }
 0x33b   : > { %3736 = vmatprep.subr.bf16.mxu1 %v20261_v41  ;;  %v20348_v41 = vld [vmem:[%s28510_s5 + $0xa4] ss:$16 sps:$4 sm:$0xff]  }
 0x33d   : > { %3631 = vmatpush1.bf16.msra.mxu0 %v20256_v42  ;;  %v20351_v42 = vld [vmem:[%s28510_s5 + $0xac] ss:$16 sps:$4 sm:$0xff]  }
 0x33e   : > { %3737 = vmatpush1.bf16.msra.mxu1 %v20259_v43  ;;  %3632 = vmatprep.subr.bf16.mxu0 %v20264_v44  ;;  %v20346_v43 = vld [vmem:[%s28510_s5 + $0xa0] ss:$16 sps:$4 sm:$0xff]   ;;  %v20349_v44 = vld [vmem:[%s28510_s5 + $0xa8] ss:$16 sps:$4 sm:$0xff]  }
 0x33f   : > { %3738 = vmatprep.subr.bf16.mxu1 %v20267_v45  ;;  %v20354_v45 = vld [vmem:[%s28510_s5 + $0xc4] ss:$16 sps:$4 sm:$0xff]  }
 0x341   : > { %3633 = vmatpush1.bf16.msra.mxu0 %v20262_v46  ;;  %v20357_v46 = vld [vmem:[%s28510_s5 + $0xcc] ss:$16 sps:$4 sm:$0xff]  }
 0x342   : > { %3739 = vmatpush1.bf16.msra.mxu1 %v20265_v47  ;;  %3634 = vmatprep.subr.bf16.mxu0 %v20270_v48  ;;  %v20352_v47 = vld [vmem:[%s28510_s5 + $0xc0] ss:$16 sps:$4 sm:$0xff]   ;;  %v20355_v48 = vld [vmem:[%s28510_s5 + $0xc8] ss:$16 sps:$4 sm:$0xff]  }
 0x343   : > { %3740 = vmatprep.subr.bf16.mxu1 %v20273_v49  ;;  %v20360_v49 = vld [vmem:[%s28510_s5 + $0xe4] ss:$16 sps:$4 sm:$0xff]  }
 0x345   : > { %3635 = vmatpush1.bf16.msra.mxu0 %v20268_v50  ;;  %v20363_v50 = vld [vmem:[%s28510_s5 + $0xec] ss:$16 sps:$4 sm:$0xff]  }
 0x346   : > { %3741 = vmatpush1.bf16.msra.mxu1 %v20271_v51  ;;  %3636 = vmatprep.subr.bf16.mxu0 %v20276_v52  ;;  %v20358_v51 = vld [vmem:[%s28510_s5 + $0xe0] ss:$16 sps:$4 sm:$0xff]   ;;  %v20361_v52 = vld [vmem:[%s28510_s5 + $0xe8] ss:$16 sps:$4 sm:$0xff]  }
 0x347   : > { %3742 = vmatprep.subr.bf16.mxu1 %v20279_v53  ;;  %v20366_v53 = vld [vmem:[%s28510_s5 + $0x104] ss:$16 sps:$4 sm:$0xff]  }
 0x349   : > { %3637 = vmatpush1.bf16.msra.mxu0 %v20274_v54  ;;  %v20369_v54 = vld [vmem:[%s28510_s5 + $0x10c] ss:$16 sps:$4 sm:$0xff]  }
 0x34a   : > { %3743 = vmatpush1.bf16.msra.mxu1 %v20277_v55  ;;  %3638 = vmatprep.subr.bf16.mxu0 %v20282_v0  ;;  %v20364_v55 = vld [vmem:[%s28510_s5 + $0x100] ss:$16 sps:$4 sm:$0xff]   ;;  %v20367_v0 = vld [vmem:[%s28510_s5 + $0x108] ss:$16 sps:$4 sm:$0xff]  }
 0x34b   : > { %3744 = vmatprep.subr.bf16.mxu1 %v20285_v1  ;;  %v20372_v1 = vld [vmem:[%s28510_s5 + $0x124] ss:$16 sps:$4 sm:$0xff]  }
 0x34d   : > { %3639 = vmatpush1.bf16.msra.mxu0 %v20280_v2  ;;  %v20375_v2 = vld [vmem:[%s28510_s5 + $0x12c] ss:$16 sps:$4 sm:$0xff]  }
 0x34e   : > { %3745 = vmatpush1.bf16.msra.mxu1 %v20283_v3  ;;  %3640 = vmatprep.subr.bf16.mxu0 %v20288_v4  ;;  %v20370_v3 = vld [vmem:[%s28510_s5 + $0x120] ss:$16 sps:$4 sm:$0xff]   ;;  %v20373_v4 = vld [vmem:[%s28510_s5 + $0x128] ss:$16 sps:$4 sm:$0xff]  }
 0x34f   : > { %3746 = vmatprep.subr.bf16.mxu1 %v20291_v5  ;;  %v20378_v5 = vld [vmem:[%s28510_s5 + $0x144] ss:$16 sps:$4 sm:$0xff]  }
 0x351   : > { %3641 = vmatpush1.bf16.msra.mxu0 %v20286_v6  ;;  %v20381_v6 = vld [vmem:[%s28510_s5 + $0x14c] ss:$16 sps:$4 sm:$0xff]  }
 0x352   : > { %3747 = vmatpush1.bf16.msra.mxu1 %v20289_v7  ;;  %3642 = vmatprep.subr.bf16.mxu0 %v20294_v8  ;;  %v20376_v7 = vld [vmem:[%s28510_s5 + $0x140] ss:$16 sps:$4 sm:$0xff]   ;;  %v20379_v8 = vld [vmem:[%s28510_s5 + $0x148] ss:$16 sps:$4 sm:$0xff]  }
 0x353   : > { %3748 = vmatprep.subr.bf16.mxu1 %v20297_v9  ;;  %v20384_v9 = vld [vmem:[%s28510_s5 + $0x164] ss:$16 sps:$4 sm:$0xff]  }
 0x355   : > { %3643 = vmatpush1.bf16.msra.mxu0 %v20292_v10  ;;  %v20387_v10 = vld [vmem:[%s28510_s5 + $0x16c] ss:$16 sps:$4 sm:$0xff]  }
 0x356   : > { %3749 = vmatpush1.bf16.msra.mxu1 %v20295_v11  ;;  %3644 = vmatprep.subr.bf16.mxu0 %v20300_v12  ;;  %v20382_v11 = vld [vmem:[%s28510_s5 + $0x160] ss:$16 sps:$4 sm:$0xff]   ;;  %v20385_v12 = vld [vmem:[%s28510_s5 + $0x168] ss:$16 sps:$4 sm:$0xff]  }
 0x357   : > { %3750 = vmatprep.subr.bf16.mxu1 %v20303_v13  ;;  %v20390_v13 = vld [vmem:[%s28510_s5 + $0x184] ss:$16 sps:$4 sm:$0xff]  }
 0x359   : > { %3645 = vmatpush1.bf16.msra.mxu0 %v20298_v14  ;;  %v20393_v14 = vld [vmem:[%s28510_s5 + $0x18c] ss:$16 sps:$4 sm:$0xff]  }
 0x35a   : > { %3751 = vmatpush1.bf16.msra.mxu1 %v20301_v15  ;;  %3646 = vmatprep.subr.bf16.mxu0 %v20306_v16  ;;  %v20388_v15 = vld [vmem:[%s28510_s5 + $0x180] ss:$16 sps:$4 sm:$0xff]   ;;  %v20391_v16 = vld [vmem:[%s28510_s5 + $0x188] ss:$16 sps:$4 sm:$0xff]  }
 0x35b   : > { %3752 = vmatprep.subr.bf16.mxu1 %v20309_v17  ;;  %v20396_v17 = vld [vmem:[%s28510_s5 + $0x1a4] ss:$16 sps:$4 sm:$0xff]  }
 0x35d   : > { %3647 = vmatpush1.bf16.msra.mxu0 %v20304_v18  ;;  %v20399_v18 = vld [vmem:[%s28510_s5 + $0x1ac] ss:$16 sps:$4 sm:$0xff]  }
 0x35e   : > { %3753 = vmatpush1.bf16.msra.mxu1 %v20307_v19  ;;  %3648 = vmatprep.subr.bf16.mxu0 %v20312_v21  ;;  %v20394_v19 = vld [vmem:[%s28510_s5 + $0x1a0] ss:$16 sps:$4 sm:$0xff]   ;;  %v20397_v21 = vld [vmem:[%s28510_s5 + $0x1a8] ss:$16 sps:$4 sm:$0xff]  }
 0x35f   : > { %3754 = vmatprep.subr.bf16.mxu1 %v20315_v22  ;;  %v20402_v22 = vld [vmem:[%s28510_s5 + $0x1c4] ss:$16 sps:$4 sm:$0xff]  }
 0x361   : > { %3649 = vmatpush1.bf16.msra.mxu0 %v20310_v23  ;;  %v20405_v23 = vld [vmem:[%s28510_s5 + $0x1cc] ss:$16 sps:$4 sm:$0xff]  }
 0x362   : > { %3755 = vmatpush1.bf16.msra.mxu1 %v20313_v24  ;;  %4417 = vmatprep.subr.bf16.mxu0 %v20318_v25  ;;  %v20400_v24 = vld [vmem:[%s28510_s5 + $0x1c0] ss:$16 sps:$4 sm:$0xff]   ;;  %v20403_v25 = vld [vmem:[%s28510_s5 + $0x1c8] ss:$16 sps:$4 sm:$0xff]  }
 0x363   : > { %4523 = vmatprep.subr.bf16.mxu1 %v20321_v28  ;;  %v20408_v28 = vld [vmem:[%s28510_s5 + $0x1e4] ss:$16 sps:$4 sm:$0xff]  }
 0x364   : > { %3651 = vmatmul.mubr.bf16.vlgmr.msra.gmra.mrb[28].mxu0 %v23978_v29 }
 0x365   : > { %3757 = vmatmul.mubr.bf16.vlgmr.msra.gmra.mrb[28].mxu1 %v23978_v29  ;;  %3660 = vmatprep.mubr.bf16.mxu0 %v23994_v63  ;;  %v20333_v29 = vld [vmem:[%s28510_s5 + $0x4c] ss:$16 sps:$4 sm:$0xff]  }
 0x366   : > { %3766 = vmatprep.mubr.bf16.mxu1 %v23994_v63  ;;  %4418 = vmatpush1.bf16.msra.mxu0 %v20316_v58  ;;  %v20328_v63 = vld [vmem:[%s28510_s5 + $0x40] ss:$16 sps:$4 sm:$0xff]   ;;  %v20411_v58 = vld [vmem:[%s28510_s5 + $0x1ec] ss:$16 sps:$4 sm:$0xff]  }
 0x367   : > { %4524 = vmatpush1.bf16.msra.mxu1 %v20319_v26  ;;  %4419 = vmatprep.subr.bf16.mxu0 %v20324_v27  ;;  %v20406_v26 = vld [vmem:[%s28510_s5 + $0x1e0] ss:$16 sps:$4 sm:$0xff]   ;;  %v20409_v27 = vld [vmem:[%s28510_s5 + $0x1e8] ss:$16 sps:$4 sm:$0xff]  }
 0x368   : > { %4525 = vmatprep.subr.bf16.mxu1 %v20327_v30  ;;  %v20414_v30 = vld [vmem:[%s28510_s5 + $0x204] ss:$16 sps:$4 sm:$0xff]  }
 0x36a   : > { %4420 = vmatpush1.bf16.msra.mxu0 %v20322_v32  ;;  %v20417_v32 = vld [vmem:[%s28510_s5 + $0x20c] ss:$16 sps:$4 sm:$0xff]  }
 0x36b   : > { %4526 = vmatpush1.bf16.msra.mxu1 %v20325_v33  ;;  %4421 = vmatprep.subr.bf16.mxu0 %v20330_v34 }
 0x36c   : > { %3661 = vmatmul.mubr.bf16.gmra.mrb[32].mxu0 %v23990_v57  ;;  %4527 = vmatprep.subr.bf16.mxu1 %v20333_v29 }
 0x36d   : > { %3767 = vmatmul.mubr.bf16.gmra.mrb[32].mxu1 %v23990_v57  ;;  %v20345_v57 = vld [vmem:[%s28510_s5 + $0x8c] ss:$16 sps:$4 sm:$0xff]  }
 0x36e   : > { %4422 = vmatpush1.bf16.msra.mxu0 %v20328_v63 }
 0x36f   : > { %4528 = vmatpush1.bf16.msra.mxu1 %v20331_v56  ;;  %4423 = vmatprep.subr.bf16.mxu0 %v20336_v35 }
 0x370   : > { %4529 = vmatprep.subr.bf16.mxu1 %v20339_v31 }
 0x372   : > { %4424 = vmatpush1.bf16.msra.mxu0 %v20334_v36 }
 0x373   : > { %4530 = vmatpush1.bf16.msra.mxu1 %v20337_v37  ;;  %4425 = vmatprep.subr.bf16.mxu0 %v20342_v38 }
 0x374   : > { %4531 = vmatprep.subr.bf16.mxu1 %v20345_v57 }
 0x376   : > { %4426 = vmatpush1.bf16.msra.mxu0 %v20340_v39  ;;  %v20412_v39 = vld [vmem:[%s28510_s5 + $0x200] ss:$16 sps:$4 sm:$0xff]  }
 0x377   : > { %4532 = vmatpush1.bf16.msra.mxu1 %v20343_v40  ;;  %4427 = vmatprep.subr.bf16.mxu0 %v20348_v41  ;;  %v20415_v40 = vld [vmem:[%s28510_s5 + $0x208] ss:$16 sps:$4 sm:$0xff]  }
 0x378   : > { %4533 = vmatprep.subr.bf16.mxu1 %v20351_v42  ;;  %v20420_v42 = vld [vmem:[%s28510_s5 + $0x224] ss:$16 sps:$4 sm:$0xff]  }
 0x37a   : > { %4428 = vmatpush1.bf16.msra.mxu0 %v20346_v43  ;;  %v20423_v43 = vld [vmem:[%s28510_s5 + $0x22c] ss:$16 sps:$4 sm:$0xff]  }
 0x37b   : > { %4534 = vmatpush1.bf16.msra.mxu1 %v20349_v44  ;;  %4429 = vmatprep.subr.bf16.mxu0 %v20354_v45  ;;  %v20418_v44 = vld [vmem:[%s28510_s5 + $0x220] ss:$16 sps:$4 sm:$0xff]   ;;  %v20421_v45 = vld [vmem:[%s28510_s5 + $0x228] ss:$16 sps:$4 sm:$0xff]  }
 0x37c   : > { %4535 = vmatprep.subr.bf16.mxu1 %v20357_v46 }
 0x37e   : > { %4430 = vmatpush1.bf16.msra.mxu0 %v20352_v47 }
 0x37f   : > { %4536 = vmatpush1.bf16.msra.mxu1 %v20355_v48  ;;  %4431 = vmatprep.subr.bf16.mxu0 %v20360_v49  ;;  %v20426_v48 = vld [vmem:[%s28510_s5 + $0x244] ss:$16 sps:$4 sm:$0xff]   ;;  %v20429_v49 = vld [vmem:[%s28510_s5 + $0x24c] ss:$16 sps:$4 sm:$0xff]  }
 0x380   : > { %4537 = vmatprep.subr.bf16.mxu1 %v20363_v50 }
 0x382   : > { %4432 = vmatpush1.bf16.msra.mxu0 %v20358_v51 }
 0x383   : > { %4538 = vmatpush1.bf16.msra.mxu1 %v20361_v52  ;;  %4433 = vmatprep.subr.bf16.mxu0 %v20366_v53 }
 0x384   : > { %4539 = vmatprep.subr.bf16.mxu1 %v20369_v54 }
 0x386   : > { %4434 = vmatpush1.bf16.msra.mxu0 %v20364_v55 }
 0x387   : > { %4540 = vmatpush1.bf16.msra.mxu1 %v20367_v0  ;;  %4435 = vmatprep.subr.bf16.mxu0 %v20372_v1 }
 0x388   : > { %4541 = vmatprep.subr.bf16.mxu1 %v20375_v2  ;;  %v20424_v2 = vld [vmem:[%s28510_s5 + $0x240] ss:$16 sps:$4 sm:$0xff]  }
 0x38a   : > { %4436 = vmatpush1.bf16.msra.mxu0 %v20370_v3  ;;  %v20427_v3 = vld [vmem:[%s28510_s5 + $0x248] ss:$16 sps:$4 sm:$0xff]  }
 0x38b   : > { %4542 = vmatpush1.bf16.msra.mxu1 %v20373_v4  ;;  %4437 = vmatprep.subr.bf16.mxu0 %v20378_v5 }
 0x38c   : > { %4543 = vmatprep.subr.bf16.mxu1 %v20381_v6  ;;  %v20432_v6 = vld [vmem:[%s28510_s5 + $0x264] ss:$16 sps:$4 sm:$0xff]  }
 0x38e   : > { %4438 = vmatpush1.bf16.msra.mxu0 %v20376_v7  ;;  %v20435_v7 = vld [vmem:[%s28510_s5 + $0x26c] ss:$16 sps:$4 sm:$0xff]  }
 0x38f   : > { %4544 = vmatpush1.bf16.msra.mxu1 %v20379_v8  ;;  %4439 = vmatprep.subr.bf16.mxu0 %v20384_v9  ;;  %v20430_v8 = vld [vmem:[%s28510_s5 + $0x260] ss:$16 sps:$4 sm:$0xff]   ;;  %v20433_v9 = vld [vmem:[%s28510_s5 + $0x268] ss:$16 sps:$4 sm:$0xff]  }
 0x390   : > { %4545 = vmatprep.subr.bf16.mxu1 %v20387_v10 }
 0x392   : > { %4440 = vmatpush1.bf16.msra.mxu0 %v20382_v11 }
 0x393   : > { %4546 = vmatpush1.bf16.msra.mxu1 %v20385_v12  ;;  %4441 = vmatprep.subr.bf16.mxu0 %v20390_v13  ;;  %v20438_v12 = vld [vmem:[%s28510_s5 + $0x284] ss:$16 sps:$4 sm:$0xff]   ;;  %v20441_v13 = vld [vmem:[%s28510_s5 + $0x28c] ss:$16 sps:$4 sm:$0xff]  }
 0x394   : > { %4547 = vmatprep.subr.bf16.mxu1 %v20393_v14 }
 0x396   : > { %4442 = vmatpush1.bf16.msra.mxu0 %v20388_v15 }
 0x397   : > { %4548 = vmatpush1.bf16.msra.mxu1 %v20391_v16  ;;  %4443 = vmatprep.subr.bf16.mxu0 %v20396_v17 }
 0x398   : > { %4549 = vmatprep.subr.bf16.mxu1 %v20399_v18 }
 0x39a   : > { %4444 = vmatpush1.bf16.msra.mxu0 %v20394_v19 }
 0x39b   : > { %4550 = vmatpush1.bf16.msra.mxu1 %v20397_v21  ;;  %4445 = vmatprep.subr.bf16.mxu0 %v20402_v22 }
 0x39c   : > { %4551 = vmatprep.subr.bf16.mxu1 %v20405_v23  ;;  %v20436_v23 = vld [vmem:[%s28510_s5 + $0x280] ss:$16 sps:$4 sm:$0xff]  }
 0x39e   : > { %4446 = vmatpush1.bf16.msra.mxu0 %v20400_v24  ;;  %v20439_v24 = vld [vmem:[%s28510_s5 + $0x288] ss:$16 sps:$4 sm:$0xff]  }
 0x39f   : > { %4552 = vmatpush1.bf16.msra.mxu1 %v20403_v25  ;;  %4447 = vmatprep.subr.bf16.mxu0 %v20408_v28 }
 0x3a0   : > { %4553 = vmatprep.subr.bf16.mxu1 %v20411_v58  ;;  %v20444_v58 = vld [vmem:[%s28510_s5 + $0x2a4] ss:$16 sps:$4 sm:$0xff]  }
 0x3a2   : > { %4448 = vmatpush1.bf16.msra.mxu0 %v20406_v26  ;;  %v20447_v26 = vld [vmem:[%s28510_s5 + $0x2ac] ss:$16 sps:$4 sm:$0xff]  }
 0x3a3   : > { %4554 = vmatpush1.bf16.msra.mxu1 %v20409_v27  ;;  %4470 = vmatprep.subr.bf16.mxu0 %v20414_v30  ;;  %v20442_v27 = vld [vmem:[%s28510_s5 + $0x2a0] ss:$16 sps:$4 sm:$0xff]   ;;  %v20445_v30 = vld [vmem:[%s28510_s5 + $0x2a8] ss:$16 sps:$4 sm:$0xff]  }
 0x3a4   : > { %4576 = vmatprep.subr.bf16.mxu1 %v20417_v32 }
 0x3a7   : > { %v2474_v33 = vpop.f32.mrb[12].mxu0  ;;  %v2527_v34 = vpop.f32.mrb[12].mxu1 }
 0x3a8   : > { %v2476_v29 = vpop.f32.mrb[13].mxu0  ;;  %v2529_v63 = vpop.f32.mrb[13].mxu1 }
 0x3a9   : > { %v2478_v56 = vpop.f32.mrb[14].mxu0  ;;  %v2531_v35 = vpop.f32.mrb[14].mxu1 }
 0x3aa   : > { %v2546_v31 = vpack.c.bf16 %v2478_v56, %v2474_v33  ;;  %v2480_v36 = vpop.f32.mrb[15].mxu0  ;;  %v24632_v37 = vpack.c.bf16 %v2531_v35, %v2527_v34  ;;  %v2533_v38 = vpop.f32.mrb[15].mxu1  ;;  %v20450_v34 = vld [vmem:[%s28510_s5 + $0x2c4] ss:$16 sps:$4 sm:$0xff]  }
 0x3ab   : > { %v2547_v57 = vpack.c.bf16 %v2480_v36, %v2476_v29  ;;  %v2549_v41 = vpack.c.bf16 %v2533_v38, %v2529_v63  ;;  %v20453_v29 = vld [vmem:[%s28510_s5 + $0x2cc] ss:$16 sps:$4 sm:$0xff]  }
 0x3ad   : > { %4449 = vmatprep.mubr.bf16.mxu0 %v2547_v57  ;;  %4555 = vmatprep.mubr.bf16.mxu1 %v2547_v57 }
 0x3ae   : > { %4450 = vmatmul.mubr.bf16.vlgmr.msra.gmra.mrb[28].mxu0 %v2546_v31  ;;  %4556 = vmatmul.mubr.bf16.vlgmr.msra.gmra.mrb[28].mxu1 %v2546_v31 }
 0x3af   : > { %4471 = vmatpush1.bf16.msra.mxu0 %v20412_v39  ;;  %4577 = vmatpush1.bf16.msra.mxu1 %v20415_v40  ;;  %v2484_v46 = vpop.f32.mrb[16].mxu0  ;;  %v2537_v47 = vpop.f32.mrb[16].mxu1  ;;  %v20448_v40 = vld [vmem:[%s28510_s5 + $0x2c0] ss:$16 sps:$4 sm:$0xff]  }
 0x3b0   : > { %4472 = vmatprep.subr.bf16.mxu0 %v20420_v42  ;;  %4578 = vmatprep.subr.bf16.mxu1 %v20423_v43  ;;  %v2486_v50 = vpop.f32.mrb[17].mxu0  ;;  %v2539_v51 = vpop.f32.mrb[17].mxu1 }
 0x3b1   : > { %v2488_v52 = vpop.f32.mrb[18].mxu0  ;;  %v2541_v53 = vpop.f32.mrb[18].mxu1 }
 0x3b2   : > { %v2550_v54 = vpack.c.bf16 %v2488_v52, %v2484_v46  ;;  %v2490_v55 = vpop.f32.mrb[19].mxu0  ;;  %v24658_v0 = vpack.c.bf16 %v2541_v53, %v2537_v47  ;;  %v2543_v1 = vpop.f32.mrb[19].mxu1  ;;  %v20454_v46 = vld [vmem:[%s28510_s5 + $0x2e0] ss:$16 sps:$4 sm:$0xff]   ;;  %v20457_v47 = vld [vmem:[%s28510_s5 + $0x2e8] ss:$16 sps:$4 sm:$0xff]  }
 0x3b3   : > { %4473 = vmatpush1.bf16.msra.mxu0 %v20418_v44  ;;  %4579 = vmatpush1.bf16.msra.mxu1 %v20421_v45  ;;  %v2551_v4 = vpack.c.bf16 %v2490_v55, %v2486_v50  ;;  %v24666_v5 = vpack.c.bf16 %v2543_v1, %v2539_v51  ;;  %v20456_v44 = vld [vmem:[%s28510_s5 + $0x2e4] ss:$16 sps:$4 sm:$0xff]   ;;  %v20459_v45 = vld [vmem:[%s28510_s5 + $0x2ec] ss:$16 sps:$4 sm:$0xff]   ;;  %v20460_v50 = vld [vmem:[%s28510_s5 + $0x300] ss:$16 sps:$4 sm:$0xff]  }
 0x3b4   : > { %4474 = vmatprep.subr.bf16.mxu0 %v20426_v48  ;;  %4580 = vmatprep.subr.bf16.mxu1 %v20429_v49  ;;  %v20462_v48 = vld [vmem:[%s28510_s5 + $0x304] ss:$16 sps:$4 sm:$0xff]   ;;  %v20465_v49 = vld [vmem:[%s28510_s5 + $0x30c] ss:$16 sps:$4 sm:$0xff]   ;;  %v20463_v51 = vld [vmem:[%s28510_s5 + $0x308] ss:$16 sps:$4 sm:$0xff]  }
 0x3b5   : > { %4459 = vmatprep.mubr.bf16.mxu0 %v2551_v4  ;;  %4565 = vmatprep.mubr.bf16.mxu1 %v2551_v4  ;;  %v20468_v52 = vld [vmem:[%s28510_s5 + $0x324] ss:$16 sps:$4 sm:$0xff]   ;;  %v20471_v53 = vld [vmem:[%s28510_s5 + $0x32c] ss:$16 sps:$4 sm:$0xff]   ;;  %v20469_v55 = vld [vmem:[%s28510_s5 + $0x328] ss:$16 sps:$4 sm:$0xff]  }
 0x3b6   : > { %4460 = vmatmul.mubr.bf16.gmra.mrb[32].mxu0 %v2550_v54  ;;  %4566 = vmatmul.mubr.bf16.gmra.mrb[32].mxu1 %v2550_v54  ;;  %v20466_v54 = vld [vmem:[%s28510_s5 + $0x320] ss:$16 sps:$4 sm:$0xff]   ;;  %v20474_v1 = vld [vmem:[%s28510_s5 + $0x344] ss:$16 sps:$4 sm:$0xff]   ;;  %v20475_v4 = vld [vmem:[%s28510_s5 + $0x348] ss:$16 sps:$4 sm:$0xff]  }
 0x3b7   : > { %4475 = vmatpush1.bf16.msra.mxu0 %v20424_v2  ;;  %4581 = vmatpush1.bf16.msra.mxu1 %v20427_v3  ;;  %v2588_v10 = vpop.f32.mrb[20].mxu0  ;;  %v2641_v11 = vpop.f32.mrb[20].mxu1  ;;  %v20477_v2 = vld [vmem:[%s28510_s5 + $0x34c] ss:$16 sps:$4 sm:$0xff]   ;;  %v20472_v3 = vld [vmem:[%s28510_s5 + $0x340] ss:$16 sps:$4 sm:$0xff]  }
 0x3b8   : > { %4476 = vmatprep.subr.bf16.mxu0 %v20432_v6  ;;  %4582 = vmatprep.subr.bf16.mxu1 %v20435_v7  ;;  %v2590_v14 = vpop.f32.mrb[21].mxu0  ;;  %v2643_v15 = vpop.f32.mrb[21].mxu1  ;;  %v20480_v6 = vld [vmem:[%s28510_s5 + $0x364] ss:$16 sps:$4 sm:$0xff]   ;;  %v20483_v7 = vld [vmem:[%s28510_s5 + $0x36c] ss:$16 sps:$4 sm:$0xff]  }
 0x3b9   : > { %v2592_v16 = vpop.f32.mrb[22].mxu0  ;;  %4502 = vmatprep.mubr.bf16.mxu0 %v2549_v41  ;;  %4608 = vmatprep.mubr.bf16.mxu1 %v2549_v41  ;;  %v2645_v17 = vpop.f32.mrb[22].mxu1  ;;  %v20451_v41 = vld [vmem:[%s28510_s5 + $0x2c8] ss:$16 sps:$4 sm:$0xff]  }
 0x3ba   : > { %v24686_v18 = vpack.c.bf16 %v2592_v16, %v2588_v10  ;;  %v2594_v19 = vpop.f32.mrb[23].mxu0  ;;  %v24688_v21 = vpack.c.bf16 %v2645_v17, %v2641_v11  ;;  %v2647_v22 = vpop.f32.mrb[23].mxu1  ;;  %v20486_v10 = vld [vmem:[%s28510_s5 + $0x384] ss:$16 sps:$4 sm:$0xff]   ;;  %v20489_v11 = vld [vmem:[%s28510_s5 + $0x38c] ss:$16 sps:$4 sm:$0xff]  }
 0x3bb   : > { %4477 = vmatpush1.bf16.msra.mxu0 %v20430_v8  ;;  %4583 = vmatpush1.bf16.msra.mxu1 %v20433_v9  ;;  %v24696_v25 = vpack.c.bf16 %v2594_v19, %v2590_v14  ;;  %v24698_v28 = vpack.c.bf16 %v2647_v22, %v2643_v15  ;;  %v20478_v8 = vld [vmem:[%s28510_s5 + $0x360] ss:$16 sps:$4 sm:$0xff]   ;;  %v20481_v9 = vld [vmem:[%s28510_s5 + $0x368] ss:$16 sps:$4 sm:$0xff]   ;;  %v20492_v14 = vld [vmem:[%s28510_s5 + $0x3a4] ss:$16 sps:$4 sm:$0xff]  }
 0x3bc   : > { %4478 = vmatprep.subr.bf16.mxu0 %v20438_v12  ;;  %4584 = vmatprep.subr.bf16.mxu1 %v20441_v13  ;;  %v20484_v12 = vld [vmem:[%s28510_s5 + $0x380] ss:$16 sps:$4 sm:$0xff]   ;;  %v20487_v13 = vld [vmem:[%s28510_s5 + $0x388] ss:$16 sps:$4 sm:$0xff]   ;;  %v20495_v15 = vld [vmem:[%s28510_s5 + $0x3ac] ss:$16 sps:$4 sm:$0xff]  }
 0x3bd   : > { %v20490_v16 = vld [vmem:[%s28510_s5 + $0x3a0] ss:$16 sps:$4 sm:$0xff]   ;;  %v20493_v17 = vld [vmem:[%s28510_s5 + $0x3a8] ss:$16 sps:$4 sm:$0xff]   ;;  %v20498_v19 = vld [vmem:[%s28510_s5 + $0x3c4] ss:$16 sps:$4 sm:$0xff]  }
 0x3be   : > { %v20501_v22 = vld [vmem:[%s28510_s5 + $0x3cc] ss:$16 sps:$4 sm:$0xff]  }
 0x3bf   : > { %4479 = vmatpush1.bf16.msra.mxu0 %v20436_v23  ;;  %4585 = vmatpush1.bf16.msra.mxu1 %v20439_v24  ;;  %v2598_v32 = vpop.f32.mrb[24].mxu0  ;;  %v2651_v33 = vpop.f32.mrb[24].mxu1  ;;  %v20496_v23 = vld [vmem:[%s28510_s5 + $0x3c0] ss:$16 sps:$4 sm:$0xff]   ;;  %v20499_v24 = vld [vmem:[%s28510_s5 + $0x3c8] ss:$16 sps:$4 sm:$0xff]  }
 0x3c0   : > { %4480 = vmatprep.subr.bf16.mxu0 %v20444_v58  ;;  %4586 = vmatprep.subr.bf16.mxu1 %v20447_v26  ;;  %v2600_v63 = vpop.f32.mrb[25].mxu0  ;;  %v2653_v56 = vpop.f32.mrb[25].mxu1  ;;  %v20504_v58 = vld [vmem:[%s28510_s5 + $0x3e4] ss:$16 sps:$4 sm:$0xff]   ;;  %v20507_v26 = vld [vmem:[%s28510_s5 + $0x3ec] ss:$16 sps:$4 sm:$0xff]  }
 0x3c1   : > { %v2602_v35 = vpop.f32.mrb[26].mxu0  ;;  %v2655_v31 = vpop.f32.mrb[26].mxu1 }
 0x3c2   : > { %v24718_v36 = vpack.c.bf16 %v2602_v35, %v2598_v32  ;;  %v2604_v38 = vpop.f32.mrb[27].mxu0  ;;  %v24720_v57 = vpack.c.bf16 %v2655_v31, %v2651_v33  ;;  %v2657_v39 = vpop.f32.mrb[27].mxu1  ;;  %v20510_v32 = vld [vmem:[%s28510_s5 + $0x804] ss:$16 sps:$4 sm:$0xff]   ;;  %v20513_v33 = vld [vmem:[%s28510_s5 + $0x80c] ss:$16 sps:$4 sm:$0xff]  }
 0x3c3   : > { %4481 = vmatpush1.bf16.msra.mxu0 %v20442_v27  ;;  %4587 = vmatpush1.bf16.msra.mxu1 %v20445_v30  ;;  %v24728_v42 = vpack.c.bf16 %v2604_v38, %v2600_v63  ;;  %v24730_v43 = vpack.c.bf16 %v2657_v39, %v2653_v56  ;;  %v20502_v27 = vld [vmem:[%s28510_s5 + $0x3e0] ss:$16 sps:$4 sm:$0xff]   ;;  %v20505_v30 = vld [vmem:[%s28510_s5 + $0x3e8] ss:$16 sps:$4 sm:$0xff]   ;;  %v20516_v63 = vld [vmem:[%s28510_s5 + $0x824] ss:$16 sps:$4 sm:$0xff]  }
 0x3c4   : > { %4482 = vmatprep.subr.bf16.mxu0 %v20450_v34  ;;  %4588 = vmatprep.subr.bf16.mxu1 %v20453_v29  ;;  %v20508_v34 = vld [vmem:[%s28510_s5 + $0x800] ss:$16 sps:$4 sm:$0xff]   ;;  %v20511_v29 = vld [vmem:[%s28510_s5 + $0x808] ss:$16 sps:$4 sm:$0xff]   ;;  %v20519_v56 = vld [vmem:[%s28510_s5 + $0x82c] ss:$16 sps:$4 sm:$0xff]  }
 0x3c5   : > { %v20514_v35 = vld [vmem:[%s28510_s5 + $0x820] ss:$16 sps:$4 sm:$0xff]   ;;  %v20517_v31 = vld [vmem:[%s28510_s5 + $0x828] ss:$16 sps:$4 sm:$0xff]  }
 0x3c6   : > { %v20520_v38 = vld [vmem:[%s28510_s5 + $0x840] ss:$16 sps:$4 sm:$0xff]   ;;  %v20523_v39 = vld [vmem:[%s28510_s5 + $0x848] ss:$16 sps:$4 sm:$0xff]  }
 0x3c7   : > { %4483 = vmatpush1.bf16.msra.mxu0 %v20448_v40  ;;  %4589 = vmatpush1.bf16.msra.mxu1 %v20451_v41  ;;  %v20528_v40 = vld [vmem:[%s28510_s5 + $0x864] ss:$16 sps:$4 sm:$0xff]   ;;  %v20531_v41 = vld [vmem:[%s28510_s5 + $0x86c] ss:$16 sps:$4 sm:$0xff]  }
 0x3c8   : > { %4484 = vmatprep.subr.bf16.mxu0 %v20456_v44  ;;  %4590 = vmatprep.subr.bf16.mxu1 %v20459_v45  ;;  %v20526_v44 = vld [vmem:[%s28510_s5 + $0x860] ss:$16 sps:$4 sm:$0xff]   ;;  %v20529_v45 = vld [vmem:[%s28510_s5 + $0x868] ss:$16 sps:$4 sm:$0xff]  }
 0x3cb   : > { %4485 = vmatpush1.bf16.msra.mxu0 %v20454_v46  ;;  %4591 = vmatpush1.bf16.msra.mxu1 %v20457_v47  ;;  %v20532_v46 = vld [vmem:[%s28510_s5 + $0x880] ss:$16 sps:$4 sm:$0xff]   ;;  %v20535_v47 = vld [vmem:[%s28510_s5 + $0x888] ss:$16 sps:$4 sm:$0xff]  }
 0x3cc   : > { %4486 = vmatprep.subr.bf16.mxu0 %v20462_v48  ;;  %4592 = vmatprep.subr.bf16.mxu1 %v20465_v49  ;;  %v20540_v48 = vld [vmem:[%s28510_s5 + $0x8a4] ss:$16 sps:$4 sm:$0xff]   ;;  %v20543_v49 = vld [vmem:[%s28510_s5 + $0x8ac] ss:$16 sps:$4 sm:$0xff]  }
 0x3cf   : > { %4487 = vmatpush1.bf16.msra.mxu0 %v20460_v50  ;;  %4593 = vmatpush1.bf16.msra.mxu1 %v20463_v51  ;;  %v20538_v50 = vld [vmem:[%s28510_s5 + $0x8a0] ss:$16 sps:$4 sm:$0xff]   ;;  %v20541_v51 = vld [vmem:[%s28510_s5 + $0x8a8] ss:$16 sps:$4 sm:$0xff]  }
 0x3d0   : > { %4488 = vmatprep.subr.bf16.mxu0 %v20468_v52  ;;  %4594 = vmatprep.subr.bf16.mxu1 %v20471_v53  ;;  %v20546_v52 = vld [vmem:[%s28510_s5 + $0x8c4] ss:$16 sps:$4 sm:$0xff]   ;;  %v20549_v53 = vld [vmem:[%s28510_s5 + $0x8cc] ss:$16 sps:$4 sm:$0xff]  }
 0x3d3   : > { %4489 = vmatpush1.bf16.msra.mxu0 %v20466_v54  ;;  %4595 = vmatpush1.bf16.msra.mxu1 %v20469_v55  ;;  %v20544_v54 = vld [vmem:[%s28510_s5 + $0x8c0] ss:$16 sps:$4 sm:$0xff]   ;;  %v20547_v55 = vld [vmem:[%s28510_s5 + $0x8c8] ss:$16 sps:$4 sm:$0xff]  }
 0x3d4   : > { %4490 = vmatprep.subr.bf16.mxu0 %v20474_v1  ;;  %4596 = vmatprep.subr.bf16.mxu1 %v20477_v2  ;;  %v20552_v1 = vld [vmem:[%s28510_s5 + $0x8e4] ss:$16 sps:$4 sm:$0xff]   ;;  %v20555_v2 = vld [vmem:[%s28510_s5 + $0x8ec] ss:$16 sps:$4 sm:$0xff]  }
 0x3d7   : > { %4491 = vmatpush1.bf16.msra.mxu0 %v20472_v3  ;;  %4597 = vmatpush1.bf16.msra.mxu1 %v20475_v4  ;;  %v20550_v3 = vld [vmem:[%s28510_s5 + $0x8e0] ss:$16 sps:$4 sm:$0xff]   ;;  %v20553_v4 = vld [vmem:[%s28510_s5 + $0x8e8] ss:$16 sps:$4 sm:$0xff]  }
 0x3d8   : > { %4492 = vmatprep.subr.bf16.mxu0 %v20480_v6  ;;  %4598 = vmatprep.subr.bf16.mxu1 %v20483_v7  ;;  %v20558_v6 = vld [vmem:[%s28510_s5 + $0x904] ss:$16 sps:$4 sm:$0xff]   ;;  %v20561_v7 = vld [vmem:[%s28510_s5 + $0x90c] ss:$16 sps:$4 sm:$0xff]  }
 0x3db   : > { %4493 = vmatpush1.bf16.msra.mxu0 %v20478_v8  ;;  %4599 = vmatpush1.bf16.msra.mxu1 %v20481_v9  ;;  %v20556_v8 = vld [vmem:[%s28510_s5 + $0x900] ss:$16 sps:$4 sm:$0xff]   ;;  %v20559_v9 = vld [vmem:[%s28510_s5 + $0x908] ss:$16 sps:$4 sm:$0xff]  }
 0x3dc   : > { %4494 = vmatprep.subr.bf16.mxu0 %v20486_v10  ;;  %4600 = vmatprep.subr.bf16.mxu1 %v20489_v11  ;;  %v20564_v10 = vld [vmem:[%s28510_s5 + $0x924] ss:$16 sps:$4 sm:$0xff]   ;;  %v20567_v11 = vld [vmem:[%s28510_s5 + $0x92c] ss:$16 sps:$4 sm:$0xff]  }
 0x3df   : > { %4495 = vmatpush1.bf16.msra.mxu0 %v20484_v12  ;;  %4601 = vmatpush1.bf16.msra.mxu1 %v20487_v13  ;;  %v20562_v12 = vld [vmem:[%s28510_s5 + $0x920] ss:$16 sps:$4 sm:$0xff]   ;;  %v20565_v13 = vld [vmem:[%s28510_s5 + $0x928] ss:$16 sps:$4 sm:$0xff]  }
 0x3e0   : > { %4496 = vmatprep.subr.bf16.mxu0 %v20492_v14  ;;  %4602 = vmatprep.subr.bf16.mxu1 %v20495_v15  ;;  %v20570_v14 = vld [vmem:[%s28510_s5 + $0x944] ss:$16 sps:$4 sm:$0xff]   ;;  %v20573_v15 = vld [vmem:[%s28510_s5 + $0x94c] ss:$16 sps:$4 sm:$0xff]  }
 0x3e3   : > { %4497 = vmatpush1.bf16.msra.mxu0 %v20490_v16  ;;  %4603 = vmatpush1.bf16.msra.mxu1 %v20493_v17  ;;  %v20568_v16 = vld [vmem:[%s28510_s5 + $0x940] ss:$16 sps:$4 sm:$0xff]   ;;  %v20571_v17 = vld [vmem:[%s28510_s5 + $0x948] ss:$16 sps:$4 sm:$0xff]  }
 0x3e4   : > { %4498 = vmatprep.subr.bf16.mxu0 %v20498_v19  ;;  %4604 = vmatprep.subr.bf16.mxu1 %v20501_v22  ;;  %v20576_v19 = vld [vmem:[%s28510_s5 + $0x964] ss:$16 sps:$4 sm:$0xff]   ;;  %v20579_v22 = vld [vmem:[%s28510_s5 + $0x96c] ss:$16 sps:$4 sm:$0xff]  }
 0x3e7   : > { %4499 = vmatpush1.bf16.msra.mxu0 %v20496_v23  ;;  %4605 = vmatpush1.bf16.msra.mxu1 %v20499_v24  ;;  %v20574_v23 = vld [vmem:[%s28510_s5 + $0x960] ss:$16 sps:$4 sm:$0xff]   ;;  %v20577_v24 = vld [vmem:[%s28510_s5 + $0x968] ss:$16 sps:$4 sm:$0xff]  }
 0x3e8   : > { %4500 = vmatprep.subr.bf16.mxu0 %v20504_v58  ;;  %4606 = vmatprep.subr.bf16.mxu1 %v20507_v26  ;;  %v20582_v58 = vld [vmem:[%s28510_s5 + $0x984] ss:$16 sps:$4 sm:$0xff]   ;;  %v20585_v26 = vld [vmem:[%s28510_s5 + $0x98c] ss:$16 sps:$4 sm:$0xff]  }
 0x3eb   : > { %4501 = vmatpush1.bf16.msra.mxu0 %v20502_v27  ;;  %4607 = vmatpush1.bf16.msra.mxu1 %v20505_v30  ;;  %v20580_v27 = vld [vmem:[%s28510_s5 + $0x980] ss:$16 sps:$4 sm:$0xff]   ;;  %v20583_v30 = vld [vmem:[%s28510_s5 + $0x988] ss:$16 sps:$4 sm:$0xff]  }
 0x3ec   : > { %5398 = vmatprep.subr.bf16.mxu0 %v20510_v32  ;;  %5504 = vmatprep.subr.bf16.mxu1 %v20513_v33  ;;  %v20588_v32 = vld [vmem:[%s28510_s5 + $0x9a4] ss:$16 sps:$4 sm:$0xff]   ;;  %v20591_v33 = vld [vmem:[%s28510_s5 + $0x9ac] ss:$16 sps:$4 sm:$0xff]  }
 0x3ee   : > { %4503 = vmatmul.mubr.bf16.vlgmr.msra.gmra.mrb[28].mxu0 %v24632_v37  ;;  %4609 = vmatmul.mubr.bf16.vlgmr.msra.gmra.mrb[28].mxu1 %v24632_v37  ;;  %v20522_v37 = vld [vmem:[%s28510_s5 + $0x844] ss:$16 sps:$4 sm:$0xff]  }
 0x3ef   : > { %4512 = vmatprep.mubr.bf16.mxu0 %v24666_v5  ;;  %4618 = vmatprep.mubr.bf16.mxu1 %v24666_v5  ;;  %v20525_v5 = vld [vmem:[%s28510_s5 + $0x84c] ss:$16 sps:$4 sm:$0xff]  }
 0x3f0   : > { %5399 = vmatpush1.bf16.msra.mxu0 %v20508_v34  ;;  %5505 = vmatpush1.bf16.msra.mxu1 %v20511_v29  ;;  %v20586_v34 = vld [vmem:[%s28510_s5 + $0x9a0] ss:$16 sps:$4 sm:$0xff]   ;;  %v20589_v29 = vld [vmem:[%s28510_s5 + $0x9a8] ss:$16 sps:$4 sm:$0xff]  }
 0x3f1   : > { %5400 = vmatprep.subr.bf16.mxu0 %v20516_v63  ;;  %5506 = vmatprep.subr.bf16.mxu1 %v20519_v56  ;;  %v20594_v63 = vld [vmem:[%s28510_s5 + $0x9c4] ss:$16 sps:$4 sm:$0xff]   ;;  %v20597_v56 = vld [vmem:[%s28510_s5 + $0x9cc] ss:$16 sps:$4 sm:$0xff]  }
 0x3f4   : > { %5401 = vmatpush1.bf16.msra.mxu0 %v20514_v35  ;;  %5507 = vmatpush1.bf16.msra.mxu1 %v20517_v31  ;;  %v20592_v35 = vld [vmem:[%s28510_s5 + $0x9c0] ss:$16 sps:$4 sm:$0xff]   ;;  %v20595_v31 = vld [vmem:[%s28510_s5 + $0x9c8] ss:$16 sps:$4 sm:$0xff]  }
 0x3f5   : > { %5402 = vmatprep.subr.bf16.mxu0 %v20522_v37  ;;  %5508 = vmatprep.subr.bf16.mxu1 %v20525_v5  ;;  %v20600_v37 = vld [vmem:[%s28510_s5 + $0x9e4] ss:$16 sps:$4 sm:$0xff]   ;;  %v20603_v5 = vld [vmem:[%s28510_s5 + $0x9ec] ss:$16 sps:$4 sm:$0xff]  }
 0x3f6   : > { %4513 = vmatmul.mubr.bf16.gmra.mrb[32].mxu0 %v24658_v0  ;;  %4619 = vmatmul.mubr.bf16.gmra.mrb[32].mxu1 %v24658_v0  ;;  %v20534_v0 = vld [vmem:[%s28510_s5 + $0x884] ss:$16 sps:$4 sm:$0xff]  }
 0x3f7   : > { %5430 = vmatprep.mubr.bf16.mxu0 %v24696_v25  ;;  %5536 = vmatprep.mubr.bf16.mxu1 %v24696_v25  ;;  %v20537_v25 = vld [vmem:[%s28510_s5 + $0x88c] ss:$16 sps:$4 sm:$0xff]  }
 0x3f8   : > { %5403 = vmatpush1.bf16.msra.mxu0 %v20520_v38  ;;  %5509 = vmatpush1.bf16.msra.mxu1 %v20523_v39  ;;  %v20598_v38 = vld [vmem:[%s28510_s5 + $0x9e0] ss:$16 sps:$4 sm:$0xff]   ;;  %v20601_v39 = vld [vmem:[%s28510_s5 + $0x9e8] ss:$16 sps:$4 sm:$0xff]  }
 0x3f9   : > { %5404 = vmatprep.subr.bf16.mxu0 %v20528_v40  ;;  %5510 = vmatprep.subr.bf16.mxu1 %v20531_v41  ;;  %v20606_v40 = vld [vmem:[%s28510_s5 + $0xa04] ss:$16 sps:$4 sm:$0xff]   ;;  %v20609_v41 = vld [vmem:[%s28510_s5 + $0xa0c] ss:$16 sps:$4 sm:$0xff]  }
 0x3fc   : > { %5405 = vmatpush1.bf16.msra.mxu0 %v20526_v44  ;;  %5511 = vmatpush1.bf16.msra.mxu1 %v20529_v45  ;;  %v20604_v44 = vld [vmem:[%s28510_s5 + $0xa00] ss:$16 sps:$4 sm:$0xff]   ;;  %v20607_v45 = vld [vmem:[%s28510_s5 + $0xa08] ss:$16 sps:$4 sm:$0xff]  }
 0x3fd   : > { %5406 = vmatprep.subr.bf16.mxu0 %v20534_v0  ;;  %5512 = vmatprep.subr.bf16.mxu1 %v20537_v25  ;;  %v20612_v0 = vld [vmem:[%s28510_s5 + $0xa24] ss:$16 sps:$4 sm:$0xff]   ;;  %v20615_v25 = vld [vmem:[%s28510_s5 + $0xa2c] ss:$16 sps:$4 sm:$0xff]  }
 0x400   : > { %5407 = vmatpush1.bf16.msra.mxu0 %v20532_v46  ;;  %5513 = vmatpush1.bf16.msra.mxu1 %v20535_v47  ;;  %v20610_v46 = vld [vmem:[%s28510_s5 + $0xa20] ss:$16 sps:$4 sm:$0xff]   ;;  %v20613_v47 = vld [vmem:[%s28510_s5 + $0xa28] ss:$16 sps:$4 sm:$0xff]  }
 0x401   : > { %5408 = vmatprep.subr.bf16.mxu0 %v20540_v48  ;;  %5514 = vmatprep.subr.bf16.mxu1 %v20543_v49  ;;  %v20618_v48 = vld [vmem:[%s28510_s5 + $0xa44] ss:$16 sps:$4 sm:$0xff]   ;;  %v20619_v49 = vld [vmem:[%s28510_s5 + $0xa48] ss:$16 sps:$4 sm:$0xff]  }
 0x404   : > { %5409 = vmatpush1.bf16.msra.mxu0 %v20538_v50  ;;  %5515 = vmatpush1.bf16.msra.mxu1 %v20541_v51  ;;  %v20624_v50 = vld [vmem:[%s28510_s5 + $0xa64] ss:$16 sps:$4 sm:$0xff]   ;;  %v20627_v51 = vld [vmem:[%s28510_s5 + $0xa6c] ss:$16 sps:$4 sm:$0xff]  }
 0x405   : > { %5410 = vmatprep.subr.bf16.mxu0 %v20546_v52  ;;  %5516 = vmatprep.subr.bf16.mxu1 %v20549_v53  ;;  %v20622_v52 = vld [vmem:[%s28510_s5 + $0xa60] ss:$16 sps:$4 sm:$0xff]   ;;  %v20625_v53 = vld [vmem:[%s28510_s5 + $0xa68] ss:$16 sps:$4 sm:$0xff]  }
 0x408   : > { %5411 = vmatpush1.bf16.msra.mxu0 %v20544_v54  ;;  %5517 = vmatpush1.bf16.msra.mxu1 %v20547_v55  ;;  %v20630_v54 = vld [vmem:[%s28510_s5 + $0xa84] ss:$16 sps:$4 sm:$0xff]   ;;  %v20628_v55 = vld [vmem:[%s28510_s5 + $0xa80] ss:$16 sps:$4 sm:$0xff]  }
 0x409   : > { %5412 = vmatprep.subr.bf16.mxu0 %v20552_v1  ;;  %5518 = vmatprep.subr.bf16.mxu1 %v20555_v2  ;;  %v20636_v1 = vld [vmem:[%s28510_s5 + $0xaa4] ss:$16 sps:$4 sm:$0xff]   ;;  %v20639_v2 = vld [vmem:[%s28510_s5 + $0xaac] ss:$16 sps:$4 sm:$0xff]  }
 0x40c   : > { %5413 = vmatpush1.bf16.msra.mxu0 %v20550_v3  ;;  %5519 = vmatpush1.bf16.msra.mxu1 %v20553_v4  ;;  %v20634_v3 = vld [vmem:[%s28510_s5 + $0xaa0] ss:$16 sps:$4 sm:$0xff]   ;;  %v20637_v4 = vld [vmem:[%s28510_s5 + $0xaa8] ss:$16 sps:$4 sm:$0xff]  }
 0x40d   : > { %5414 = vmatprep.subr.bf16.mxu0 %v20558_v6  ;;  %5520 = vmatprep.subr.bf16.mxu1 %v20561_v7  ;;  %v20642_v6 = vld [vmem:[%s28510_s5 + $0xac4] ss:$16 sps:$4 sm:$0xff]   ;;  %v20645_v7 = vld [vmem:[%s28510_s5 + $0xacc] ss:$16 sps:$4 sm:$0xff]  }
 0x410   : > { %5415 = vmatpush1.bf16.msra.mxu0 %v20556_v8  ;;  %5521 = vmatpush1.bf16.msra.mxu1 %v20559_v9  ;;  %v20640_v8 = vld [vmem:[%s28510_s5 + $0xac0] ss:$16 sps:$4 sm:$0xff]   ;;  %v20643_v9 = vld [vmem:[%s28510_s5 + $0xac8] ss:$16 sps:$4 sm:$0xff]  }
 0x411   : > { %5416 = vmatprep.subr.bf16.mxu0 %v20564_v10  ;;  %5522 = vmatprep.subr.bf16.mxu1 %v20567_v11  ;;  %v20648_v10 = vld [vmem:[%s28510_s5 + $0xae4] ss:$16 sps:$4 sm:$0xff]   ;;  %v20651_v11 = vld [vmem:[%s28510_s5 + $0xaec] ss:$16 sps:$4 sm:$0xff]  }
 0x414   : > { %5417 = vmatpush1.bf16.msra.mxu0 %v20562_v12  ;;  %5523 = vmatpush1.bf16.msra.mxu1 %v20565_v13  ;;  %v20646_v12 = vld [vmem:[%s28510_s5 + $0xae0] ss:$16 sps:$4 sm:$0xff]   ;;  %v20649_v13 = vld [vmem:[%s28510_s5 + $0xae8] ss:$16 sps:$4 sm:$0xff]  }
 0x415   : > { %5418 = vmatprep.subr.bf16.mxu0 %v20570_v14  ;;  %5524 = vmatprep.subr.bf16.mxu1 %v20573_v15  ;;  %v20654_v14 = vld [vmem:[%s28510_s5 + $0xb04] ss:$16 sps:$4 sm:$0xff]   ;;  %v20657_v15 = vld [vmem:[%s28510_s5 + $0xb0c] ss:$16 sps:$4 sm:$0xff]  }
 0x418   : > { %5419 = vmatpush1.bf16.msra.mxu0 %v20568_v16  ;;  %5525 = vmatpush1.bf16.msra.mxu1 %v20571_v17  ;;  %v20652_v16 = vld [vmem:[%s28510_s5 + $0xb00] ss:$16 sps:$4 sm:$0xff]   ;;  %v20655_v17 = vld [vmem:[%s28510_s5 + $0xb08] ss:$16 sps:$4 sm:$0xff]  }
 0x419   : > { %5420 = vmatprep.subr.bf16.mxu0 %v20576_v19  ;;  %5526 = vmatprep.subr.bf16.mxu1 %v20579_v22  ;;  %v20660_v19 = vld [vmem:[%s28510_s5 + $0xb24] ss:$16 sps:$4 sm:$0xff]   ;;  %v20663_v22 = vld [vmem:[%s28510_s5 + $0xb2c] ss:$16 sps:$4 sm:$0xff]  }
 0x41c   : > { %5421 = vmatpush1.bf16.msra.mxu0 %v20574_v23  ;;  %5527 = vmatpush1.bf16.msra.mxu1 %v20577_v24  ;;  %v20658_v23 = vld [vmem:[%s28510_s5 + $0xb20] ss:$16 sps:$4 sm:$0xff]   ;;  %v20661_v24 = vld [vmem:[%s28510_s5 + $0xb28] ss:$16 sps:$4 sm:$0xff]  }
 0x41d   : > { %5422 = vmatprep.subr.bf16.mxu0 %v20582_v58  ;;  %5528 = vmatprep.subr.bf16.mxu1 %v20585_v26  ;;  %v20666_v58 = vld [vmem:[%s28510_s5 + $0xb44] ss:$16 sps:$4 sm:$0xff]   ;;  %v20669_v26 = vld [vmem:[%s28510_s5 + $0xb4c] ss:$16 sps:$4 sm:$0xff]  }
 0x420   : > { %5423 = vmatpush1.bf16.msra.mxu0 %v20580_v27  ;;  %5529 = vmatpush1.bf16.msra.mxu1 %v20583_v30  ;;  %v20664_v27 = vld [vmem:[%s28510_s5 + $0xb40] ss:$16 sps:$4 sm:$0xff]   ;;  %v20667_v30 = vld [vmem:[%s28510_s5 + $0xb48] ss:$16 sps:$4 sm:$0xff]  }
 0x421   : > { %5424 = vmatprep.subr.bf16.mxu0 %v20588_v32  ;;  %5530 = vmatprep.subr.bf16.mxu1 %v20591_v33  ;;  %v20672_v32 = vld [vmem:[%s28510_s5 + $0xb64] ss:$16 sps:$4 sm:$0xff]   ;;  %v20675_v33 = vld [vmem:[%s28510_s5 + $0xb6c] ss:$16 sps:$4 sm:$0xff]  }
 0x424   : > { %5425 = vmatpush1.bf16.msra.mxu0 %v20586_v34  ;;  %5531 = vmatpush1.bf16.msra.mxu1 %v20589_v29  ;;  %v20670_v34 = vld [vmem:[%s28510_s5 + $0xb60] ss:$16 sps:$4 sm:$0xff]   ;;  %v20673_v29 = vld [vmem:[%s28510_s5 + $0xb68] ss:$16 sps:$4 sm:$0xff]  }
 0x425   : > { %5426 = vmatprep.subr.bf16.mxu0 %v20594_v63  ;;  %5532 = vmatprep.subr.bf16.mxu1 %v20597_v56  ;;  %v20678_v63 = vld [vmem:[%s28510_s5 + $0xb84] ss:$16 sps:$4 sm:$0xff]   ;;  %v20681_v56 = vld [vmem:[%s28510_s5 + $0xb8c] ss:$16 sps:$4 sm:$0xff]  }
 0x428   : > { %5427 = vmatpush1.bf16.msra.mxu0 %v20592_v35  ;;  %5533 = vmatpush1.bf16.msra.mxu1 %v20595_v31  ;;  %v20676_v35 = vld [vmem:[%s28510_s5 + $0xb80] ss:$16 sps:$4 sm:$0xff]   ;;  %v20679_v31 = vld [vmem:[%s28510_s5 + $0xb88] ss:$16 sps:$4 sm:$0xff]  }
 0x429   : > { %5428 = vmatprep.subr.bf16.mxu0 %v20600_v37  ;;  %5534 = vmatprep.subr.bf16.mxu1 %v20603_v5  ;;  %v20684_v37 = vld [vmem:[%s28510_s5 + $0xba4] ss:$16 sps:$4 sm:$0xff]   ;;  %v20687_v5 = vld [vmem:[%s28510_s5 + $0xbac] ss:$16 sps:$4 sm:$0xff]  }
 0x42c   : > { %5429 = vmatpush1.bf16.msra.mxu0 %v20598_v38  ;;  %5535 = vmatpush1.bf16.msra.mxu1 %v20601_v39  ;;  %v20682_v38 = vld [vmem:[%s28510_s5 + $0xba0] ss:$16 sps:$4 sm:$0xff]   ;;  %v20685_v39 = vld [vmem:[%s28510_s5 + $0xba8] ss:$16 sps:$4 sm:$0xff]  }
 0x42d   : > { %5451 = vmatprep.subr.bf16.mxu0 %v20606_v40  ;;  %5557 = vmatprep.subr.bf16.mxu1 %v20609_v41  ;;  %v20690_v40 = vld [vmem:[%s28510_s5 + $0xbc4] ss:$16 sps:$4 sm:$0xff]   ;;  %v20693_v41 = vld [vmem:[%s28510_s5 + $0xbcc] ss:$16 sps:$4 sm:$0xff]  }
 0x42f   : > { %5431 = vmatmul.mubr.bf16.vlgmr.msra.gmra.mrb[28].mxu0 %v24686_v18  ;;  %5537 = vmatmul.mubr.bf16.vlgmr.msra.gmra.mrb[28].mxu1 %v24686_v18  ;;  %v20621_v18 = vld [vmem:[%s28510_s5 + $0xa4c] ss:$16 sps:$4 sm:$0xff]  }
 0x430   : > { %5440 = vmatprep.mubr.bf16.mxu0 %v24728_v42  ;;  %5452 = vmatpush1.bf16.msra.mxu0 %v20604_v44  ;;  %v20688_v44 = vld [vmem:[%s28510_s5 + $0xbc0] ss:$16 sps:$4 sm:$0xff]  }
 0x431   : > { %5546 = vmatprep.mubr.bf16.mxu1 %v24728_v42  ;;  %5558 = vmatpush1.bf16.msra.mxu1 %v20607_v45  ;;  %v20616_v42 = vld [vmem:[%s28510_s5 + $0xa40] ss:$16 sps:$4 sm:$0xff]   ;;  %v20691_v45 = vld [vmem:[%s28510_s5 + $0xbc8] ss:$16 sps:$4 sm:$0xff]  }
 0x432   : > { %5453 = vmatprep.subr.bf16.mxu0 %v20612_v0  ;;  %5559 = vmatprep.subr.bf16.mxu1 %v20615_v25  ;;  %v20696_v0 = vld [vmem:[%s28510_s5 + $0xbe4] ss:$16 sps:$4 sm:$0xff]   ;;  %v20699_v25 = vld [vmem:[%s28510_s5 + $0xbec] ss:$16 sps:$4 sm:$0xff]  }
 0x434   : > { %5454 = vmatpush1.bf16.msra.mxu0 %v20610_v46  ;;  %v20694_v46 = vld [vmem:[%s28510_s5 + $0xbe0] ss:$16 sps:$4 sm:$0xff]  }
 0x435   : > { %5560 = vmatpush1.bf16.msra.mxu1 %v20613_v47  ;;  %5455 = vmatprep.subr.bf16.mxu0 %v20618_v48  ;;  %v20697_v47 = vld [vmem:[%s28510_s5 + $0xbe8] ss:$16 sps:$4 sm:$0xff]   ;;  %v5626_v48 = vld [vmem:[%s28511_s6] sm:$0xf] }
 0x436   : > { %5561 = vmatprep.subr.bf16.mxu1 %v20621_v18  ;;  %v5631_v18 = vrot.slane %v5626_v48, %v23964_v59 }
 0x437   : > { %5441 = vmatmul.mubr.bf16.gmra.mrb[32].mxu0 %v24718_v36  ;;  %5547 = vmatmul.mubr.bf16.gmra.mrb[32].mxu1 %v24718_v36  ;;  %v20633_v36 = vld [vmem:[%s28510_s5 + $0xa8c] ss:$16 sps:$4 sm:$0xff]  }
 0x438   : > { %5456 = vmatpush1.bf16.msra.mxu0 %v20616_v42  ;;  %5483 = vmatprep.mubr.bf16.mxu0 %v24698_v28  ;;  %v5635_v42 = vrot.slane %v5626_v48, %v23968_v61 }
 0x439   : > { %5562 = vmatpush1.bf16.msra.mxu1 %v20619_v49  ;;  %5589 = vmatprep.mubr.bf16.mxu1 %v24698_v28  ;;  %v20631_v28 = vld [vmem:[%s28510_s5 + $0xa88] ss:$16 sps:$4 sm:$0xff]  }
 0x43a   : > { %5457 = vmatprep.subr.bf16.mxu0 %v20624_v50  ;;  %5563 = vmatprep.subr.bf16.mxu1 %v20627_v51 }
 0x43c   : > { %5458 = vmatpush1.bf16.msra.mxu0 %v20622_v52 }
 0x43d   : > { %5564 = vmatpush1.bf16.msra.mxu1 %v20625_v53  ;;  %5459 = vmatprep.subr.bf16.mxu0 %v20630_v54 }
 0x43e   : > { %5565 = vmatprep.subr.bf16.mxu1 %v20633_v36 }
 0x440   : > { %5460 = vmatpush1.bf16.msra.mxu0 %v20628_v55 }
 0x441   : > { %5566 = vmatpush1.bf16.msra.mxu1 %v20631_v28  ;;  %5461 = vmatprep.subr.bf16.mxu0 %v20636_v1 }
 0x442   : > { %5567 = vmatprep.subr.bf16.mxu1 %v20639_v2 }
 0x444   : > { %5462 = vmatpush1.bf16.msra.mxu0 %v20634_v3 }
 0x445   : > { %5568 = vmatpush1.bf16.msra.mxu1 %v20637_v4  ;;  %5463 = vmatprep.subr.bf16.mxu0 %v20642_v6 }
 0x446   : > { %5569 = vmatprep.subr.bf16.mxu1 %v20645_v7 }
 0x448   : > { %5464 = vmatpush1.bf16.msra.mxu0 %v20640_v8 }
 0x449   : > { %5570 = vmatpush1.bf16.msra.mxu1 %v20643_v9  ;;  %5465 = vmatprep.subr.bf16.mxu0 %v20648_v10 }
 0x44a   : > { %5571 = vmatprep.subr.bf16.mxu1 %v20651_v11 }
 0x44c   : > { %5466 = vmatpush1.bf16.msra.mxu0 %v20646_v12 }
 0x44d   : > { %5572 = vmatpush1.bf16.msra.mxu1 %v20649_v13  ;;  %5467 = vmatprep.subr.bf16.mxu0 %v20654_v14 }
 0x44e   : > { %5573 = vmatprep.subr.bf16.mxu1 %v20657_v15 }
 0x450   : > { %5468 = vmatpush1.bf16.msra.mxu0 %v20652_v16 }
 0x451   : > { %5574 = vmatpush1.bf16.msra.mxu1 %v20655_v17  ;;  %5469 = vmatprep.subr.bf16.mxu0 %v20660_v19 }
 0x452   : > { %5575 = vmatprep.subr.bf16.mxu1 %v20663_v22 }
 0x454   : > { %5470 = vmatpush1.bf16.msra.mxu0 %v20658_v23 }
 0x455   : > { %5576 = vmatpush1.bf16.msra.mxu1 %v20661_v24  ;;  %5471 = vmatprep.subr.bf16.mxu0 %v20666_v58 }
 0x456   : > { %5577 = vmatprep.subr.bf16.mxu1 %v20669_v26 }
 0x458   : > { %5472 = vmatpush1.bf16.msra.mxu0 %v20664_v27 }
 0x459   : > { %5578 = vmatpush1.bf16.msra.mxu1 %v20667_v30  ;;  %5473 = vmatprep.subr.bf16.mxu0 %v20672_v32 }
 0x45a   : > { %5579 = vmatprep.subr.bf16.mxu1 %v20675_v33 }
 0x45c   : > { %5474 = vmatpush1.bf16.msra.mxu0 %v20670_v34 }
 0x45d   : > { %5580 = vmatpush1.bf16.msra.mxu1 %v20673_v29  ;;  %5475 = vmatprep.subr.bf16.mxu0 %v20678_v63 }
 0x45e   : > { %5581 = vmatprep.subr.bf16.mxu1 %v20681_v56 }
 0x460   : > { %5476 = vmatpush1.bf16.msra.mxu0 %v20676_v35 }
 0x461   : > { %5582 = vmatpush1.bf16.msra.mxu1 %v20679_v31  ;;  %5477 = vmatprep.subr.bf16.mxu0 %v20684_v37 }
 0x462   : > { %5583 = vmatprep.subr.bf16.mxu1 %v20687_v5 }
 0x464   : > { %5478 = vmatpush1.bf16.msra.mxu0 %v20682_v38 }
 0x465   : > { %5584 = vmatpush1.bf16.msra.mxu1 %v20685_v39  ;;  %5479 = vmatprep.subr.bf16.mxu0 %v20690_v40 }
 0x466   : > { %5585 = vmatprep.subr.bf16.mxu1 %v20693_v41 }
 0x468   : > { %5480 = vmatpush1.bf16.msra.mxu0 %v20688_v44 }
 0x469   : > { %5586 = vmatpush1.bf16.msra.mxu1 %v20691_v45  ;;  %5481 = vmatprep.subr.bf16.mxu0 %v20696_v0 }
 0x46a   : > { %5587 = vmatprep.subr.bf16.mxu1 %v20699_v25 }
 0x46c   : > { %5482 = vmatpush1.bf16.msra.mxu0 %v20694_v46 }
 0x46d   : > { %5588 = vmatpush1.bf16.msra.mxu1 %v20697_v47 }
 0x46f   : > { %5484 = vmatmul.mubr.bf16.vlgmr.msra.gmra.mrb[28].mxu0 %v24688_v21 }
 0x470   : > { %5590 = vmatmul.mubr.bf16.vlgmr.msra.gmra.mrb[28].mxu1 %v24688_v21  ;;  %5493 = vmatprep.mubr.bf16.mxu0 %v24730_v43  ;;  %v5639_v21 = vrot.slane %v5626_v48, %v23966_v60 }
 0x471   : > { %5599 = vmatprep.mubr.bf16.mxu1 %v24730_v43  ;;  %v5643_v43 = vrot.slane %v5626_v48, %v23970_v62 }
 0x477   : > { %5494 = vmatmul.mubr.bf16.gmra.mrb[32].mxu0 %v24720_v57 }
 0x478   : > { %5600 = vmatmul.mubr.bf16.gmra.mrb[32].mxu1 %v24720_v57  ;;  %5720 = vmatprep.mubr.bf16.mxu0 %v22693_v20 }
 0x479   : > { %5773 = vmatprep.mubr.bf16.mxu1 %v22693_v20 }
 0x542   : > { %v5485_v49 = vpop.f32.mrb[28].mxu0 }
 0x543   : > { %v5648_v50 = vadd.f32 %v5631_v18, %v5485_v49  ;;  %v5591_v51 = vpop.f32.mrb[28].mxu1  ;;  %v5487_v57 = vpop.f32.mrb[29].mxu0  ;;  %v21857_v49 = vld [vmem:[%s28506_s1 + $0x8] sm:$0xff]  }
 0x544   : > { %v5650_v52 = vadd.f32 %v5639_v21, %v5591_v51  ;;  %v5649_v53 = vadd.f32 %v5635_v42, %v5487_v57  ;;  %v5593_v54 = vpop.f32.mrb[29].mxu1  ;;  %v5489_v36 = vpop.f32.mrb[30].mxu0  ;;  %v20703_v51 = vld [vmem:[%s28512_s7 + $0x408] ss:$16 sps:$4 sm:$0xff]   ;;  %v20708_v57 = vld [vmem:[%s28512_s7 + $0x424] ss:$16 sps:$4 sm:$0xff]  }
 0x545   : > { %v5651_v55 = vadd.f32 %v5643_v43, %v5593_v54  ;;  %v5652_v28 = vadd.f32 %v5631_v18, %v5489_v36  ;;  %v5595_v1 = vpop.f32.mrb[30].mxu1  ;;  %v5491_v2 = vpop.f32.mrb[31].mxu0  ;;  %v5664_v7 = vmax.f32 %v5648_v50, 0.0  ;;  %v20700_v50 = vld [vmem:[%s28512_s7 + $0x400] ss:$16 sps:$4 sm:$0xff]  }
 0x546   : > { %v5654_v3 = vadd.f32 %v5639_v21, %v5595_v1  ;;  %v5653_v4 = vadd.f32 %v5635_v42, %v5491_v2  ;;  %v5597_v6 = vpop.f32.mrb[31].mxu1  ;;  %v5666_v10 = vmax.f32 %v5650_v52, 0.0  ;;  %v5665_v11 = vmax.f32 %v5649_v53, 0.0  ;;  %v20711_v52 = vld [vmem:[%s28512_s7 + $0x42c] ss:$16 sps:$4 sm:$0xff]   ;;  %v21858_v53 = vld [vmem:[%s28507_s2] sm:$0xff]  }
 0x547   : > { %v5668_v8 = vmax.f32 %v5652_v28, 0.0  ;;  %v5655_v9 = vadd.f32 %v5643_v43, %v5597_v6  ;;  %v5667_v14 = vmax.f32 %v5651_v55, 0.0  ;;  %v20706_v54 = vld [vmem:[%s28512_s7 + $0x420] ss:$16 sps:$4 sm:$0xff]   ;;  %v20709_v36 = vld [vmem:[%s28512_s7 + $0x428] ss:$16 sps:$4 sm:$0xff]  }
 0x548   : > { %v5670_v12 = vmax.f32 %v5654_v3, 0.0  ;;  %v5669_v13 = vmax.f32 %v5653_v4, 0.0  ;;  %v20714_v55 = vld [vmem:[%s28512_s7 + $0x444] ss:$16 sps:$4 sm:$0xff]   ;;  %v20717_v28 = vld [vmem:[%s28512_s7 + $0x44c] ss:$16 sps:$4 sm:$0xff]  }
 0x549   : > { %v25255_v15 = vpack.c.bf16 %v5668_v8, %v5664_v7  ;;  %v5671_v16 = vmax.f32 %v5655_v9, 0.0  ;;  %v20712_v1 = vld [vmem:[%s28512_s7 + $0x440] ss:$16 sps:$4 sm:$0xff]   ;;  %v20715_v2 = vld [vmem:[%s28512_s7 + $0x448] ss:$16 sps:$4 sm:$0xff]  }
 0x54a   : > { %v25257_v17 = vpack.c.bf16 %v5670_v12, %v5666_v10  ;;  %v25259_v19 = vpack.c.bf16 %v5669_v13, %v5665_v11  ;;  %v5495_v22 = vpop.f32.mrb[32].mxu0  ;;  %v20720_v3 = vld [vmem:[%s28512_s7 + $0x464] ss:$16 sps:$4 sm:$0xff]   ;;  %v21859_v4 = vld [vmem:[%s28507_s2 + $0x8] sm:$0xff]   ;;  %v20718_v7 = vld [vmem:[%s28512_s7 + $0x460] ss:$16 sps:$4 sm:$0xff]  }
 0x54b   : > { %v25261_v23 = vpack.c.bf16 %v5671_v16, %v5667_v14  ;;  %v5656_v24 = vadd.f32 %v5631_v18, %v5495_v22  ;;  %v5601_v58 = vpop.f32.mrb[32].mxu1  ;;  %v5497_v26 = vpop.f32.mrb[33].mxu0  ;;  %v20723_v6 = vld [vmem:[%s28512_s7 + $0x46c] ss:$16 sps:$4 sm:$0xff]   ;;  %v20721_v8 = vld [vmem:[%s28512_s7 + $0x468] ss:$16 sps:$4 sm:$0xff]  }
 0x54c   : > { %v5658_v27 = vadd.f32 %v5639_v21, %v5601_v58  ;;  %v5657_v30 = vadd.f32 %v5635_v42, %v5497_v26  ;;  %v5603_v32 = vpop.f32.mrb[33].mxu1  ;;  %v5499_v33 = vpop.f32.mrb[34].mxu0  ;;  %5688 = vmatprep.subr.bf16.mxu0 %v25259_v19  ;;  %v20726_v9 = vld [vmem:[%s28512_s7 + $0x484] ss:$16 sps:$4 sm:$0xff]   ;;  %v20729_v10 = vld [vmem:[%s28512_s7 + $0x48c] ss:$16 sps:$4 sm:$0xff]  }
 0x54d   : > { %v5659_v34 = vadd.f32 %v5643_v43, %v5603_v32  ;;  %v5660_v29 = vadd.f32 %v5631_v18, %v5499_v33  ;;  %v5605_v63 = vpop.f32.mrb[34].mxu1  ;;  %5741 = vmatprep.subr.bf16.mxu1 %v25261_v23  ;;  %v5501_v56 = vpop.f32.mrb[35].mxu0  ;;  %5689 = vmatpush1.bf16.msra.mxu0 %v25255_v15  ;;  %v5672_v5 = vmax.f32 %v5656_v24, 0.0  ;;  %v20724_v11 = vld [vmem:[%s28512_s7 + $0x480] ss:$16 sps:$4 sm:$0xff]  }
 0x54e   : > { %v5662_v35 = vadd.f32 %v5639_v21, %v5605_v63  ;;  %v5661_v31 = vadd.f32 %v5635_v42, %v5501_v56  ;;  %v5607_v37 = vpop.f32.mrb[35].mxu1  ;;  %5742 = vmatpush1.bf16.msra.mxu1 %v25257_v17  ;;  %v5674_v40 = vmax.f32 %v5658_v27, 0.0  ;;  %v5673_v41 = vmax.f32 %v5657_v30, 0.0  ;;  %v21856_v21 = vld [vmem:[%s28506_s1] sm:$0xff]   ;;  %v20727_v12 = vld [vmem:[%s28512_s7 + $0x488] ss:$16 sps:$4 sm:$0xff]  }
 0x54f   : > { %v5676_v38 = vmax.f32 %v5660_v29, 0.0  ;;  %v5663_v39 = vadd.f32 %v5643_v43, %v5607_v37  ;;  %v5675_v0 = vmax.f32 %v5659_v34, 0.0  ;;  %v20702_v42 = vld [vmem:[%s28512_s7 + $0x404] ss:$16 sps:$4 sm:$0xff]   ;;  %v20705_v43 = vld [vmem:[%s28512_s7 + $0x40c] ss:$16 sps:$4 sm:$0xff]  }
 0x550   : > { %v5678_v44 = vmax.f32 %v5662_v35, 0.0  ;;  %v5677_v45 = vmax.f32 %v5661_v31, 0.0  ;;  %v20732_v13 = vld [vmem:[%s28512_s7 + $0x4a4] ss:$16 sps:$4 sm:$0xff]   ;;  %v20735_v14 = vld [vmem:[%s28512_s7 + $0x4ac] ss:$16 sps:$4 sm:$0xff]  }
 0x551   : > { %v25267_v25 = vpack.c.bf16 %v5676_v38, %v5672_v5  ;;  %v5679_v46 = vmax.f32 %v5663_v39, 0.0  ;;  %v20730_v16 = vld [vmem:[%s28512_s7 + $0x4a0] ss:$16 sps:$4 sm:$0xff]   ;;  %v20738_v22 = vld [vmem:[%s28512_s7 + $0x4c4] ss:$16 sps:$4 sm:$0xff]  }
 0x552   : > { %v25269_v47 = vpack.c.bf16 %v5678_v44, %v5674_v40  ;;  %v25271_v48 = vpack.c.bf16 %v5677_v45, %v5673_v41  ;;  %v20741_v24 = vld [vmem:[%s28512_s7 + $0x4cc] ss:$16 sps:$4 sm:$0xff]   ;;  %v20736_v58 = vld [vmem:[%s28512_s7 + $0x4c0] ss:$16 sps:$4 sm:$0xff]   ;;  %v20739_v26 = vld [vmem:[%s28512_s7 + $0x4c8] ss:$16 sps:$4 sm:$0xff]  }
 0x553   : > { %v25273_v18 = vpack.c.bf16 %v5679_v46, %v5675_v0  ;;  %v20744_v27 = vld [vmem:[%s28512_s7 + $0x4e4] ss:$16 sps:$4 sm:$0xff]   ;;  %v20747_v30 = vld [vmem:[%s28512_s7 + $0x4ec] ss:$16 sps:$4 sm:$0xff]   ;;  %v20742_v32 = vld [vmem:[%s28512_s7 + $0x4e0] ss:$16 sps:$4 sm:$0xff]  }
 0x554   : > { %5690 = vmatprep.subr.bf16.mxu0 %v25271_v48  ;;  %v20745_v33 = vld [vmem:[%s28512_s7 + $0x4e8] ss:$16 sps:$4 sm:$0xff]   ;;  %v20750_v34 = vld [vmem:[%s28512_s7 + $0x504] ss:$16 sps:$4 sm:$0xff]   ;;  %v20753_v29 = vld [vmem:[%s28512_s7 + $0x50c] ss:$16 sps:$4 sm:$0xff]  }
 0x555   : > { %5743 = vmatprep.subr.bf16.mxu1 %v25273_v18  ;;  %5691 = vmatpush1.bf16.msra.mxu0 %v25267_v25  ;;  %v20748_v63 = vld [vmem:[%s28512_s7 + $0x500] ss:$16 sps:$4 sm:$0xff]   ;;  %v20751_v56 = vld [vmem:[%s28512_s7 + $0x508] ss:$16 sps:$4 sm:$0xff]   ;;  %v20756_v35 = vld [vmem:[%s28512_s7 + $0x524] ss:$16 sps:$4 sm:$0xff]  }
 0x556   : > { %5744 = vmatpush1.bf16.msra.mxu1 %v25269_v47  ;;  %5802 = vmatprep.subr.bf16.mxu0 %v25259_v19  ;;  %v20759_v31 = vld [vmem:[%s28512_s7 + $0x52c] ss:$16 sps:$4 sm:$0xff]   ;;  %v20754_v37 = vld [vmem:[%s28512_s7 + $0x520] ss:$16 sps:$4 sm:$0xff]   ;;  %v20757_v5 = vld [vmem:[%s28512_s7 + $0x528] ss:$16 sps:$4 sm:$0xff]  }
 0x557   : > { %5855 = vmatprep.subr.bf16.mxu1 %v25261_v23  ;;  %v20762_v38 = vld [vmem:[%s28512_s7 + $0x544] ss:$16 sps:$4 sm:$0xff]   ;;  %v20765_v39 = vld [vmem:[%s28512_s7 + $0x54c] ss:$16 sps:$4 sm:$0xff]   ;;  %v20760_v40 = vld [vmem:[%s28512_s7 + $0x540] ss:$16 sps:$4 sm:$0xff]  }
 0x558   : > { %17471 = vmatmul.mubr.msk.bf16.vlgmr.msra.gmra.mrb[36].mxu0 %vm1337_vm0, %v21856_v21  ;;  %v20763_v41 = vld [vmem:[%s28512_s7 + $0x548] ss:$16 sps:$4 sm:$0xff]   ;;  %v20768_v44 = vld [vmem:[%s28512_s7 + $0x564] ss:$16 sps:$4 sm:$0xff]   ;;  %v20771_v45 = vld [vmem:[%s28512_s7 + $0x56c] ss:$16 sps:$4 sm:$0xff]  }
 0x559   : > { %17473 = vmatmul.mubr.msk.bf16.vlgmr.msra.gmra.mrb[36].mxu1 %vm1337_vm0, %v21856_v21  ;;  %5803 = vmatpush1.bf16.msra.mxu0 %v25255_v15  ;;  %v20766_v0 = vld [vmem:[%s28512_s7 + $0x560] ss:$16 sps:$4 sm:$0xff]   ;;  %v20769_v46 = vld [vmem:[%s28512_s7 + $0x568] ss:$16 sps:$4 sm:$0xff]   ;;  %v20774_v21 = vld [vmem:[%s28512_s7 + $0x584] ss:$16 sps:$4 sm:$0xff]  }
 0x55a   : > { %5856 = vmatpush1.bf16.msra.mxu1 %v25257_v17  ;;  %5804 = vmatprep.subr.bf16.mxu0 %v25271_v48 }
 0x55b   : > { %5857 = vmatprep.subr.bf16.mxu1 %v25273_v18  ;;  %5730 = vmatprep.mubr.bf16.mxu0 %v22693_v20 }
 0x55c   : > { %5783 = vmatprep.mubr.bf16.mxu1 %v22693_v20 }
 0x55d   : > { %5805 = vmatpush1.bf16.msra.mxu0 %v25267_v25 }
 0x55e   : > { %5858 = vmatpush1.bf16.msra.mxu1 %v25269_v47  ;;  %6813 = vmatprep.subr.bf16.mxu0 %v20702_v42  ;;  %v20777_v42 = vld [vmem:[%s28512_s7 + $0x58c] ss:$16 sps:$4 sm:$0xff]  }
 0x55f   : > { %6919 = vmatprep.subr.bf16.mxu1 %v20705_v43  ;;  %v20772_v43 = vld [vmem:[%s28512_s7 + $0x580] ss:$16 sps:$4 sm:$0xff]  }
 0x560   : > { %17472 = vmatmul.mubr.msk.bf16.gmra.mrb[40].mxu0 %vm1337_vm0, %v21857_v49 }
 0x561   : > { %17474 = vmatmul.mubr.msk.bf16.gmra.mrb[40].mxu1 %vm1337_vm0, %v21857_v49  ;;  %5834 = vmatprep.mubr.bf16.mxu0 %v22693_v20  ;;  %v20775_v49 = vld [vmem:[%s28512_s7 + $0x588] ss:$16 sps:$4 sm:$0xff]  }
 0x562   : > { %5887 = vmatprep.mubr.bf16.mxu1 %v22693_v20 }
 0x568   : > { %17475 = vmatmul.mubr.msk.bf16.vlgmr.msra.gmra.mrb[44].mxu0 %vm1337_vm0, %v21858_v53 }
 0x569   : > { %17477 = vmatmul.mubr.msk.bf16.vlgmr.msra.gmra.mrb[44].mxu1 %vm1337_vm0, %v21858_v53  ;;  %6814 = vmatpush1.bf16.msra.mxu0 %v20700_v50  ;;  %v20780_v50 = vld [vmem:[%s28512_s7 + $0x5a4] ss:$16 sps:$4 sm:$0xff]  }
 0x56a   : > { %6920 = vmatpush1.bf16.msra.mxu1 %v20703_v51  ;;  %6815 = vmatprep.subr.bf16.mxu0 %v20708_v57  ;;  %v20783_v51 = vld [vmem:[%s28512_s7 + $0x5ac] ss:$16 sps:$4 sm:$0xff]   ;;  %v20778_v57 = vld [vmem:[%s28512_s7 + $0x5a0] ss:$16 sps:$4 sm:$0xff]   ;;  %v20786_v53 = vld [vmem:[%s28512_s7 + $0x5c4] ss:$16 sps:$4 sm:$0xff]  }
 0x56b   : > { %6921 = vmatprep.subr.bf16.mxu1 %v20711_v52  ;;  %5844 = vmatprep.mubr.bf16.mxu0 %v22693_v20  ;;  %v20781_v52 = vld [vmem:[%s28512_s7 + $0x5a8] ss:$16 sps:$4 sm:$0xff]  }
 0x56c   : > { %5897 = vmatprep.mubr.bf16.mxu1 %v22693_v20 }
 0x56d   : > { %6816 = vmatpush1.bf16.msra.mxu0 %v20706_v54  ;;  %v20789_v54 = vld [vmem:[%s28512_s7 + $0x5cc] ss:$16 sps:$4 sm:$0xff]  }
 0x56e   : > { %6922 = vmatpush1.bf16.msra.mxu1 %v20709_v36  ;;  %6817 = vmatprep.subr.bf16.mxu0 %v20714_v55  ;;  %v20784_v36 = vld [vmem:[%s28512_s7 + $0x5c0] ss:$16 sps:$4 sm:$0xff]   ;;  %v20787_v55 = vld [vmem:[%s28512_s7 + $0x5c8] ss:$16 sps:$4 sm:$0xff]  }
 0x56f   : > { %6923 = vmatprep.subr.bf16.mxu1 %v20717_v28  ;;  %v20792_v28 = vld [vmem:[%s28512_s7 + $0x5e4] ss:$16 sps:$4 sm:$0xff]  }
 0x570   : > { %17476 = vmatmul.mubr.msk.bf16.gmra.mrb[48].mxu0 %vm1337_vm0, %v21859_v4 }
 0x571   : > { %17478 = vmatmul.mubr.msk.bf16.gmra.mrb[48].mxu1 %vm1337_vm0, %v21859_v4  ;;  %6818 = vmatpush1.bf16.msra.mxu0 %v20712_v1  ;;  %v20795_v1 = vld [vmem:[%s28512_s7 + $0x5ec] ss:$16 sps:$4 sm:$0xff]   ;;  %v20798_v4 = vld [vmem:[%s28512_s7 + $0x604] ss:$16 sps:$4 sm:$0xff]  }
 0x572   : > { %6924 = vmatpush1.bf16.msra.mxu1 %v20715_v2  ;;  %6845 = vmatprep.mubr.bf16.mxu0 %v25259_v19  ;;  %v20790_v2 = vld [vmem:[%s28512_s7 + $0x5e0] ss:$16 sps:$4 sm:$0xff]  }
 0x573   : > { %6951 = vmatprep.mubr.bf16.mxu1 %v25259_v19  ;;  %6819 = vmatprep.subr.bf16.mxu0 %v20720_v3  ;;  %v20733_v19 = vld [vmem:[%s28512_s7 + $0x4a8] ss:$16 sps:$4 sm:$0xff]  }
 0x574   : > { %6925 = vmatprep.subr.bf16.mxu1 %v20723_v6  ;;  %v20793_v3 = vld [vmem:[%s28512_s7 + $0x5e8] ss:$16 sps:$4 sm:$0xff]   ;;  %v20801_v6 = vld [vmem:[%s28512_s7 + $0x60c] ss:$16 sps:$4 sm:$0xff]  }
 0x575   : > { %6820 = vmatpush1.bf16.msra.mxu0 %v20718_v7  ;;  %v20796_v7 = vld [vmem:[%s28512_s7 + $0x600] ss:$16 sps:$4 sm:$0xff]  }
 0x576   : > { %6926 = vmatpush1.bf16.msra.mxu1 %v20721_v8  ;;  %6821 = vmatprep.subr.bf16.mxu0 %v20726_v9  ;;  %v20799_v8 = vld [vmem:[%s28512_s7 + $0x608] ss:$16 sps:$4 sm:$0xff]   ;;  %v20804_v9 = vld [vmem:[%s28512_s7 + $0x624] ss:$16 sps:$4 sm:$0xff]  }
 0x577   : > { %6927 = vmatprep.subr.bf16.mxu1 %v20729_v10  ;;  %v20807_v10 = vld [vmem:[%s28512_s7 + $0x62c] ss:$16 sps:$4 sm:$0xff]  }
 0x579   : > { %6822 = vmatpush1.bf16.msra.mxu0 %v20724_v11  ;;  %v20802_v11 = vld [vmem:[%s28512_s7 + $0x620] ss:$16 sps:$4 sm:$0xff]  }
 0x57a   : > { %6928 = vmatpush1.bf16.msra.mxu1 %v20727_v12  ;;  %6823 = vmatprep.subr.bf16.mxu0 %v20732_v13  ;;  %v20805_v12 = vld [vmem:[%s28512_s7 + $0x628] ss:$16 sps:$4 sm:$0xff]   ;;  %v20810_v13 = vld [vmem:[%s28512_s7 + $0x644] ss:$16 sps:$4 sm:$0xff]  }
 0x57b   : > { %6929 = vmatprep.subr.bf16.mxu1 %v20735_v14  ;;  %v20811_v14 = vld [vmem:[%s28512_s7 + $0x648] ss:$16 sps:$4 sm:$0xff]  }
 0x57d   : > { %6824 = vmatpush1.bf16.msra.mxu0 %v20730_v16  ;;  %v20816_v16 = vld [vmem:[%s28512_s7 + $0x664] ss:$16 sps:$4 sm:$0xff]  }
 0x57e   : > { %6930 = vmatpush1.bf16.msra.mxu1 %v20733_v19  ;;  %6825 = vmatprep.subr.bf16.mxu0 %v20738_v22  ;;  %v20819_v19 = vld [vmem:[%s28512_s7 + $0x66c] ss:$16 sps:$4 sm:$0xff]   ;;  %v20814_v22 = vld [vmem:[%s28512_s7 + $0x660] ss:$16 sps:$4 sm:$0xff]  }
 0x57f   : > { %6931 = vmatprep.subr.bf16.mxu1 %v20741_v24  ;;  %v20817_v24 = vld [vmem:[%s28512_s7 + $0x668] ss:$16 sps:$4 sm:$0xff]  }
 0x581   : > { %6826 = vmatpush1.bf16.msra.mxu0 %v20736_v58  ;;  %v20822_v58 = vld [vmem:[%s28512_s7 + $0x684] ss:$16 sps:$4 sm:$0xff]  }
 0x582   : > { %6932 = vmatpush1.bf16.msra.mxu1 %v20739_v26  ;;  %6827 = vmatprep.subr.bf16.mxu0 %v20744_v27  ;;  %v20823_v26 = vld [vmem:[%s28512_s7 + $0x688] ss:$16 sps:$4 sm:$0xff]   ;;  %v20828_v27 = vld [vmem:[%s28512_s7 + $0x6a4] ss:$16 sps:$4 sm:$0xff]  }
 0x583   : > { %6933 = vmatprep.subr.bf16.mxu1 %v20747_v30  ;;  %v20831_v30 = vld [vmem:[%s28512_s7 + $0x6ac] ss:$16 sps:$4 sm:$0xff]  }
 0x585   : > { %6828 = vmatpush1.bf16.msra.mxu0 %v20742_v32  ;;  %v20826_v32 = vld [vmem:[%s28512_s7 + $0x6a0] ss:$16 sps:$4 sm:$0xff]  }
 0x586   : > { %6934 = vmatpush1.bf16.msra.mxu1 %v20745_v33  ;;  %6829 = vmatprep.subr.bf16.mxu0 %v20750_v34  ;;  %v20829_v33 = vld [vmem:[%s28512_s7 + $0x6a8] ss:$16 sps:$4 sm:$0xff]   ;;  %v20834_v34 = vld [vmem:[%s28512_s7 + $0x6c4] ss:$16 sps:$4 sm:$0xff]  }
 0x587   : > { %6935 = vmatprep.subr.bf16.mxu1 %v20753_v29  ;;  %v20837_v29 = vld [vmem:[%s28512_s7 + $0x6cc] ss:$16 sps:$4 sm:$0xff]  }
 0x589   : > { %6830 = vmatpush1.bf16.msra.mxu0 %v20748_v63  ;;  %v20832_v63 = vld [vmem:[%s28512_s7 + $0x6c0] ss:$16 sps:$4 sm:$0xff]  }
 0x58a   : > { %6936 = vmatpush1.bf16.msra.mxu1 %v20751_v56  ;;  %6831 = vmatprep.subr.bf16.mxu0 %v20756_v35  ;;  %v20835_v56 = vld [vmem:[%s28512_s7 + $0x6c8] ss:$16 sps:$4 sm:$0xff]   ;;  %v20840_v35 = vld [vmem:[%s28512_s7 + $0x6e4] ss:$16 sps:$4 sm:$0xff]  }
 0x58b   : > { %6937 = vmatprep.subr.bf16.mxu1 %v20759_v31  ;;  %v20843_v31 = vld [vmem:[%s28512_s7 + $0x6ec] ss:$16 sps:$4 sm:$0xff]  }
 0x58d   : > { %6832 = vmatpush1.bf16.msra.mxu0 %v20754_v37  ;;  %v20838_v37 = vld [vmem:[%s28512_s7 + $0x6e0] ss:$16 sps:$4 sm:$0xff]  }
 0x58e   : > { %6938 = vmatpush1.bf16.msra.mxu1 %v20757_v5  ;;  %6833 = vmatprep.subr.bf16.mxu0 %v20762_v38  ;;  %v20841_v5 = vld [vmem:[%s28512_s7 + $0x6e8] ss:$16 sps:$4 sm:$0xff]   ;;  %v20846_v38 = vld [vmem:[%s28512_s7 + $0x704] ss:$16 sps:$4 sm:$0xff]  }
 0x58f   : > { %6939 = vmatprep.subr.bf16.mxu1 %v20765_v39  ;;  %v20849_v39 = vld [vmem:[%s28512_s7 + $0x70c] ss:$16 sps:$4 sm:$0xff]  }
 0x591   : > { %6834 = vmatpush1.bf16.msra.mxu0 %v20760_v40  ;;  %v20844_v40 = vld [vmem:[%s28512_s7 + $0x700] ss:$16 sps:$4 sm:$0xff]  }
 0x592   : > { %6940 = vmatpush1.bf16.msra.mxu1 %v20763_v41  ;;  %6835 = vmatprep.subr.bf16.mxu0 %v20768_v44  ;;  %v20847_v41 = vld [vmem:[%s28512_s7 + $0x708] ss:$16 sps:$4 sm:$0xff]   ;;  %v20852_v44 = vld [vmem:[%s28512_s7 + $0x724] ss:$16 sps:$4 sm:$0xff]  }
 0x593   : > { %6941 = vmatprep.subr.bf16.mxu1 %v20771_v45  ;;  %v20855_v45 = vld [vmem:[%s28512_s7 + $0x72c] ss:$16 sps:$4 sm:$0xff]  }
 0x595   : > { %6836 = vmatpush1.bf16.msra.mxu0 %v20766_v0  ;;  %v20850_v0 = vld [vmem:[%s28512_s7 + $0x720] ss:$16 sps:$4 sm:$0xff]  }
 0x596   : > { %6942 = vmatpush1.bf16.msra.mxu1 %v20769_v46  ;;  %6837 = vmatprep.subr.bf16.mxu0 %v20774_v21  ;;  %v20853_v46 = vld [vmem:[%s28512_s7 + $0x728] ss:$16 sps:$4 sm:$0xff]   ;;  %v20858_v21 = vld [vmem:[%s28512_s7 + $0x744] ss:$16 sps:$4 sm:$0xff]  }
 0x597   : > { %6943 = vmatprep.subr.bf16.mxu1 %v20777_v42  ;;  %v20861_v42 = vld [vmem:[%s28512_s7 + $0x74c] ss:$16 sps:$4 sm:$0xff]  }
 0x599   : > { %6838 = vmatpush1.bf16.msra.mxu0 %v20772_v43  ;;  %v20856_v43 = vld [vmem:[%s28512_s7 + $0x740] ss:$16 sps:$4 sm:$0xff]  }
 0x59a   : > { %6944 = vmatpush1.bf16.msra.mxu1 %v20775_v49  ;;  %6839 = vmatprep.subr.bf16.mxu0 %v20780_v50  ;;  %v20859_v49 = vld [vmem:[%s28512_s7 + $0x748] ss:$16 sps:$4 sm:$0xff]   ;;  %v20864_v50 = vld [vmem:[%s28512_s7 + $0x764] ss:$16 sps:$4 sm:$0xff]  }
 0x59b   : > { %6945 = vmatprep.subr.bf16.mxu1 %v20783_v51  ;;  %v20867_v51 = vld [vmem:[%s28512_s7 + $0x76c] ss:$16 sps:$4 sm:$0xff]  }
 0x59d   : > { %6840 = vmatpush1.bf16.msra.mxu0 %v20778_v57  ;;  %v20862_v57 = vld [vmem:[%s28512_s7 + $0x760] ss:$16 sps:$4 sm:$0xff]  }
 0x59e   : > { %6946 = vmatpush1.bf16.msra.mxu1 %v20781_v52  ;;  %6841 = vmatprep.subr.bf16.mxu0 %v20786_v53  ;;  %v20865_v52 = vld [vmem:[%s28512_s7 + $0x768] ss:$16 sps:$4 sm:$0xff]   ;;  %v20870_v53 = vld [vmem:[%s28512_s7 + $0x784] ss:$16 sps:$4 sm:$0xff]  }
 0x59f   : > { %6947 = vmatprep.subr.bf16.mxu1 %v20789_v54  ;;  %v20873_v54 = vld [vmem:[%s28512_s7 + $0x78c] ss:$16 sps:$4 sm:$0xff]  }
 0x5a1   : > { %6842 = vmatpush1.bf16.msra.mxu0 %v20784_v36  ;;  %v20868_v36 = vld [vmem:[%s28512_s7 + $0x780] ss:$16 sps:$4 sm:$0xff]  }
 0x5a2   : > { %6948 = vmatpush1.bf16.msra.mxu1 %v20787_v55  ;;  %6843 = vmatprep.subr.bf16.mxu0 %v20792_v28  ;;  %v20871_v55 = vld [vmem:[%s28512_s7 + $0x788] ss:$16 sps:$4 sm:$0xff]   ;;  %v20876_v28 = vld [vmem:[%s28512_s7 + $0x7a4] ss:$16 sps:$4 sm:$0xff]  }
 0x5a3   : > { %6949 = vmatprep.subr.bf16.mxu1 %v20795_v1  ;;  %v20879_v1 = vld [vmem:[%s28512_s7 + $0x7ac] ss:$16 sps:$4 sm:$0xff]  }
 0x5a5   : > { %6844 = vmatpush1.bf16.msra.mxu0 %v20790_v2  ;;  %v20874_v2 = vld [vmem:[%s28512_s7 + $0x7a0] ss:$16 sps:$4 sm:$0xff]  }
 0x5a6   : > { %6950 = vmatpush1.bf16.msra.mxu1 %v20793_v3  ;;  %6866 = vmatprep.subr.bf16.mxu0 %v20798_v4  ;;  %v20877_v3 = vld [vmem:[%s28512_s7 + $0x7a8] ss:$16 sps:$4 sm:$0xff]   ;;  %v20882_v4 = vld [vmem:[%s28512_s7 + $0x7c4] ss:$16 sps:$4 sm:$0xff]  }
 0x5a7   : > { %6972 = vmatprep.subr.bf16.mxu1 %v20801_v6  ;;  %v20885_v6 = vld [vmem:[%s28512_s7 + $0x7cc] ss:$16 sps:$4 sm:$0xff]  }
 0x5a8   : > { %6846 = vmatmul.mubr.bf16.vlgmr.msra.gmra.mrb[52].mxu0 %v25255_v15 }
 0x5a9   : > { %6952 = vmatmul.mubr.bf16.vlgmr.msra.gmra.mrb[52].mxu1 %v25255_v15  ;;  %6855 = vmatprep.mubr.bf16.mxu0 %v25271_v48  ;;  %v20813_v15 = vld [vmem:[%s28512_s7 + $0x64c] ss:$16 sps:$4 sm:$0xff]  }
 0x5aa   : > { %6867 = vmatpush1.bf16.msra.mxu0 %v20796_v7  ;;  %6961 = vmatprep.mubr.bf16.mxu1 %v25271_v48  ;;  %v20808_v48 = vld [vmem:[%s28512_s7 + $0x640] ss:$16 sps:$4 sm:$0xff]  }
 0x5ab   : > { %6973 = vmatpush1.bf16.msra.mxu1 %v20799_v8  ;;  %6868 = vmatprep.subr.bf16.mxu0 %v20804_v9  ;;  %v20880_v7 = vld [vmem:[%s28512_s7 + $0x7c0] ss:$16 sps:$4 sm:$0xff]   ;;  %v20883_v8 = vld [vmem:[%s28512_s7 + $0x7c8] ss:$16 sps:$4 sm:$0xff]   ;;  %v20888_v9 = vld [vmem:[%s28512_s7 + $0x7e4] ss:$16 sps:$4 sm:$0xff]  }
 0x5ac   : > { %6974 = vmatprep.subr.bf16.mxu1 %v20807_v10  ;;  %v20891_v10 = vld [vmem:[%s28512_s7 + $0x7ec] ss:$16 sps:$4 sm:$0xff]  }
 0x5ae   : > { %6869 = vmatpush1.bf16.msra.mxu0 %v20802_v11  ;;  %v20886_v11 = vld [vmem:[%s28512_s7 + $0x7e0] ss:$16 sps:$4 sm:$0xff]  }
 0x5af   : > { %6975 = vmatpush1.bf16.msra.mxu1 %v20805_v12  ;;  %6870 = vmatprep.subr.bf16.mxu0 %v20810_v13  ;;  %v20889_v12 = vld [vmem:[%s28512_s7 + $0x7e8] ss:$16 sps:$4 sm:$0xff]   ;;  %v20894_v13 = vld [vmem:[%s28512_s7 + $0x4] ss:$16 sps:$4 sm:$0xff]  }
 0x5b0   : > { %6856 = vmatmul.mubr.bf16.gmra.mrb[56].mxu0 %v25267_v25  ;;  %6976 = vmatprep.subr.bf16.mxu1 %v20813_v15  ;;  %v20897_v15 = vld [vmem:[%s28512_s7 + $0xc] ss:$16 sps:$4 sm:$0xff]  }
 0x5b1   : > { %6962 = vmatmul.mubr.bf16.gmra.mrb[56].mxu1 %v25267_v25  ;;  %6898 = vmatprep.mubr.bf16.mxu0 %v25261_v23  ;;  %v20825_v25 = vld [vmem:[%s28512_s7 + $0x68c] ss:$16 sps:$4 sm:$0xff]  }
 0x5b2   : > { %6871 = vmatpush1.bf16.msra.mxu0 %v20808_v48  ;;  %7004 = vmatprep.mubr.bf16.mxu1 %v25261_v23  ;;  %v20820_v23 = vld [vmem:[%s28512_s7 + $0x680] ss:$16 sps:$4 sm:$0xff]  }
 0x5b3   : > { %6977 = vmatpush1.bf16.msra.mxu1 %v20811_v14  ;;  %6872 = vmatprep.subr.bf16.mxu0 %v20816_v16  ;;  %v20892_v48 = vld [vmem:[%s28512_s7] ss:$16 sps:$4 sm:$0xff]   ;;  %v20895_v14 = vld [vmem:[%s28512_s7 + $0x8] ss:$16 sps:$4 sm:$0xff]   ;;  %v20900_v16 = vld [vmem:[%s28512_s7 + $0x24] ss:$16 sps:$4 sm:$0xff]  }
 0x5b4   : > { %6978 = vmatprep.subr.bf16.mxu1 %v20819_v19  ;;  %v20903_v19 = vld [vmem:[%s28512_s7 + $0x2c] ss:$16 sps:$4 sm:$0xff]  }
 0x5b6   : > { %6873 = vmatpush1.bf16.msra.mxu0 %v20814_v22  ;;  %v20898_v22 = vld [vmem:[%s28512_s7 + $0x20] ss:$16 sps:$4 sm:$0xff]  }
 0x5b7   : > { %6979 = vmatpush1.bf16.msra.mxu1 %v20817_v24  ;;  %6874 = vmatprep.subr.bf16.mxu0 %v20822_v58  ;;  %v20901_v24 = vld [vmem:[%s28512_s7 + $0x28] ss:$16 sps:$4 sm:$0xff]   ;;  %v20906_v58 = vld [vmem:[%s28512_s7 + $0x44] ss:$16 sps:$4 sm:$0xff]  }
 0x5b8   : > { %6980 = vmatprep.subr.bf16.mxu1 %v20825_v25  ;;  %v20907_v25 = vld [vmem:[%s28512_s7 + $0x48] ss:$16 sps:$4 sm:$0xff]  }
 0x5ba   : > { %6875 = vmatpush1.bf16.msra.mxu0 %v20820_v23  ;;  %v20912_v23 = vld [vmem:[%s28512_s7 + $0x64] ss:$16 sps:$4 sm:$0xff]  }
 0x5bb   : > { %6981 = vmatpush1.bf16.msra.mxu1 %v20823_v26  ;;  %6876 = vmatprep.subr.bf16.mxu0 %v20828_v27  ;;  %v20915_v26 = vld [vmem:[%s28512_s7 + $0x6c] ss:$16 sps:$4 sm:$0xff]   ;;  %v20910_v27 = vld [vmem:[%s28512_s7 + $0x60] ss:$16 sps:$4 sm:$0xff]  }
 0x5bc   : > { %6982 = vmatprep.subr.bf16.mxu1 %v20831_v30  ;;  %v20913_v30 = vld [vmem:[%s28512_s7 + $0x68] ss:$16 sps:$4 sm:$0xff]  }
 0x5be   : > { %6877 = vmatpush1.bf16.msra.mxu0 %v20826_v32  ;;  %v20918_v32 = vld [vmem:[%s28512_s7 + $0x84] ss:$16 sps:$4 sm:$0xff]  }
 0x5bf   : > { %6983 = vmatpush1.bf16.msra.mxu1 %v20829_v33  ;;  %6878 = vmatprep.subr.bf16.mxu0 %v20834_v34  ;;  %v20916_v33 = vld [vmem:[%s28512_s7 + $0x80] ss:$16 sps:$4 sm:$0xff]   ;;  %v20919_v34 = vld [vmem:[%s28512_s7 + $0x88] ss:$16 sps:$4 sm:$0xff]  }
 0x5c0   : > { %6984 = vmatprep.subr.bf16.mxu1 %v20837_v29  ;;  %v20924_v29 = vld [vmem:[%s28512_s7 + $0xa4] ss:$16 sps:$4 sm:$0xff]  }
 0x5c2   : > { %6879 = vmatpush1.bf16.msra.mxu0 %v20832_v63  ;;  %v20927_v63 = vld [vmem:[%s28512_s7 + $0xac] ss:$16 sps:$4 sm:$0xff]  }
 0x5c3   : > { %6985 = vmatpush1.bf16.msra.mxu1 %v20835_v56  ;;  %6880 = vmatprep.subr.bf16.mxu0 %v20840_v35  ;;  %v20922_v56 = vld [vmem:[%s28512_s7 + $0xa0] ss:$16 sps:$4 sm:$0xff]   ;;  %v20925_v35 = vld [vmem:[%s28512_s7 + $0xa8] ss:$16 sps:$4 sm:$0xff]  }
 0x5c4   : > { %6986 = vmatprep.subr.bf16.mxu1 %v20843_v31  ;;  %v20930_v31 = vld [vmem:[%s28512_s7 + $0xc4] ss:$16 sps:$4 sm:$0xff]  }
 0x5c6   : > { %6881 = vmatpush1.bf16.msra.mxu0 %v20838_v37  ;;  %v20933_v37 = vld [vmem:[%s28512_s7 + $0xcc] ss:$16 sps:$4 sm:$0xff]  }
 0x5c7   : > { %6987 = vmatpush1.bf16.msra.mxu1 %v20841_v5  ;;  %6882 = vmatprep.subr.bf16.mxu0 %v20846_v38  ;;  %v20928_v5 = vld [vmem:[%s28512_s7 + $0xc0] ss:$16 sps:$4 sm:$0xff]   ;;  %v20931_v38 = vld [vmem:[%s28512_s7 + $0xc8] ss:$16 sps:$4 sm:$0xff]  }
 0x5c8   : > { %6988 = vmatprep.subr.bf16.mxu1 %v20849_v39  ;;  %v20936_v39 = vld [vmem:[%s28512_s7 + $0xe4] ss:$16 sps:$4 sm:$0xff]  }
 0x5ca   : > { %6883 = vmatpush1.bf16.msra.mxu0 %v20844_v40  ;;  %v20939_v40 = vld [vmem:[%s28512_s7 + $0xec] ss:$16 sps:$4 sm:$0xff]  }
 0x5cb   : > { %6989 = vmatpush1.bf16.msra.mxu1 %v20847_v41  ;;  %6884 = vmatprep.subr.bf16.mxu0 %v20852_v44  ;;  %v20934_v41 = vld [vmem:[%s28512_s7 + $0xe0] ss:$16 sps:$4 sm:$0xff]   ;;  %v20937_v44 = vld [vmem:[%s28512_s7 + $0xe8] ss:$16 sps:$4 sm:$0xff]  }
 0x5cc   : > { %6990 = vmatprep.subr.bf16.mxu1 %v20855_v45  ;;  %v20942_v45 = vld [vmem:[%s28512_s7 + $0x104] ss:$16 sps:$4 sm:$0xff]  }
 0x5ce   : > { %6885 = vmatpush1.bf16.msra.mxu0 %v20850_v0  ;;  %v20945_v0 = vld [vmem:[%s28512_s7 + $0x10c] ss:$16 sps:$4 sm:$0xff]  }
 0x5cf   : > { %6991 = vmatpush1.bf16.msra.mxu1 %v20853_v46  ;;  %6886 = vmatprep.subr.bf16.mxu0 %v20858_v21  ;;  %v20940_v46 = vld [vmem:[%s28512_s7 + $0x100] ss:$16 sps:$4 sm:$0xff]   ;;  %v20943_v21 = vld [vmem:[%s28512_s7 + $0x108] ss:$16 sps:$4 sm:$0xff]  }
 0x5d0   : > { %6992 = vmatprep.subr.bf16.mxu1 %v20861_v42  ;;  %v20948_v42 = vld [vmem:[%s28512_s7 + $0x124] ss:$16 sps:$4 sm:$0xff]  }
 0x5d2   : > { %6887 = vmatpush1.bf16.msra.mxu0 %v20856_v43  ;;  %v20951_v43 = vld [vmem:[%s28512_s7 + $0x12c] ss:$16 sps:$4 sm:$0xff]  }
 0x5d3   : > { %6993 = vmatpush1.bf16.msra.mxu1 %v20859_v49  ;;  %6888 = vmatprep.subr.bf16.mxu0 %v20864_v50  ;;  %v20946_v49 = vld [vmem:[%s28512_s7 + $0x120] ss:$16 sps:$4 sm:$0xff]   ;;  %v20949_v50 = vld [vmem:[%s28512_s7 + $0x128] ss:$16 sps:$4 sm:$0xff]  }
 0x5d4   : > { %6994 = vmatprep.subr.bf16.mxu1 %v20867_v51  ;;  %v20954_v51 = vld [vmem:[%s28512_s7 + $0x144] ss:$16 sps:$4 sm:$0xff]  }
 0x5d6   : > { %6889 = vmatpush1.bf16.msra.mxu0 %v20862_v57  ;;  %v20957_v57 = vld [vmem:[%s28512_s7 + $0x14c] ss:$16 sps:$4 sm:$0xff]  }
 0x5d7   : > { %6995 = vmatpush1.bf16.msra.mxu1 %v20865_v52  ;;  %6890 = vmatprep.subr.bf16.mxu0 %v20870_v53  ;;  %v20952_v52 = vld [vmem:[%s28512_s7 + $0x140] ss:$16 sps:$4 sm:$0xff]   ;;  %v20955_v53 = vld [vmem:[%s28512_s7 + $0x148] ss:$16 sps:$4 sm:$0xff]  }
 0x5d8   : > { %6996 = vmatprep.subr.bf16.mxu1 %v20873_v54  ;;  %v20960_v54 = vld [vmem:[%s28512_s7 + $0x164] ss:$16 sps:$4 sm:$0xff]  }
 0x5da   : > { %6891 = vmatpush1.bf16.msra.mxu0 %v20868_v36  ;;  %v20963_v36 = vld [vmem:[%s28512_s7 + $0x16c] ss:$16 sps:$4 sm:$0xff]  }
 0x5db   : > { %6997 = vmatpush1.bf16.msra.mxu1 %v20871_v55  ;;  %6892 = vmatprep.subr.bf16.mxu0 %v20876_v28  ;;  %v20958_v55 = vld [vmem:[%s28512_s7 + $0x160] ss:$16 sps:$4 sm:$0xff]   ;;  %v20961_v28 = vld [vmem:[%s28512_s7 + $0x168] ss:$16 sps:$4 sm:$0xff]  }
 0x5dc   : > { %6998 = vmatprep.subr.bf16.mxu1 %v20879_v1  ;;  %v20966_v1 = vld [vmem:[%s28512_s7 + $0x184] ss:$16 sps:$4 sm:$0xff]  }
 0x5de   : > { %6893 = vmatpush1.bf16.msra.mxu0 %v20874_v2  ;;  %v20969_v2 = vld [vmem:[%s28512_s7 + $0x18c] ss:$16 sps:$4 sm:$0xff]  }
 0x5df   : > { %6999 = vmatpush1.bf16.msra.mxu1 %v20877_v3  ;;  %6894 = vmatprep.subr.bf16.mxu0 %v20882_v4  ;;  %v20964_v3 = vld [vmem:[%s28512_s7 + $0x180] ss:$16 sps:$4 sm:$0xff]   ;;  %v20967_v4 = vld [vmem:[%s28512_s7 + $0x188] ss:$16 sps:$4 sm:$0xff]  }
 0x5e0   : > { %7000 = vmatprep.subr.bf16.mxu1 %v20885_v6  ;;  %v20972_v6 = vld [vmem:[%s28512_s7 + $0x1a4] ss:$16 sps:$4 sm:$0xff]  }
 0x5e2   : > { %6895 = vmatpush1.bf16.msra.mxu0 %v20880_v7  ;;  %v20975_v7 = vld [vmem:[%s28512_s7 + $0x1ac] ss:$16 sps:$4 sm:$0xff]  }
 0x5e3   : > { %7001 = vmatpush1.bf16.msra.mxu1 %v20883_v8  ;;  %6896 = vmatprep.subr.bf16.mxu0 %v20888_v9  ;;  %v20970_v8 = vld [vmem:[%s28512_s7 + $0x1a0] ss:$16 sps:$4 sm:$0xff]   ;;  %v20973_v9 = vld [vmem:[%s28512_s7 + $0x1a8] ss:$16 sps:$4 sm:$0xff]  }
 0x5e4   : > { %7002 = vmatprep.subr.bf16.mxu1 %v20891_v10  ;;  %v20978_v10 = vld [vmem:[%s28512_s7 + $0x1c4] ss:$16 sps:$4 sm:$0xff]  }
 0x5e6   : > { %6897 = vmatpush1.bf16.msra.mxu0 %v20886_v11  ;;  %v20981_v11 = vld [vmem:[%s28512_s7 + $0x1cc] ss:$16 sps:$4 sm:$0xff]  }
 0x5e7   : > { %7003 = vmatpush1.bf16.msra.mxu1 %v20889_v12  ;;  %7665 = vmatprep.subr.bf16.mxu0 %v20894_v13  ;;  %v20976_v12 = vld [vmem:[%s28512_s7 + $0x1c0] ss:$16 sps:$4 sm:$0xff]   ;;  %v20979_v13 = vld [vmem:[%s28512_s7 + $0x1c8] ss:$16 sps:$4 sm:$0xff]  }
 0x5e8   : > { %7771 = vmatprep.subr.bf16.mxu1 %v20897_v15  ;;  %v20984_v15 = vld [vmem:[%s28512_s7 + $0x1e4] ss:$16 sps:$4 sm:$0xff]  }
 0x5e9   : > { %6899 = vmatmul.mubr.bf16.vlgmr.msra.gmra.mrb[52].mxu0 %v25257_v17 }
 0x5ea   : > { %7005 = vmatmul.mubr.bf16.vlgmr.msra.gmra.mrb[52].mxu1 %v25257_v17  ;;  %6908 = vmatprep.mubr.bf16.mxu0 %v25273_v18  ;;  %v20909_v17 = vld [vmem:[%s28512_s7 + $0x4c] ss:$16 sps:$4 sm:$0xff]  }
 0x5eb   : > { %7014 = vmatprep.mubr.bf16.mxu1 %v25273_v18  ;;  %7666 = vmatpush1.bf16.msra.mxu0 %v20892_v48  ;;  %v20904_v18 = vld [vmem:[%s28512_s7 + $0x40] ss:$16 sps:$4 sm:$0xff]   ;;  %v20987_v48 = vld [vmem:[%s28512_s7 + $0x1ec] ss:$16 sps:$4 sm:$0xff]  }
 0x5ec   : > { %7772 = vmatpush1.bf16.msra.mxu1 %v20895_v14  ;;  %7667 = vmatprep.subr.bf16.mxu0 %v20900_v16  ;;  %v20982_v14 = vld [vmem:[%s28512_s7 + $0x1e0] ss:$16 sps:$4 sm:$0xff]   ;;  %v20985_v16 = vld [vmem:[%s28512_s7 + $0x1e8] ss:$16 sps:$4 sm:$0xff]  }
 0x5ed   : > { %7773 = vmatprep.subr.bf16.mxu1 %v20903_v19  ;;  %v20990_v19 = vld [vmem:[%s28512_s7 + $0x204] ss:$16 sps:$4 sm:$0xff]  }
 0x5ef   : > { %7668 = vmatpush1.bf16.msra.mxu0 %v20898_v22  ;;  %v20993_v22 = vld [vmem:[%s28512_s7 + $0x20c] ss:$16 sps:$4 sm:$0xff]  }
 0x5f0   : > { %7774 = vmatpush1.bf16.msra.mxu1 %v20901_v24  ;;  %7669 = vmatprep.subr.bf16.mxu0 %v20906_v58 }
 0x5f1   : > { %6909 = vmatmul.mubr.bf16.gmra.mrb[56].mxu0 %v25269_v47  ;;  %7775 = vmatprep.subr.bf16.mxu1 %v20909_v17 }
 0x5f2   : > { %7015 = vmatmul.mubr.bf16.gmra.mrb[56].mxu1 %v25269_v47  ;;  %v20921_v47 = vld [vmem:[%s28512_s7 + $0x8c] ss:$16 sps:$4 sm:$0xff]  }
 0x5f3   : > { %7670 = vmatpush1.bf16.msra.mxu0 %v20904_v18 }
 0x5f4   : > { %7776 = vmatpush1.bf16.msra.mxu1 %v20907_v25  ;;  %7671 = vmatprep.subr.bf16.mxu0 %v20912_v23 }
 0x5f5   : > { %7777 = vmatprep.subr.bf16.mxu1 %v20915_v26 }
 0x5f7   : > { %7672 = vmatpush1.bf16.msra.mxu0 %v20910_v27 }
 0x5f8   : > { %7778 = vmatpush1.bf16.msra.mxu1 %v20913_v30  ;;  %7673 = vmatprep.subr.bf16.mxu0 %v20918_v32  ;;  %v20988_v32 = vld [vmem:[%s28512_s7 + $0x200] ss:$16 sps:$4 sm:$0xff]  }
 0x5f9   : > { %7779 = vmatprep.subr.bf16.mxu1 %v20921_v47  ;;  %v20991_v47 = vld [vmem:[%s28512_s7 + $0x208] ss:$16 sps:$4 sm:$0xff]  }
 0x5fb   : > { %7674 = vmatpush1.bf16.msra.mxu0 %v20916_v33 }
 0x5fc   : > { %7780 = vmatpush1.bf16.msra.mxu1 %v20919_v34  ;;  %7675 = vmatprep.subr.bf16.mxu0 %v20924_v29  ;;  %v20996_v29 = vld [vmem:[%s28512_s7 + $0x224] ss:$16 sps:$4 sm:$0xff]  }
 0x5fd   : > { %7781 = vmatprep.subr.bf16.mxu1 %v20927_v63  ;;  %v20999_v63 = vld [vmem:[%s28512_s7 + $0x22c] ss:$16 sps:$4 sm:$0xff]  }
 0x5ff   : > { %7676 = vmatpush1.bf16.msra.mxu0 %v20922_v56 }
 0x600   : > { %7782 = vmatpush1.bf16.msra.mxu1 %v20925_v35  ;;  %7677 = vmatprep.subr.bf16.mxu0 %v20930_v31  ;;  %v20994_v35 = vld [vmem:[%s28512_s7 + $0x220] ss:$16 sps:$4 sm:$0xff]   ;;  %v20997_v31 = vld [vmem:[%s28512_s7 + $0x228] ss:$16 sps:$4 sm:$0xff]  }
 0x601   : > { %7783 = vmatprep.subr.bf16.mxu1 %v20933_v37 }
 0x603   : > { %7678 = vmatpush1.bf16.msra.mxu0 %v20928_v5  ;;  %v21002_v5 = vld [vmem:[%s28512_s7 + $0x244] ss:$16 sps:$4 sm:$0xff]  }
 0x604   : > { %7784 = vmatpush1.bf16.msra.mxu1 %v20931_v38  ;;  %7679 = vmatprep.subr.bf16.mxu0 %v20936_v39  ;;  %v21005_v38 = vld [vmem:[%s28512_s7 + $0x24c] ss:$16 sps:$4 sm:$0xff]  }
 0x605   : > { %7785 = vmatprep.subr.bf16.mxu1 %v20939_v40 }
 0x607   : > { %7680 = vmatpush1.bf16.msra.mxu0 %v20934_v41 }
 0x608   : > { %7786 = vmatpush1.bf16.msra.mxu1 %v20937_v44  ;;  %7681 = vmatprep.subr.bf16.mxu0 %v20942_v45 }
 0x609   : > { %7787 = vmatprep.subr.bf16.mxu1 %v20945_v0 }
 0x60b   : > { %7682 = vmatpush1.bf16.msra.mxu0 %v20940_v46 }
 0x60c   : > { %7788 = vmatpush1.bf16.msra.mxu1 %v20943_v21  ;;  %7683 = vmatprep.subr.bf16.mxu0 %v20948_v42  ;;  %v21000_v21 = vld [vmem:[%s28512_s7 + $0x240] ss:$16 sps:$4 sm:$0xff]   ;;  %v21003_v42 = vld [vmem:[%s28512_s7 + $0x248] ss:$16 sps:$4 sm:$0xff]  }
 0x60d   : > { %7789 = vmatprep.subr.bf16.mxu1 %v20951_v43 }
 0x60f   : > { %7684 = vmatpush1.bf16.msra.mxu0 %v20946_v49 }
 0x610   : > { %7790 = vmatpush1.bf16.msra.mxu1 %v20949_v50  ;;  %7685 = vmatprep.subr.bf16.mxu0 %v20954_v51  ;;  %v21008_v51 = vld [vmem:[%s28512_s7 + $0x264] ss:$16 sps:$4 sm:$0xff]  }
 0x611   : > { %7791 = vmatprep.subr.bf16.mxu1 %v20957_v57  ;;  %v21011_v57 = vld [vmem:[%s28512_s7 + $0x26c] ss:$16 sps:$4 sm:$0xff]  }
 0x613   : > { %7686 = vmatpush1.bf16.msra.mxu0 %v20952_v52 }
 0x614   : > { %7792 = vmatpush1.bf16.msra.mxu1 %v20955_v53  ;;  %7687 = vmatprep.subr.bf16.mxu0 %v20960_v54  ;;  %v21006_v53 = vld [vmem:[%s28512_s7 + $0x260] ss:$16 sps:$4 sm:$0xff]   ;;  %v21009_v54 = vld [vmem:[%s28512_s7 + $0x268] ss:$16 sps:$4 sm:$0xff]  }
 0x615   : > { %7793 = vmatprep.subr.bf16.mxu1 %v20963_v36 }
 0x617   : > { %7688 = vmatpush1.bf16.msra.mxu0 %v20958_v55  ;;  %v21014_v55 = vld [vmem:[%s28512_s7 + $0x284] ss:$16 sps:$4 sm:$0xff]  }
 0x618   : > { %7794 = vmatpush1.bf16.msra.mxu1 %v20961_v28  ;;  %7689 = vmatprep.subr.bf16.mxu0 %v20966_v1  ;;  %v21017_v28 = vld [vmem:[%s28512_s7 + $0x28c] ss:$16 sps:$4 sm:$0xff]  }
 0x619   : > { %7795 = vmatprep.subr.bf16.mxu1 %v20969_v2 }
 0x61b   : > { %7690 = vmatpush1.bf16.msra.mxu0 %v20964_v3 }
 0x61c   : > { %7796 = vmatpush1.bf16.msra.mxu1 %v20967_v4  ;;  %7691 = vmatprep.subr.bf16.mxu0 %v20972_v6 }
 0x61d   : > { %7797 = vmatprep.subr.bf16.mxu1 %v20975_v7 }
 0x61f   : > { %7692 = vmatpush1.bf16.msra.mxu0 %v20970_v8 }
 0x620   : > { %7798 = vmatpush1.bf16.msra.mxu1 %v20973_v9  ;;  %7693 = vmatprep.subr.bf16.mxu0 %v20978_v10  ;;  %v21012_v9 = vld [vmem:[%s28512_s7 + $0x280] ss:$16 sps:$4 sm:$0xff]   ;;  %v21015_v10 = vld [vmem:[%s28512_s7 + $0x288] ss:$16 sps:$4 sm:$0xff]  }
 0x621   : > { %7799 = vmatprep.subr.bf16.mxu1 %v20981_v11 }
 0x623   : > { %7694 = vmatpush1.bf16.msra.mxu0 %v20976_v12 }
 0x624   : > { %7800 = vmatpush1.bf16.msra.mxu1 %v20979_v13  ;;  %7695 = vmatprep.subr.bf16.mxu0 %v20984_v15  ;;  %v21020_v15 = vld [vmem:[%s28512_s7 + $0x2a4] ss:$16 sps:$4 sm:$0xff]  }
 0x625   : > { %7801 = vmatprep.subr.bf16.mxu1 %v20987_v48  ;;  %v21023_v48 = vld [vmem:[%s28512_s7 + $0x2ac] ss:$16 sps:$4 sm:$0xff]  }
 0x627   : > { %7696 = vmatpush1.bf16.msra.mxu0 %v20982_v14 }
 0x628   : > { %7802 = vmatpush1.bf16.msra.mxu1 %v20985_v16  ;;  %7718 = vmatprep.subr.bf16.mxu0 %v20990_v19  ;;  %v21018_v16 = vld [vmem:[%s28512_s7 + $0x2a0] ss:$16 sps:$4 sm:$0xff]   ;;  %v21021_v19 = vld [vmem:[%s28512_s7 + $0x2a8] ss:$16 sps:$4 sm:$0xff]  }
 0x629   : > { %7824 = vmatprep.subr.bf16.mxu1 %v20993_v22 }
 0x62b   : > { %v5722_v24 = vpop.f32.mrb[36].mxu0 }
 0x62c   : > { %v5724_v58 = vpop.f32.mrb[37].mxu0  ;;  %v5775_v17 = vpop.f32.mrb[36].mxu1 }
 0x62d   : > { %v5726_v18 = vpop.f32.mrb[38].mxu0  ;;  %v5777_v25 = vpop.f32.mrb[37].mxu1 }
 0x62e   : > { %v5794_v23 = vpack.c.bf16 %v5726_v18, %v5722_v24  ;;  %v5728_v26 = vpop.f32.mrb[39].mxu0  ;;  %v5779_v27 = vpop.f32.mrb[38].mxu1  ;;  %v21026_v24 = vld [vmem:[%s28512_s7 + $0x2c4] ss:$16 sps:$4 sm:$0xff]  }
 0x62f   : > { %v5795_v30 = vpack.c.bf16 %v5728_v26, %v5724_v58  ;;  %v25917_v33 = vpack.c.bf16 %v5779_v27, %v5775_v17  ;;  %v5781_v34 = vpop.f32.mrb[39].mxu1  ;;  %v21029_v58 = vld [vmem:[%s28512_s7 + $0x2cc] ss:$16 sps:$4 sm:$0xff]  }
 0x630   : > { %v5797_v56 = vpack.c.bf16 %v5781_v34, %v5777_v25 }
 0x631   : > { %7697 = vmatprep.mubr.bf16.mxu0 %v5795_v30  ;;  %7803 = vmatprep.mubr.bf16.mxu1 %v5795_v30 }
 0x632   : > { %7698 = vmatmul.mubr.bf16.vlgmr.msra.gmra.mrb[52].mxu0 %v5794_v23  ;;  %7804 = vmatmul.mubr.bf16.vlgmr.msra.gmra.mrb[52].mxu1 %v5794_v23 }
 0x633   : > { %7719 = vmatpush1.bf16.msra.mxu0 %v20988_v32  ;;  %7825 = vmatpush1.bf16.msra.mxu1 %v20991_v47  ;;  %v5732_v37 = vpop.f32.mrb[40].mxu0  ;;  %v21024_v32 = vld [vmem:[%s28512_s7 + $0x2c0] ss:$16 sps:$4 sm:$0xff]   ;;  %v21027_v47 = vld [vmem:[%s28512_s7 + $0x2c8] ss:$16 sps:$4 sm:$0xff]  }
 0x634   : > { %7720 = vmatprep.subr.bf16.mxu0 %v20996_v29  ;;  %7826 = vmatprep.subr.bf16.mxu1 %v20999_v63  ;;  %v5734_v39 = vpop.f32.mrb[41].mxu0  ;;  %v5785_v40 = vpop.f32.mrb[40].mxu1 }
 0x635   : > { %v5736_v41 = vpop.f32.mrb[42].mxu0  ;;  %v5787_v44 = vpop.f32.mrb[41].mxu1 }
 0x636   : > { %v5798_v45 = vpack.c.bf16 %v5736_v41, %v5732_v37  ;;  %v5738_v0 = vpop.f32.mrb[43].mxu0  ;;  %v5789_v46 = vpop.f32.mrb[42].mxu1  ;;  %v21030_v37 = vld [vmem:[%s28512_s7 + $0x2e0] ss:$16 sps:$4 sm:$0xff]   ;;  %v21039_v41 = vld [vmem:[%s28512_s7 + $0x308] ss:$16 sps:$4 sm:$0xff]  }
 0x637   : > { %7721 = vmatpush1.bf16.msra.mxu0 %v20994_v35  ;;  %7827 = vmatpush1.bf16.msra.mxu1 %v20997_v31  ;;  %v5799_v43 = vpack.c.bf16 %v5738_v0, %v5734_v39  ;;  %v25943_v49 = vpack.c.bf16 %v5789_v46, %v5785_v40  ;;  %v5791_v50 = vpop.f32.mrb[43].mxu1  ;;  %v21035_v35 = vld [vmem:[%s28512_s7 + $0x2ec] ss:$16 sps:$4 sm:$0xff]   ;;  %v21036_v40 = vld [vmem:[%s28512_s7 + $0x300] ss:$16 sps:$4 sm:$0xff]  }
 0x638   : > { %7722 = vmatprep.subr.bf16.mxu0 %v21002_v5  ;;  %7828 = vmatprep.subr.bf16.mxu1 %v21005_v38  ;;  %v25951_v52 = vpack.c.bf16 %v5791_v50, %v5787_v44  ;;  %v21033_v5 = vld [vmem:[%s28512_s7 + $0x2e8] ss:$16 sps:$4 sm:$0xff]   ;;  %v21038_v38 = vld [vmem:[%s28512_s7 + $0x304] ss:$16 sps:$4 sm:$0xff]   ;;  %v21041_v39 = vld [vmem:[%s28512_s7 + $0x30c] ss:$16 sps:$4 sm:$0xff]  }
 0x639   : > { %7707 = vmatprep.mubr.bf16.mxu0 %v5799_v43  ;;  %7813 = vmatprep.mubr.bf16.mxu1 %v5799_v43  ;;  %v21044_v44 = vld [vmem:[%s28512_s7 + $0x324] ss:$16 sps:$4 sm:$0xff]   ;;  %v21042_v0 = vld [vmem:[%s28512_s7 + $0x320] ss:$16 sps:$4 sm:$0xff]   ;;  %v21045_v46 = vld [vmem:[%s28512_s7 + $0x328] ss:$16 sps:$4 sm:$0xff]  }
 0x63a   : > { %7708 = vmatmul.mubr.bf16.gmra.mrb[56].mxu0 %v5798_v45  ;;  %7814 = vmatmul.mubr.bf16.gmra.mrb[56].mxu1 %v5798_v45  ;;  %v21047_v45 = vld [vmem:[%s28512_s7 + $0x32c] ss:$16 sps:$4 sm:$0xff]   ;;  %v21048_v43 = vld [vmem:[%s28512_s7 + $0x340] ss:$16 sps:$4 sm:$0xff]   ;;  %v21051_v50 = vld [vmem:[%s28512_s7 + $0x348] ss:$16 sps:$4 sm:$0xff]  }
 0x63b   : > { %7723 = vmatpush1.bf16.msra.mxu0 %v21000_v21  ;;  %7829 = vmatpush1.bf16.msra.mxu1 %v21003_v42  ;;  %v5836_v36 = vpop.f32.mrb[44].mxu0  ;;  %v21050_v21 = vld [vmem:[%s28512_s7 + $0x344] ss:$16 sps:$4 sm:$0xff]   ;;  %v21053_v42 = vld [vmem:[%s28512_s7 + $0x34c] ss:$16 sps:$4 sm:$0xff]  }
 0x63c   : > { %7724 = vmatprep.subr.bf16.mxu0 %v21008_v51  ;;  %7830 = vmatprep.subr.bf16.mxu1 %v21011_v57  ;;  %v5838_v1 = vpop.f32.mrb[45].mxu0  ;;  %v5889_v2 = vpop.f32.mrb[44].mxu1  ;;  %v21056_v51 = vld [vmem:[%s28512_s7 + $0x364] ss:$16 sps:$4 sm:$0xff]   ;;  %v21059_v57 = vld [vmem:[%s28512_s7 + $0x36c] ss:$16 sps:$4 sm:$0xff]  }
 0x63d   : > { %7750 = vmatprep.mubr.bf16.mxu0 %v5797_v56  ;;  %7856 = vmatprep.mubr.bf16.mxu1 %v5797_v56  ;;  %v5840_v3 = vpop.f32.mrb[46].mxu0  ;;  %v5891_v4 = vpop.f32.mrb[45].mxu1  ;;  %v21032_v56 = vld [vmem:[%s28512_s7 + $0x2e4] ss:$16 sps:$4 sm:$0xff]  }
 0x63e   : > { %v25965_v6 = vpack.c.bf16 %v5840_v3, %v5836_v36  ;;  %v5842_v7 = vpop.f32.mrb[47].mxu0  ;;  %v5893_v8 = vpop.f32.mrb[46].mxu1  ;;  %v21062_v36 = vld [vmem:[%s28512_s7 + $0x384] ss:$16 sps:$4 sm:$0xff]   ;;  %v21071_v3 = vld [vmem:[%s28512_s7 + $0x3ac] ss:$16 sps:$4 sm:$0xff]  }
 0x63f   : > { %7725 = vmatpush1.bf16.msra.mxu0 %v21006_v53  ;;  %7831 = vmatpush1.bf16.msra.mxu1 %v21009_v54  ;;  %v25973_v11 = vpack.c.bf16 %v5842_v7, %v5838_v1  ;;  %v25975_v12 = vpack.c.bf16 %v5893_v8, %v5889_v2  ;;  %v5895_v13 = vpop.f32.mrb[47].mxu1  ;;  %v21054_v53 = vld [vmem:[%s28512_s7 + $0x360] ss:$16 sps:$4 sm:$0xff]   ;;  %v21057_v54 = vld [vmem:[%s28512_s7 + $0x368] ss:$16 sps:$4 sm:$0xff]  }
 0x640   : > { %7726 = vmatprep.subr.bf16.mxu0 %v21014_v55  ;;  %7832 = vmatprep.subr.bf16.mxu1 %v21017_v28  ;;  %v25983_v14 = vpack.c.bf16 %v5895_v13, %v5891_v4  ;;  %v21065_v55 = vld [vmem:[%s28512_s7 + $0x38c] ss:$16 sps:$4 sm:$0xff]   ;;  %v21060_v28 = vld [vmem:[%s28512_s7 + $0x380] ss:$16 sps:$4 sm:$0xff]   ;;  %v21063_v1 = vld [vmem:[%s28512_s7 + $0x388] ss:$16 sps:$4 sm:$0xff]  }
 0x641   : > { %v21068_v2 = vld [vmem:[%s28512_s7 + $0x3a4] ss:$16 sps:$4 sm:$0xff]   ;;  %v21066_v4 = vld [vmem:[%s28512_s7 + $0x3a0] ss:$16 sps:$4 sm:$0xff]   ;;  %v21069_v7 = vld [vmem:[%s28512_s7 + $0x3a8] ss:$16 sps:$4 sm:$0xff]  }
 0x642   : > { %v21074_v8 = vld [vmem:[%s28512_s7 + $0x3c4] ss:$16 sps:$4 sm:$0xff]   ;;  %v21075_v13 = vld [vmem:[%s28512_s7 + $0x3c8] ss:$16 sps:$4 sm:$0xff]  }
 0x643   : > { %7727 = vmatpush1.bf16.msra.mxu0 %v21012_v9  ;;  %7833 = vmatpush1.bf16.msra.mxu1 %v21015_v10  ;;  %v5846_v22 = vpop.f32.mrb[48].mxu0  ;;  %v21077_v9 = vld [vmem:[%s28512_s7 + $0x3cc] ss:$16 sps:$4 sm:$0xff]   ;;  %v21072_v10 = vld [vmem:[%s28512_s7 + $0x3c0] ss:$16 sps:$4 sm:$0xff]  }
 0x644   : > { %7728 = vmatprep.subr.bf16.mxu0 %v21020_v15  ;;  %7834 = vmatprep.subr.bf16.mxu1 %v21023_v48  ;;  %v5848_v17 = vpop.f32.mrb[49].mxu0  ;;  %v5899_v18 = vpop.f32.mrb[48].mxu1  ;;  %v21080_v15 = vld [vmem:[%s28512_s7 + $0x3e4] ss:$16 sps:$4 sm:$0xff]   ;;  %v21083_v48 = vld [vmem:[%s28512_s7 + $0x3ec] ss:$16 sps:$4 sm:$0xff]  }
 0x645   : > { %v5850_v25 = vpop.f32.mrb[50].mxu0  ;;  %v5901_v23 = vpop.f32.mrb[49].mxu1 }
 0x646   : > { %v25997_v26 = vpack.c.bf16 %v5850_v25, %v5846_v22  ;;  %v5852_v27 = vpop.f32.mrb[51].mxu0  ;;  %v5903_v30 = vpop.f32.mrb[50].mxu1  ;;  %v21086_v22 = vld [vmem:[%s28512_s7 + $0x804] ss:$16 sps:$4 sm:$0xff]   ;;  %v21095_v25 = vld [vmem:[%s28512_s7 + $0x82c] ss:$16 sps:$4 sm:$0xff]  }
 0x647   : > { %7729 = vmatpush1.bf16.msra.mxu0 %v21018_v16  ;;  %7835 = vmatpush1.bf16.msra.mxu1 %v21021_v19  ;;  %v26005_v34 = vpack.c.bf16 %v5852_v27, %v5848_v17  ;;  %v26007_v29 = vpack.c.bf16 %v5903_v30, %v5899_v18  ;;  %v5905_v63 = vpop.f32.mrb[51].mxu1  ;;  %v21078_v16 = vld [vmem:[%s28512_s7 + $0x3e0] ss:$16 sps:$4 sm:$0xff]   ;;  %v21081_v19 = vld [vmem:[%s28512_s7 + $0x3e8] ss:$16 sps:$4 sm:$0xff]  }
 0x648   : > { %7730 = vmatprep.subr.bf16.mxu0 %v21026_v24  ;;  %7836 = vmatprep.subr.bf16.mxu1 %v21029_v58  ;;  %v26015_v31 = vpack.c.bf16 %v5905_v63, %v5901_v23  ;;  %v21089_v24 = vld [vmem:[%s28512_s7 + $0x80c] ss:$16 sps:$4 sm:$0xff]   ;;  %v21084_v58 = vld [vmem:[%s28512_s7 + $0x800] ss:$16 sps:$4 sm:$0xff]   ;;  %v21087_v17 = vld [vmem:[%s28512_s7 + $0x808] ss:$16 sps:$4 sm:$0xff]  }
 0x649   : > { %v21092_v18 = vld [vmem:[%s28512_s7 + $0x824] ss:$16 sps:$4 sm:$0xff]   ;;  %v21090_v23 = vld [vmem:[%s28512_s7 + $0x820] ss:$16 sps:$4 sm:$0xff]   ;;  %v21093_v27 = vld [vmem:[%s28512_s7 + $0x828] ss:$16 sps:$4 sm:$0xff]  }
 0x64a   : > { %v21096_v30 = vld [vmem:[%s28512_s7 + $0x840] ss:$16 sps:$4 sm:$0xff]   ;;  %v21107_v63 = vld [vmem:[%s28512_s7 + $0x86c] ss:$16 sps:$4 sm:$0xff]  }
 0x64b   : > { %7731 = vmatpush1.bf16.msra.mxu0 %v21024_v32  ;;  %7837 = vmatpush1.bf16.msra.mxu1 %v21027_v47  ;;  %v21099_v32 = vld [vmem:[%s28512_s7 + $0x848] ss:$16 sps:$4 sm:$0xff]   ;;  %v21104_v47 = vld [vmem:[%s28512_s7 + $0x864] ss:$16 sps:$4 sm:$0xff]  }
 0x64c   : > { %7732 = vmatprep.subr.bf16.mxu0 %v21032_v56  ;;  %7838 = vmatprep.subr.bf16.mxu1 %v21035_v35  ;;  %v21102_v56 = vld [vmem:[%s28512_s7 + $0x860] ss:$16 sps:$4 sm:$0xff]   ;;  %v21105_v35 = vld [vmem:[%s28512_s7 + $0x868] ss:$16 sps:$4 sm:$0xff]  }
 0x64f   : > { %7733 = vmatpush1.bf16.msra.mxu0 %v21030_v37  ;;  %7839 = vmatpush1.bf16.msra.mxu1 %v21033_v5  ;;  %v21108_v37 = vld [vmem:[%s28512_s7 + $0x880] ss:$16 sps:$4 sm:$0xff]   ;;  %v21111_v5 = vld [vmem:[%s28512_s7 + $0x888] ss:$16 sps:$4 sm:$0xff]  }
 0x650   : > { %7734 = vmatprep.subr.bf16.mxu0 %v21038_v38  ;;  %7840 = vmatprep.subr.bf16.mxu1 %v21041_v39  ;;  %v21116_v38 = vld [vmem:[%s28512_s7 + $0x8a4] ss:$16 sps:$4 sm:$0xff]   ;;  %v21119_v39 = vld [vmem:[%s28512_s7 + $0x8ac] ss:$16 sps:$4 sm:$0xff]  }
 0x653   : > { %7735 = vmatpush1.bf16.msra.mxu0 %v21036_v40  ;;  %7841 = vmatpush1.bf16.msra.mxu1 %v21039_v41  ;;  %v21114_v40 = vld [vmem:[%s28512_s7 + $0x8a0] ss:$16 sps:$4 sm:$0xff]   ;;  %v21117_v41 = vld [vmem:[%s28512_s7 + $0x8a8] ss:$16 sps:$4 sm:$0xff]  }
 0x654   : > { %7736 = vmatprep.subr.bf16.mxu0 %v21044_v44  ;;  %7842 = vmatprep.subr.bf16.mxu1 %v21047_v45  ;;  %v21122_v44 = vld [vmem:[%s28512_s7 + $0x8c4] ss:$16 sps:$4 sm:$0xff]   ;;  %v21125_v45 = vld [vmem:[%s28512_s7 + $0x8cc] ss:$16 sps:$4 sm:$0xff]  }
 0x657   : > { %7737 = vmatpush1.bf16.msra.mxu0 %v21042_v0  ;;  %7843 = vmatpush1.bf16.msra.mxu1 %v21045_v46  ;;  %v21120_v0 = vld [vmem:[%s28512_s7 + $0x8c0] ss:$16 sps:$4 sm:$0xff]   ;;  %v21123_v46 = vld [vmem:[%s28512_s7 + $0x8c8] ss:$16 sps:$4 sm:$0xff]  }
 0x658   : > { %7738 = vmatprep.subr.bf16.mxu0 %v21050_v21  ;;  %7844 = vmatprep.subr.bf16.mxu1 %v21053_v42  ;;  %v21128_v21 = vld [vmem:[%s28512_s7 + $0x8e4] ss:$16 sps:$4 sm:$0xff]   ;;  %v21131_v42 = vld [vmem:[%s28512_s7 + $0x8ec] ss:$16 sps:$4 sm:$0xff]  }
 0x65b   : > { %7739 = vmatpush1.bf16.msra.mxu0 %v21048_v43  ;;  %7845 = vmatpush1.bf16.msra.mxu1 %v21051_v50  ;;  %v21126_v43 = vld [vmem:[%s28512_s7 + $0x8e0] ss:$16 sps:$4 sm:$0xff]   ;;  %v21129_v50 = vld [vmem:[%s28512_s7 + $0x8e8] ss:$16 sps:$4 sm:$0xff]  }
 0x65c   : > { %7740 = vmatprep.subr.bf16.mxu0 %v21056_v51  ;;  %7846 = vmatprep.subr.bf16.mxu1 %v21059_v57  ;;  %v21134_v51 = vld [vmem:[%s28512_s7 + $0x904] ss:$16 sps:$4 sm:$0xff]   ;;  %v21137_v57 = vld [vmem:[%s28512_s7 + $0x90c] ss:$16 sps:$4 sm:$0xff]  }
 0x65f   : > { %7741 = vmatpush1.bf16.msra.mxu0 %v21054_v53  ;;  %7847 = vmatpush1.bf16.msra.mxu1 %v21057_v54  ;;  %v21132_v53 = vld [vmem:[%s28512_s7 + $0x900] ss:$16 sps:$4 sm:$0xff]   ;;  %v21135_v54 = vld [vmem:[%s28512_s7 + $0x908] ss:$16 sps:$4 sm:$0xff]  }
 0x660   : > { %7742 = vmatprep.subr.bf16.mxu0 %v21062_v36  ;;  %7848 = vmatprep.subr.bf16.mxu1 %v21065_v55  ;;  %v21140_v36 = vld [vmem:[%s28512_s7 + $0x924] ss:$16 sps:$4 sm:$0xff]   ;;  %v21143_v55 = vld [vmem:[%s28512_s7 + $0x92c] ss:$16 sps:$4 sm:$0xff]  }
 0x663   : > { %7743 = vmatpush1.bf16.msra.mxu0 %v21060_v28  ;;  %7849 = vmatpush1.bf16.msra.mxu1 %v21063_v1  ;;  %v21138_v28 = vld [vmem:[%s28512_s7 + $0x920] ss:$16 sps:$4 sm:$0xff]   ;;  %v21141_v1 = vld [vmem:[%s28512_s7 + $0x928] ss:$16 sps:$4 sm:$0xff]  }
 0x664   : > { %7744 = vmatprep.subr.bf16.mxu0 %v21068_v2  ;;  %7850 = vmatprep.subr.bf16.mxu1 %v21071_v3  ;;  %v21146_v2 = vld [vmem:[%s28512_s7 + $0x944] ss:$16 sps:$4 sm:$0xff]   ;;  %v21149_v3 = vld [vmem:[%s28512_s7 + $0x94c] ss:$16 sps:$4 sm:$0xff]  }
 0x667   : > { %7745 = vmatpush1.bf16.msra.mxu0 %v21066_v4  ;;  %7851 = vmatpush1.bf16.msra.mxu1 %v21069_v7  ;;  %v21144_v4 = vld [vmem:[%s28512_s7 + $0x940] ss:$16 sps:$4 sm:$0xff]   ;;  %v21147_v7 = vld [vmem:[%s28512_s7 + $0x948] ss:$16 sps:$4 sm:$0xff]  }
 0x668   : > { %7746 = vmatprep.subr.bf16.mxu0 %v21074_v8  ;;  %7852 = vmatprep.subr.bf16.mxu1 %v21077_v9  ;;  %v21152_v8 = vld [vmem:[%s28512_s7 + $0x964] ss:$16 sps:$4 sm:$0xff]   ;;  %v21155_v9 = vld [vmem:[%s28512_s7 + $0x96c] ss:$16 sps:$4 sm:$0xff]  }
 0x66b   : > { %7747 = vmatpush1.bf16.msra.mxu0 %v21072_v10  ;;  %7853 = vmatpush1.bf16.msra.mxu1 %v21075_v13  ;;  %v21150_v10 = vld [vmem:[%s28512_s7 + $0x960] ss:$16 sps:$4 sm:$0xff]   ;;  %v21153_v13 = vld [vmem:[%s28512_s7 + $0x968] ss:$16 sps:$4 sm:$0xff]  }
 0x66c   : > { %7748 = vmatprep.subr.bf16.mxu0 %v21080_v15  ;;  %7854 = vmatprep.subr.bf16.mxu1 %v21083_v48  ;;  %v21158_v15 = vld [vmem:[%s28512_s7 + $0x984] ss:$16 sps:$4 sm:$0xff]   ;;  %v21161_v48 = vld [vmem:[%s28512_s7 + $0x98c] ss:$16 sps:$4 sm:$0xff]  }
 0x66f   : > { %7749 = vmatpush1.bf16.msra.mxu0 %v21078_v16  ;;  %7855 = vmatpush1.bf16.msra.mxu1 %v21081_v19  ;;  %v21156_v16 = vld [vmem:[%s28512_s7 + $0x980] ss:$16 sps:$4 sm:$0xff]   ;;  %v21159_v19 = vld [vmem:[%s28512_s7 + $0x988] ss:$16 sps:$4 sm:$0xff]  }
 0x670   : > { %8646 = vmatprep.subr.bf16.mxu0 %v21086_v22  ;;  %8752 = vmatprep.subr.bf16.mxu1 %v21089_v24  ;;  %v21164_v22 = vld [vmem:[%s28512_s7 + $0x9a4] ss:$16 sps:$4 sm:$0xff]   ;;  %v21167_v24 = vld [vmem:[%s28512_s7 + $0x9ac] ss:$16 sps:$4 sm:$0xff]  }
 0x672   : > { %7751 = vmatmul.mubr.bf16.vlgmr.msra.gmra.mrb[52].mxu0 %v25917_v33  ;;  %7857 = vmatmul.mubr.bf16.vlgmr.msra.gmra.mrb[52].mxu1 %v25917_v33  ;;  %v21098_v33 = vld [vmem:[%s28512_s7 + $0x844] ss:$16 sps:$4 sm:$0xff]  }
 0x673   : > { %7760 = vmatprep.mubr.bf16.mxu0 %v25951_v52  ;;  %7866 = vmatprep.mubr.bf16.mxu1 %v25951_v52  ;;  %v21101_v52 = vld [vmem:[%s28512_s7 + $0x84c] ss:$16 sps:$4 sm:$0xff]  }
 0x674   : > { %8647 = vmatpush1.bf16.msra.mxu0 %v21084_v58  ;;  %8753 = vmatpush1.bf16.msra.mxu1 %v21087_v17  ;;  %v21162_v58 = vld [vmem:[%s28512_s7 + $0x9a0] ss:$16 sps:$4 sm:$0xff]   ;;  %v21165_v17 = vld [vmem:[%s28512_s7 + $0x9a8] ss:$16 sps:$4 sm:$0xff]  }
 0x675   : > { %8648 = vmatprep.subr.bf16.mxu0 %v21092_v18  ;;  %8754 = vmatprep.subr.bf16.mxu1 %v21095_v25  ;;  %v21170_v18 = vld [vmem:[%s28512_s7 + $0x9c4] ss:$16 sps:$4 sm:$0xff]   ;;  %v21173_v25 = vld [vmem:[%s28512_s7 + $0x9cc] ss:$16 sps:$4 sm:$0xff]  }
 0x678   : > { %8649 = vmatpush1.bf16.msra.mxu0 %v21090_v23  ;;  %8755 = vmatpush1.bf16.msra.mxu1 %v21093_v27  ;;  %v21168_v23 = vld [vmem:[%s28512_s7 + $0x9c0] ss:$16 sps:$4 sm:$0xff]   ;;  %v21171_v27 = vld [vmem:[%s28512_s7 + $0x9c8] ss:$16 sps:$4 sm:$0xff]  }
 0x679   : > { %8650 = vmatprep.subr.bf16.mxu0 %v21098_v33  ;;  %8756 = vmatprep.subr.bf16.mxu1 %v21101_v52  ;;  %v21176_v33 = vld [vmem:[%s28512_s7 + $0x9e4] ss:$16 sps:$4 sm:$0xff]   ;;  %v21179_v52 = vld [vmem:[%s28512_s7 + $0x9ec] ss:$16 sps:$4 sm:$0xff]  }
 0x67a   : > { %7761 = vmatmul.mubr.bf16.gmra.mrb[56].mxu0 %v25943_v49  ;;  %7867 = vmatmul.mubr.bf16.gmra.mrb[56].mxu1 %v25943_v49  ;;  %v21110_v49 = vld [vmem:[%s28512_s7 + $0x884] ss:$16 sps:$4 sm:$0xff]  }
 0x67b   : > { %8678 = vmatprep.mubr.bf16.mxu0 %v25973_v11  ;;  %8784 = vmatprep.mubr.bf16.mxu1 %v25973_v11  ;;  %v21113_v11 = vld [vmem:[%s28512_s7 + $0x88c] ss:$16 sps:$4 sm:$0xff]  }
 0x67c   : > { %8651 = vmatpush1.bf16.msra.mxu0 %v21096_v30  ;;  %8757 = vmatpush1.bf16.msra.mxu1 %v21099_v32  ;;  %v21174_v30 = vld [vmem:[%s28512_s7 + $0x9e0] ss:$16 sps:$4 sm:$0xff]   ;;  %v21177_v32 = vld [vmem:[%s28512_s7 + $0x9e8] ss:$16 sps:$4 sm:$0xff]  }
 0x67d   : > { %8652 = vmatprep.subr.bf16.mxu0 %v21104_v47  ;;  %8758 = vmatprep.subr.bf16.mxu1 %v21107_v63  ;;  %v21182_v47 = vld [vmem:[%s28512_s7 + $0xa04] ss:$16 sps:$4 sm:$0xff]   ;;  %v21185_v63 = vld [vmem:[%s28512_s7 + $0xa0c] ss:$16 sps:$4 sm:$0xff]  }
 0x680   : > { %8653 = vmatpush1.bf16.msra.mxu0 %v21102_v56  ;;  %8759 = vmatpush1.bf16.msra.mxu1 %v21105_v35  ;;  %v21180_v56 = vld [vmem:[%s28512_s7 + $0xa00] ss:$16 sps:$4 sm:$0xff]   ;;  %v21183_v35 = vld [vmem:[%s28512_s7 + $0xa08] ss:$16 sps:$4 sm:$0xff]  }
 0x681   : > { %8654 = vmatprep.subr.bf16.mxu0 %v21110_v49  ;;  %8760 = vmatprep.subr.bf16.mxu1 %v21113_v11  ;;  %v21188_v49 = vld [vmem:[%s28512_s7 + $0xa24] ss:$16 sps:$4 sm:$0xff]   ;;  %v21191_v11 = vld [vmem:[%s28512_s7 + $0xa2c] ss:$16 sps:$4 sm:$0xff]  }
 0x684   : > { %8655 = vmatpush1.bf16.msra.mxu0 %v21108_v37  ;;  %8761 = vmatpush1.bf16.msra.mxu1 %v21111_v5  ;;  %v21186_v37 = vld [vmem:[%s28512_s7 + $0xa20] ss:$16 sps:$4 sm:$0xff]   ;;  %v21189_v5 = vld [vmem:[%s28512_s7 + $0xa28] ss:$16 sps:$4 sm:$0xff]  }
 0x685   : > { %8656 = vmatprep.subr.bf16.mxu0 %v21116_v38  ;;  %8762 = vmatprep.subr.bf16.mxu1 %v21119_v39  ;;  %v21194_v38 = vld [vmem:[%s28512_s7 + $0xa44] ss:$16 sps:$4 sm:$0xff]   ;;  %v21195_v39 = vld [vmem:[%s28512_s7 + $0xa48] ss:$16 sps:$4 sm:$0xff]  }
 0x688   : > { %8657 = vmatpush1.bf16.msra.mxu0 %v21114_v40  ;;  %8763 = vmatpush1.bf16.msra.mxu1 %v21117_v41  ;;  %v21200_v40 = vld [vmem:[%s28512_s7 + $0xa64] ss:$16 sps:$4 sm:$0xff]   ;;  %v21203_v41 = vld [vmem:[%s28512_s7 + $0xa6c] ss:$16 sps:$4 sm:$0xff]  }
 0x689   : > { %8658 = vmatprep.subr.bf16.mxu0 %v21122_v44  ;;  %8764 = vmatprep.subr.bf16.mxu1 %v21125_v45  ;;  %v21198_v44 = vld [vmem:[%s28512_s7 + $0xa60] ss:$16 sps:$4 sm:$0xff]   ;;  %v21201_v45 = vld [vmem:[%s28512_s7 + $0xa68] ss:$16 sps:$4 sm:$0xff]  }
 0x68c   : > { %8659 = vmatpush1.bf16.msra.mxu0 %v21120_v0  ;;  %8765 = vmatpush1.bf16.msra.mxu1 %v21123_v46  ;;  %v21206_v0 = vld [vmem:[%s28512_s7 + $0xa84] ss:$16 sps:$4 sm:$0xff]   ;;  %v21204_v46 = vld [vmem:[%s28512_s7 + $0xa80] ss:$16 sps:$4 sm:$0xff]  }
 0x68d   : > { %8660 = vmatprep.subr.bf16.mxu0 %v21128_v21  ;;  %8766 = vmatprep.subr.bf16.mxu1 %v21131_v42  ;;  %v21212_v21 = vld [vmem:[%s28512_s7 + $0xaa4] ss:$16 sps:$4 sm:$0xff]   ;;  %v21215_v42 = vld [vmem:[%s28512_s7 + $0xaac] ss:$16 sps:$4 sm:$0xff]  }
 0x690   : > { %8661 = vmatpush1.bf16.msra.mxu0 %v21126_v43  ;;  %8767 = vmatpush1.bf16.msra.mxu1 %v21129_v50  ;;  %v21210_v43 = vld [vmem:[%s28512_s7 + $0xaa0] ss:$16 sps:$4 sm:$0xff]   ;;  %v21213_v50 = vld [vmem:[%s28512_s7 + $0xaa8] ss:$16 sps:$4 sm:$0xff]  }
 0x691   : > { %8662 = vmatprep.subr.bf16.mxu0 %v21134_v51  ;;  %8768 = vmatprep.subr.bf16.mxu1 %v21137_v57  ;;  %v21218_v51 = vld [vmem:[%s28512_s7 + $0xac4] ss:$16 sps:$4 sm:$0xff]   ;;  %v21221_v57 = vld [vmem:[%s28512_s7 + $0xacc] ss:$16 sps:$4 sm:$0xff]  }
 0x694   : > { %8663 = vmatpush1.bf16.msra.mxu0 %v21132_v53  ;;  %8769 = vmatpush1.bf16.msra.mxu1 %v21135_v54  ;;  %v21216_v53 = vld [vmem:[%s28512_s7 + $0xac0] ss:$16 sps:$4 sm:$0xff]   ;;  %v21219_v54 = vld [vmem:[%s28512_s7 + $0xac8] ss:$16 sps:$4 sm:$0xff]  }
 0x695   : > { %8664 = vmatprep.subr.bf16.mxu0 %v21140_v36  ;;  %8770 = vmatprep.subr.bf16.mxu1 %v21143_v55  ;;  %v21224_v36 = vld [vmem:[%s28512_s7 + $0xae4] ss:$16 sps:$4 sm:$0xff]   ;;  %v21227_v55 = vld [vmem:[%s28512_s7 + $0xaec] ss:$16 sps:$4 sm:$0xff]  }
 0x698   : > { %8665 = vmatpush1.bf16.msra.mxu0 %v21138_v28  ;;  %8771 = vmatpush1.bf16.msra.mxu1 %v21141_v1  ;;  %v21222_v28 = vld [vmem:[%s28512_s7 + $0xae0] ss:$16 sps:$4 sm:$0xff]   ;;  %v21225_v1 = vld [vmem:[%s28512_s7 + $0xae8] ss:$16 sps:$4 sm:$0xff]  }
 0x699   : > { %8666 = vmatprep.subr.bf16.mxu0 %v21146_v2  ;;  %8772 = vmatprep.subr.bf16.mxu1 %v21149_v3  ;;  %v21230_v2 = vld [vmem:[%s28512_s7 + $0xb04] ss:$16 sps:$4 sm:$0xff]   ;;  %v21233_v3 = vld [vmem:[%s28512_s7 + $0xb0c] ss:$16 sps:$4 sm:$0xff]  }
 0x69c   : > { %8667 = vmatpush1.bf16.msra.mxu0 %v21144_v4  ;;  %8773 = vmatpush1.bf16.msra.mxu1 %v21147_v7  ;;  %v21228_v4 = vld [vmem:[%s28512_s7 + $0xb00] ss:$16 sps:$4 sm:$0xff]   ;;  %v21231_v7 = vld [vmem:[%s28512_s7 + $0xb08] ss:$16 sps:$4 sm:$0xff]  }
 0x69d   : > { %8668 = vmatprep.subr.bf16.mxu0 %v21152_v8  ;;  %8774 = vmatprep.subr.bf16.mxu1 %v21155_v9  ;;  %v21236_v8 = vld [vmem:[%s28512_s7 + $0xb24] ss:$16 sps:$4 sm:$0xff]   ;;  %v21239_v9 = vld [vmem:[%s28512_s7 + $0xb2c] ss:$16 sps:$4 sm:$0xff]  }
 0x6a0   : > { %8669 = vmatpush1.bf16.msra.mxu0 %v21150_v10  ;;  %8775 = vmatpush1.bf16.msra.mxu1 %v21153_v13  ;;  %v21234_v10 = vld [vmem:[%s28512_s7 + $0xb20] ss:$16 sps:$4 sm:$0xff]   ;;  %v21237_v13 = vld [vmem:[%s28512_s7 + $0xb28] ss:$16 sps:$4 sm:$0xff]  }
 0x6a1   : > { %8670 = vmatprep.subr.bf16.mxu0 %v21158_v15  ;;  %8776 = vmatprep.subr.bf16.mxu1 %v21161_v48  ;;  %v21242_v15 = vld [vmem:[%s28512_s7 + $0xb44] ss:$16 sps:$4 sm:$0xff]   ;;  %v21245_v48 = vld [vmem:[%s28512_s7 + $0xb4c] ss:$16 sps:$4 sm:$0xff]  }
 0x6a4   : > { %8671 = vmatpush1.bf16.msra.mxu0 %v21156_v16  ;;  %8777 = vmatpush1.bf16.msra.mxu1 %v21159_v19  ;;  %v21240_v16 = vld [vmem:[%s28512_s7 + $0xb40] ss:$16 sps:$4 sm:$0xff]   ;;  %v21243_v19 = vld [vmem:[%s28512_s7 + $0xb48] ss:$16 sps:$4 sm:$0xff]  }
 0x6a5   : > { %8672 = vmatprep.subr.bf16.mxu0 %v21164_v22  ;;  %8778 = vmatprep.subr.bf16.mxu1 %v21167_v24  ;;  %v21248_v22 = vld [vmem:[%s28512_s7 + $0xb64] ss:$16 sps:$4 sm:$0xff]   ;;  %v21251_v24 = vld [vmem:[%s28512_s7 + $0xb6c] ss:$16 sps:$4 sm:$0xff]  }
 0x6a8   : > { %8673 = vmatpush1.bf16.msra.mxu0 %v21162_v58  ;;  %8779 = vmatpush1.bf16.msra.mxu1 %v21165_v17  ;;  %v21246_v58 = vld [vmem:[%s28512_s7 + $0xb60] ss:$16 sps:$4 sm:$0xff]   ;;  %v21249_v17 = vld [vmem:[%s28512_s7 + $0xb68] ss:$16 sps:$4 sm:$0xff]  }
 0x6a9   : > { %8674 = vmatprep.subr.bf16.mxu0 %v21170_v18  ;;  %8780 = vmatprep.subr.bf16.mxu1 %v21173_v25  ;;  %v21254_v18 = vld [vmem:[%s28512_s7 + $0xb84] ss:$16 sps:$4 sm:$0xff]   ;;  %v21257_v25 = vld [vmem:[%s28512_s7 + $0xb8c] ss:$16 sps:$4 sm:$0xff]  }
 0x6ac   : > { %8675 = vmatpush1.bf16.msra.mxu0 %v21168_v23  ;;  %8781 = vmatpush1.bf16.msra.mxu1 %v21171_v27  ;;  %v21252_v23 = vld [vmem:[%s28512_s7 + $0xb80] ss:$16 sps:$4 sm:$0xff]   ;;  %v21255_v27 = vld [vmem:[%s28512_s7 + $0xb88] ss:$16 sps:$4 sm:$0xff]  }
 0x6ad   : > { %8676 = vmatprep.subr.bf16.mxu0 %v21176_v33  ;;  %8782 = vmatprep.subr.bf16.mxu1 %v21179_v52  ;;  %v21260_v33 = vld [vmem:[%s28512_s7 + $0xba4] ss:$16 sps:$4 sm:$0xff]   ;;  %v21263_v52 = vld [vmem:[%s28512_s7 + $0xbac] ss:$16 sps:$4 sm:$0xff]  }
 0x6b0   : > { %8677 = vmatpush1.bf16.msra.mxu0 %v21174_v30  ;;  %8783 = vmatpush1.bf16.msra.mxu1 %v21177_v32  ;;  %v21258_v30 = vld [vmem:[%s28512_s7 + $0xba0] ss:$16 sps:$4 sm:$0xff]   ;;  %v21261_v32 = vld [vmem:[%s28512_s7 + $0xba8] ss:$16 sps:$4 sm:$0xff]  }
 0x6b1   : > { %8699 = vmatprep.subr.bf16.mxu0 %v21182_v47  ;;  %8805 = vmatprep.subr.bf16.mxu1 %v21185_v63  ;;  %v21266_v47 = vld [vmem:[%s28512_s7 + $0xbc4] ss:$16 sps:$4 sm:$0xff]   ;;  %v21269_v63 = vld [vmem:[%s28512_s7 + $0xbcc] ss:$16 sps:$4 sm:$0xff]  }
 0x6b3   : > { %8679 = vmatmul.mubr.bf16.vlgmr.msra.gmra.mrb[52].mxu0 %v25965_v6  ;;  %8785 = vmatmul.mubr.bf16.vlgmr.msra.gmra.mrb[52].mxu1 %v25965_v6  ;;  %v21197_v6 = vld [vmem:[%s28512_s7 + $0xa4c] ss:$16 sps:$4 sm:$0xff]  }
 0x6b4   : > { %8688 = vmatprep.mubr.bf16.mxu0 %v26005_v34  ;;  %8700 = vmatpush1.bf16.msra.mxu0 %v21180_v56  ;;  %v21264_v56 = vld [vmem:[%s28512_s7 + $0xbc0] ss:$16 sps:$4 sm:$0xff]  }
 0x6b5   : > { %8794 = vmatprep.mubr.bf16.mxu1 %v26005_v34  ;;  %8806 = vmatpush1.bf16.msra.mxu1 %v21183_v35  ;;  %v21192_v34 = vld [vmem:[%s28512_s7 + $0xa40] ss:$16 sps:$4 sm:$0xff]   ;;  %v21267_v35 = vld [vmem:[%s28512_s7 + $0xbc8] ss:$16 sps:$4 sm:$0xff]  }
 0x6b6   : > { %8701 = vmatprep.subr.bf16.mxu0 %v21188_v49  ;;  %8807 = vmatprep.subr.bf16.mxu1 %v21191_v11  ;;  %v21272_v49 = vld [vmem:[%s28512_s7 + $0xbe4] ss:$16 sps:$4 sm:$0xff]   ;;  %v21275_v11 = vld [vmem:[%s28512_s7 + $0xbec] ss:$16 sps:$4 sm:$0xff]  }
 0x6b8   : > { %8702 = vmatpush1.bf16.msra.mxu0 %v21186_v37  ;;  %v21270_v37 = vld [vmem:[%s28512_s7 + $0xbe0] ss:$16 sps:$4 sm:$0xff]  }
 0x6b9   : > { %8808 = vmatpush1.bf16.msra.mxu1 %v21189_v5  ;;  %8703 = vmatprep.subr.bf16.mxu0 %v21194_v38  ;;  %v21273_v5 = vld [vmem:[%s28512_s7 + $0xbe8] ss:$16 sps:$4 sm:$0xff]   ;;  %v8874_v38 = vld [vmem:[%s28513_s8] sm:$0xf] }
 0x6ba   : > { %8809 = vmatprep.subr.bf16.mxu1 %v21197_v6  ;;  %v8879_v6 = vrot.slane %v8874_v38, %v23964_v59 }
 0x6bb   : > { %8689 = vmatmul.mubr.bf16.gmra.mrb[56].mxu0 %v25997_v26  ;;  %8795 = vmatmul.mubr.bf16.gmra.mrb[56].mxu1 %v25997_v26  ;;  %v21209_v26 = vld [vmem:[%s28512_s7 + $0xa8c] ss:$16 sps:$4 sm:$0xff]  }
 0x6bc   : > { %8704 = vmatpush1.bf16.msra.mxu0 %v21192_v34  ;;  %8731 = vmatprep.mubr.bf16.mxu0 %v25983_v14  ;;  %v8883_v34 = vrot.slane %v8874_v38, %v23968_v61 }
 0x6bd   : > { %8810 = vmatpush1.bf16.msra.mxu1 %v21195_v39  ;;  %8837 = vmatprep.mubr.bf16.mxu1 %v25983_v14  ;;  %v21207_v14 = vld [vmem:[%s28512_s7 + $0xa88] ss:$16 sps:$4 sm:$0xff]  }
 0x6be   : > { %8705 = vmatprep.subr.bf16.mxu0 %v21200_v40  ;;  %8811 = vmatprep.subr.bf16.mxu1 %v21203_v41 }
 0x6c0   : > { %8706 = vmatpush1.bf16.msra.mxu0 %v21198_v44 }
 0x6c1   : > { %8812 = vmatpush1.bf16.msra.mxu1 %v21201_v45  ;;  %8707 = vmatprep.subr.bf16.mxu0 %v21206_v0 }
 0x6c2   : > { %8813 = vmatprep.subr.bf16.mxu1 %v21209_v26 }
 0x6c4   : > { %8708 = vmatpush1.bf16.msra.mxu0 %v21204_v46 }
 0x6c5   : > { %8814 = vmatpush1.bf16.msra.mxu1 %v21207_v14  ;;  %8709 = vmatprep.subr.bf16.mxu0 %v21212_v21 }
 0x6c6   : > { %8815 = vmatprep.subr.bf16.mxu1 %v21215_v42 }
 0x6c8   : > { %8710 = vmatpush1.bf16.msra.mxu0 %v21210_v43 }
 0x6c9   : > { %8816 = vmatpush1.bf16.msra.mxu1 %v21213_v50  ;;  %8711 = vmatprep.subr.bf16.mxu0 %v21218_v51 }
 0x6ca   : > { %8817 = vmatprep.subr.bf16.mxu1 %v21221_v57 }
 0x6cc   : > { %8712 = vmatpush1.bf16.msra.mxu0 %v21216_v53 }
 0x6cd   : > { %8818 = vmatpush1.bf16.msra.mxu1 %v21219_v54  ;;  %8713 = vmatprep.subr.bf16.mxu0 %v21224_v36 }
 0x6ce   : > { %8819 = vmatprep.subr.bf16.mxu1 %v21227_v55 }
 0x6d0   : > { %8714 = vmatpush1.bf16.msra.mxu0 %v21222_v28 }
 0x6d1   : > { %8820 = vmatpush1.bf16.msra.mxu1 %v21225_v1  ;;  %8715 = vmatprep.subr.bf16.mxu0 %v21230_v2 }
 0x6d2   : > { %8821 = vmatprep.subr.bf16.mxu1 %v21233_v3 }
 0x6d4   : > { %8716 = vmatpush1.bf16.msra.mxu0 %v21228_v4 }
 0x6d5   : > { %8822 = vmatpush1.bf16.msra.mxu1 %v21231_v7  ;;  %8717 = vmatprep.subr.bf16.mxu0 %v21236_v8 }
 0x6d6   : > { %8823 = vmatprep.subr.bf16.mxu1 %v21239_v9 }
 0x6d8   : > { %8718 = vmatpush1.bf16.msra.mxu0 %v21234_v10 }
 0x6d9   : > { %8824 = vmatpush1.bf16.msra.mxu1 %v21237_v13  ;;  %8719 = vmatprep.subr.bf16.mxu0 %v21242_v15 }
 0x6da   : > { %8825 = vmatprep.subr.bf16.mxu1 %v21245_v48 }
 0x6dc   : > { %8720 = vmatpush1.bf16.msra.mxu0 %v21240_v16 }
 0x6dd   : > { %8826 = vmatpush1.bf16.msra.mxu1 %v21243_v19  ;;  %8721 = vmatprep.subr.bf16.mxu0 %v21248_v22 }
 0x6de   : > { %8827 = vmatprep.subr.bf16.mxu1 %v21251_v24 }
 0x6e0   : > { %8722 = vmatpush1.bf16.msra.mxu0 %v21246_v58 }
 0x6e1   : > { %8828 = vmatpush1.bf16.msra.mxu1 %v21249_v17  ;;  %8723 = vmatprep.subr.bf16.mxu0 %v21254_v18 }
 0x6e2   : > { %8829 = vmatprep.subr.bf16.mxu1 %v21257_v25 }
 0x6e4   : > { %8724 = vmatpush1.bf16.msra.mxu0 %v21252_v23 }
 0x6e5   : > { %8830 = vmatpush1.bf16.msra.mxu1 %v21255_v27  ;;  %8725 = vmatprep.subr.bf16.mxu0 %v21260_v33 }
 0x6e6   : > { %8831 = vmatprep.subr.bf16.mxu1 %v21263_v52 }
 0x6e8   : > { %8726 = vmatpush1.bf16.msra.mxu0 %v21258_v30 }
 0x6e9   : > { %8832 = vmatpush1.bf16.msra.mxu1 %v21261_v32  ;;  %8727 = vmatprep.subr.bf16.mxu0 %v21266_v47 }
 0x6ea   : > { %8833 = vmatprep.subr.bf16.mxu1 %v21269_v63 }
 0x6ec   : > { %8728 = vmatpush1.bf16.msra.mxu0 %v21264_v56 }
 0x6ed   : > { %8834 = vmatpush1.bf16.msra.mxu1 %v21267_v35  ;;  %8729 = vmatprep.subr.bf16.mxu0 %v21272_v49 }
 0x6ee   : > { %8835 = vmatprep.subr.bf16.mxu1 %v21275_v11 }
 0x6f0   : > { %8730 = vmatpush1.bf16.msra.mxu0 %v21270_v37 }
 0x6f1   : > { %8836 = vmatpush1.bf16.msra.mxu1 %v21273_v5 }
 0x6f3   : > { %8732 = vmatmul.mubr.bf16.vlgmr.msra.gmra.mrb[52].mxu0 %v25975_v12 }
 0x6f4   : > { %8838 = vmatmul.mubr.bf16.vlgmr.msra.gmra.mrb[52].mxu1 %v25975_v12  ;;  %8741 = vmatprep.mubr.bf16.mxu0 %v26015_v31  ;;  %v8887_v12 = vrot.slane %v8874_v38, %v23966_v60 }
 0x6f5   : > { %8847 = vmatprep.mubr.bf16.mxu1 %v26015_v31  ;;  %v8891_v31 = vrot.slane %v8874_v38, %v23970_v62 }
 0x6fb   : > { %8742 = vmatmul.mubr.bf16.gmra.mrb[56].mxu0 %v26007_v29 }
 0x6fc   : > { %8848 = vmatmul.mubr.bf16.gmra.mrb[56].mxu1 %v26007_v29  ;;  %8968 = vmatprep.mubr.bf16.mxu0 %v22693_v20 }
 0x6fd   : > { %9021 = vmatprep.mubr.bf16.mxu1 %v22693_v20 }
 0x7c6   : > { %v8733_v39 = vpop.f32.mrb[52].mxu0 }
 0x7c7   : > { %v8896_v40 = vadd.f32 %v8879_v6, %v8733_v39  ;;  %v8839_v41 = vpop.f32.mrb[52].mxu1  ;;  %v8735_v29 = vpop.f32.mrb[53].mxu0  ;;  %v21861_v39 = vld [vmem:[%s28506_s1 + $0x8] sm:$0xff]  }
 0x7c8   : > { %v8898_v44 = vadd.f32 %v8887_v12, %v8839_v41  ;;  %v8897_v45 = vadd.f32 %v8883_v34, %v8735_v29  ;;  %v8841_v0 = vpop.f32.mrb[53].mxu1  ;;  %v8737_v26 = vpop.f32.mrb[54].mxu0  ;;  %v21279_v41 = vld [vmem:[%s28514_s9 + $0x408] ss:$16 sps:$4 sm:$0xff]   ;;  %v21284_v29 = vld [vmem:[%s28514_s9 + $0x424] ss:$16 sps:$4 sm:$0xff]  }
 0x7c9   : > { %v8899_v46 = vadd.f32 %v8891_v31, %v8841_v0  ;;  %v8900_v14 = vadd.f32 %v8879_v6, %v8737_v26  ;;  %v8843_v21 = vpop.f32.mrb[54].mxu1  ;;  %v8739_v42 = vpop.f32.mrb[55].mxu0  ;;  %v8912_v57 = vmax.f32 %v8896_v40, 0.0  ;;  %v21276_v40 = vld [vmem:[%s28514_s9 + $0x400] ss:$16 sps:$4 sm:$0xff]  }
 0x7ca   : > { %v8902_v43 = vadd.f32 %v8887_v12, %v8843_v21  ;;  %v8901_v50 = vadd.f32 %v8883_v34, %v8739_v42  ;;  %v8845_v51 = vpop.f32.mrb[55].mxu1  ;;  %v8914_v36 = vmax.f32 %v8898_v44, 0.0  ;;  %v8913_v55 = vmax.f32 %v8897_v45, 0.0  ;;  %v21287_v44 = vld [vmem:[%s28514_s9 + $0x42c] ss:$16 sps:$4 sm:$0xff]   ;;  %v21862_v45 = vld [vmem:[%s28507_s2] sm:$0xff]  }
 0x7cb   : > { %v8916_v53 = vmax.f32 %v8900_v14, 0.0  ;;  %v8903_v54 = vadd.f32 %v8891_v31, %v8845_v51  ;;  %v8915_v2 = vmax.f32 %v8899_v46, 0.0  ;;  %v21282_v0 = vld [vmem:[%s28514_s9 + $0x420] ss:$16 sps:$4 sm:$0xff]   ;;  %v21285_v26 = vld [vmem:[%s28514_s9 + $0x428] ss:$16 sps:$4 sm:$0xff]  }
 0x7cc   : > { %v8918_v28 = vmax.f32 %v8902_v43, 0.0  ;;  %v8917_v1 = vmax.f32 %v8901_v50, 0.0  ;;  %v21290_v46 = vld [vmem:[%s28514_s9 + $0x444] ss:$16 sps:$4 sm:$0xff]   ;;  %v21293_v14 = vld [vmem:[%s28514_s9 + $0x44c] ss:$16 sps:$4 sm:$0xff]  }
 0x7cd   : > { %v26534_v3 = vpack.c.bf16 %v8916_v53, %v8912_v57  ;;  %v8919_v4 = vmax.f32 %v8903_v54, 0.0  ;;  %v21288_v21 = vld [vmem:[%s28514_s9 + $0x440] ss:$16 sps:$4 sm:$0xff]   ;;  %v21291_v42 = vld [vmem:[%s28514_s9 + $0x448] ss:$16 sps:$4 sm:$0xff]  }
 0x7ce   : > { %v26536_v7 = vpack.c.bf16 %v8918_v28, %v8914_v36  ;;  %v26538_v8 = vpack.c.bf16 %v8917_v1, %v8913_v55  ;;  %v8743_v9 = vpop.f32.mrb[56].mxu0  ;;  %v21296_v43 = vld [vmem:[%s28514_s9 + $0x464] ss:$16 sps:$4 sm:$0xff]   ;;  %v21299_v50 = vld [vmem:[%s28514_s9 + $0x46c] ss:$16 sps:$4 sm:$0xff]  }
 0x7cf   : > { %v26540_v10 = vpack.c.bf16 %v8919_v4, %v8915_v2  ;;  %v8904_v13 = vadd.f32 %v8879_v6, %v8743_v9  ;;  %v8849_v15 = vpop.f32.mrb[56].mxu1  ;;  %v8745_v48 = vpop.f32.mrb[57].mxu0  ;;  %v21294_v51 = vld [vmem:[%s28514_s9 + $0x460] ss:$16 sps:$4 sm:$0xff]   ;;  %v21297_v57 = vld [vmem:[%s28514_s9 + $0x468] ss:$16 sps:$4 sm:$0xff]  }
 0x7d0   : > { %v8906_v16 = vadd.f32 %v8887_v12, %v8849_v15  ;;  %v8905_v19 = vadd.f32 %v8883_v34, %v8745_v48  ;;  %v8851_v22 = vpop.f32.mrb[57].mxu1  ;;  %v8747_v24 = vpop.f32.mrb[58].mxu0  ;;  %8936 = vmatprep.subr.bf16.mxu0 %v26538_v8  ;;  %v21302_v53 = vld [vmem:[%s28514_s9 + $0x484] ss:$16 sps:$4 sm:$0xff]   ;;  %v21305_v54 = vld [vmem:[%s28514_s9 + $0x48c] ss:$16 sps:$4 sm:$0xff]  }
 0x7d1   : > { %v8907_v58 = vadd.f32 %v8891_v31, %v8851_v22  ;;  %v8908_v17 = vadd.f32 %v8879_v6, %v8747_v24  ;;  %v8853_v18 = vpop.f32.mrb[58].mxu1  ;;  %8989 = vmatprep.subr.bf16.mxu1 %v26540_v10  ;;  %v8749_v25 = vpop.f32.mrb[59].mxu0  ;;  %8937 = vmatpush1.bf16.msra.mxu0 %v26534_v3  ;;  %v8920_v52 = vmax.f32 %v8904_v13, 0.0  ;;  %v21300_v36 = vld [vmem:[%s28514_s9 + $0x480] ss:$16 sps:$4 sm:$0xff]  }
 0x7d2   : > { %v8910_v23 = vadd.f32 %v8887_v12, %v8853_v18  ;;  %v8909_v27 = vadd.f32 %v8883_v34, %v8749_v25  ;;  %v8855_v33 = vpop.f32.mrb[59].mxu1  ;;  %8990 = vmatpush1.bf16.msra.mxu1 %v26536_v7  ;;  %v8922_v47 = vmax.f32 %v8906_v16, 0.0  ;;  %v8921_v63 = vmax.f32 %v8905_v19, 0.0  ;;  %v21860_v12 = vld [vmem:[%s28506_s1] sm:$0xff]   ;;  %v21303_v55 = vld [vmem:[%s28514_s9 + $0x488] ss:$16 sps:$4 sm:$0xff]  }
 0x7d3   : > { %v8924_v30 = vmax.f32 %v8908_v17, 0.0  ;;  %v8911_v32 = vadd.f32 %v8891_v31, %v8855_v33  ;;  %v8923_v49 = vmax.f32 %v8907_v58, 0.0  ;;  %v21278_v34 = vld [vmem:[%s28514_s9 + $0x404] ss:$16 sps:$4 sm:$0xff]   ;;  %v21281_v31 = vld [vmem:[%s28514_s9 + $0x40c] ss:$16 sps:$4 sm:$0xff]  }
 0x7d4   : > { %v8926_v56 = vmax.f32 %v8910_v23, 0.0  ;;  %v8925_v35 = vmax.f32 %v8909_v27, 0.0  ;;  %v21308_v28 = vld [vmem:[%s28514_s9 + $0x4a4] ss:$16 sps:$4 sm:$0xff]   ;;  %v21311_v1 = vld [vmem:[%s28514_s9 + $0x4ac] ss:$16 sps:$4 sm:$0xff]  }
 0x7d5   : > { %v26546_v11 = vpack.c.bf16 %v8924_v30, %v8920_v52  ;;  %v8927_v37 = vmax.f32 %v8911_v32, 0.0  ;;  %v21306_v2 = vld [vmem:[%s28514_s9 + $0x4a0] ss:$16 sps:$4 sm:$0xff]   ;;  %v21309_v4 = vld [vmem:[%s28514_s9 + $0x4a8] ss:$16 sps:$4 sm:$0xff]  }
 0x7d6   : > { %v26548_v5 = vpack.c.bf16 %v8926_v56, %v8922_v47  ;;  %v26550_v38 = vpack.c.bf16 %v8925_v35, %v8921_v63  ;;  %v21317_v9 = vld [vmem:[%s28514_s9 + $0x4cc] ss:$16 sps:$4 sm:$0xff]   ;;  %v21312_v13 = vld [vmem:[%s28514_s9 + $0x4c0] ss:$16 sps:$4 sm:$0xff]   ;;  %v21315_v15 = vld [vmem:[%s28514_s9 + $0x4c8] ss:$16 sps:$4 sm:$0xff]  }
 0x7d7   : > { %v26552_v6 = vpack.c.bf16 %v8927_v37, %v8923_v49  ;;  %v21320_v48 = vld [vmem:[%s28514_s9 + $0x4e4] ss:$16 sps:$4 sm:$0xff]   ;;  %v21323_v16 = vld [vmem:[%s28514_s9 + $0x4ec] ss:$16 sps:$4 sm:$0xff]   ;;  %v21318_v19 = vld [vmem:[%s28514_s9 + $0x4e0] ss:$16 sps:$4 sm:$0xff]  }
 0x7d8   : > { %8938 = vmatprep.subr.bf16.mxu0 %v26550_v38  ;;  %v21321_v22 = vld [vmem:[%s28514_s9 + $0x4e8] ss:$16 sps:$4 sm:$0xff]   ;;  %v21326_v24 = vld [vmem:[%s28514_s9 + $0x504] ss:$16 sps:$4 sm:$0xff]   ;;  %v21329_v58 = vld [vmem:[%s28514_s9 + $0x50c] ss:$16 sps:$4 sm:$0xff]  }
 0x7d9   : > { %8991 = vmatprep.subr.bf16.mxu1 %v26552_v6  ;;  %8939 = vmatpush1.bf16.msra.mxu0 %v26546_v11  ;;  %v21324_v17 = vld [vmem:[%s28514_s9 + $0x500] ss:$16 sps:$4 sm:$0xff]   ;;  %v21327_v18 = vld [vmem:[%s28514_s9 + $0x508] ss:$16 sps:$4 sm:$0xff]   ;;  %v21332_v25 = vld [vmem:[%s28514_s9 + $0x524] ss:$16 sps:$4 sm:$0xff]  }
 0x7da   : > { %8992 = vmatpush1.bf16.msra.mxu1 %v26548_v5  ;;  %9050 = vmatprep.subr.bf16.mxu0 %v26538_v8  ;;  %v21335_v23 = vld [vmem:[%s28514_s9 + $0x52c] ss:$16 sps:$4 sm:$0xff]   ;;  %v21330_v27 = vld [vmem:[%s28514_s9 + $0x520] ss:$16 sps:$4 sm:$0xff]   ;;  %v21333_v33 = vld [vmem:[%s28514_s9 + $0x528] ss:$16 sps:$4 sm:$0xff]  }
 0x7db   : > { %9103 = vmatprep.subr.bf16.mxu1 %v26540_v10  ;;  %v21338_v52 = vld [vmem:[%s28514_s9 + $0x544] ss:$16 sps:$4 sm:$0xff]   ;;  %v21341_v30 = vld [vmem:[%s28514_s9 + $0x54c] ss:$16 sps:$4 sm:$0xff]   ;;  %v21336_v32 = vld [vmem:[%s28514_s9 + $0x540] ss:$16 sps:$4 sm:$0xff]  }
 0x7dc   : > { %18119 = vmatmul.mubr.msk.bf16.vlgmr.msra.gmra.mrb[60].mxu0 %vm1337_vm0, %v21860_v12  ;;  %v21339_v47 = vld [vmem:[%s28514_s9 + $0x548] ss:$16 sps:$4 sm:$0xff]   ;;  %v21344_v63 = vld [vmem:[%s28514_s9 + $0x564] ss:$16 sps:$4 sm:$0xff]   ;;  %v21347_v56 = vld [vmem:[%s28514_s9 + $0x56c] ss:$16 sps:$4 sm:$0xff]  }
 0x7dd   : > { %18121 = vmatmul.mubr.msk.bf16.vlgmr.msra.gmra.mrb[60].mxu1 %vm1337_vm0, %v21860_v12  ;;  %9051 = vmatpush1.bf16.msra.mxu0 %v26534_v3  ;;  %v21342_v35 = vld [vmem:[%s28514_s9 + $0x560] ss:$16 sps:$4 sm:$0xff]   ;;  %v21345_v49 = vld [vmem:[%s28514_s9 + $0x568] ss:$16 sps:$4 sm:$0xff]   ;;  %v21350_v37 = vld [vmem:[%s28514_s9 + $0x584] ss:$16 sps:$4 sm:$0xff]  }
 0x7de   : > { %9104 = vmatpush1.bf16.msra.mxu1 %v26536_v7  ;;  %9052 = vmatprep.subr.bf16.mxu0 %v26550_v38  ;;  %v21353_v12 = vld [vmem:[%s28514_s9 + $0x58c] ss:$16 sps:$4 sm:$0xff]  }
 0x7df   : > { %9105 = vmatprep.subr.bf16.mxu1 %v26552_v6  ;;  %8978 = vmatprep.mubr.bf16.mxu0 %v22693_v20 }
 0x7e0   : > { %9031 = vmatprep.mubr.bf16.mxu1 %v22693_v20 }
 0x7e1   : > { %9053 = vmatpush1.bf16.msra.mxu0 %v26546_v11 }
 0x7e2   : > { %9106 = vmatpush1.bf16.msra.mxu1 %v26548_v5  ;;  %10061 = vmatprep.subr.bf16.mxu0 %v21278_v34  ;;  %v21348_v34 = vld [vmem:[%s28514_s9 + $0x580] ss:$16 sps:$4 sm:$0xff]  }
 0x7e3   : > { %10167 = vmatprep.subr.bf16.mxu1 %v21281_v31  ;;  %v21351_v31 = vld [vmem:[%s28514_s9 + $0x588] ss:$16 sps:$4 sm:$0xff]  }
 0x7e4   : > { %18120 = vmatmul.mubr.msk.bf16.gmra.mrb[64].mxu0 %vm1337_vm0, %v21861_v39 }
 0x7e5   : > { %18122 = vmatmul.mubr.msk.bf16.gmra.mrb[64].mxu1 %vm1337_vm0, %v21861_v39  ;;  %9082 = vmatprep.mubr.bf16.mxu0 %v22693_v20  ;;  %v21356_v39 = vld [vmem:[%s28514_s9 + $0x5a4] ss:$16 sps:$4 sm:$0xff]  }
 0x7e6   : > { %9135 = vmatprep.mubr.bf16.mxu1 %v22693_v20 }
 0x7ec   : > { %18123 = vmatmul.mubr.msk.bf16.vlgmr.msra.gmra.mrb[68].mxu0 %vm1337_vm0, %v21862_v45 }
 0x7ed   : > { %18125 = vmatmul.mubr.msk.bf16.vlgmr.msra.gmra.mrb[68].mxu1 %vm1337_vm0, %v21862_v45  ;;  %10062 = vmatpush1.bf16.msra.mxu0 %v21276_v40  ;;  %v21359_v40 = vld [vmem:[%s28514_s9 + $0x5ac] ss:$16 sps:$4 sm:$0xff]  }
 0x7ee   : > { %10168 = vmatpush1.bf16.msra.mxu1 %v21279_v41  ;;  %10063 = vmatprep.subr.bf16.mxu0 %v21284_v29  ;;  %v21354_v41 = vld [vmem:[%s28514_s9 + $0x5a0] ss:$16 sps:$4 sm:$0xff]   ;;  %v21357_v29 = vld [vmem:[%s28514_s9 + $0x5a8] ss:$16 sps:$4 sm:$0xff]   ;;  %v21365_v45 = vld [vmem:[%s28514_s9 + $0x5cc] ss:$16 sps:$4 sm:$0xff]  }
 0x7ef   : > { %10169 = vmatprep.subr.bf16.mxu1 %v21287_v44  ;;  %9092 = vmatprep.mubr.bf16.mxu0 %v22693_v20  ;;  %v21362_v44 = vld [vmem:[%s28514_s9 + $0x5c4] ss:$16 sps:$4 sm:$0xff]  }
 0x7f0   : > { %9145 = vmatprep.mubr.bf16.mxu1 %v22693_v20  ;;  %v21863_v20 = vld [vmem:[%s28507_s2 + $0x8] sm:$0xff]  }
 0x7f1   : > { %10064 = vmatpush1.bf16.msra.mxu0 %v21282_v0  ;;  %v21360_v0 = vld [vmem:[%s28514_s9 + $0x5c0] ss:$16 sps:$4 sm:$0xff]  }
 0x7f2   : > { %10170 = vmatpush1.bf16.msra.mxu1 %v21285_v26  ;;  %10065 = vmatprep.subr.bf16.mxu0 %v21290_v46  ;;  %v21363_v26 = vld [vmem:[%s28514_s9 + $0x5c8] ss:$16 sps:$4 sm:$0xff]   ;;  %v21368_v46 = vld [vmem:[%s28514_s9 + $0x5e4] ss:$16 sps:$4 sm:$0xff]  }
 0x7f3   : > { %10171 = vmatprep.subr.bf16.mxu1 %v21293_v14  ;;  %v21371_v14 = vld [vmem:[%s28514_s9 + $0x5ec] ss:$16 sps:$4 sm:$0xff]  }
 0x7f4   : > { %18124 = vmatmul.mubr.msk.bf16.gmra.mrb[72].mxu0 %vm1337_vm0, %v21863_v20 }
 0x7f5   : > { %18126 = vmatmul.mubr.msk.bf16.gmra.mrb[72].mxu1 %vm1337_vm0, %v21863_v20  ;;  %10066 = vmatpush1.bf16.msra.mxu0 %v21288_v21  ;;  %v21366_v21 = vld [vmem:[%s28514_s9 + $0x5e0] ss:$16 sps:$4 sm:$0xff]   ;;  %v21377_v20 = vld [vmem:[%s28514_s9 + $0x60c] ss:$16 sps:$4 sm:$0xff]  }
 0x7f6   : > { %10172 = vmatpush1.bf16.msra.mxu1 %v21291_v42  ;;  %10093 = vmatprep.mubr.bf16.mxu0 %v26538_v8  ;;  %v21369_v42 = vld [vmem:[%s28514_s9 + $0x5e8] ss:$16 sps:$4 sm:$0xff]  }
 0x7f7   : > { %10199 = vmatprep.mubr.bf16.mxu1 %v26538_v8  ;;  %10067 = vmatprep.subr.bf16.mxu0 %v21296_v43  ;;  %v21314_v8 = vld [vmem:[%s28514_s9 + $0x4c4] ss:$16 sps:$4 sm:$0xff]  }
 0x7f8   : > { %10173 = vmatprep.subr.bf16.mxu1 %v21299_v50  ;;  %v21374_v43 = vld [vmem:[%s28514_s9 + $0x604] ss:$16 sps:$4 sm:$0xff]   ;;  %v21372_v50 = vld [vmem:[%s28514_s9 + $0x600] ss:$16 sps:$4 sm:$0xff]  }
 0x7f9   : > { %10068 = vmatpush1.bf16.msra.mxu0 %v21294_v51  ;;  %v21375_v51 = vld [vmem:[%s28514_s9 + $0x608] ss:$16 sps:$4 sm:$0xff]  }
 0x7fa   : > { %10174 = vmatpush1.bf16.msra.mxu1 %v21297_v57  ;;  %10069 = vmatprep.subr.bf16.mxu0 %v21302_v53  ;;  %v21380_v57 = vld [vmem:[%s28514_s9 + $0x624] ss:$16 sps:$4 sm:$0xff]   ;;  %v21383_v53 = vld [vmem:[%s28514_s9 + $0x62c] ss:$16 sps:$4 sm:$0xff]  }
 0x7fb   : > { %10175 = vmatprep.subr.bf16.mxu1 %v21305_v54  ;;  %v21378_v54 = vld [vmem:[%s28514_s9 + $0x620] ss:$16 sps:$4 sm:$0xff]  }
 0x7fd   : > { %10070 = vmatpush1.bf16.msra.mxu0 %v21300_v36  ;;  %v21381_v36 = vld [vmem:[%s28514_s9 + $0x628] ss:$16 sps:$4 sm:$0xff]  }
 0x7fe   : > { %10176 = vmatpush1.bf16.msra.mxu1 %v21303_v55  ;;  %10071 = vmatprep.subr.bf16.mxu0 %v21308_v28  ;;  %v21386_v55 = vld [vmem:[%s28514_s9 + $0x644] ss:$16 sps:$4 sm:$0xff]   ;;  %v21387_v28 = vld [vmem:[%s28514_s9 + $0x648] ss:$16 sps:$4 sm:$0xff]  }
 0x7ff   : > { %10177 = vmatprep.subr.bf16.mxu1 %v21311_v1  ;;  %v21392_v1 = vld [vmem:[%s28514_s9 + $0x664] ss:$16 sps:$4 sm:$0xff]  }
 0x801   : > { %10072 = vmatpush1.bf16.msra.mxu0 %v21306_v2  ;;  %v21395_v2 = vld [vmem:[%s28514_s9 + $0x66c] ss:$16 sps:$4 sm:$0xff]  }
 0x802   : > { %10178 = vmatpush1.bf16.msra.mxu1 %v21309_v4  ;;  %10073 = vmatprep.subr.bf16.mxu0 %v21314_v8  ;;  %v21390_v4 = vld [vmem:[%s28514_s9 + $0x660] ss:$16 sps:$4 sm:$0xff]   ;;  %v21393_v8 = vld [vmem:[%s28514_s9 + $0x668] ss:$16 sps:$4 sm:$0xff]  }
 0x803   : > { %10179 = vmatprep.subr.bf16.mxu1 %v21317_v9  ;;  %v21398_v9 = vld [vmem:[%s28514_s9 + $0x684] ss:$16 sps:$4 sm:$0xff]  }
 0x805   : > { %10074 = vmatpush1.bf16.msra.mxu0 %v21312_v13  ;;  %v21399_v13 = vld [vmem:[%s28514_s9 + $0x688] ss:$16 sps:$4 sm:$0xff]  }
 0x806   : > { %10180 = vmatpush1.bf16.msra.mxu1 %v21315_v15  ;;  %10075 = vmatprep.subr.bf16.mxu0 %v21320_v48  ;;  %v21404_v15 = vld [vmem:[%s28514_s9 + $0x6a4] ss:$16 sps:$4 sm:$0xff]   ;;  %v21407_v48 = vld [vmem:[%s28514_s9 + $0x6ac] ss:$16 sps:$4 sm:$0xff]  }
 0x807   : > { %10181 = vmatprep.subr.bf16.mxu1 %v21323_v16  ;;  %v21402_v16 = vld [vmem:[%s28514_s9 + $0x6a0] ss:$16 sps:$4 sm:$0xff]  }
 0x809   : > { %10076 = vmatpush1.bf16.msra.mxu0 %v21318_v19  ;;  %v21405_v19 = vld [vmem:[%s28514_s9 + $0x6a8] ss:$16 sps:$4 sm:$0xff]  }
 0x80a   : > { %10182 = vmatpush1.bf16.msra.mxu1 %v21321_v22  ;;  %10077 = vmatprep.subr.bf16.mxu0 %v21326_v24  ;;  %v21410_v22 = vld [vmem:[%s28514_s9 + $0x6c4] ss:$16 sps:$4 sm:$0xff]   ;;  %v21413_v24 = vld [vmem:[%s28514_s9 + $0x6cc] ss:$16 sps:$4 sm:$0xff]  }
 0x80b   : > { %10183 = vmatprep.subr.bf16.mxu1 %v21329_v58  ;;  %v21408_v58 = vld [vmem:[%s28514_s9 + $0x6c0] ss:$16 sps:$4 sm:$0xff]  }
 0x80d   : > { %10078 = vmatpush1.bf16.msra.mxu0 %v21324_v17  ;;  %v21411_v17 = vld [vmem:[%s28514_s9 + $0x6c8] ss:$16 sps:$4 sm:$0xff]  }
 0x80e   : > { %10184 = vmatpush1.bf16.msra.mxu1 %v21327_v18  ;;  %10079 = vmatprep.subr.bf16.mxu0 %v21332_v25  ;;  %v21416_v18 = vld [vmem:[%s28514_s9 + $0x6e4] ss:$16 sps:$4 sm:$0xff]   ;;  %v21419_v25 = vld [vmem:[%s28514_s9 + $0x6ec] ss:$16 sps:$4 sm:$0xff]  }
 0x80f   : > { %10185 = vmatprep.subr.bf16.mxu1 %v21335_v23  ;;  %v21414_v23 = vld [vmem:[%s28514_s9 + $0x6e0] ss:$16 sps:$4 sm:$0xff]  }
 0x811   : > { %10080 = vmatpush1.bf16.msra.mxu0 %v21330_v27  ;;  %v21417_v27 = vld [vmem:[%s28514_s9 + $0x6e8] ss:$16 sps:$4 sm:$0xff]  }
 0x812   : > { %10186 = vmatpush1.bf16.msra.mxu1 %v21333_v33  ;;  %10081 = vmatprep.subr.bf16.mxu0 %v21338_v52  ;;  %v21422_v33 = vld [vmem:[%s28514_s9 + $0x704] ss:$16 sps:$4 sm:$0xff]   ;;  %v21425_v52 = vld [vmem:[%s28514_s9 + $0x70c] ss:$16 sps:$4 sm:$0xff]  }
 0x813   : > { %10187 = vmatprep.subr.bf16.mxu1 %v21341_v30  ;;  %v21420_v30 = vld [vmem:[%s28514_s9 + $0x700] ss:$16 sps:$4 sm:$0xff]  }
 0x815   : > { %10082 = vmatpush1.bf16.msra.mxu0 %v21336_v32  ;;  %v21423_v32 = vld [vmem:[%s28514_s9 + $0x708] ss:$16 sps:$4 sm:$0xff]  }
 0x816   : > { %10188 = vmatpush1.bf16.msra.mxu1 %v21339_v47  ;;  %10083 = vmatprep.subr.bf16.mxu0 %v21344_v63  ;;  %v21428_v47 = vld [vmem:[%s28514_s9 + $0x724] ss:$16 sps:$4 sm:$0xff]   ;;  %v21431_v63 = vld [vmem:[%s28514_s9 + $0x72c] ss:$16 sps:$4 sm:$0xff]  }
 0x817   : > { %10189 = vmatprep.subr.bf16.mxu1 %v21347_v56  ;;  %v21426_v56 = vld [vmem:[%s28514_s9 + $0x720] ss:$16 sps:$4 sm:$0xff]  }
 0x819   : > { %10084 = vmatpush1.bf16.msra.mxu0 %v21342_v35  ;;  %v21429_v35 = vld [vmem:[%s28514_s9 + $0x728] ss:$16 sps:$4 sm:$0xff]  }
 0x81a   : > { %10190 = vmatpush1.bf16.msra.mxu1 %v21345_v49  ;;  %10085 = vmatprep.subr.bf16.mxu0 %v21350_v37  ;;  %v21434_v49 = vld [vmem:[%s28514_s9 + $0x744] ss:$16 sps:$4 sm:$0xff]   ;;  %v21437_v37 = vld [vmem:[%s28514_s9 + $0x74c] ss:$16 sps:$4 sm:$0xff]  }
 0x81b   : > { %10191 = vmatprep.subr.bf16.mxu1 %v21353_v12  ;;  %v21432_v12 = vld [vmem:[%s28514_s9 + $0x740] ss:$16 sps:$4 sm:$0xff]  }
 0x81d   : > { %10086 = vmatpush1.bf16.msra.mxu0 %v21348_v34  ;;  %v21435_v34 = vld [vmem:[%s28514_s9 + $0x748] ss:$16 sps:$4 sm:$0xff]  }
 0x81e   : > { %10192 = vmatpush1.bf16.msra.mxu1 %v21351_v31  ;;  %10087 = vmatprep.subr.bf16.mxu0 %v21356_v39  ;;  %v21440_v31 = vld [vmem:[%s28514_s9 + $0x764] ss:$16 sps:$4 sm:$0xff]   ;;  %v21443_v39 = vld [vmem:[%s28514_s9 + $0x76c] ss:$16 sps:$4 sm:$0xff]  }
 0x81f   : > { %10193 = vmatprep.subr.bf16.mxu1 %v21359_v40  ;;  %v21438_v40 = vld [vmem:[%s28514_s9 + $0x760] ss:$16 sps:$4 sm:$0xff]  }
 0x821   : > { %10088 = vmatpush1.bf16.msra.mxu0 %v21354_v41  ;;  %v21441_v41 = vld [vmem:[%s28514_s9 + $0x768] ss:$16 sps:$4 sm:$0xff]  }
 0x822   : > { %10194 = vmatpush1.bf16.msra.mxu1 %v21357_v29  ;;  %10089 = vmatprep.subr.bf16.mxu0 %v21362_v44  ;;  %v21446_v29 = vld [vmem:[%s28514_s9 + $0x784] ss:$16 sps:$4 sm:$0xff]   ;;  %v21449_v44 = vld [vmem:[%s28514_s9 + $0x78c] ss:$16 sps:$4 sm:$0xff]  }
 0x823   : > { %10195 = vmatprep.subr.bf16.mxu1 %v21365_v45  ;;  %v21444_v45 = vld [vmem:[%s28514_s9 + $0x780] ss:$16 sps:$4 sm:$0xff]  }
 0x825   : > { %10090 = vmatpush1.bf16.msra.mxu0 %v21360_v0  ;;  %v21447_v0 = vld [vmem:[%s28514_s9 + $0x788] ss:$16 sps:$4 sm:$0xff]  }
 0x826   : > { %10196 = vmatpush1.bf16.msra.mxu1 %v21363_v26  ;;  %10091 = vmatprep.subr.bf16.mxu0 %v21368_v46  ;;  %v21452_v26 = vld [vmem:[%s28514_s9 + $0x7a4] ss:$16 sps:$4 sm:$0xff]   ;;  %v21455_v46 = vld [vmem:[%s28514_s9 + $0x7ac] ss:$16 sps:$4 sm:$0xff]  }
 0x827   : > { %10197 = vmatprep.subr.bf16.mxu1 %v21371_v14  ;;  %v21450_v14 = vld [vmem:[%s28514_s9 + $0x7a0] ss:$16 sps:$4 sm:$0xff]  }
 0x829   : > { %10092 = vmatpush1.bf16.msra.mxu0 %v21366_v21  ;;  %v21453_v21 = vld [vmem:[%s28514_s9 + $0x7a8] ss:$16 sps:$4 sm:$0xff]  }
 0x82a   : > { %10198 = vmatpush1.bf16.msra.mxu1 %v21369_v42  ;;  %10114 = vmatprep.subr.bf16.mxu0 %v21374_v43  ;;  %v21458_v42 = vld [vmem:[%s28514_s9 + $0x7c4] ss:$16 sps:$4 sm:$0xff]   ;;  %v21461_v43 = vld [vmem:[%s28514_s9 + $0x7cc] ss:$16 sps:$4 sm:$0xff]  }
 0x82b   : > { %10220 = vmatprep.subr.bf16.mxu1 %v21377_v20  ;;  %v21456_v20 = vld [vmem:[%s28514_s9 + $0x7c0] ss:$16 sps:$4 sm:$0xff]  }
 0x82c   : > { %10094 = vmatmul.mubr.bf16.vlgmr.msra.gmra.mrb[76].mxu0 %v26534_v3 }
 0x82d   : > { %10200 = vmatmul.mubr.bf16.vlgmr.msra.gmra.mrb[76].mxu1 %v26534_v3  ;;  %10103 = vmatprep.mubr.bf16.mxu0 %v26550_v38  ;;  %v21389_v3 = vld [vmem:[%s28514_s9 + $0x64c] ss:$16 sps:$4 sm:$0xff]  }
 0x82e   : > { %10115 = vmatpush1.bf16.msra.mxu0 %v21372_v50  ;;  %10209 = vmatprep.mubr.bf16.mxu1 %v26550_v38  ;;  %v21384_v38 = vld [vmem:[%s28514_s9 + $0x640] ss:$16 sps:$4 sm:$0xff]   ;;  %v21459_v50 = vld [vmem:[%s28514_s9 + $0x7c8] ss:$16 sps:$4 sm:$0xff]  }
 0x82f   : > { %10221 = vmatpush1.bf16.msra.mxu1 %v21375_v51  ;;  %10116 = vmatprep.subr.bf16.mxu0 %v21380_v57  ;;  %v21464_v51 = vld [vmem:[%s28514_s9 + $0x7e4] ss:$16 sps:$4 sm:$0xff]   ;;  %v21467_v57 = vld [vmem:[%s28514_s9 + $0x7ec] ss:$16 sps:$4 sm:$0xff]  }
 0x830   : > { %10222 = vmatprep.subr.bf16.mxu1 %v21383_v53  ;;  %v21462_v53 = vld [vmem:[%s28514_s9 + $0x7e0] ss:$16 sps:$4 sm:$0xff]  }
 0x832   : > { %10117 = vmatpush1.bf16.msra.mxu0 %v21378_v54  ;;  %v21465_v54 = vld [vmem:[%s28514_s9 + $0x7e8] ss:$16 sps:$4 sm:$0xff]  }
 0x833   : > { %10223 = vmatpush1.bf16.msra.mxu1 %v21381_v36  ;;  %10118 = vmatprep.subr.bf16.mxu0 %v21386_v55  ;;  %v21470_v36 = vld [vmem:[%s28514_s9 + $0x4] ss:$16 sps:$4 sm:$0xff]   ;;  %v21473_v55 = vld [vmem:[%s28514_s9 + $0xc] ss:$16 sps:$4 sm:$0xff]  }
 0x834   : > { %10104 = vmatmul.mubr.bf16.gmra.mrb[80].mxu0 %v26546_v11  ;;  %10224 = vmatprep.subr.bf16.mxu1 %v21389_v3  ;;  %v21468_v3 = vld [vmem:[%s28514_s9] ss:$16 sps:$4 sm:$0xff]  }
 0x835   : > { %10210 = vmatmul.mubr.bf16.gmra.mrb[80].mxu1 %v26546_v11  ;;  %10146 = vmatprep.mubr.bf16.mxu0 %v26540_v10  ;;  %v21401_v11 = vld [vmem:[%s28514_s9 + $0x68c] ss:$16 sps:$4 sm:$0xff]  }
 0x836   : > { %10119 = vmatpush1.bf16.msra.mxu0 %v21384_v38  ;;  %10252 = vmatprep.mubr.bf16.mxu1 %v26540_v10  ;;  %v21396_v10 = vld [vmem:[%s28514_s9 + $0x680] ss:$16 sps:$4 sm:$0xff]   ;;  %v21471_v38 = vld [vmem:[%s28514_s9 + $0x8] ss:$16 sps:$4 sm:$0xff]  }
 0x837   : > { %10225 = vmatpush1.bf16.msra.mxu1 %v21387_v28  ;;  %10120 = vmatprep.subr.bf16.mxu0 %v21392_v1  ;;  %v21476_v28 = vld [vmem:[%s28514_s9 + $0x24] ss:$16 sps:$4 sm:$0xff]   ;;  %v21479_v1 = vld [vmem:[%s28514_s9 + $0x2c] ss:$16 sps:$4 sm:$0xff]  }
 0x838   : > { %10226 = vmatprep.subr.bf16.mxu1 %v21395_v2  ;;  %v21474_v2 = vld [vmem:[%s28514_s9 + $0x20] ss:$16 sps:$4 sm:$0xff]  }
 0x83a   : > { %10121 = vmatpush1.bf16.msra.mxu0 %v21390_v4  ;;  %v21477_v4 = vld [vmem:[%s28514_s9 + $0x28] ss:$16 sps:$4 sm:$0xff]  }
 0x83b   : > { %10227 = vmatpush1.bf16.msra.mxu1 %v21393_v8  ;;  %10122 = vmatprep.subr.bf16.mxu0 %v21398_v9  ;;  %v21482_v8 = vld [vmem:[%s28514_s9 + $0x44] ss:$16 sps:$4 sm:$0xff]   ;;  %v21483_v9 = vld [vmem:[%s28514_s9 + $0x48] ss:$16 sps:$4 sm:$0xff]  }
 0x83c   : > { %10228 = vmatprep.subr.bf16.mxu1 %v21401_v11  ;;  %v21488_v11 = vld [vmem:[%s28514_s9 + $0x64] ss:$16 sps:$4 sm:$0xff]  }
 0x83e   : > { %10123 = vmatpush1.bf16.msra.mxu0 %v21396_v10  ;;  %v21491_v10 = vld [vmem:[%s28514_s9 + $0x6c] ss:$16 sps:$4 sm:$0xff]  }
 0x83f   : > { %10229 = vmatpush1.bf16.msra.mxu1 %v21399_v13  ;;  %10124 = vmatprep.subr.bf16.mxu0 %v21404_v15  ;;  %v21486_v13 = vld [vmem:[%s28514_s9 + $0x60] ss:$16 sps:$4 sm:$0xff]   ;;  %v21489_v15 = vld [vmem:[%s28514_s9 + $0x68] ss:$16 sps:$4 sm:$0xff]  }
 0x840   : > { %10230 = vmatprep.subr.bf16.mxu1 %v21407_v48  ;;  %v21494_v48 = vld [vmem:[%s28514_s9 + $0x84] ss:$16 sps:$4 sm:$0xff]  }
 0x842   : > { %10125 = vmatpush1.bf16.msra.mxu0 %v21402_v16  ;;  %v21492_v16 = vld [vmem:[%s28514_s9 + $0x80] ss:$16 sps:$4 sm:$0xff]  }
 0x843   : > { %10231 = vmatpush1.bf16.msra.mxu1 %v21405_v19  ;;  %10126 = vmatprep.subr.bf16.mxu0 %v21410_v22  ;;  %v21495_v19 = vld [vmem:[%s28514_s9 + $0x88] ss:$16 sps:$4 sm:$0xff]   ;;  %v21500_v22 = vld [vmem:[%s28514_s9 + $0xa4] ss:$16 sps:$4 sm:$0xff]  }
 0x844   : > { %10232 = vmatprep.subr.bf16.mxu1 %v21413_v24  ;;  %v21503_v24 = vld [vmem:[%s28514_s9 + $0xac] ss:$16 sps:$4 sm:$0xff]  }
 0x846   : > { %10127 = vmatpush1.bf16.msra.mxu0 %v21408_v58  ;;  %v21498_v58 = vld [vmem:[%s28514_s9 + $0xa0] ss:$16 sps:$4 sm:$0xff]  }
 0x847   : > { %10233 = vmatpush1.bf16.msra.mxu1 %v21411_v17  ;;  %10128 = vmatprep.subr.bf16.mxu0 %v21416_v18  ;;  %v21501_v17 = vld [vmem:[%s28514_s9 + $0xa8] ss:$16 sps:$4 sm:$0xff]   ;;  %v21506_v18 = vld [vmem:[%s28514_s9 + $0xc4] ss:$16 sps:$4 sm:$0xff]  }
 0x848   : > { %10234 = vmatprep.subr.bf16.mxu1 %v21419_v25  ;;  %v21509_v25 = vld [vmem:[%s28514_s9 + $0xcc] ss:$16 sps:$4 sm:$0xff]  }
 0x84a   : > { %10129 = vmatpush1.bf16.msra.mxu0 %v21414_v23  ;;  %v21504_v23 = vld [vmem:[%s28514_s9 + $0xc0] ss:$16 sps:$4 sm:$0xff]  }
 0x84b   : > { %10235 = vmatpush1.bf16.msra.mxu1 %v21417_v27  ;;  %10130 = vmatprep.subr.bf16.mxu0 %v21422_v33  ;;  %v21507_v27 = vld [vmem:[%s28514_s9 + $0xc8] ss:$16 sps:$4 sm:$0xff]   ;;  %v21512_v33 = vld [vmem:[%s28514_s9 + $0xe4] ss:$16 sps:$4 sm:$0xff]  }
 0x84c   : > { %10236 = vmatprep.subr.bf16.mxu1 %v21425_v52  ;;  %v21515_v52 = vld [vmem:[%s28514_s9 + $0xec] ss:$16 sps:$4 sm:$0xff]  }
 0x84e   : > { %10131 = vmatpush1.bf16.msra.mxu0 %v21420_v30  ;;  %v21510_v30 = vld [vmem:[%s28514_s9 + $0xe0] ss:$16 sps:$4 sm:$0xff]  }
 0x84f   : > { %10237 = vmatpush1.bf16.msra.mxu1 %v21423_v32  ;;  %10132 = vmatprep.subr.bf16.mxu0 %v21428_v47  ;;  %v21513_v32 = vld [vmem:[%s28514_s9 + $0xe8] ss:$16 sps:$4 sm:$0xff]   ;;  %v21518_v47 = vld [vmem:[%s28514_s9 + $0x104] ss:$16 sps:$4 sm:$0xff]  }
 0x850   : > { %10238 = vmatprep.subr.bf16.mxu1 %v21431_v63  ;;  %v21521_v63 = vld [vmem:[%s28514_s9 + $0x10c] ss:$16 sps:$4 sm:$0xff]  }
 0x852   : > { %10133 = vmatpush1.bf16.msra.mxu0 %v21426_v56  ;;  %v21516_v56 = vld [vmem:[%s28514_s9 + $0x100] ss:$16 sps:$4 sm:$0xff]  }
 0x853   : > { %10239 = vmatpush1.bf16.msra.mxu1 %v21429_v35  ;;  %10134 = vmatprep.subr.bf16.mxu0 %v21434_v49  ;;  %v21519_v35 = vld [vmem:[%s28514_s9 + $0x108] ss:$16 sps:$4 sm:$0xff]   ;;  %v21524_v49 = vld [vmem:[%s28514_s9 + $0x124] ss:$16 sps:$4 sm:$0xff]  }
 0x854   : > { %10240 = vmatprep.subr.bf16.mxu1 %v21437_v37  ;;  %v21527_v37 = vld [vmem:[%s28514_s9 + $0x12c] ss:$16 sps:$4 sm:$0xff]  }
 0x856   : > { %10135 = vmatpush1.bf16.msra.mxu0 %v21432_v12  ;;  %v21522_v12 = vld [vmem:[%s28514_s9 + $0x120] ss:$16 sps:$4 sm:$0xff]  }
 0x857   : > { %10241 = vmatpush1.bf16.msra.mxu1 %v21435_v34  ;;  %10136 = vmatprep.subr.bf16.mxu0 %v21440_v31  ;;  %v21525_v34 = vld [vmem:[%s28514_s9 + $0x128] ss:$16 sps:$4 sm:$0xff]   ;;  %v21530_v31 = vld [vmem:[%s28514_s9 + $0x144] ss:$16 sps:$4 sm:$0xff]  }
 0x858   : > { %10242 = vmatprep.subr.bf16.mxu1 %v21443_v39  ;;  %v21533_v39 = vld [vmem:[%s28514_s9 + $0x14c] ss:$16 sps:$4 sm:$0xff]  }
 0x85a   : > { %10137 = vmatpush1.bf16.msra.mxu0 %v21438_v40  ;;  %v21528_v40 = vld [vmem:[%s28514_s9 + $0x140] ss:$16 sps:$4 sm:$0xff]  }
 0x85b   : > { %10243 = vmatpush1.bf16.msra.mxu1 %v21441_v41  ;;  %10138 = vmatprep.subr.bf16.mxu0 %v21446_v29  ;;  %v21531_v41 = vld [vmem:[%s28514_s9 + $0x148] ss:$16 sps:$4 sm:$0xff]   ;;  %v21536_v29 = vld [vmem:[%s28514_s9 + $0x164] ss:$16 sps:$4 sm:$0xff]  }
 0x85c   : > { %10244 = vmatprep.subr.bf16.mxu1 %v21449_v44  ;;  %v21539_v44 = vld [vmem:[%s28514_s9 + $0x16c] ss:$16 sps:$4 sm:$0xff]  }
 0x85e   : > { %10139 = vmatpush1.bf16.msra.mxu0 %v21444_v45  ;;  %v21534_v45 = vld [vmem:[%s28514_s9 + $0x160] ss:$16 sps:$4 sm:$0xff]  }
 0x85f   : > { %10245 = vmatpush1.bf16.msra.mxu1 %v21447_v0  ;;  %10140 = vmatprep.subr.bf16.mxu0 %v21452_v26  ;;  %v21537_v0 = vld [vmem:[%s28514_s9 + $0x168] ss:$16 sps:$4 sm:$0xff]   ;;  %v21542_v26 = vld [vmem:[%s28514_s9 + $0x184] ss:$16 sps:$4 sm:$0xff]  }
 0x860   : > { %10246 = vmatprep.subr.bf16.mxu1 %v21455_v46  ;;  %v21545_v46 = vld [vmem:[%s28514_s9 + $0x18c] ss:$16 sps:$4 sm:$0xff]  }
 0x862   : > { %10141 = vmatpush1.bf16.msra.mxu0 %v21450_v14  ;;  %v21540_v14 = vld [vmem:[%s28514_s9 + $0x180] ss:$16 sps:$4 sm:$0xff]  }
 0x863   : > { %10247 = vmatpush1.bf16.msra.mxu1 %v21453_v21  ;;  %10142 = vmatprep.subr.bf16.mxu0 %v21458_v42  ;;  %v21543_v21 = vld [vmem:[%s28514_s9 + $0x188] ss:$16 sps:$4 sm:$0xff]   ;;  %v21548_v42 = vld [vmem:[%s28514_s9 + $0x1a4] ss:$16 sps:$4 sm:$0xff]  }
 0x864   : > { %10248 = vmatprep.subr.bf16.mxu1 %v21461_v43  ;;  %v21551_v43 = vld [vmem:[%s28514_s9 + $0x1ac] ss:$16 sps:$4 sm:$0xff]  }
 0x866   : > { %10143 = vmatpush1.bf16.msra.mxu0 %v21456_v20  ;;  %v21546_v20 = vld [vmem:[%s28514_s9 + $0x1a0] ss:$16 sps:$4 sm:$0xff]  }
 0x867   : > { %10249 = vmatpush1.bf16.msra.mxu1 %v21459_v50  ;;  %10144 = vmatprep.subr.bf16.mxu0 %v21464_v51  ;;  %v21549_v50 = vld [vmem:[%s28514_s9 + $0x1a8] ss:$16 sps:$4 sm:$0xff]   ;;  %v21554_v51 = vld [vmem:[%s28514_s9 + $0x1c4] ss:$16 sps:$4 sm:$0xff]  }
 0x868   : > { %10250 = vmatprep.subr.bf16.mxu1 %v21467_v57  ;;  %v21557_v57 = vld [vmem:[%s28514_s9 + $0x1cc] ss:$16 sps:$4 sm:$0xff]  }
 0x86a   : > { %10145 = vmatpush1.bf16.msra.mxu0 %v21462_v53  ;;  %v21552_v53 = vld [vmem:[%s28514_s9 + $0x1c0] ss:$16 sps:$4 sm:$0xff]  }
 0x86b   : > { %10251 = vmatpush1.bf16.msra.mxu1 %v21465_v54  ;;  %10913 = vmatprep.subr.bf16.mxu0 %v21470_v36  ;;  %v21555_v54 = vld [vmem:[%s28514_s9 + $0x1c8] ss:$16 sps:$4 sm:$0xff]   ;;  %v21560_v36 = vld [vmem:[%s28514_s9 + $0x1e4] ss:$16 sps:$4 sm:$0xff]  }
 0x86c   : > { %11019 = vmatprep.subr.bf16.mxu1 %v21473_v55  ;;  %v21563_v55 = vld [vmem:[%s28514_s9 + $0x1ec] ss:$16 sps:$4 sm:$0xff]  }
 0x86d   : > { %10147 = vmatmul.mubr.bf16.vlgmr.msra.gmra.mrb[76].mxu0 %v26536_v7 }
 0x86e   : > { %10253 = vmatmul.mubr.bf16.vlgmr.msra.gmra.mrb[76].mxu1 %v26536_v7  ;;  %10156 = vmatprep.mubr.bf16.mxu0 %v26552_v6  ;;  %v21485_v7 = vld [vmem:[%s28514_s9 + $0x4c] ss:$16 sps:$4 sm:$0xff]  }
 0x86f   : > { %10262 = vmatprep.mubr.bf16.mxu1 %v26552_v6  ;;  %10914 = vmatpush1.bf16.msra.mxu0 %v21468_v3  ;;  %v21480_v6 = vld [vmem:[%s28514_s9 + $0x40] ss:$16 sps:$4 sm:$0xff]  }
 0x870   : > { %11020 = vmatpush1.bf16.msra.mxu1 %v21471_v38  ;;  %10915 = vmatprep.subr.bf16.mxu0 %v21476_v28  ;;  %v21558_v3 = vld [vmem:[%s28514_s9 + $0x1e0] ss:$16 sps:$4 sm:$0xff]   ;;  %v21561_v38 = vld [vmem:[%s28514_s9 + $0x1e8] ss:$16 sps:$4 sm:$0xff]   ;;  %v21566_v28 = vld [vmem:[%s28514_s9 + $0x204] ss:$16 sps:$4 sm:$0xff]  }
 0x871   : > { %11021 = vmatprep.subr.bf16.mxu1 %v21479_v1  ;;  %v21569_v1 = vld [vmem:[%s28514_s9 + $0x20c] ss:$16 sps:$4 sm:$0xff]  }
 0x873   : > { %10916 = vmatpush1.bf16.msra.mxu0 %v21474_v2 }
 0x874   : > { %11022 = vmatpush1.bf16.msra.mxu1 %v21477_v4  ;;  %10917 = vmatprep.subr.bf16.mxu0 %v21482_v8 }
 0x875   : > { %10157 = vmatmul.mubr.bf16.gmra.mrb[80].mxu0 %v26548_v5  ;;  %11023 = vmatprep.subr.bf16.mxu1 %v21485_v7 }
 0x876   : > { %10263 = vmatmul.mubr.bf16.gmra.mrb[80].mxu1 %v26548_v5  ;;  %v21497_v5 = vld [vmem:[%s28514_s9 + $0x8c] ss:$16 sps:$4 sm:$0xff]  }
 0x877   : > { %10918 = vmatpush1.bf16.msra.mxu0 %v21480_v6 }
 0x878   : > { %11024 = vmatpush1.bf16.msra.mxu1 %v21483_v9  ;;  %10919 = vmatprep.subr.bf16.mxu0 %v21488_v11 }
 0x879   : > { %11025 = vmatprep.subr.bf16.mxu1 %v21491_v10 }
 0x87b   : > { %10920 = vmatpush1.bf16.msra.mxu0 %v21486_v13 }
 0x87c   : > { %11026 = vmatpush1.bf16.msra.mxu1 %v21489_v15  ;;  %10921 = vmatprep.subr.bf16.mxu0 %v21494_v48  ;;  %v21564_v15 = vld [vmem:[%s28514_s9 + $0x200] ss:$16 sps:$4 sm:$0xff]   ;;  %v21567_v48 = vld [vmem:[%s28514_s9 + $0x208] ss:$16 sps:$4 sm:$0xff]  }
 0x87d   : > { %11027 = vmatprep.subr.bf16.mxu1 %v21497_v5 }
 0x87f   : > { %10922 = vmatpush1.bf16.msra.mxu0 %v21492_v16 }
 0x880   : > { %11028 = vmatpush1.bf16.msra.mxu1 %v21495_v19  ;;  %10923 = vmatprep.subr.bf16.mxu0 %v21500_v22  ;;  %v21572_v19 = vld [vmem:[%s28514_s9 + $0x224] ss:$16 sps:$4 sm:$0xff]   ;;  %v21575_v22 = vld [vmem:[%s28514_s9 + $0x22c] ss:$16 sps:$4 sm:$0xff]  }
 0x881   : > { %11029 = vmatprep.subr.bf16.mxu1 %v21503_v24 }
 0x883   : > { %10924 = vmatpush1.bf16.msra.mxu0 %v21498_v58 }
 0x884   : > { %11030 = vmatpush1.bf16.msra.mxu1 %v21501_v17  ;;  %10925 = vmatprep.subr.bf16.mxu0 %v21506_v18  ;;  %v21570_v17 = vld [vmem:[%s28514_s9 + $0x220] ss:$16 sps:$4 sm:$0xff]   ;;  %v21573_v18 = vld [vmem:[%s28514_s9 + $0x228] ss:$16 sps:$4 sm:$0xff]  }
 0x885   : > { %11031 = vmatprep.subr.bf16.mxu1 %v21509_v25 }
 0x887   : > { %10926 = vmatpush1.bf16.msra.mxu0 %v21504_v23  ;;  %v21578_v23 = vld [vmem:[%s28514_s9 + $0x244] ss:$16 sps:$4 sm:$0xff]  }
 0x888   : > { %11032 = vmatpush1.bf16.msra.mxu1 %v21507_v27  ;;  %10927 = vmatprep.subr.bf16.mxu0 %v21512_v33  ;;  %v21581_v27 = vld [vmem:[%s28514_s9 + $0x24c] ss:$16 sps:$4 sm:$0xff]  }
 0x889   : > { %11033 = vmatprep.subr.bf16.mxu1 %v21515_v52 }
 0x88b   : > { %10928 = vmatpush1.bf16.msra.mxu0 %v21510_v30 }
 0x88c   : > { %11034 = vmatpush1.bf16.msra.mxu1 %v21513_v32  ;;  %10929 = vmatprep.subr.bf16.mxu0 %v21518_v47 }
 0x88d   : > { %11035 = vmatprep.subr.bf16.mxu1 %v21521_v63 }
 0x88f   : > { %10930 = vmatpush1.bf16.msra.mxu0 %v21516_v56 }
 0x890   : > { %11036 = vmatpush1.bf16.msra.mxu1 %v21519_v35  ;;  %10931 = vmatprep.subr.bf16.mxu0 %v21524_v49  ;;  %v21576_v35 = vld [vmem:[%s28514_s9 + $0x240] ss:$16 sps:$4 sm:$0xff]   ;;  %v21579_v49 = vld [vmem:[%s28514_s9 + $0x248] ss:$16 sps:$4 sm:$0xff]  }
 0x891   : > { %11037 = vmatprep.subr.bf16.mxu1 %v21527_v37 }
 0x893   : > { %10932 = vmatpush1.bf16.msra.mxu0 %v21522_v12 }
 0x894   : > { %11038 = vmatpush1.bf16.msra.mxu1 %v21525_v34  ;;  %10933 = vmatprep.subr.bf16.mxu0 %v21530_v31  ;;  %v21584_v34 = vld [vmem:[%s28514_s9 + $0x264] ss:$16 sps:$4 sm:$0xff]  }
 0x895   : > { %11039 = vmatprep.subr.bf16.mxu1 %v21533_v39  ;;  %v21587_v39 = vld [vmem:[%s28514_s9 + $0x26c] ss:$16 sps:$4 sm:$0xff]  }
 0x897   : > { %10934 = vmatpush1.bf16.msra.mxu0 %v21528_v40  ;;  %v21582_v40 = vld [vmem:[%s28514_s9 + $0x260] ss:$16 sps:$4 sm:$0xff]  }
 0x898   : > { %11040 = vmatpush1.bf16.msra.mxu1 %v21531_v41  ;;  %10935 = vmatprep.subr.bf16.mxu0 %v21536_v29  ;;  %v21585_v41 = vld [vmem:[%s28514_s9 + $0x268] ss:$16 sps:$4 sm:$0xff]  }
 0x899   : > { %11041 = vmatprep.subr.bf16.mxu1 %v21539_v44  ;;  %v21590_v44 = vld [vmem:[%s28514_s9 + $0x284] ss:$16 sps:$4 sm:$0xff]  }
 0x89b   : > { %10936 = vmatpush1.bf16.msra.mxu0 %v21534_v45  ;;  %v21593_v45 = vld [vmem:[%s28514_s9 + $0x28c] ss:$16 sps:$4 sm:$0xff]  }
 0x89c   : > { %11042 = vmatpush1.bf16.msra.mxu1 %v21537_v0  ;;  %10937 = vmatprep.subr.bf16.mxu0 %v21542_v26 }
 0x89d   : > { %11043 = vmatprep.subr.bf16.mxu1 %v21545_v46 }
 0x89f   : > { %10938 = vmatpush1.bf16.msra.mxu0 %v21540_v14 }
 0x8a0   : > { %11044 = vmatpush1.bf16.msra.mxu1 %v21543_v21  ;;  %10939 = vmatprep.subr.bf16.mxu0 %v21548_v42 }
 0x8a1   : > { %11045 = vmatprep.subr.bf16.mxu1 %v21551_v43 }
 0x8a3   : > { %10940 = vmatpush1.bf16.msra.mxu0 %v21546_v20  ;;  %v21588_v20 = vld [vmem:[%s28514_s9 + $0x280] ss:$16 sps:$4 sm:$0xff]  }
 0x8a4   : > { %11046 = vmatpush1.bf16.msra.mxu1 %v21549_v50  ;;  %10941 = vmatprep.subr.bf16.mxu0 %v21554_v51  ;;  %v21591_v50 = vld [vmem:[%s28514_s9 + $0x288] ss:$16 sps:$4 sm:$0xff]  }
 0x8a5   : > { %11047 = vmatprep.subr.bf16.mxu1 %v21557_v57 }
 0x8a7   : > { %10942 = vmatpush1.bf16.msra.mxu0 %v21552_v53 }
 0x8a8   : > { %11048 = vmatpush1.bf16.msra.mxu1 %v21555_v54  ;;  %10943 = vmatprep.subr.bf16.mxu0 %v21560_v36  ;;  %v21596_v54 = vld [vmem:[%s28514_s9 + $0x2a4] ss:$16 sps:$4 sm:$0xff]   ;;  %v21599_v36 = vld [vmem:[%s28514_s9 + $0x2ac] ss:$16 sps:$4 sm:$0xff]  }
 0x8a9   : > { %11049 = vmatprep.subr.bf16.mxu1 %v21563_v55 }
 0x8ab   : > { %10944 = vmatpush1.bf16.msra.mxu0 %v21558_v3  ;;  %v21594_v3 = vld [vmem:[%s28514_s9 + $0x2a0] ss:$16 sps:$4 sm:$0xff]  }
 0x8ac   : > { %11050 = vmatpush1.bf16.msra.mxu1 %v21561_v38  ;;  %10966 = vmatprep.subr.bf16.mxu0 %v21566_v28  ;;  %v21597_v38 = vld [vmem:[%s28514_s9 + $0x2a8] ss:$16 sps:$4 sm:$0xff]  }
 0x8ad   : > { %11072 = vmatprep.subr.bf16.mxu1 %v21569_v1  ;;  %v21602_v1 = vld [vmem:[%s28514_s9 + $0x2c4] ss:$16 sps:$4 sm:$0xff]  }
 0x8af   : > { %v8970_v2 = vpop.f32.mrb[60].mxu0 }
 0x8b0   : > { %v8972_v4 = vpop.f32.mrb[61].mxu0  ;;  %v9023_v8 = vpop.f32.mrb[60].mxu1 }
 0x8b1   : > { %v8974_v7 = vpop.f32.mrb[62].mxu0  ;;  %v9025_v6 = vpop.f32.mrb[61].mxu1 }
 0x8b2   : > { %v9042_v9 = vpack.c.bf16 %v8974_v7, %v8970_v2  ;;  %v8976_v11 = vpop.f32.mrb[63].mxu0  ;;  %v9027_v10 = vpop.f32.mrb[62].mxu1  ;;  %v21605_v2 = vld [vmem:[%s28514_s9 + $0x2cc] ss:$16 sps:$4 sm:$0xff]  }
 0x8b3   : > { %v9043_v13 = vpack.c.bf16 %v8976_v11, %v8972_v4  ;;  %v27196_v5 = vpack.c.bf16 %v9027_v10, %v9023_v8  ;;  %v9029_v16 = vpop.f32.mrb[63].mxu1 }
 0x8b4   : > { %v9045_v24 = vpack.c.bf16 %v9029_v16, %v9025_v6 }
 0x8b5   : > { %10945 = vmatprep.mubr.bf16.mxu0 %v9043_v13  ;;  %11051 = vmatprep.mubr.bf16.mxu1 %v9043_v13  ;;  %v21600_v13 = vld [vmem:[%s28514_s9 + $0x2c0] ss:$16 sps:$4 sm:$0xff]  }
 0x8b6   : > { %10946 = vmatmul.mubr.bf16.vlgmr.msra.gmra.mrb[76].mxu0 %v9042_v9  ;;  %11052 = vmatmul.mubr.bf16.vlgmr.msra.gmra.mrb[76].mxu1 %v9042_v9 }
 0x8b7   : > { %10967 = vmatpush1.bf16.msra.mxu0 %v21564_v15  ;;  %11073 = vmatpush1.bf16.msra.mxu1 %v21567_v48  ;;  %v8980_v58 = vpop.f32.mrb[64].mxu0  ;;  %v21603_v15 = vld [vmem:[%s28514_s9 + $0x2c8] ss:$16 sps:$4 sm:$0xff]  }
 0x8b8   : > { %10968 = vmatprep.subr.bf16.mxu0 %v21572_v19  ;;  %11074 = vmatprep.subr.bf16.mxu1 %v21575_v22  ;;  %v8982_v25 = vpop.f32.mrb[65].mxu0  ;;  %v9033_v33 = vpop.f32.mrb[64].mxu1  ;;  %v21608_v22 = vld [vmem:[%s28514_s9 + $0x2e4] ss:$16 sps:$4 sm:$0xff]  }
 0x8b9   : > { %v8984_v52 = vpop.f32.mrb[66].mxu0  ;;  %v9035_v30 = vpop.f32.mrb[65].mxu1 }
 0x8ba   : > { %v9046_v32 = vpack.c.bf16 %v8984_v52, %v8980_v58  ;;  %v8986_v47 = vpop.f32.mrb[67].mxu0  ;;  %v9037_v63 = vpop.f32.mrb[66].mxu1  ;;  %v21620_v52 = vld [vmem:[%s28514_s9 + $0x324] ss:$16 sps:$4 sm:$0xff]  }
 0x8bb   : > { %10969 = vmatpush1.bf16.msra.mxu0 %v21570_v17  ;;  %11075 = vmatpush1.bf16.msra.mxu1 %v21573_v18  ;;  %v9047_v56 = vpack.c.bf16 %v8986_v47, %v8982_v25  ;;  %v27222_v37 = vpack.c.bf16 %v9037_v63, %v9033_v33  ;;  %v9039_v12 = vpop.f32.mrb[67].mxu1  ;;  %v21606_v17 = vld [vmem:[%s28514_s9 + $0x2e0] ss:$16 sps:$4 sm:$0xff]   ;;  %v21609_v18 = vld [vmem:[%s28514_s9 + $0x2e8] ss:$16 sps:$4 sm:$0xff]  }
 0x8bc   : > { %10970 = vmatprep.subr.bf16.mxu0 %v21578_v23  ;;  %11076 = vmatprep.subr.bf16.mxu1 %v21581_v27  ;;  %v27227_v31 = vpack.c.bf16 %v9039_v12, %v9035_v30  ;;  %v21614_v25 = vld [vmem:[%s28514_s9 + $0x304] ss:$16 sps:$4 sm:$0xff]   ;;  %v21617_v23 = vld [vmem:[%s28514_s9 + $0x30c] ss:$16 sps:$4 sm:$0xff]   ;;  %v21612_v27 = vld [vmem:[%s28514_s9 + $0x300] ss:$16 sps:$4 sm:$0xff]  }
 0x8bd   : > { %10955 = vmatprep.mubr.bf16.mxu0 %v9047_v56  ;;  %11061 = vmatprep.mubr.bf16.mxu1 %v9047_v56  ;;  %v21615_v33 = vld [vmem:[%s28514_s9 + $0x308] ss:$16 sps:$4 sm:$0xff]   ;;  %v21623_v30 = vld [vmem:[%s28514_s9 + $0x32c] ss:$16 sps:$4 sm:$0xff]   ;;  %v21626_v63 = vld [vmem:[%s28514_s9 + $0x344] ss:$16 sps:$4 sm:$0xff]  }
 0x8be   : > { %10956 = vmatmul.mubr.bf16.gmra.mrb[80].mxu0 %v9046_v32  ;;  %11062 = vmatmul.mubr.bf16.gmra.mrb[80].mxu1 %v9046_v32  ;;  %v21618_v32 = vld [vmem:[%s28514_s9 + $0x320] ss:$16 sps:$4 sm:$0xff]   ;;  %v21621_v47 = vld [vmem:[%s28514_s9 + $0x328] ss:$16 sps:$4 sm:$0xff]   ;;  %v21629_v56 = vld [vmem:[%s28514_s9 + $0x34c] ss:$16 sps:$4 sm:$0xff]  }
 0x8bf   : > { %10971 = vmatpush1.bf16.msra.mxu0 %v21576_v35  ;;  %11077 = vmatpush1.bf16.msra.mxu1 %v21579_v49  ;;  %v9084_v29 = vpop.f32.mrb[68].mxu0  ;;  %v21624_v35 = vld [vmem:[%s28514_s9 + $0x340] ss:$16 sps:$4 sm:$0xff]   ;;  %v21627_v49 = vld [vmem:[%s28514_s9 + $0x348] ss:$16 sps:$4 sm:$0xff]  }
 0x8c0   : > { %10972 = vmatprep.subr.bf16.mxu0 %v21584_v34  ;;  %10998 = vmatprep.mubr.bf16.mxu0 %v9045_v24  ;;  %v9137_v0 = vpop.f32.mrb[68].mxu1  ;;  %v9086_v26 = vpop.f32.mrb[69].mxu0  ;;  %v21632_v12 = vld [vmem:[%s28514_s9 + $0x364] ss:$16 sps:$4 sm:$0xff]   ;;  %v21635_v34 = vld [vmem:[%s28514_s9 + $0x36c] ss:$16 sps:$4 sm:$0xff]  }
 0x8c1   : > { %11078 = vmatprep.subr.bf16.mxu1 %v21587_v39  ;;  %11104 = vmatprep.mubr.bf16.mxu1 %v9045_v24  ;;  %v9139_v46 = vpop.f32.mrb[69].mxu1  ;;  %v9088_v14 = vpop.f32.mrb[70].mxu0  ;;  %v21611_v24 = vld [vmem:[%s28514_s9 + $0x2ec] ss:$16 sps:$4 sm:$0xff]   ;;  %v21630_v39 = vld [vmem:[%s28514_s9 + $0x360] ss:$16 sps:$4 sm:$0xff]  }
 0x8c2   : > { %v27244_v21 = vpack.c.bf16 %v9088_v14, %v9084_v29  ;;  %v9141_v42 = vpop.f32.mrb[70].mxu1  ;;  %v9090_v43 = vpop.f32.mrb[71].mxu0  ;;  %v21641_v29 = vld [vmem:[%s28514_s9 + $0x38c] ss:$16 sps:$4 sm:$0xff]   ;;  %v21645_v14 = vld [vmem:[%s28514_s9 + $0x3a8] ss:$16 sps:$4 sm:$0xff]  }
 0x8c3   : > { %10973 = vmatpush1.bf16.msra.mxu0 %v21582_v40  ;;  %11079 = vmatpush1.bf16.msra.mxu1 %v21585_v41  ;;  %v27252_v51 = vpack.c.bf16 %v9141_v42, %v9137_v0  ;;  %v27254_v57 = vpack.c.bf16 %v9090_v43, %v9086_v26  ;;  %v9143_v53 = vpop.f32.mrb[71].mxu1  ;;  %v21633_v40 = vld [vmem:[%s28514_s9 + $0x368] ss:$16 sps:$4 sm:$0xff]   ;;  %v21638_v41 = vld [vmem:[%s28514_s9 + $0x384] ss:$16 sps:$4 sm:$0xff]  }
 0x8c4   : > { %10974 = vmatprep.subr.bf16.mxu0 %v21590_v44  ;;  %11080 = vmatprep.subr.bf16.mxu1 %v21593_v45  ;;  %v27262_v55 = vpack.c.bf16 %v9143_v53, %v9139_v46  ;;  %v21636_v44 = vld [vmem:[%s28514_s9 + $0x380] ss:$16 sps:$4 sm:$0xff]   ;;  %v21639_v45 = vld [vmem:[%s28514_s9 + $0x388] ss:$16 sps:$4 sm:$0xff]   ;;  %v21644_v0 = vld [vmem:[%s28514_s9 + $0x3a4] ss:$16 sps:$4 sm:$0xff]  }
 0x8c5   : > { %v21647_v26 = vld [vmem:[%s28514_s9 + $0x3ac] ss:$16 sps:$4 sm:$0xff]   ;;  %v21642_v46 = vld [vmem:[%s28514_s9 + $0x3a0] ss:$16 sps:$4 sm:$0xff]   ;;  %v21650_v42 = vld [vmem:[%s28514_s9 + $0x3c4] ss:$16 sps:$4 sm:$0xff]  }
 0x8c6   : > { %v21653_v43 = vld [vmem:[%s28514_s9 + $0x3cc] ss:$16 sps:$4 sm:$0xff]   ;;  %v21656_v53 = vld [vmem:[%s28514_s9 + $0x3e4] ss:$16 sps:$4 sm:$0xff]  }
 0x8c7   : > { %10975 = vmatpush1.bf16.msra.mxu0 %v21588_v20  ;;  %11081 = vmatpush1.bf16.msra.mxu1 %v21591_v50  ;;  %v9094_v28 = vpop.f32.mrb[72].mxu0  ;;  %v21648_v20 = vld [vmem:[%s28514_s9 + $0x3c0] ss:$16 sps:$4 sm:$0xff]   ;;  %v21651_v50 = vld [vmem:[%s28514_s9 + $0x3c8] ss:$16 sps:$4 sm:$0xff]  }
 0x8c8   : > { %10976 = vmatprep.subr.bf16.mxu0 %v21596_v54  ;;  %11082 = vmatprep.subr.bf16.mxu1 %v21599_v36  ;;  %v9147_v4 = vpop.f32.mrb[72].mxu1  ;;  %v9096_v8 = vpop.f32.mrb[73].mxu0  ;;  %v21659_v54 = vld [vmem:[%s28514_s9 + $0x3ec] ss:$16 sps:$4 sm:$0xff]   ;;  %v21654_v36 = vld [vmem:[%s28514_s9 + $0x3e0] ss:$16 sps:$4 sm:$0xff]  }
 0x8c9   : > { %v9149_v7 = vpop.f32.mrb[73].mxu1  ;;  %v9098_v6 = vpop.f32.mrb[74].mxu0 }
 0x8ca   : > { %v27276_v9 = vpack.c.bf16 %v9098_v6, %v9094_v28  ;;  %v9151_v11 = vpop.f32.mrb[74].mxu1  ;;  %v9100_v10 = vpop.f32.mrb[75].mxu0  ;;  %v21665_v28 = vld [vmem:[%s28514_s9 + $0x80c] ss:$16 sps:$4 sm:$0xff]   ;;  %v21669_v6 = vld [vmem:[%s28514_s9 + $0x828] ss:$16 sps:$4 sm:$0xff]  }
 0x8cb   : > { %10977 = vmatpush1.bf16.msra.mxu0 %v21594_v3  ;;  %11083 = vmatpush1.bf16.msra.mxu1 %v21597_v38  ;;  %v27284_v48 = vpack.c.bf16 %v9151_v11, %v9147_v4  ;;  %v27286_v16 = vpack.c.bf16 %v9100_v10, %v9096_v8  ;;  %v9153_v19 = vpop.f32.mrb[75].mxu1  ;;  %v21657_v3 = vld [vmem:[%s28514_s9 + $0x3e8] ss:$16 sps:$4 sm:$0xff]   ;;  %v21662_v38 = vld [vmem:[%s28514_s9 + $0x804] ss:$16 sps:$4 sm:$0xff]  }
 0x8cc   : > { %10978 = vmatprep.subr.bf16.mxu0 %v21602_v1  ;;  %11084 = vmatprep.subr.bf16.mxu1 %v21605_v2  ;;  %v27294_v58 = vpack.c.bf16 %v9153_v19, %v9149_v7  ;;  %v21660_v1 = vld [vmem:[%s28514_s9 + $0x800] ss:$16 sps:$4 sm:$0xff]   ;;  %v21663_v2 = vld [vmem:[%s28514_s9 + $0x808] ss:$16 sps:$4 sm:$0xff]   ;;  %v21668_v4 = vld [vmem:[%s28514_s9 + $0x824] ss:$16 sps:$4 sm:$0xff]  }
 0x8cd   : > { %v21671_v8 = vld [vmem:[%s28514_s9 + $0x82c] ss:$16 sps:$4 sm:$0xff]   ;;  %v21666_v7 = vld [vmem:[%s28514_s9 + $0x820] ss:$16 sps:$4 sm:$0xff]   ;;  %v21675_v10 = vld [vmem:[%s28514_s9 + $0x848] ss:$16 sps:$4 sm:$0xff]  }
 0x8ce   : > { %v21672_v11 = vld [vmem:[%s28514_s9 + $0x840] ss:$16 sps:$4 sm:$0xff]  }
 0x8cf   : > { %10979 = vmatpush1.bf16.msra.mxu0 %v21600_v13  ;;  %11085 = vmatpush1.bf16.msra.mxu1 %v21603_v15  ;;  %v21680_v13 = vld [vmem:[%s28514_s9 + $0x864] ss:$16 sps:$4 sm:$0xff]   ;;  %v21683_v15 = vld [vmem:[%s28514_s9 + $0x86c] ss:$16 sps:$4 sm:$0xff]   ;;  %v21678_v19 = vld [vmem:[%s28514_s9 + $0x860] ss:$16 sps:$4 sm:$0xff]  }
 0x8d0   : > { %10980 = vmatprep.subr.bf16.mxu0 %v21608_v22  ;;  %11086 = vmatprep.subr.bf16.mxu1 %v21611_v24  ;;  %v21681_v22 = vld [vmem:[%s28514_s9 + $0x868] ss:$16 sps:$4 sm:$0xff]   ;;  %v21684_v24 = vld [vmem:[%s28514_s9 + $0x880] ss:$16 sps:$4 sm:$0xff]  }
 0x8d3   : > { %10981 = vmatpush1.bf16.msra.mxu0 %v21606_v17  ;;  %11087 = vmatpush1.bf16.msra.mxu1 %v21609_v18  ;;  %v21687_v17 = vld [vmem:[%s28514_s9 + $0x888] ss:$16 sps:$4 sm:$0xff]   ;;  %v21692_v18 = vld [vmem:[%s28514_s9 + $0x8a4] ss:$16 sps:$4 sm:$0xff]  }
 0x8d4   : > { %10982 = vmatprep.subr.bf16.mxu0 %v21614_v25  ;;  %11088 = vmatprep.subr.bf16.mxu1 %v21617_v23  ;;  %v21695_v25 = vld [vmem:[%s28514_s9 + $0x8ac] ss:$16 sps:$4 sm:$0xff]   ;;  %v21690_v23 = vld [vmem:[%s28514_s9 + $0x8a0] ss:$16 sps:$4 sm:$0xff]  }
 0x8d7   : > { %10983 = vmatpush1.bf16.msra.mxu0 %v21612_v27  ;;  %11089 = vmatpush1.bf16.msra.mxu1 %v21615_v33  ;;  %v21693_v27 = vld [vmem:[%s28514_s9 + $0x8a8] ss:$16 sps:$4 sm:$0xff]   ;;  %v21698_v33 = vld [vmem:[%s28514_s9 + $0x8c4] ss:$16 sps:$4 sm:$0xff]  }
 0x8d8   : > { %10984 = vmatprep.subr.bf16.mxu0 %v21620_v52  ;;  %11090 = vmatprep.subr.bf16.mxu1 %v21623_v30  ;;  %v21701_v52 = vld [vmem:[%s28514_s9 + $0x8cc] ss:$16 sps:$4 sm:$0xff]   ;;  %v21696_v30 = vld [vmem:[%s28514_s9 + $0x8c0] ss:$16 sps:$4 sm:$0xff]  }
 0x8db   : > { %10985 = vmatpush1.bf16.msra.mxu0 %v21618_v32  ;;  %11091 = vmatpush1.bf16.msra.mxu1 %v21621_v47  ;;  %v21699_v32 = vld [vmem:[%s28514_s9 + $0x8c8] ss:$16 sps:$4 sm:$0xff]   ;;  %v21704_v47 = vld [vmem:[%s28514_s9 + $0x8e4] ss:$16 sps:$4 sm:$0xff]  }
 0x8dc   : > { %10986 = vmatprep.subr.bf16.mxu0 %v21626_v63  ;;  %11092 = vmatprep.subr.bf16.mxu1 %v21629_v56  ;;  %v21707_v63 = vld [vmem:[%s28514_s9 + $0x8ec] ss:$16 sps:$4 sm:$0xff]   ;;  %v21702_v56 = vld [vmem:[%s28514_s9 + $0x8e0] ss:$16 sps:$4 sm:$0xff]  }
 0x8df   : > { %10987 = vmatpush1.bf16.msra.mxu0 %v21624_v35  ;;  %11093 = vmatpush1.bf16.msra.mxu1 %v21627_v49  ;;  %v21705_v35 = vld [vmem:[%s28514_s9 + $0x8e8] ss:$16 sps:$4 sm:$0xff]   ;;  %v21710_v49 = vld [vmem:[%s28514_s9 + $0x904] ss:$16 sps:$4 sm:$0xff]  }
 0x8e0   : > { %10988 = vmatprep.subr.bf16.mxu0 %v21632_v12  ;;  %11094 = vmatprep.subr.bf16.mxu1 %v21635_v34  ;;  %v21713_v12 = vld [vmem:[%s28514_s9 + $0x90c] ss:$16 sps:$4 sm:$0xff]   ;;  %v21708_v34 = vld [vmem:[%s28514_s9 + $0x900] ss:$16 sps:$4 sm:$0xff]  }
 0x8e3   : > { %10989 = vmatpush1.bf16.msra.mxu0 %v21630_v39  ;;  %11095 = vmatpush1.bf16.msra.mxu1 %v21633_v40  ;;  %v21711_v39 = vld [vmem:[%s28514_s9 + $0x908] ss:$16 sps:$4 sm:$0xff]   ;;  %v21716_v40 = vld [vmem:[%s28514_s9 + $0x924] ss:$16 sps:$4 sm:$0xff]  }
 0x8e4   : > { %10990 = vmatprep.subr.bf16.mxu0 %v21638_v41  ;;  %11096 = vmatprep.subr.bf16.mxu1 %v21641_v29  ;;  %v21719_v41 = vld [vmem:[%s28514_s9 + $0x92c] ss:$16 sps:$4 sm:$0xff]   ;;  %v21714_v29 = vld [vmem:[%s28514_s9 + $0x920] ss:$16 sps:$4 sm:$0xff]  }
 0x8e7   : > { %10991 = vmatpush1.bf16.msra.mxu0 %v21636_v44  ;;  %11097 = vmatpush1.bf16.msra.mxu1 %v21639_v45  ;;  %v21717_v44 = vld [vmem:[%s28514_s9 + $0x928] ss:$16 sps:$4 sm:$0xff]   ;;  %v21722_v45 = vld [vmem:[%s28514_s9 + $0x944] ss:$16 sps:$4 sm:$0xff]  }
 0x8e8   : > { %10992 = vmatprep.subr.bf16.mxu0 %v21644_v0  ;;  %11098 = vmatprep.subr.bf16.mxu1 %v21647_v26  ;;  %v21725_v0 = vld [vmem:[%s28514_s9 + $0x94c] ss:$16 sps:$4 sm:$0xff]   ;;  %v21720_v26 = vld [vmem:[%s28514_s9 + $0x940] ss:$16 sps:$4 sm:$0xff]  }
 0x8eb   : > { %10993 = vmatpush1.bf16.msra.mxu0 %v21642_v46  ;;  %11099 = vmatpush1.bf16.msra.mxu1 %v21645_v14  ;;  %v21723_v46 = vld [vmem:[%s28514_s9 + $0x948] ss:$16 sps:$4 sm:$0xff]   ;;  %v21728_v14 = vld [vmem:[%s28514_s9 + $0x964] ss:$16 sps:$4 sm:$0xff]  }
 0x8ec   : > { %10994 = vmatprep.subr.bf16.mxu0 %v21650_v42  ;;  %11100 = vmatprep.subr.bf16.mxu1 %v21653_v43  ;;  %v21731_v42 = vld [vmem:[%s28514_s9 + $0x96c] ss:$16 sps:$4 sm:$0xff]   ;;  %v21726_v43 = vld [vmem:[%s28514_s9 + $0x960] ss:$16 sps:$4 sm:$0xff]  }
 0x8ef   : > { %10995 = vmatpush1.bf16.msra.mxu0 %v21648_v20  ;;  %11101 = vmatpush1.bf16.msra.mxu1 %v21651_v50  ;;  %v21729_v20 = vld [vmem:[%s28514_s9 + $0x968] ss:$16 sps:$4 sm:$0xff]   ;;  %v21734_v50 = vld [vmem:[%s28514_s9 + $0x984] ss:$16 sps:$4 sm:$0xff]  }
 0x8f0   : > { %10996 = vmatprep.subr.bf16.mxu0 %v21656_v53  ;;  %11102 = vmatprep.subr.bf16.mxu1 %v21659_v54  ;;  %v21737_v53 = vld [vmem:[%s28514_s9 + $0x98c] ss:$16 sps:$4 sm:$0xff]   ;;  %v21732_v54 = vld [vmem:[%s28514_s9 + $0x980] ss:$16 sps:$4 sm:$0xff]  }
 0x8f3   : > { %10997 = vmatpush1.bf16.msra.mxu0 %v21654_v36  ;;  %11103 = vmatpush1.bf16.msra.mxu1 %v21657_v3  ;;  %v21735_v36 = vld [vmem:[%s28514_s9 + $0x988] ss:$16 sps:$4 sm:$0xff]   ;;  %v21740_v3 = vld [vmem:[%s28514_s9 + $0x9a4] ss:$16 sps:$4 sm:$0xff]  }
 0x8f4   : > { %11894 = vmatprep.subr.bf16.mxu0 %v21662_v38  ;;  %12000 = vmatprep.subr.bf16.mxu1 %v21665_v28  ;;  %v21743_v38 = vld [vmem:[%s28514_s9 + $0x9ac] ss:$16 sps:$4 sm:$0xff]   ;;  %v21738_v28 = vld [vmem:[%s28514_s9 + $0x9a0] ss:$16 sps:$4 sm:$0xff]  }
 0x8f6   : > { %10999 = vmatmul.mubr.bf16.vlgmr.msra.gmra.mrb[76].mxu0 %v27196_v5  ;;  %11105 = vmatmul.mubr.bf16.vlgmr.msra.gmra.mrb[76].mxu1 %v27196_v5  ;;  %v21674_v5 = vld [vmem:[%s28514_s9 + $0x844] ss:$16 sps:$4 sm:$0xff]  }
 0x8f7   : > { %11008 = vmatprep.mubr.bf16.mxu0 %v27227_v31  ;;  %11114 = vmatprep.mubr.bf16.mxu1 %v27227_v31  ;;  %v21677_v31 = vld [vmem:[%s28514_s9 + $0x84c] ss:$16 sps:$4 sm:$0xff]  }
 0x8f8   : > { %11895 = vmatpush1.bf16.msra.mxu0 %v21660_v1  ;;  %12001 = vmatpush1.bf16.msra.mxu1 %v21663_v2  ;;  %v21741_v1 = vld [vmem:[%s28514_s9 + $0x9a8] ss:$16 sps:$4 sm:$0xff]   ;;  %v21746_v2 = vld [vmem:[%s28514_s9 + $0x9c4] ss:$16 sps:$4 sm:$0xff]  }
 0x8f9   : > { %11896 = vmatprep.subr.bf16.mxu0 %v21668_v4  ;;  %12002 = vmatprep.subr.bf16.mxu1 %v21671_v8  ;;  %v21749_v4 = vld [vmem:[%s28514_s9 + $0x9cc] ss:$16 sps:$4 sm:$0xff]   ;;  %v21744_v8 = vld [vmem:[%s28514_s9 + $0x9c0] ss:$16 sps:$4 sm:$0xff]  }
 0x8fc   : > { %11897 = vmatpush1.bf16.msra.mxu0 %v21666_v7  ;;  %12003 = vmatpush1.bf16.msra.mxu1 %v21669_v6  ;;  %v21747_v7 = vld [vmem:[%s28514_s9 + $0x9c8] ss:$16 sps:$4 sm:$0xff]   ;;  %v21752_v6 = vld [vmem:[%s28514_s9 + $0x9e4] ss:$16 sps:$4 sm:$0xff]  }
 0x8fd   : > { %11898 = vmatprep.subr.bf16.mxu0 %v21674_v5  ;;  %12004 = vmatprep.subr.bf16.mxu1 %v21677_v31  ;;  %v21755_v5 = vld [vmem:[%s28514_s9 + $0x9ec] ss:$16 sps:$4 sm:$0xff]   ;;  %v21750_v31 = vld [vmem:[%s28514_s9 + $0x9e0] ss:$16 sps:$4 sm:$0xff]  }
 0x8fe   : > { %11009 = vmatmul.mubr.bf16.gmra.mrb[80].mxu0 %v27222_v37  ;;  %11115 = vmatmul.mubr.bf16.gmra.mrb[80].mxu1 %v27222_v37  ;;  %v21686_v37 = vld [vmem:[%s28514_s9 + $0x884] ss:$16 sps:$4 sm:$0xff]  }
 0x8ff   : > { %11926 = vmatprep.mubr.bf16.mxu0 %v27254_v57  ;;  %12032 = vmatprep.mubr.bf16.mxu1 %v27254_v57  ;;  %v21689_v57 = vld [vmem:[%s28514_s9 + $0x88c] ss:$16 sps:$4 sm:$0xff]  }
 0x900   : > { %11899 = vmatpush1.bf16.msra.mxu0 %v21672_v11  ;;  %12005 = vmatpush1.bf16.msra.mxu1 %v21675_v10  ;;  %v21753_v11 = vld [vmem:[%s28514_s9 + $0x9e8] ss:$16 sps:$4 sm:$0xff]   ;;  %v21758_v10 = vld [vmem:[%s28514_s9 + $0xa04] ss:$16 sps:$4 sm:$0xff]  }
 0x901   : > { %11900 = vmatprep.subr.bf16.mxu0 %v21680_v13  ;;  %12006 = vmatprep.subr.bf16.mxu1 %v21683_v15  ;;  %v21761_v13 = vld [vmem:[%s28514_s9 + $0xa0c] ss:$16 sps:$4 sm:$0xff]   ;;  %v21756_v15 = vld [vmem:[%s28514_s9 + $0xa00] ss:$16 sps:$4 sm:$0xff]  }
 0x904   : > { %11901 = vmatpush1.bf16.msra.mxu0 %v21678_v19  ;;  %12007 = vmatpush1.bf16.msra.mxu1 %v21681_v22  ;;  %v21759_v19 = vld [vmem:[%s28514_s9 + $0xa08] ss:$16 sps:$4 sm:$0xff]   ;;  %v21764_v22 = vld [vmem:[%s28514_s9 + $0xa24] ss:$16 sps:$4 sm:$0xff]  }
 0x905   : > { %11902 = vmatprep.subr.bf16.mxu0 %v21686_v37  ;;  %12008 = vmatprep.subr.bf16.mxu1 %v21689_v57  ;;  %v21767_v37 = vld [vmem:[%s28514_s9 + $0xa2c] ss:$16 sps:$4 sm:$0xff]   ;;  %v21762_v57 = vld [vmem:[%s28514_s9 + $0xa20] ss:$16 sps:$4 sm:$0xff]  }
 0x908   : > { %11903 = vmatpush1.bf16.msra.mxu0 %v21684_v24  ;;  %12009 = vmatpush1.bf16.msra.mxu1 %v21687_v17  ;;  %v21765_v24 = vld [vmem:[%s28514_s9 + $0xa28] ss:$16 sps:$4 sm:$0xff]   ;;  %v21770_v17 = vld [vmem:[%s28514_s9 + $0xa44] ss:$16 sps:$4 sm:$0xff]  }
 0x909   : > { %11904 = vmatprep.subr.bf16.mxu0 %v21692_v18  ;;  %12010 = vmatprep.subr.bf16.mxu1 %v21695_v25  ;;  %v21771_v18 = vld [vmem:[%s28514_s9 + $0xa48] ss:$16 sps:$4 sm:$0xff]   ;;  %v21776_v25 = vld [vmem:[%s28514_s9 + $0xa64] ss:$16 sps:$4 sm:$0xff]  }
 0x90c   : > { %11905 = vmatpush1.bf16.msra.mxu0 %v21690_v23  ;;  %12011 = vmatpush1.bf16.msra.mxu1 %v21693_v27  ;;  %v21779_v23 = vld [vmem:[%s28514_s9 + $0xa6c] ss:$16 sps:$4 sm:$0xff]   ;;  %v21774_v27 = vld [vmem:[%s28514_s9 + $0xa60] ss:$16 sps:$4 sm:$0xff]  }
 0x90d   : > { %11906 = vmatprep.subr.bf16.mxu0 %v21698_v33  ;;  %12012 = vmatprep.subr.bf16.mxu1 %v21701_v52  ;;  %v21777_v33 = vld [vmem:[%s28514_s9 + $0xa68] ss:$16 sps:$4 sm:$0xff]   ;;  %v21782_v52 = vld [vmem:[%s28514_s9 + $0xa84] ss:$16 sps:$4 sm:$0xff]  }
 0x910   : > { %11907 = vmatpush1.bf16.msra.mxu0 %v21696_v30  ;;  %12013 = vmatpush1.bf16.msra.mxu1 %v21699_v32  ;;  %v21780_v30 = vld [vmem:[%s28514_s9 + $0xa80] ss:$16 sps:$4 sm:$0xff]   ;;  %v21788_v32 = vld [vmem:[%s28514_s9 + $0xaa4] ss:$16 sps:$4 sm:$0xff]  }
 0x911   : > { %11908 = vmatprep.subr.bf16.mxu0 %v21704_v47  ;;  %12014 = vmatprep.subr.bf16.mxu1 %v21707_v63  ;;  %v21791_v47 = vld [vmem:[%s28514_s9 + $0xaac] ss:$16 sps:$4 sm:$0xff]   ;;  %v21786_v63 = vld [vmem:[%s28514_s9 + $0xaa0] ss:$16 sps:$4 sm:$0xff]  }
 0x914   : > { %11909 = vmatpush1.bf16.msra.mxu0 %v21702_v56  ;;  %12015 = vmatpush1.bf16.msra.mxu1 %v21705_v35  ;;  %v21789_v56 = vld [vmem:[%s28514_s9 + $0xaa8] ss:$16 sps:$4 sm:$0xff]   ;;  %v21794_v35 = vld [vmem:[%s28514_s9 + $0xac4] ss:$16 sps:$4 sm:$0xff]  }
 0x915   : > { %11910 = vmatprep.subr.bf16.mxu0 %v21710_v49  ;;  %12016 = vmatprep.subr.bf16.mxu1 %v21713_v12  ;;  %v21797_v49 = vld [vmem:[%s28514_s9 + $0xacc] ss:$16 sps:$4 sm:$0xff]   ;;  %v21792_v12 = vld [vmem:[%s28514_s9 + $0xac0] ss:$16 sps:$4 sm:$0xff]  }
 0x918   : > { %11911 = vmatpush1.bf16.msra.mxu0 %v21708_v34  ;;  %12017 = vmatpush1.bf16.msra.mxu1 %v21711_v39  ;;  %v21795_v34 = vld [vmem:[%s28514_s9 + $0xac8] ss:$16 sps:$4 sm:$0xff]   ;;  %v21800_v39 = vld [vmem:[%s28514_s9 + $0xae4] ss:$16 sps:$4 sm:$0xff]  }
 0x919   : > { %11912 = vmatprep.subr.bf16.mxu0 %v21716_v40  ;;  %12018 = vmatprep.subr.bf16.mxu1 %v21719_v41  ;;  %v21803_v40 = vld [vmem:[%s28514_s9 + $0xaec] ss:$16 sps:$4 sm:$0xff]   ;;  %v21798_v41 = vld [vmem:[%s28514_s9 + $0xae0] ss:$16 sps:$4 sm:$0xff]  }
 0x91c   : > { %11913 = vmatpush1.bf16.msra.mxu0 %v21714_v29  ;;  %12019 = vmatpush1.bf16.msra.mxu1 %v21717_v44  ;;  %v21801_v29 = vld [vmem:[%s28514_s9 + $0xae8] ss:$16 sps:$4 sm:$0xff]   ;;  %v21806_v44 = vld [vmem:[%s28514_s9 + $0xb04] ss:$16 sps:$4 sm:$0xff]  }
 0x91d   : > { %11914 = vmatprep.subr.bf16.mxu0 %v21722_v45  ;;  %12020 = vmatprep.subr.bf16.mxu1 %v21725_v0  ;;  %v21809_v45 = vld [vmem:[%s28514_s9 + $0xb0c] ss:$16 sps:$4 sm:$0xff]   ;;  %v21804_v0 = vld [vmem:[%s28514_s9 + $0xb00] ss:$16 sps:$4 sm:$0xff]  }
 0x920   : > { %11915 = vmatpush1.bf16.msra.mxu0 %v21720_v26  ;;  %12021 = vmatpush1.bf16.msra.mxu1 %v21723_v46  ;;  %v21807_v26 = vld [vmem:[%s28514_s9 + $0xb08] ss:$16 sps:$4 sm:$0xff]   ;;  %v21812_v46 = vld [vmem:[%s28514_s9 + $0xb24] ss:$16 sps:$4 sm:$0xff]  }
 0x921   : > { %11916 = vmatprep.subr.bf16.mxu0 %v21728_v14  ;;  %12022 = vmatprep.subr.bf16.mxu1 %v21731_v42  ;;  %v21815_v14 = vld [vmem:[%s28514_s9 + $0xb2c] ss:$16 sps:$4 sm:$0xff]   ;;  %v21810_v42 = vld [vmem:[%s28514_s9 + $0xb20] ss:$16 sps:$4 sm:$0xff]  }
 0x924   : > { %11917 = vmatpush1.bf16.msra.mxu0 %v21726_v43  ;;  %12023 = vmatpush1.bf16.msra.mxu1 %v21729_v20  ;;  %v21813_v43 = vld [vmem:[%s28514_s9 + $0xb28] ss:$16 sps:$4 sm:$0xff]   ;;  %v21818_v20 = vld [vmem:[%s28514_s9 + $0xb44] ss:$16 sps:$4 sm:$0xff]  }
 0x925   : > { %11918 = vmatprep.subr.bf16.mxu0 %v21734_v50  ;;  %12024 = vmatprep.subr.bf16.mxu1 %v21737_v53  ;;  %v21821_v50 = vld [vmem:[%s28514_s9 + $0xb4c] ss:$16 sps:$4 sm:$0xff]   ;;  %v21816_v53 = vld [vmem:[%s28514_s9 + $0xb40] ss:$16 sps:$4 sm:$0xff]  }
 0x928   : > { %11919 = vmatpush1.bf16.msra.mxu0 %v21732_v54  ;;  %12025 = vmatpush1.bf16.msra.mxu1 %v21735_v36  ;;  %v21819_v54 = vld [vmem:[%s28514_s9 + $0xb48] ss:$16 sps:$4 sm:$0xff]   ;;  %v21824_v36 = vld [vmem:[%s28514_s9 + $0xb64] ss:$16 sps:$4 sm:$0xff]  }
 0x929   : > { %11920 = vmatprep.subr.bf16.mxu0 %v21740_v3  ;;  %12026 = vmatprep.subr.bf16.mxu1 %v21743_v38  ;;  %v21827_v3 = vld [vmem:[%s28514_s9 + $0xb6c] ss:$16 sps:$4 sm:$0xff]   ;;  %v21822_v38 = vld [vmem:[%s28514_s9 + $0xb60] ss:$16 sps:$4 sm:$0xff]  }
 0x92c   : > { %11921 = vmatpush1.bf16.msra.mxu0 %v21738_v28  ;;  %12027 = vmatpush1.bf16.msra.mxu1 %v21741_v1  ;;  %v21825_v28 = vld [vmem:[%s28514_s9 + $0xb68] ss:$16 sps:$4 sm:$0xff]   ;;  %v21830_v1 = vld [vmem:[%s28514_s9 + $0xb84] ss:$16 sps:$4 sm:$0xff]  }
 0x92d   : > { %11922 = vmatprep.subr.bf16.mxu0 %v21746_v2  ;;  %12028 = vmatprep.subr.bf16.mxu1 %v21749_v4  ;;  %v21833_v2 = vld [vmem:[%s28514_s9 + $0xb8c] ss:$16 sps:$4 sm:$0xff]   ;;  %v21828_v4 = vld [vmem:[%s28514_s9 + $0xb80] ss:$16 sps:$4 sm:$0xff]  }
 0x930   : > { %11923 = vmatpush1.bf16.msra.mxu0 %v21744_v8  ;;  %12029 = vmatpush1.bf16.msra.mxu1 %v21747_v7  ;;  %v21831_v8 = vld [vmem:[%s28514_s9 + $0xb88] ss:$16 sps:$4 sm:$0xff]   ;;  %v21836_v7 = vld [vmem:[%s28514_s9 + $0xba4] ss:$16 sps:$4 sm:$0xff]  }
 0x931   : > { %11924 = vmatprep.subr.bf16.mxu0 %v21752_v6  ;;  %12030 = vmatprep.subr.bf16.mxu1 %v21755_v5  ;;  %v21839_v6 = vld [vmem:[%s28514_s9 + $0xbac] ss:$16 sps:$4 sm:$0xff]   ;;  %v21834_v5 = vld [vmem:[%s28514_s9 + $0xba0] ss:$16 sps:$4 sm:$0xff]  }
 0x934   : > { %11925 = vmatpush1.bf16.msra.mxu0 %v21750_v31  ;;  %12031 = vmatpush1.bf16.msra.mxu1 %v21753_v11  ;;  %v21837_v31 = vld [vmem:[%s28514_s9 + $0xba8] ss:$16 sps:$4 sm:$0xff]   ;;  %v21842_v11 = vld [vmem:[%s28514_s9 + $0xbc4] ss:$16 sps:$4 sm:$0xff]  }
 0x935   : > { %11947 = vmatprep.subr.bf16.mxu0 %v21758_v10  ;;  %12053 = vmatprep.subr.bf16.mxu1 %v21761_v13  ;;  %v21845_v10 = vld [vmem:[%s28514_s9 + $0xbcc] ss:$16 sps:$4 sm:$0xff]   ;;  %v21840_v13 = vld [vmem:[%s28514_s9 + $0xbc0] ss:$16 sps:$4 sm:$0xff]  }
 0x937   : > { %11927 = vmatmul.mubr.bf16.vlgmr.msra.gmra.mrb[76].mxu0 %v27244_v21  ;;  %12033 = vmatmul.mubr.bf16.vlgmr.msra.gmra.mrb[76].mxu1 %v27244_v21  ;;  %v21773_v21 = vld [vmem:[%s28514_s9 + $0xa4c] ss:$16 sps:$4 sm:$0xff]  }
 0x938   : > { %11936 = vmatprep.mubr.bf16.mxu0 %v27286_v16  ;;  %11948 = vmatpush1.bf16.msra.mxu0 %v21756_v15  ;;  %v21843_v15 = vld [vmem:[%s28514_s9 + $0xbc8] ss:$16 sps:$4 sm:$0xff]  }
 0x939   : > { %12042 = vmatprep.mubr.bf16.mxu1 %v27286_v16  ;;  %12054 = vmatpush1.bf16.msra.mxu1 %v21759_v19  ;;  %v21768_v16 = vld [vmem:[%s28514_s9 + $0xa40] ss:$16 sps:$4 sm:$0xff]   ;;  %v21848_v19 = vld [vmem:[%s28514_s9 + $0xbe4] ss:$16 sps:$4 sm:$0xff]  }
 0x93a   : > { %11949 = vmatprep.subr.bf16.mxu0 %v21764_v22  ;;  %12055 = vmatprep.subr.bf16.mxu1 %v21767_v37  ;;  %v21851_v22 = vld [vmem:[%s28514_s9 + $0xbec] ss:$16 sps:$4 sm:$0xff]   ;;  %v21846_v37 = vld [vmem:[%s28514_s9 + $0xbe0] ss:$16 sps:$4 sm:$0xff]  }
 0x93c   : > { %11950 = vmatpush1.bf16.msra.mxu0 %v21762_v57  ;;  %v21849_v57 = vld [vmem:[%s28514_s9 + $0xbe8] ss:$16 sps:$4 sm:$0xff]  }
 0x93d   : > { %12056 = vmatpush1.bf16.msra.mxu1 %v21765_v24  ;;  %11951 = vmatprep.subr.bf16.mxu0 %v21770_v17  ;;  %v12122_v24 = vld [vmem:[%s28515_s10] sm:$0xf] }
 0x93e   : > { %12057 = vmatprep.subr.bf16.mxu1 %v21773_v21  ;;  %v12127_v17 = vrot.slane %v12122_v24, %v23964_v59  ;;  %v12135_v21 = vrot.slane %v12122_v24, %v23966_v60 }
 0x93f   : > { %11937 = vmatmul.mubr.bf16.gmra.mrb[80].mxu0 %v27276_v9  ;;  %12043 = vmatmul.mubr.bf16.gmra.mrb[80].mxu1 %v27276_v9  ;;  %v21785_v9 = vld [vmem:[%s28514_s9 + $0xa8c] ss:$16 sps:$4 sm:$0xff]  }
 0x940   : > { %11952 = vmatpush1.bf16.msra.mxu0 %v21768_v16  ;;  %11979 = vmatprep.mubr.bf16.mxu0 %v27262_v55  ;;  %v12131_v16 = vrot.slane %v12122_v24, %v23968_v61 }
 0x941   : > { %12058 = vmatpush1.bf16.msra.mxu1 %v21771_v18  ;;  %12085 = vmatprep.mubr.bf16.mxu1 %v27262_v55  ;;  %v21783_v55 = vld [vmem:[%s28514_s9 + $0xa88] ss:$16 sps:$4 sm:$0xff]  }
 0x942   : > { %11953 = vmatprep.subr.bf16.mxu0 %v21776_v25  ;;  %12059 = vmatprep.subr.bf16.mxu1 %v21779_v23 }
 0x944   : > { %11954 = vmatpush1.bf16.msra.mxu0 %v21774_v27 }
 0x945   : > { %12060 = vmatpush1.bf16.msra.mxu1 %v21777_v33  ;;  %11955 = vmatprep.subr.bf16.mxu0 %v21782_v52 }
 0x946   : > { %12061 = vmatprep.subr.bf16.mxu1 %v21785_v9 }
 0x948   : > { %11956 = vmatpush1.bf16.msra.mxu0 %v21780_v30 }
 0x949   : > { %12062 = vmatpush1.bf16.msra.mxu1 %v21783_v55  ;;  %11957 = vmatprep.subr.bf16.mxu0 %v21788_v32 }
 0x94a   : > { %12063 = vmatprep.subr.bf16.mxu1 %v21791_v47 }
 0x94c   : > { %11958 = vmatpush1.bf16.msra.mxu0 %v21786_v63 }
 0x94d   : > { %12064 = vmatpush1.bf16.msra.mxu1 %v21789_v56  ;;  %11959 = vmatprep.subr.bf16.mxu0 %v21794_v35 }
 0x94e   : > { %12065 = vmatprep.subr.bf16.mxu1 %v21797_v49 }
 0x950   : > { %11960 = vmatpush1.bf16.msra.mxu0 %v21792_v12 }
 0x951   : > { %12066 = vmatpush1.bf16.msra.mxu1 %v21795_v34  ;;  %11961 = vmatprep.subr.bf16.mxu0 %v21800_v39 }
 0x952   : > { %12067 = vmatprep.subr.bf16.mxu1 %v21803_v40 }
 0x954   : > { %11962 = vmatpush1.bf16.msra.mxu0 %v21798_v41 }
 0x955   : > { %12068 = vmatpush1.bf16.msra.mxu1 %v21801_v29  ;;  %11963 = vmatprep.subr.bf16.mxu0 %v21806_v44 }
 0x956   : > { %12069 = vmatprep.subr.bf16.mxu1 %v21809_v45 }
 0x958   : > { %11964 = vmatpush1.bf16.msra.mxu0 %v21804_v0 }
 0x959   : > { %12070 = vmatpush1.bf16.msra.mxu1 %v21807_v26  ;;  %11965 = vmatprep.subr.bf16.mxu0 %v21812_v46 }
 0x95a   : > { %12071 = vmatprep.subr.bf16.mxu1 %v21815_v14 }
 0x95c   : > { %11966 = vmatpush1.bf16.msra.mxu0 %v21810_v42 }
 0x95d   : > { %12072 = vmatpush1.bf16.msra.mxu1 %v21813_v43  ;;  %11967 = vmatprep.subr.bf16.mxu0 %v21818_v20 }
 0x95e   : > { %12073 = vmatprep.subr.bf16.mxu1 %v21821_v50 }
 0x960   : > { %11968 = vmatpush1.bf16.msra.mxu0 %v21816_v53 }
 0x961   : > { %12074 = vmatpush1.bf16.msra.mxu1 %v21819_v54  ;;  %11969 = vmatprep.subr.bf16.mxu0 %v21824_v36 }
 0x962   : > { %12075 = vmatprep.subr.bf16.mxu1 %v21827_v3 }
 0x964   : > { %11970 = vmatpush1.bf16.msra.mxu0 %v21822_v38 }
 0x965   : > { %12076 = vmatpush1.bf16.msra.mxu1 %v21825_v28  ;;  %11971 = vmatprep.subr.bf16.mxu0 %v21830_v1 }
 0x966   : > { %12077 = vmatprep.subr.bf16.mxu1 %v21833_v2 }
 0x968   : > { %11972 = vmatpush1.bf16.msra.mxu0 %v21828_v4 }
 0x969   : > { %12078 = vmatpush1.bf16.msra.mxu1 %v21831_v8  ;;  %11973 = vmatprep.subr.bf16.mxu0 %v21836_v7 }
 0x96a   : > { %12079 = vmatprep.subr.bf16.mxu1 %v21839_v6 }
 0x96c   : > { %11974 = vmatpush1.bf16.msra.mxu0 %v21834_v5 }
 0x96d   : > { %12080 = vmatpush1.bf16.msra.mxu1 %v21837_v31  ;;  %11975 = vmatprep.subr.bf16.mxu0 %v21842_v11 }
 0x96e   : > { %12081 = vmatprep.subr.bf16.mxu1 %v21845_v10 }
 0x970   : > { %11976 = vmatpush1.bf16.msra.mxu0 %v21840_v13 }
 0x971   : > { %12082 = vmatpush1.bf16.msra.mxu1 %v21843_v15  ;;  %11977 = vmatprep.subr.bf16.mxu0 %v21848_v19 }
 0x972   : > { %12083 = vmatprep.subr.bf16.mxu1 %v21851_v22 }
 0x974   : > { %11978 = vmatpush1.bf16.msra.mxu0 %v21846_v37 }
 0x975   : > { %12084 = vmatpush1.bf16.msra.mxu1 %v21849_v57 }
 0x977   : > { %11980 = vmatmul.mubr.bf16.vlgmr.msra.gmra.mrb[76].mxu0 %v27252_v51 }
 0x978   : > { %12086 = vmatmul.mubr.bf16.vlgmr.msra.gmra.mrb[76].mxu1 %v27252_v51  ;;  %11989 = vmatprep.mubr.bf16.mxu0 %v27294_v58  ;;  %v12139_v51 = vrot.slane %v12122_v24, %v23970_v62 }
 0x979   : > { %12095 = vmatprep.mubr.bf16.mxu1 %v27294_v58 }
 0x97f   : > { %11990 = vmatmul.mubr.bf16.gmra.mrb[80].mxu0 %v27284_v48 }
 0x980   : > { %12096 = vmatmul.mubr.bf16.gmra.mrb[80].mxu1 %v27284_v48 }
 0xa4a   : > { %v11981_v18 = vpop.f32.mrb[76].mxu0 }
 0xa4b   : > { %v12144_v25 = vadd.f32 %v12127_v17, %v11981_v18  ;;  %v12087_v23 = vpop.f32.mrb[76].mxu1  ;;  %v11983_v58 = vpop.f32.mrb[77].mxu0 }
 0xa4c   : > { %v12146_v27 = vadd.f32 %v12135_v21, %v12087_v23  ;;  %v12145_v33 = vadd.f32 %v12131_v16, %v11983_v58  ;;  %v12089_v52 = vpop.f32.mrb[77].mxu1  ;;  %v11985_v48 = vpop.f32.mrb[78].mxu0 }
 0xa4d   : > { %v12147_v9 = vadd.f32 %v12139_v51, %v12089_v52  ;;  %v12148_v30 = vadd.f32 %v12127_v17, %v11985_v48  ;;  %v12091_v55 = vpop.f32.mrb[78].mxu1  ;;  %v11987_v32 = vpop.f32.mrb[79].mxu0  ;;  %v12160_v60 = vmax.f32 %v12144_v25, 0.0 }
 0xa4e   : > { %v12150_v47 = vadd.f32 %v12135_v21, %v12091_v55  ;;  %v12149_v59 = vadd.f32 %v12131_v16, %v11987_v32  ;;  %v12093_v63 = vpop.f32.mrb[79].mxu1  ;;  %v12162_v35 = vmax.f32 %v12146_v27, 0.0  ;;  %v12161_v62 = vmax.f32 %v12145_v33, 0.0 }
 0xa4f   : > { %v12164_v56 = vmax.f32 %v12148_v30, 0.0  ;;  %v12151_v61 = vadd.f32 %v12139_v51, %v12093_v63  ;;  %v12163_v34 = vmax.f32 %v12147_v9, 0.0 }
 0xa50   : > { %v12166_v49 = vmax.f32 %v12150_v47, 0.0  ;;  %v12165_v12 = vmax.f32 %v12149_v59, 0.0 }
 0xa51   : > { %v12176_v39 = vpack.c.bf16 %v12164_v56, %v12160_v60  ;;  %v12167_v40 = vmax.f32 %v12151_v61, 0.0 }
 0xa52   : > { %v12178_v41 = vpack.c.bf16 %v12166_v49, %v12162_v35  ;;  %v12177_v29 = vpack.c.bf16 %v12165_v12, %v12161_v62  ;;  %v11991_v44 = vpop.f32.mrb[80].mxu0 }
 0xa53   : > { %12184 = vst [vmem:[#allocation2] sm:$0xff] %v12176_v39  ;;  %v12179_v45 = vpack.c.bf16 %v12167_v40, %v12163_v34  ;;  %v12152_v0 = vadd.f32 %v12127_v17, %v11991_v44  ;;  %v12097_v26 = vpop.f32.mrb[80].mxu1  ;;  %v11993_v46 = vpop.f32.mrb[81].mxu0 }
 0xa54   : > { %12186 = vst [vmem:[#allocation2 + $0x10] sm:$0xff] %v12178_v41  ;;  %12185 = vst [vmem:[#allocation2 + $0x8] sm:$0xff] %v12177_v29  ;;  %v12154_v14 = vadd.f32 %v12135_v21, %v12097_v26  ;;  %v12153_v42 = vadd.f32 %v12131_v16, %v11993_v46  ;;  %v12099_v43 = vpop.f32.mrb[81].mxu1  ;;  %v11995_v20 = vpop.f32.mrb[82].mxu0 }
 0xa55   : > { %12187 = vst [vmem:[#allocation2 + $0x18] sm:$0xff] %v12179_v45  ;;  %v12155_v50 = vadd.f32 %v12139_v51, %v12099_v43  ;;  %v12156_v53 = vadd.f32 %v12127_v17, %v11995_v20  ;;  %v12101_v54 = vpop.f32.mrb[82].mxu1  ;;  %v11997_v36 = vpop.f32.mrb[83].mxu0  ;;  %v12168_v1 = vmax.f32 %v12152_v0, 0.0 }
 0xa56   : > { %v12158_v3 = vadd.f32 %v12135_v21, %v12101_v54  ;;  %v12157_v38 = vadd.f32 %v12131_v16, %v11997_v36  ;;  %v12103_v28 = vpop.f32.mrb[83].mxu1  ;;  %v12170_v8 = vmax.f32 %v12154_v14, 0.0  ;;  %v12169_v7 = vmax.f32 %v12153_v42, 0.0 }
 0xa57   : > { %v12172_v2 = vmax.f32 %v12156_v53, 0.0  ;;  %v12159_v4 = vadd.f32 %v12139_v51, %v12103_v28  ;;  %v12171_v31 = vmax.f32 %v12155_v50, 0.0 }
 0xa58   : > { %v12174_v6 = vmax.f32 %v12158_v3, 0.0  ;;  %v12173_v5 = vmax.f32 %v12157_v38, 0.0 }
 0xa59   : > { %v12180_v11 = vpack.c.bf16 %v12172_v2, %v12168_v1  ;;  %v12175_v10 = vmax.f32 %v12159_v4, 0.0 }
 0xa5a   : > { %v12182_v13 = vpack.c.bf16 %v12174_v6, %v12170_v8  ;;  %v12181_v15 = vpack.c.bf16 %v12173_v5, %v12169_v7 }
 0xa5b   : > { %12188 = vst [vmem:[#allocation2 + $0x20] sm:$0xff] %v12180_v11  ;;  %v12183_v19 = vpack.c.bf16 %v12175_v10, %v12171_v31 }
 0xa5c   : > { %12190 = vst [vmem:[#allocation2 + $0x30] sm:$0xff] %v12182_v13  ;;  %12189 = vst [vmem:[#allocation2 + $0x28] sm:$0xff] %v12181_v15 }
 0xa5d   : > { %12191 = vst [vmem:[#allocation2 + $0x38] sm:$0xff] %v12183_v19 }
 0xa5e PF: > { %v27811_v22 = vld [vmem:[#allocation2 + $0x8] sm:$0xff]  ;;  %v27813_v37 = vld [vmem:[#allocation2] sm:$0xff]  ;;  %v22694_v24 = vmov 0   ;;  %v27819_v17 = vld [vmem:[#allocation2 + $0x18] sm:$0xff]  ;;  %vm12214_vm1 = vcmask 261120   ;;  %vm15673_vm2 = vcmask 1041409  }
 0xa5f   : > { %12221 = vmatprep.subr.bf16.mxu0 %v27811_v22  ;;  %12253 = vmatprep.mubr.bf16.mxu0 %v22694_v24  ;;  %v12194_v21 = vld [vmem:[#allocation2 + $0x10] sm:$0xff]  ;;  %v21864_v18 = vld [vmem:[%s28506_s1] sm:$0xff]   ;;  %v21865_v58 = vld [vmem:[%s28506_s1 + $0x8] sm:$0xff]  }
 0xa60   : > { %12222 = vmatpush1.bf16.msra.mxu0 %v27813_v37  ;;  %12306 = vmatprep.mubr.bf16.mxu1 %v22694_v24  ;;  %v21869_v23 = vld [vmem:[%s23602_s18 + $0x404] ss:$16 sps:$4 sm:$0xff]   ;;  %v21872_v27 = vld [vmem:[%s23602_s18 + $0x40c] ss:$16 sps:$4 sm:$0xff]   ;;  %v21867_v52 = vld [vmem:[%s23602_s18 + $0x400] ss:$16 sps:$4 sm:$0xff]  }
 0xa61   : > { %12274 = vmatprep.subr.bf16.mxu1 %v27819_v17  ;;  %v21866_v33 = vld [vmem:[%s28507_s2] sm:$0xff]   ;;  %v21870_v9 = vld [vmem:[%s23602_s18 + $0x408] ss:$16 sps:$4 sm:$0xff]   ;;  %v21878_v30 = vld [vmem:[%s23602_s18 + $0x42c] ss:$16 sps:$4 sm:$0xff]  }
 0xa62   : > { %v27822_v16 = vld [vmem:[#allocation2 + $0x20] sm:$0xff]  ;;  %12275 = vmatpush1.bf16.msra.mxu1 %v12194_v21  ;;  %v21876_v47 = vld [vmem:[%s23602_s18 + $0x428] ss:$16 sps:$4 sm:$0xff]   ;;  %v21884_v59 = vld [vmem:[%s23602_s18 + $0x44c] ss:$16 sps:$4 sm:$0xff]  }
 0xa63   : > { %v27815_v57 = vld [vmem:[#allocation2 + $0x28] sm:$0xff]  ;;  %v12198_v25 = vld [vmem:[#allocation2 + $0x30] sm:$0xff] }
 0xa64   : > { %12223 = vmatprep.subr.bf16.mxu0 %v27815_v57  ;;  %v12199_v51 = vld [vmem:[#allocation2 + $0x38] sm:$0xff]  ;;  %v21875_v48 = vld [vmem:[%s23602_s18 + $0x424] ss:$16 sps:$4 sm:$0xff]   ;;  %v21873_v55 = vld [vmem:[%s23602_s18 + $0x420] ss:$16 sps:$4 sm:$0xff]  }
 0xa65   : > { %12276 = vmatprep.subr.bf16.mxu1 %v12199_v51  ;;  %12224 = vmatpush1.bf16.msra.mxu0 %v27822_v16  ;;  %v21881_v32 = vld [vmem:[%s23602_s18 + $0x444] ss:$16 sps:$4 sm:$0xff]   ;;  %v21879_v63 = vld [vmem:[%s23602_s18 + $0x440] ss:$16 sps:$4 sm:$0xff]   ;;  %v21882_v56 = vld [vmem:[%s23602_s18 + $0x448] ss:$16 sps:$4 sm:$0xff]  }
 0xa66   : > { %12355 = vmatprep.subr.bf16.mxu0 %v27811_v22  ;;  %12277 = vmatpush1.bf16.msra.mxu1 %v12198_v25  ;;  %v21887_v60 = vld [vmem:[%s23602_s18 + $0x464] ss:$16 sps:$4 sm:$0xff]   ;;  %v21890_v61 = vld [vmem:[%s23602_s18 + $0x46c] ss:$16 sps:$4 sm:$0xff]   ;;  %v21885_v35 = vld [vmem:[%s23602_s18 + $0x460] ss:$16 sps:$4 sm:$0xff]  }
 0xa67   : > { %12408 = vmatprep.subr.bf16.mxu1 %v27819_v17  ;;  %v21893_v62 = vld [vmem:[%s23602_s18 + $0x484] ss:$16 sps:$4 sm:$0xff]   ;;  %v21888_v49 = vld [vmem:[%s23602_s18 + $0x468] ss:$16 sps:$4 sm:$0xff]   ;;  %v21896_v12 = vld [vmem:[%s23602_s18 + $0x48c] ss:$16 sps:$4 sm:$0xff]  }
 0xa68   : > { %18769 = vmatmul.mubr.msk.bf16.vlgmr.msra.gmra.mrb[0].mxu0 %vm12214_vm1, %v21864_v18  ;;  %v21891_v34 = vld [vmem:[%s23602_s18 + $0x480] ss:$16 sps:$4 sm:$0xff]   ;;  %v21899_v39 = vld [vmem:[%s23602_s18 + $0x4a4] ss:$16 sps:$4 sm:$0xff]   ;;  %v21894_v40 = vld [vmem:[%s23602_s18 + $0x488] ss:$16 sps:$4 sm:$0xff]  }
 0xa69   : > { %12356 = vmatpush1.bf16.msra.mxu0 %v27813_v37  ;;  %12263 = vmatprep.mubr.bf16.mxu0 %v22694_v24  ;;  %v21902_v41 = vld [vmem:[%s23602_s18 + $0x4ac] ss:$16 sps:$4 sm:$0xff]   ;;  %v21897_v29 = vld [vmem:[%s23602_s18 + $0x4a0] ss:$16 sps:$4 sm:$0xff]   ;;  %v21905_v44 = vld [vmem:[%s23602_s18 + $0x4c4] ss:$16 sps:$4 sm:$0xff]  }
 0xa6a   : > { %18771 = vmatmul.mubr.msk.bf16.vlgmr.msra.gmra.mrb[0].mxu1 %vm12214_vm1, %v21864_v18  ;;  %12357 = vmatprep.subr.bf16.mxu0 %v27815_v57  ;;  %v21951_v45 = vld [vmem:[%s28507_s2 + $0x8] sm:$0xff]   ;;  %v21903_v46 = vld [vmem:[%s23602_s18 + $0x4c0] ss:$16 sps:$4 sm:$0xff]   ;;  %v21911_v14 = vld [vmem:[%s23602_s18 + $0x4e4] ss:$16 sps:$4 sm:$0xff]  }
 0xa6b   : > { %12316 = vmatprep.mubr.bf16.mxu1 %v22694_v24  ;;  %12409 = vmatpush1.bf16.msra.mxu1 %v12194_v21  ;;  %v21900_v0 = vld [vmem:[%s23602_s18 + $0x4a8] ss:$16 sps:$4 sm:$0xff]   ;;  %v21908_v26 = vld [vmem:[%s23602_s18 + $0x4cc] ss:$16 sps:$4 sm:$0xff]   ;;  %v21909_v20 = vld [vmem:[%s23602_s18 + $0x4e0] ss:$16 sps:$4 sm:$0xff]  }
 0xa6c   : > { %12410 = vmatprep.subr.bf16.mxu1 %v12199_v51  ;;  %v21906_v42 = vld [vmem:[%s23602_s18 + $0x4c8] ss:$16 sps:$4 sm:$0xff]   ;;  %v21914_v43 = vld [vmem:[%s23602_s18 + $0x4ec] ss:$16 sps:$4 sm:$0xff]   ;;  %v21917_v50 = vld [vmem:[%s23602_s18 + $0x504] ss:$16 sps:$4 sm:$0xff]  }
 0xa6d   : > { %12358 = vmatpush1.bf16.msra.mxu0 %v27822_v16  ;;  %v21912_v53 = vld [vmem:[%s23602_s18 + $0x4e8] ss:$16 sps:$4 sm:$0xff]   ;;  %v21920_v54 = vld [vmem:[%s23602_s18 + $0x50c] ss:$16 sps:$4 sm:$0xff]   ;;  %v21915_v36 = vld [vmem:[%s23602_s18 + $0x500] ss:$16 sps:$4 sm:$0xff]  }
 0xa6e   : > { %13366 = vmatprep.subr.bf16.mxu0 %v21869_v23  ;;  %v21923_v3 = vld [vmem:[%s23602_s18 + $0x524] ss:$16 sps:$4 sm:$0xff]   ;;  %v21918_v38 = vld [vmem:[%s23602_s18 + $0x508] ss:$16 sps:$4 sm:$0xff]   ;;  %v21926_v28 = vld [vmem:[%s23602_s18 + $0x52c] ss:$16 sps:$4 sm:$0xff]  }
 0xa6f   : > { %12411 = vmatpush1.bf16.msra.mxu1 %v12198_v25  ;;  %v21921_v1 = vld [vmem:[%s23602_s18 + $0x520] ss:$16 sps:$4 sm:$0xff]   ;;  %v21929_v2 = vld [vmem:[%s23602_s18 + $0x544] ss:$16 sps:$4 sm:$0xff]   ;;  %v21924_v4 = vld [vmem:[%s23602_s18 + $0x528] ss:$16 sps:$4 sm:$0xff]  }
 0xa70   : > { %18770 = vmatmul.mubr.msk.bf16.gmra.mrb[4].mxu0 %vm12214_vm1, %v21865_v58  ;;  %13472 = vmatprep.subr.bf16.mxu1 %v21872_v27  ;;  %v21932_v8 = vld [vmem:[%s23602_s18 + $0x54c] ss:$16 sps:$4 sm:$0xff]   ;;  %v21927_v7 = vld [vmem:[%s23602_s18 + $0x540] ss:$16 sps:$4 sm:$0xff]   ;;  %v21935_v6 = vld [vmem:[%s23602_s18 + $0x564] ss:$16 sps:$4 sm:$0xff]  }
 0xa71   : > { %12387 = vmatprep.mubr.bf16.mxu0 %v22694_v24  ;;  %v21930_v5 = vld [vmem:[%s23602_s18 + $0x548] ss:$16 sps:$4 sm:$0xff]   ;;  %v21938_v31 = vld [vmem:[%s23602_s18 + $0x56c] ss:$16 sps:$4 sm:$0xff]   ;;  %v21933_v11 = vld [vmem:[%s23602_s18 + $0x560] ss:$16 sps:$4 sm:$0xff]  }
 0xa72   : > { %18772 = vmatmul.mubr.msk.bf16.gmra.mrb[4].mxu1 %vm12214_vm1, %v21865_v58  ;;  %v21941_v10 = vld [vmem:[%s23602_s18 + $0x584] ss:$16 sps:$4 sm:$0xff]   ;;  %v21936_v13 = vld [vmem:[%s23602_s18 + $0x568] ss:$16 sps:$4 sm:$0xff]   ;;  %v21944_v15 = vld [vmem:[%s23602_s18 + $0x58c] ss:$16 sps:$4 sm:$0xff]  }
 0xa73   : > { %12440 = vmatprep.mubr.bf16.mxu1 %v22694_v24  ;;  %v21939_v19 = vld [vmem:[%s23602_s18 + $0x580] ss:$16 sps:$4 sm:$0xff]   ;;  %v21950_v21 = vld [vmem:[%s23602_s18 + $0x5ac] ss:$16 sps:$4 sm:$0xff]   ;;  %v21954_v18 = vld [vmem:[%s23602_s18 + $0x5c4] ss:$16 sps:$4 sm:$0xff]  }
 0xa74   : > { %v21945_v51 = vld [vmem:[%s23602_s18 + $0x5a0] ss:$16 sps:$4 sm:$0xff]   ;;  %v21948_v25 = vld [vmem:[%s23602_s18 + $0x5a8] ss:$16 sps:$4 sm:$0xff]   ;;  %v21957_v23 = vld [vmem:[%s23602_s18 + $0x5cc] ss:$16 sps:$4 sm:$0xff]  }
 0xa75   : > { %v21952_v58 = vld [vmem:[%s23602_s18 + $0x5c0] ss:$16 sps:$4 sm:$0xff]   ;;  %v21960_v27 = vld [vmem:[%s23602_s18 + $0x5e4] ss:$16 sps:$4 sm:$0xff]  }
 0xa78   : > { %18775 = vmatmul.mubr.msk.bf16.vlgmr.msra.gmra.mrb[8].mxu0 %vm12214_vm1, %v21866_v33 }
 0xa79   : > { %13367 = vmatpush1.bf16.msra.mxu0 %v21867_v52  ;;  %12397 = vmatprep.mubr.bf16.mxu0 %v22694_v24  ;;  %v21963_v52 = vld [vmem:[%s23602_s18 + $0x5ec] ss:$16 sps:$4 sm:$0xff]  }
 0xa7a   : > { %18777 = vmatmul.mubr.msk.bf16.vlgmr.msra.gmra.mrb[8].mxu1 %vm12214_vm1, %v21866_v33  ;;  %13368 = vmatprep.subr.bf16.mxu0 %v21875_v48  ;;  %v21955_v33 = vld [vmem:[%s23602_s18 + $0x5c8] ss:$16 sps:$4 sm:$0xff]   ;;  %v21958_v48 = vld [vmem:[%s23602_s18 + $0x5e0] ss:$16 sps:$4 sm:$0xff]  }
 0xa7b   : > { %13473 = vmatpush1.bf16.msra.mxu1 %v21870_v9  ;;  %12450 = vmatprep.mubr.bf16.mxu1 %v22694_v24  ;;  %v21942_v24 = vld [vmem:[%s23602_s18 + $0x588] ss:$16 sps:$4 sm:$0xff]   ;;  %v21966_v9 = vld [vmem:[%s23602_s18 + $0x604] ss:$16 sps:$4 sm:$0xff]  }
 0xa7c   : > { %13474 = vmatprep.subr.bf16.mxu1 %v21878_v30  ;;  %v21961_v30 = vld [vmem:[%s23602_s18 + $0x5e8] ss:$16 sps:$4 sm:$0xff]  }
 0xa7d   : > { %13369 = vmatpush1.bf16.msra.mxu0 %v21873_v55  ;;  %v21969_v55 = vld [vmem:[%s23602_s18 + $0x60c] ss:$16 sps:$4 sm:$0xff]  }
 0xa7e   : > { %13370 = vmatprep.subr.bf16.mxu0 %v21881_v32  ;;  %v21964_v32 = vld [vmem:[%s23602_s18 + $0x600] ss:$16 sps:$4 sm:$0xff]  }
 0xa7f   : > { %13475 = vmatpush1.bf16.msra.mxu1 %v21876_v47  ;;  %v21972_v47 = vld [vmem:[%s23602_s18 + $0x624] ss:$16 sps:$4 sm:$0xff]  }
 0xa80   : > { %13476 = vmatprep.subr.bf16.mxu1 %v21884_v59  ;;  %18776 = vmatmul.mubr.msk.bf16.gmra.mrb[12].mxu0 %vm12214_vm1, %v21951_v45  ;;  %v21967_v59 = vld [vmem:[%s23602_s18 + $0x608] ss:$16 sps:$4 sm:$0xff]  }
 0xa81   : > { %13371 = vmatpush1.bf16.msra.mxu0 %v21879_v63  ;;  %13398 = vmatprep.mubr.bf16.mxu0 %v27811_v22  ;;  %v21975_v63 = vld [vmem:[%s23602_s18 + $0x62c] ss:$16 sps:$4 sm:$0xff]  }
 0xa82   : > { %13372 = vmatprep.subr.bf16.mxu0 %v21887_v60  ;;  %18778 = vmatmul.mubr.msk.bf16.gmra.mrb[12].mxu1 %vm12214_vm1, %v21951_v45  ;;  %v21970_v60 = vld [vmem:[%s23602_s18 + $0x620] ss:$16 sps:$4 sm:$0xff]  }
 0xa83   : > { %13477 = vmatpush1.bf16.msra.mxu1 %v21882_v56  ;;  %13504 = vmatprep.mubr.bf16.mxu1 %v27811_v22  ;;  %v21947_v22 = vld [vmem:[%s23602_s18 + $0x5a4] ss:$16 sps:$4 sm:$0xff]   ;;  %v21994_v45 = vld [vmem:[%s23602_s18 + $0x6a0] ss:$16 sps:$4 sm:$0xff]  }
 0xa84   : > { %13478 = vmatprep.subr.bf16.mxu1 %v21890_v61  ;;  %v21978_v56 = vld [vmem:[%s23602_s18 + $0x644] ss:$16 sps:$4 sm:$0xff]   ;;  %v21973_v61 = vld [vmem:[%s23602_s18 + $0x628] ss:$16 sps:$4 sm:$0xff]  }
 0xa85   : > { %13373 = vmatpush1.bf16.msra.mxu0 %v21885_v35  ;;  %v21981_v35 = vld [vmem:[%s23602_s18 + $0x64c] ss:$16 sps:$4 sm:$0xff]  }
 0xa86   : > { %13374 = vmatprep.subr.bf16.mxu0 %v21893_v62  ;;  %v21976_v62 = vld [vmem:[%s23602_s18 + $0x640] ss:$16 sps:$4 sm:$0xff]  }
 0xa87   : > { %13479 = vmatpush1.bf16.msra.mxu1 %v21888_v49  ;;  %v21984_v49 = vld [vmem:[%s23602_s18 + $0x664] ss:$16 sps:$4 sm:$0xff]  }
 0xa88   : > { %13480 = vmatprep.subr.bf16.mxu1 %v21896_v12  ;;  %v21979_v12 = vld [vmem:[%s23602_s18 + $0x648] ss:$16 sps:$4 sm:$0xff]  }
 0xa89   : > { %13375 = vmatpush1.bf16.msra.mxu0 %v21891_v34  ;;  %v21990_v34 = vld [vmem:[%s23602_s18 + $0x684] ss:$16 sps:$4 sm:$0xff]  }
 0xa8a   : > { %13376 = vmatprep.subr.bf16.mxu0 %v21899_v39  ;;  %v21985_v39 = vld [vmem:[%s23602_s18 + $0x668] ss:$16 sps:$4 sm:$0xff]  }
 0xa8b   : > { %13481 = vmatpush1.bf16.msra.mxu1 %v21894_v40  ;;  %v21993_v40 = vld [vmem:[%s23602_s18 + $0x68c] ss:$16 sps:$4 sm:$0xff]  }
 0xa8c   : > { %13482 = vmatprep.subr.bf16.mxu1 %v21902_v41  ;;  %v21988_v41 = vld [vmem:[%s23602_s18 + $0x680] ss:$16 sps:$4 sm:$0xff]  }
 0xa8d   : > { %13377 = vmatpush1.bf16.msra.mxu0 %v21897_v29  ;;  %v21996_v29 = vld [vmem:[%s23602_s18 + $0x6a4] ss:$16 sps:$4 sm:$0xff]  }
 0xa8e   : > { %13378 = vmatprep.subr.bf16.mxu0 %v21905_v44  ;;  %v21991_v44 = vld [vmem:[%s23602_s18 + $0x688] ss:$16 sps:$4 sm:$0xff]  }
 0xa8f   : > { %13483 = vmatpush1.bf16.msra.mxu1 %v21900_v0  ;;  %v21997_v0 = vld [vmem:[%s23602_s18 + $0x6a8] ss:$16 sps:$4 sm:$0xff]  }
 0xa90   : > { %13484 = vmatprep.subr.bf16.mxu1 %v21908_v26  ;;  %v22005_v26 = vld [vmem:[%s23602_s18 + $0x6cc] ss:$16 sps:$4 sm:$0xff]  }
 0xa91   : > { %13379 = vmatpush1.bf16.msra.mxu0 %v21903_v46  ;;  %v22000_v46 = vld [vmem:[%s23602_s18 + $0x6c0] ss:$16 sps:$4 sm:$0xff]  }
 0xa92   : > { %13380 = vmatprep.subr.bf16.mxu0 %v21911_v14  ;;  %v22008_v14 = vld [vmem:[%s23602_s18 + $0x6e4] ss:$16 sps:$4 sm:$0xff]  }
 0xa93   : > { %13485 = vmatpush1.bf16.msra.mxu1 %v21906_v42  ;;  %v22003_v42 = vld [vmem:[%s23602_s18 + $0x6c8] ss:$16 sps:$4 sm:$0xff]  }
 0xa94   : > { %13486 = vmatprep.subr.bf16.mxu1 %v21914_v43  ;;  %v22011_v43 = vld [vmem:[%s23602_s18 + $0x6ec] ss:$16 sps:$4 sm:$0xff]  }
 0xa95   : > { %13381 = vmatpush1.bf16.msra.mxu0 %v21909_v20  ;;  %v22006_v20 = vld [vmem:[%s23602_s18 + $0x6e0] ss:$16 sps:$4 sm:$0xff]  }
 0xa96   : > { %13382 = vmatprep.subr.bf16.mxu0 %v21917_v50  ;;  %v22014_v50 = vld [vmem:[%s23602_s18 + $0x704] ss:$16 sps:$4 sm:$0xff]  }
 0xa97   : > { %13487 = vmatpush1.bf16.msra.mxu1 %v21912_v53  ;;  %v22009_v53 = vld [vmem:[%s23602_s18 + $0x6e8] ss:$16 sps:$4 sm:$0xff]  }
 0xa98   : > { %13488 = vmatprep.subr.bf16.mxu1 %v21920_v54  ;;  %v22017_v54 = vld [vmem:[%s23602_s18 + $0x70c] ss:$16 sps:$4 sm:$0xff]  }
 0xa99   : > { %13383 = vmatpush1.bf16.msra.mxu0 %v21915_v36  ;;  %v22012_v36 = vld [vmem:[%s23602_s18 + $0x700] ss:$16 sps:$4 sm:$0xff]  }
 0xa9a   : > { %13384 = vmatprep.subr.bf16.mxu0 %v21923_v3  ;;  %v22020_v3 = vld [vmem:[%s23602_s18 + $0x724] ss:$16 sps:$4 sm:$0xff]  }
 0xa9b   : > { %13489 = vmatpush1.bf16.msra.mxu1 %v21918_v38  ;;  %v22015_v38 = vld [vmem:[%s23602_s18 + $0x708] ss:$16 sps:$4 sm:$0xff]  }
 0xa9c   : > { %13490 = vmatprep.subr.bf16.mxu1 %v21926_v28  ;;  %v22023_v28 = vld [vmem:[%s23602_s18 + $0x72c] ss:$16 sps:$4 sm:$0xff]  }
 0xa9d   : > { %13385 = vmatpush1.bf16.msra.mxu0 %v21921_v1  ;;  %v22018_v1 = vld [vmem:[%s23602_s18 + $0x720] ss:$16 sps:$4 sm:$0xff]  }
 0xa9e   : > { %13386 = vmatprep.subr.bf16.mxu0 %v21929_v2  ;;  %v22026_v2 = vld [vmem:[%s23602_s18 + $0x744] ss:$16 sps:$4 sm:$0xff]  }
 0xa9f   : > { %13491 = vmatpush1.bf16.msra.mxu1 %v21924_v4  ;;  %v22021_v4 = vld [vmem:[%s23602_s18 + $0x728] ss:$16 sps:$4 sm:$0xff]  }
 0xaa0   : > { %13492 = vmatprep.subr.bf16.mxu1 %v21932_v8  ;;  %v22029_v8 = vld [vmem:[%s23602_s18 + $0x74c] ss:$16 sps:$4 sm:$0xff]  }
 0xaa1   : > { %13387 = vmatpush1.bf16.msra.mxu0 %v21927_v7  ;;  %v22024_v7 = vld [vmem:[%s23602_s18 + $0x740] ss:$16 sps:$4 sm:$0xff]  }
 0xaa2   : > { %13388 = vmatprep.subr.bf16.mxu0 %v21935_v6  ;;  %v22032_v6 = vld [vmem:[%s23602_s18 + $0x764] ss:$16 sps:$4 sm:$0xff]  }
 0xaa3   : > { %13493 = vmatpush1.bf16.msra.mxu1 %v21930_v5  ;;  %v22027_v5 = vld [vmem:[%s23602_s18 + $0x748] ss:$16 sps:$4 sm:$0xff]  }
 0xaa4   : > { %13494 = vmatprep.subr.bf16.mxu1 %v21938_v31  ;;  %v22035_v31 = vld [vmem:[%s23602_s18 + $0x76c] ss:$16 sps:$4 sm:$0xff]  }
 0xaa5   : > { %13389 = vmatpush1.bf16.msra.mxu0 %v21933_v11  ;;  %v22030_v11 = vld [vmem:[%s23602_s18 + $0x760] ss:$16 sps:$4 sm:$0xff]  }
 0xaa6   : > { %13390 = vmatprep.subr.bf16.mxu0 %v21941_v10  ;;  %v22038_v10 = vld [vmem:[%s23602_s18 + $0x784] ss:$16 sps:$4 sm:$0xff]  }
 0xaa7   : > { %13495 = vmatpush1.bf16.msra.mxu1 %v21936_v13  ;;  %v22033_v13 = vld [vmem:[%s23602_s18 + $0x768] ss:$16 sps:$4 sm:$0xff]  }
 0xaa8   : > { %13496 = vmatprep.subr.bf16.mxu1 %v21944_v15  ;;  %v22041_v15 = vld [vmem:[%s23602_s18 + $0x78c] ss:$16 sps:$4 sm:$0xff]  }
 0xaa9   : > { %13391 = vmatpush1.bf16.msra.mxu0 %v21939_v19  ;;  %v22036_v19 = vld [vmem:[%s23602_s18 + $0x780] ss:$16 sps:$4 sm:$0xff]  }
 0xaaa   : > { %13392 = vmatprep.subr.bf16.mxu0 %v21947_v22  ;;  %v22044_v22 = vld [vmem:[%s23602_s18 + $0x7a4] ss:$16 sps:$4 sm:$0xff]  }
 0xaab   : > { %13497 = vmatpush1.bf16.msra.mxu1 %v21942_v24  ;;  %v22039_v24 = vld [vmem:[%s23602_s18 + $0x788] ss:$16 sps:$4 sm:$0xff]  }
 0xaac   : > { %13498 = vmatprep.subr.bf16.mxu1 %v21950_v21  ;;  %v22047_v21 = vld [vmem:[%s23602_s18 + $0x7ac] ss:$16 sps:$4 sm:$0xff]  }
 0xaad   : > { %13393 = vmatpush1.bf16.msra.mxu0 %v21945_v51  ;;  %v22042_v51 = vld [vmem:[%s23602_s18 + $0x7a0] ss:$16 sps:$4 sm:$0xff]  }
 0xaae   : > { %13394 = vmatprep.subr.bf16.mxu0 %v21954_v18  ;;  %v22050_v18 = vld [vmem:[%s23602_s18 + $0x7c4] ss:$16 sps:$4 sm:$0xff]  }
 0xaaf   : > { %13499 = vmatpush1.bf16.msra.mxu1 %v21948_v25  ;;  %v22045_v25 = vld [vmem:[%s23602_s18 + $0x7a8] ss:$16 sps:$4 sm:$0xff]  }
 0xab0   : > { %13500 = vmatprep.subr.bf16.mxu1 %v21957_v23  ;;  %v22053_v23 = vld [vmem:[%s23602_s18 + $0x7cc] ss:$16 sps:$4 sm:$0xff]  }
 0xab1   : > { %13395 = vmatpush1.bf16.msra.mxu0 %v21952_v58  ;;  %v22048_v58 = vld [vmem:[%s23602_s18 + $0x7c0] ss:$16 sps:$4 sm:$0xff]  }
 0xab2   : > { %13396 = vmatprep.subr.bf16.mxu0 %v21960_v27  ;;  %v22056_v27 = vld [vmem:[%s23602_s18 + $0x7e4] ss:$16 sps:$4 sm:$0xff]  }
 0xab3   : > { %13501 = vmatpush1.bf16.msra.mxu1 %v21955_v33  ;;  %v22051_v33 = vld [vmem:[%s23602_s18 + $0x7c8] ss:$16 sps:$4 sm:$0xff]  }
 0xab4   : > { %13502 = vmatprep.subr.bf16.mxu1 %v21963_v52  ;;  %v22059_v52 = vld [vmem:[%s23602_s18 + $0x7ec] ss:$16 sps:$4 sm:$0xff]  }
 0xab5   : > { %13397 = vmatpush1.bf16.msra.mxu0 %v21958_v48  ;;  %v22054_v48 = vld [vmem:[%s23602_s18 + $0x7e0] ss:$16 sps:$4 sm:$0xff]  }
 0xab6   : > { %13419 = vmatprep.subr.bf16.mxu0 %v21966_v9  ;;  %v22062_v9 = vld [vmem:[%s23602_s18 + $0x4] ss:$16 sps:$4 sm:$0xff]  }
 0xab7   : > { %13503 = vmatpush1.bf16.msra.mxu1 %v21961_v30  ;;  %v22057_v30 = vld [vmem:[%s23602_s18 + $0x7e8] ss:$16 sps:$4 sm:$0xff]  }
 0xab8   : > { %13525 = vmatprep.subr.bf16.mxu1 %v21969_v55  ;;  %13399 = vmatmul.mubr.bf16.vlgmr.msra.gmra.mrb[16].mxu0 %v27813_v37  ;;  %v22065_v55 = vld [vmem:[%s23602_s18 + $0xc] ss:$16 sps:$4 sm:$0xff]  }
 0xab9   : > { %13420 = vmatpush1.bf16.msra.mxu0 %v21964_v32  ;;  %13408 = vmatprep.mubr.bf16.mxu0 %v27815_v57  ;;  %v22060_v32 = vld [vmem:[%s23602_s18] ss:$16 sps:$4 sm:$0xff]  }
 0xaba   : > { %13505 = vmatmul.mubr.bf16.vlgmr.msra.gmra.mrb[16].mxu1 %v27813_v37  ;;  %13421 = vmatprep.subr.bf16.mxu0 %v21972_v47  ;;  %v21987_v37 = vld [vmem:[%s23602_s18 + $0x66c] ss:$16 sps:$4 sm:$0xff]   ;;  %v22068_v47 = vld [vmem:[%s23602_s18 + $0x24] ss:$16 sps:$4 sm:$0xff]  }
 0xabb   : > { %13526 = vmatpush1.bf16.msra.mxu1 %v21967_v59  ;;  %13514 = vmatprep.mubr.bf16.mxu1 %v27815_v57  ;;  %v21982_v57 = vld [vmem:[%s23602_s18 + $0x660] ss:$16 sps:$4 sm:$0xff]   ;;  %v22063_v59 = vld [vmem:[%s23602_s18 + $0x8] ss:$16 sps:$4 sm:$0xff]  }
 0xabc   : > { %13527 = vmatprep.subr.bf16.mxu1 %v21975_v63  ;;  %v22636_v63 = vld [vmem:[#allocation2 + $0x10] sm:$0xff] }
 0xabd   : > { %13422 = vmatpush1.bf16.msra.mxu0 %v21970_v60  ;;  %v22071_v60 = vld [vmem:[%s23602_s18 + $0x2c] ss:$16 sps:$4 sm:$0xff]  }
 0xabe   : > { %13423 = vmatprep.subr.bf16.mxu0 %v21978_v56  ;;  %v22066_v56 = vld [vmem:[%s23602_s18 + $0x20] ss:$16 sps:$4 sm:$0xff]  }
 0xabf   : > { %13528 = vmatpush1.bf16.msra.mxu1 %v21973_v61  ;;  %v22637_v61 = vld [vmem:[#allocation2 + $0x38] sm:$0xff] }
 0xac0   : > { %13529 = vmatprep.subr.bf16.mxu1 %v21981_v35  ;;  %13409 = vmatmul.mubr.bf16.gmra.mrb[20].mxu0 %v27822_v16  ;;  %v22074_v35 = vld [vmem:[%s23602_s18 + $0x44] ss:$16 sps:$4 sm:$0xff]  }
 0xac1   : > { %13424 = vmatpush1.bf16.msra.mxu0 %v21976_v62  ;;  %13451 = vmatprep.mubr.bf16.mxu0 %v27819_v17  ;;  %v22069_v62 = vld [vmem:[%s23602_s18 + $0x28] ss:$16 sps:$4 sm:$0xff]  }
 0xac2   : > { %13425 = vmatprep.subr.bf16.mxu0 %v21984_v49  ;;  %13515 = vmatmul.mubr.bf16.gmra.mrb[20].mxu1 %v27822_v16  ;;  %v21999_v16 = vld [vmem:[%s23602_s18 + $0x6ac] ss:$16 sps:$4 sm:$0xff]  }
 0xac3   : > { %13530 = vmatpush1.bf16.msra.mxu1 %v21979_v12  ;;  %13557 = vmatprep.mubr.bf16.mxu1 %v27819_v17  ;;  %v22002_v17 = vld [vmem:[%s23602_s18 + $0x6c4] ss:$16 sps:$4 sm:$0xff]   ;;  %v22077_v49 = vld [vmem:[%s23602_s18 + $0x4c] ss:$16 sps:$4 sm:$0xff]   ;;  %v22072_v12 = vld [vmem:[%s23602_s18 + $0x40] ss:$16 sps:$4 sm:$0xff]  }
 0xac4   : > { %13531 = vmatprep.subr.bf16.mxu1 %v21987_v37  ;;  %v22080_v37 = vld [vmem:[%s23602_s18 + $0x64] ss:$16 sps:$4 sm:$0xff]  }
 0xac5   : > { %13426 = vmatpush1.bf16.msra.mxu0 %v21982_v57  ;;  %v22075_v57 = vld [vmem:[%s23602_s18 + $0x48] ss:$16 sps:$4 sm:$0xff]  }
 0xac6   : > { %13427 = vmatprep.subr.bf16.mxu0 %v21990_v34  ;;  %v22083_v34 = vld [vmem:[%s23602_s18 + $0x6c] ss:$16 sps:$4 sm:$0xff]  }
 0xac7   : > { %13532 = vmatpush1.bf16.msra.mxu1 %v21985_v39  ;;  %v22638_v39 = vld [vmem:[#allocation2 + $0x30] sm:$0xff] }
 0xac8   : > { %13533 = vmatprep.subr.bf16.mxu1 %v21993_v40  ;;  %v22078_v40 = vld [vmem:[%s23602_s18 + $0x60] ss:$16 sps:$4 sm:$0xff]  }
 0xac9   : > { %13428 = vmatpush1.bf16.msra.mxu0 %v21988_v41  ;;  %v22086_v41 = vld [vmem:[%s23602_s18 + $0x84] ss:$16 sps:$4 sm:$0xff]  }
 0xaca   : > { %13429 = vmatprep.subr.bf16.mxu0 %v21996_v29  ;;  %v22081_v29 = vld [vmem:[%s23602_s18 + $0x68] ss:$16 sps:$4 sm:$0xff]  }
 0xacb   : > { %13534 = vmatpush1.bf16.msra.mxu1 %v21991_v44  ;;  %v22089_v44 = vld [vmem:[%s23602_s18 + $0x8c] ss:$16 sps:$4 sm:$0xff]  }
 0xacc   : > { %13535 = vmatprep.subr.bf16.mxu1 %v21999_v16  ;;  %v22084_v16 = vld [vmem:[%s23602_s18 + $0x80] ss:$16 sps:$4 sm:$0xff]  }
 0xacd   : > { %13430 = vmatpush1.bf16.msra.mxu0 %v21994_v45  ;;  %v22092_v45 = vld [vmem:[%s23602_s18 + $0xa4] ss:$16 sps:$4 sm:$0xff]  }
 0xace   : > { %13431 = vmatprep.subr.bf16.mxu0 %v22002_v17  ;;  %v22087_v17 = vld [vmem:[%s23602_s18 + $0x88] ss:$16 sps:$4 sm:$0xff]  }
 0xacf   : > { %13536 = vmatpush1.bf16.msra.mxu1 %v21997_v0  ;;  %v22095_v0 = vld [vmem:[%s23602_s18 + $0xac] ss:$16 sps:$4 sm:$0xff]  }
 0xad0   : > { %13537 = vmatprep.subr.bf16.mxu1 %v22005_v26  ;;  %v22090_v26 = vld [vmem:[%s23602_s18 + $0xa0] ss:$16 sps:$4 sm:$0xff]  }
 0xad1   : > { %13432 = vmatpush1.bf16.msra.mxu0 %v22000_v46  ;;  %v22098_v46 = vld [vmem:[%s23602_s18 + $0xc4] ss:$16 sps:$4 sm:$0xff]  }
 0xad2   : > { %13433 = vmatprep.subr.bf16.mxu0 %v22008_v14  ;;  %v22093_v14 = vld [vmem:[%s23602_s18 + $0xa8] ss:$16 sps:$4 sm:$0xff]  }
 0xad3   : > { %13538 = vmatpush1.bf16.msra.mxu1 %v22003_v42  ;;  %v22101_v42 = vld [vmem:[%s23602_s18 + $0xcc] ss:$16 sps:$4 sm:$0xff]  }
 0xad4   : > { %13539 = vmatprep.subr.bf16.mxu1 %v22011_v43  ;;  %v22096_v43 = vld [vmem:[%s23602_s18 + $0xc0] ss:$16 sps:$4 sm:$0xff]  }
 0xad5   : > { %13434 = vmatpush1.bf16.msra.mxu0 %v22006_v20  ;;  %v22104_v20 = vld [vmem:[%s23602_s18 + $0xe4] ss:$16 sps:$4 sm:$0xff]  }
 0xad6   : > { %13435 = vmatprep.subr.bf16.mxu0 %v22014_v50  ;;  %v22099_v50 = vld [vmem:[%s23602_s18 + $0xc8] ss:$16 sps:$4 sm:$0xff]  }
 0xad7   : > { %13540 = vmatpush1.bf16.msra.mxu1 %v22009_v53  ;;  %v22107_v53 = vld [vmem:[%s23602_s18 + $0xec] ss:$16 sps:$4 sm:$0xff]  }
 0xad8   : > { %13541 = vmatprep.subr.bf16.mxu1 %v22017_v54  ;;  %v22102_v54 = vld [vmem:[%s23602_s18 + $0xe0] ss:$16 sps:$4 sm:$0xff]  }
 0xad9   : > { %13436 = vmatpush1.bf16.msra.mxu0 %v22012_v36  ;;  %v22110_v36 = vld [vmem:[%s23602_s18 + $0x104] ss:$16 sps:$4 sm:$0xff]  }
 0xada   : > { %13437 = vmatprep.subr.bf16.mxu0 %v22020_v3  ;;  %v22105_v3 = vld [vmem:[%s23602_s18 + $0xe8] ss:$16 sps:$4 sm:$0xff]  }
 0xadb   : > { %13542 = vmatpush1.bf16.msra.mxu1 %v22015_v38  ;;  %v22113_v38 = vld [vmem:[%s23602_s18 + $0x10c] ss:$16 sps:$4 sm:$0xff]  }
 0xadc   : > { %13543 = vmatprep.subr.bf16.mxu1 %v22023_v28  ;;  %v22108_v28 = vld [vmem:[%s23602_s18 + $0x100] ss:$16 sps:$4 sm:$0xff]  }
 0xadd   : > { %13438 = vmatpush1.bf16.msra.mxu0 %v22018_v1  ;;  %v22116_v1 = vld [vmem:[%s23602_s18 + $0x124] ss:$16 sps:$4 sm:$0xff]  }
 0xade   : > { %13439 = vmatprep.subr.bf16.mxu0 %v22026_v2  ;;  %v22111_v2 = vld [vmem:[%s23602_s18 + $0x108] ss:$16 sps:$4 sm:$0xff]  }
 0xadf   : > { %13544 = vmatpush1.bf16.msra.mxu1 %v22021_v4  ;;  %v22119_v4 = vld [vmem:[%s23602_s18 + $0x12c] ss:$16 sps:$4 sm:$0xff]  }
 0xae0   : > { %13545 = vmatprep.subr.bf16.mxu1 %v22029_v8  ;;  %v22114_v8 = vld [vmem:[%s23602_s18 + $0x120] ss:$16 sps:$4 sm:$0xff]  }
 0xae1   : > { %13440 = vmatpush1.bf16.msra.mxu0 %v22024_v7  ;;  %v22122_v7 = vld [vmem:[%s23602_s18 + $0x144] ss:$16 sps:$4 sm:$0xff]  }
 0xae2   : > { %13441 = vmatprep.subr.bf16.mxu0 %v22032_v6  ;;  %v22117_v6 = vld [vmem:[%s23602_s18 + $0x128] ss:$16 sps:$4 sm:$0xff]  }
 0xae3   : > { %13546 = vmatpush1.bf16.msra.mxu1 %v22027_v5  ;;  %v22125_v5 = vld [vmem:[%s23602_s18 + $0x14c] ss:$16 sps:$4 sm:$0xff]  }
 0xae4   : > { %13547 = vmatprep.subr.bf16.mxu1 %v22035_v31  ;;  %v22120_v31 = vld [vmem:[%s23602_s18 + $0x140] ss:$16 sps:$4 sm:$0xff]  }
 0xae5   : > { %13442 = vmatpush1.bf16.msra.mxu0 %v22030_v11  ;;  %v22128_v11 = vld [vmem:[%s23602_s18 + $0x164] ss:$16 sps:$4 sm:$0xff]  }
 0xae6   : > { %13443 = vmatprep.subr.bf16.mxu0 %v22038_v10  ;;  %v22123_v10 = vld [vmem:[%s23602_s18 + $0x148] ss:$16 sps:$4 sm:$0xff]  }
 0xae7   : > { %13548 = vmatpush1.bf16.msra.mxu1 %v22033_v13  ;;  %v22131_v13 = vld [vmem:[%s23602_s18 + $0x16c] ss:$16 sps:$4 sm:$0xff]  }
 0xae8   : > { %13549 = vmatprep.subr.bf16.mxu1 %v22041_v15  ;;  %v22126_v15 = vld [vmem:[%s23602_s18 + $0x160] ss:$16 sps:$4 sm:$0xff]  }
 0xae9   : > { %13444 = vmatpush1.bf16.msra.mxu0 %v22036_v19  ;;  %v22134_v19 = vld [vmem:[%s23602_s18 + $0x184] ss:$16 sps:$4 sm:$0xff]  }
 0xaea   : > { %13445 = vmatprep.subr.bf16.mxu0 %v22044_v22  ;;  %v22129_v22 = vld [vmem:[%s23602_s18 + $0x168] ss:$16 sps:$4 sm:$0xff]  }
 0xaeb   : > { %13550 = vmatpush1.bf16.msra.mxu1 %v22039_v24  ;;  %v22137_v24 = vld [vmem:[%s23602_s18 + $0x18c] ss:$16 sps:$4 sm:$0xff]  }
 0xaec   : > { %13551 = vmatprep.subr.bf16.mxu1 %v22047_v21  ;;  %v22132_v21 = vld [vmem:[%s23602_s18 + $0x180] ss:$16 sps:$4 sm:$0xff]  }
 0xaed   : > { %13446 = vmatpush1.bf16.msra.mxu0 %v22042_v51  ;;  %v22140_v51 = vld [vmem:[%s23602_s18 + $0x1a4] ss:$16 sps:$4 sm:$0xff]  }
 0xaee   : > { %13447 = vmatprep.subr.bf16.mxu0 %v22050_v18  ;;  %v22135_v18 = vld [vmem:[%s23602_s18 + $0x188] ss:$16 sps:$4 sm:$0xff]  }
 0xaef   : > { %13552 = vmatpush1.bf16.msra.mxu1 %v22045_v25  ;;  %v22143_v25 = vld [vmem:[%s23602_s18 + $0x1ac] ss:$16 sps:$4 sm:$0xff]  }
 0xaf0   : > { %13553 = vmatprep.subr.bf16.mxu1 %v22053_v23  ;;  %v22138_v23 = vld [vmem:[%s23602_s18 + $0x1a0] ss:$16 sps:$4 sm:$0xff]  }
 0xaf1   : > { %13448 = vmatpush1.bf16.msra.mxu0 %v22048_v58  ;;  %v22146_v58 = vld [vmem:[%s23602_s18 + $0x1c4] ss:$16 sps:$4 sm:$0xff]  }
 0xaf2   : > { %13449 = vmatprep.subr.bf16.mxu0 %v22056_v27  ;;  %v22141_v27 = vld [vmem:[%s23602_s18 + $0x1a8] ss:$16 sps:$4 sm:$0xff]  }
 0xaf3   : > { %13554 = vmatpush1.bf16.msra.mxu1 %v22051_v33  ;;  %v22149_v33 = vld [vmem:[%s23602_s18 + $0x1cc] ss:$16 sps:$4 sm:$0xff]  }
 0xaf4   : > { %13555 = vmatprep.subr.bf16.mxu1 %v22059_v52  ;;  %v22144_v52 = vld [vmem:[%s23602_s18 + $0x1c0] ss:$16 sps:$4 sm:$0xff]  }
 0xaf5   : > { %13450 = vmatpush1.bf16.msra.mxu0 %v22054_v48  ;;  %v22152_v48 = vld [vmem:[%s23602_s18 + $0x1e4] ss:$16 sps:$4 sm:$0xff]  }
 0xaf6   : > { %14218 = vmatprep.subr.bf16.mxu0 %v22062_v9  ;;  %v22147_v9 = vld [vmem:[%s23602_s18 + $0x1c8] ss:$16 sps:$4 sm:$0xff]  }
 0xaf7   : > { %13556 = vmatpush1.bf16.msra.mxu1 %v22057_v30  ;;  %v22155_v30 = vld [vmem:[%s23602_s18 + $0x1ec] ss:$16 sps:$4 sm:$0xff]  }
 0xaf8   : > { %14324 = vmatprep.subr.bf16.mxu1 %v22065_v55  ;;  %13452 = vmatmul.mubr.bf16.vlgmr.msra.gmra.mrb[16].mxu0 %v22636_v63  ;;  %v22150_v55 = vld [vmem:[%s23602_s18 + $0x1e0] ss:$16 sps:$4 sm:$0xff]  }
 0xaf9   : > { %14219 = vmatpush1.bf16.msra.mxu0 %v22060_v32  ;;  %13461 = vmatprep.mubr.bf16.mxu0 %v22637_v61  ;;  %v22153_v32 = vld [vmem:[%s23602_s18 + $0x1e8] ss:$16 sps:$4 sm:$0xff]  }
 0xafa   : > { %13558 = vmatmul.mubr.bf16.vlgmr.msra.gmra.mrb[16].mxu1 %v22636_v63  ;;  %14220 = vmatprep.subr.bf16.mxu0 %v22068_v47  ;;  %v22158_v47 = vld [vmem:[%s23602_s18 + $0x204] ss:$16 sps:$4 sm:$0xff]  }
 0xafb   : > { %14325 = vmatpush1.bf16.msra.mxu1 %v22063_v59  ;;  %13567 = vmatprep.mubr.bf16.mxu1 %v22637_v61  ;;  %v22161_v59 = vld [vmem:[%s23602_s18 + $0x20c] ss:$16 sps:$4 sm:$0xff]   ;;  %v22156_v61 = vld [vmem:[%s23602_s18 + $0x200] ss:$16 sps:$4 sm:$0xff]  }
 0xafc   : > { %14326 = vmatprep.subr.bf16.mxu1 %v22071_v60 }
 0xafd   : > { %14221 = vmatpush1.bf16.msra.mxu0 %v22066_v56 }
 0xafe   : > { %14222 = vmatprep.subr.bf16.mxu0 %v22074_v35  ;;  %v22159_v35 = vld [vmem:[%s23602_s18 + $0x208] ss:$16 sps:$4 sm:$0xff]  }
 0xaff   : > { %14327 = vmatpush1.bf16.msra.mxu1 %v22069_v62 }
 0xb00   : > { %14328 = vmatprep.subr.bf16.mxu1 %v22077_v49  ;;  %13462 = vmatmul.mubr.bf16.gmra.mrb[20].mxu0 %v22638_v39 }
 0xb01   : > { %14223 = vmatpush1.bf16.msra.mxu0 %v22072_v12 }
 0xb02   : > { %14224 = vmatprep.subr.bf16.mxu0 %v22080_v37  ;;  %13568 = vmatmul.mubr.bf16.gmra.mrb[20].mxu1 %v22638_v39  ;;  %v22164_v37 = vld [vmem:[%s23602_s18 + $0x224] ss:$16 sps:$4 sm:$0xff]  }
 0xb03   : > { %14329 = vmatpush1.bf16.msra.mxu1 %v22075_v57  ;;  %v22167_v57 = vld [vmem:[%s23602_s18 + $0x22c] ss:$16 sps:$4 sm:$0xff]  }
 0xb04   : > { %14330 = vmatprep.subr.bf16.mxu1 %v22083_v34 }
 0xb05   : > { %14225 = vmatpush1.bf16.msra.mxu0 %v22078_v40 }
 0xb06   : > { %14226 = vmatprep.subr.bf16.mxu0 %v22086_v41 }
 0xb07   : > { %14331 = vmatpush1.bf16.msra.mxu1 %v22081_v29 }
 0xb08   : > { %14332 = vmatprep.subr.bf16.mxu1 %v22089_v44  ;;  %v22162_v44 = vld [vmem:[%s23602_s18 + $0x220] ss:$16 sps:$4 sm:$0xff]  }
 0xb09   : > { %14227 = vmatpush1.bf16.msra.mxu0 %v22084_v16  ;;  %v22165_v16 = vld [vmem:[%s23602_s18 + $0x228] ss:$16 sps:$4 sm:$0xff]  }
 0xb0a   : > { %14228 = vmatprep.subr.bf16.mxu0 %v22092_v45 }
 0xb0b   : > { %14333 = vmatpush1.bf16.msra.mxu1 %v22087_v17  ;;  %v22170_v17 = vld [vmem:[%s23602_s18 + $0x244] ss:$16 sps:$4 sm:$0xff]  }
 0xb0c   : > { %14334 = vmatprep.subr.bf16.mxu1 %v22095_v0  ;;  %v22173_v0 = vld [vmem:[%s23602_s18 + $0x24c] ss:$16 sps:$4 sm:$0xff]  }
 0xb0d   : > { %14229 = vmatpush1.bf16.msra.mxu0 %v22090_v26 }
 0xb0e   : > { %14230 = vmatprep.subr.bf16.mxu0 %v22098_v46 }
 0xb0f   : > { %14335 = vmatpush1.bf16.msra.mxu1 %v22093_v14  ;;  %v22168_v14 = vld [vmem:[%s23602_s18 + $0x240] ss:$16 sps:$4 sm:$0xff]  }
 0xb10   : > { %14336 = vmatprep.subr.bf16.mxu1 %v22101_v42  ;;  %v22171_v42 = vld [vmem:[%s23602_s18 + $0x248] ss:$16 sps:$4 sm:$0xff]  }
 0xb11   : > { %14231 = vmatpush1.bf16.msra.mxu0 %v22096_v43 }
 0xb12   : > { %14232 = vmatprep.subr.bf16.mxu0 %v22104_v20 }
 0xb13   : > { %14337 = vmatpush1.bf16.msra.mxu1 %v22099_v50 }
 0xb14   : > { %14338 = vmatprep.subr.bf16.mxu1 %v22107_v53 }
 0xb15   : > { %14233 = vmatpush1.bf16.msra.mxu0 %v22102_v54  ;;  %v22176_v54 = vld [vmem:[%s23602_s18 + $0x264] ss:$16 sps:$4 sm:$0xff]  }
 0xb16   : > { %14234 = vmatprep.subr.bf16.mxu0 %v22110_v36  ;;  %v22179_v36 = vld [vmem:[%s23602_s18 + $0x26c] ss:$16 sps:$4 sm:$0xff]  }
 0xb17   : > { %14339 = vmatpush1.bf16.msra.mxu1 %v22105_v3 }
 0xb18   : > { %14340 = vmatprep.subr.bf16.mxu1 %v22113_v38 }
 0xb19   : > { %14235 = vmatpush1.bf16.msra.mxu0 %v22108_v28 }
 0xb1a   : > { %14236 = vmatprep.subr.bf16.mxu0 %v22116_v1 }
 0xb1b   : > { %14341 = vmatpush1.bf16.msra.mxu1 %v22111_v2 }
 0xb1c   : > { %14342 = vmatprep.subr.bf16.mxu1 %v22119_v4 }
 0xb1d   : > { %14237 = vmatpush1.bf16.msra.mxu0 %v22114_v8  ;;  %v22174_v8 = vld [vmem:[%s23602_s18 + $0x260] ss:$16 sps:$4 sm:$0xff]  }
 0xb1e   : > { %14238 = vmatprep.subr.bf16.mxu0 %v22122_v7  ;;  %v22177_v7 = vld [vmem:[%s23602_s18 + $0x268] ss:$16 sps:$4 sm:$0xff]  }
 0xb1f   : > { %14343 = vmatpush1.bf16.msra.mxu1 %v22117_v6  ;;  %v22182_v6 = vld [vmem:[%s23602_s18 + $0x284] ss:$16 sps:$4 sm:$0xff]  }
 0xb20   : > { %14344 = vmatprep.subr.bf16.mxu1 %v22125_v5  ;;  %v22185_v5 = vld [vmem:[%s23602_s18 + $0x28c] ss:$16 sps:$4 sm:$0xff]  }
 0xb21   : > { %14239 = vmatpush1.bf16.msra.mxu0 %v22120_v31 }
 0xb22   : > { %14240 = vmatprep.subr.bf16.mxu0 %v22128_v11 }
 0xb23   : > { %14345 = vmatpush1.bf16.msra.mxu1 %v22123_v10  ;;  %v22180_v10 = vld [vmem:[%s23602_s18 + $0x280] ss:$16 sps:$4 sm:$0xff]  }
 0xb24   : > { %14346 = vmatprep.subr.bf16.mxu1 %v22131_v13  ;;  %v22183_v13 = vld [vmem:[%s23602_s18 + $0x288] ss:$16 sps:$4 sm:$0xff]  }
 0xb25   : > { %14241 = vmatpush1.bf16.msra.mxu0 %v22126_v15 }
 0xb26   : > { %14242 = vmatprep.subr.bf16.mxu0 %v22134_v19 }
 0xb27   : > { %14347 = vmatpush1.bf16.msra.mxu1 %v22129_v22 }
 0xb28   : > { %14348 = vmatprep.subr.bf16.mxu1 %v22137_v24 }
 0xb29   : > { %14243 = vmatpush1.bf16.msra.mxu0 %v22132_v21  ;;  %v22188_v21 = vld [vmem:[%s23602_s18 + $0x2a4] ss:$16 sps:$4 sm:$0xff]  }
 0xb2a   : > { %14244 = vmatprep.subr.bf16.mxu0 %v22140_v51  ;;  %v22191_v51 = vld [vmem:[%s23602_s18 + $0x2ac] ss:$16 sps:$4 sm:$0xff]  }
 0xb2b   : > { %14349 = vmatpush1.bf16.msra.mxu1 %v22135_v18 }
 0xb2c   : > { %14350 = vmatprep.subr.bf16.mxu1 %v22143_v25 }
 0xb2d   : > { %14245 = vmatpush1.bf16.msra.mxu0 %v22138_v23 }
 0xb2e   : > { %14246 = vmatprep.subr.bf16.mxu0 %v22146_v58 }
 0xb2f   : > { %14351 = vmatpush1.bf16.msra.mxu1 %v22141_v27 }
 0xb30   : > { %14352 = vmatprep.subr.bf16.mxu1 %v22149_v33  ;;  %v22186_v33 = vld [vmem:[%s23602_s18 + $0x2a0] ss:$16 sps:$4 sm:$0xff]  }
 0xb31   : > { %14247 = vmatpush1.bf16.msra.mxu0 %v22144_v52  ;;  %v22189_v52 = vld [vmem:[%s23602_s18 + $0x2a8] ss:$16 sps:$4 sm:$0xff]  }
 0xb32   : > { %14248 = vmatprep.subr.bf16.mxu0 %v22152_v48 }
 0xb33   : > { %14353 = vmatpush1.bf16.msra.mxu1 %v22147_v9  ;;  %v22194_v9 = vld [vmem:[%s23602_s18 + $0x2c4] ss:$16 sps:$4 sm:$0xff]  }
 0xb34   : > { %14354 = vmatprep.subr.bf16.mxu1 %v22155_v30  ;;  %v22197_v30 = vld [vmem:[%s23602_s18 + $0x2cc] ss:$16 sps:$4 sm:$0xff]  }
 0xb35   : > { %14249 = vmatpush1.bf16.msra.mxu0 %v22150_v55  ;;  %v22192_v55 = vld [vmem:[%s23602_s18 + $0x2c0] ss:$16 sps:$4 sm:$0xff]  }
 0xb36   : > { %14271 = vmatprep.subr.bf16.mxu0 %v22158_v47  ;;  %v22200_v47 = vld [vmem:[%s23602_s18 + $0x2e4] ss:$16 sps:$4 sm:$0xff]  }
 0xb37   : > { %14355 = vmatpush1.bf16.msra.mxu1 %v22153_v32  ;;  %v22195_v32 = vld [vmem:[%s23602_s18 + $0x2c8] ss:$16 sps:$4 sm:$0xff]  }
 0xb38   : > { %14377 = vmatprep.subr.bf16.mxu1 %v22161_v59  ;;  %v22203_v59 = vld [vmem:[%s23602_s18 + $0x2ec] ss:$16 sps:$4 sm:$0xff]  }
 0xb3b   : > { %v12255_v63 = vpop.f32.mrb[0].mxu0 }
 0xb3c   : > { %v12257_v60 = vpop.f32.mrb[1].mxu0 }
 0xb3d   : > { %v12259_v56 = vpop.f32.mrb[2].mxu0  ;;  %v12308_v62 = vpop.f32.mrb[0].mxu1 }
 0xb3e   : > { %v12327_v49 = vpack.c.bf16 %v12259_v56, %v12255_v63  ;;  %v12261_v12 = vpop.f32.mrb[3].mxu0  ;;  %v12310_v34 = vpop.f32.mrb[1].mxu1  ;;  %v22198_v63 = vld [vmem:[%s23602_s18 + $0x2e0] ss:$16 sps:$4 sm:$0xff]   ;;  %v22206_v56 = vld [vmem:[%s23602_s18 + $0x304] ss:$16 sps:$4 sm:$0xff]  }
 0xb3f   : > { %v12328_v39 = vpack.c.bf16 %v12261_v12, %v12257_v60  ;;  %v12312_v40 = vpop.f32.mrb[2].mxu1  ;;  %v22201_v60 = vld [vmem:[%s23602_s18 + $0x2e8] ss:$16 sps:$4 sm:$0xff]   ;;  %v22215_v12 = vld [vmem:[%s23602_s18 + $0x32c] ss:$16 sps:$4 sm:$0xff]  }
 0xb40   : > { %v28059_v41 = vpack.c.bf16 %v12312_v40, %v12308_v62  ;;  %v12314_v29 = vpop.f32.mrb[3].mxu1  ;;  %v22207_v62 = vld [vmem:[%s23602_s18 + $0x308] ss:$16 sps:$4 sm:$0xff]  }
 0xb41   : > { %14250 = vmatprep.mubr.bf16.mxu0 %v12328_v39  ;;  %14356 = vmatprep.mubr.bf16.mxu1 %v12328_v39  ;;  %v12330_v45 = vpack.c.bf16 %v12314_v29, %v12310_v34  ;;  %v22210_v39 = vld [vmem:[%s23602_s18 + $0x320] ss:$16 sps:$4 sm:$0xff]   ;;  %v22213_v40 = vld [vmem:[%s23602_s18 + $0x328] ss:$16 sps:$4 sm:$0xff]  }
 0xb42   : > { %14251 = vmatmul.mubr.bf16.vlgmr.msra.gmra.mrb[16].mxu0 %v12327_v49  ;;  %14357 = vmatmul.mubr.bf16.vlgmr.msra.gmra.mrb[16].mxu1 %v12327_v49  ;;  %v22212_v49 = vld [vmem:[%s23602_s18 + $0x324] ss:$16 sps:$4 sm:$0xff]  }
 0xb43   : > { %14272 = vmatpush1.bf16.msra.mxu0 %v22156_v61  ;;  %14378 = vmatpush1.bf16.msra.mxu1 %v22159_v35  ;;  %v12265_v26 = vpop.f32.mrb[4].mxu0  ;;  %v22209_v61 = vld [vmem:[%s23602_s18 + $0x30c] ss:$16 sps:$4 sm:$0xff]   ;;  %v22204_v35 = vld [vmem:[%s23602_s18 + $0x300] ss:$16 sps:$4 sm:$0xff]  }
 0xb44   : > { %14273 = vmatprep.subr.bf16.mxu0 %v22164_v37  ;;  %14379 = vmatprep.subr.bf16.mxu1 %v22167_v57  ;;  %v12267_v46 = vpop.f32.mrb[5].mxu0 }
 0xb45   : > { %v12269_v43 = vpop.f32.mrb[6].mxu0  ;;  %v12318_v20 = vpop.f32.mrb[4].mxu1 }
 0xb46   : > { %v12331_v50 = vpack.c.bf16 %v12269_v43, %v12265_v26  ;;  %v12271_v53 = vpop.f32.mrb[7].mxu0  ;;  %v12320_v3 = vpop.f32.mrb[5].mxu1 }
 0xb47   : > { %14274 = vmatpush1.bf16.msra.mxu0 %v22162_v44  ;;  %14380 = vmatpush1.bf16.msra.mxu1 %v22165_v16  ;;  %v12332_v38 = vpack.c.bf16 %v12271_v53, %v12267_v46  ;;  %v12322_v28 = vpop.f32.mrb[6].mxu1  ;;  %v22218_v16 = vld [vmem:[%s23602_s18 + $0x344] ss:$16 sps:$4 sm:$0xff]  }
 0xb48   : > { %14275 = vmatprep.subr.bf16.mxu0 %v22170_v17  ;;  %14381 = vmatprep.subr.bf16.mxu1 %v22173_v0  ;;  %v28069_v1 = vpack.c.bf16 %v12322_v28, %v12318_v20  ;;  %v12324_v2 = vpop.f32.mrb[7].mxu1  ;;  %v22216_v20 = vld [vmem:[%s23602_s18 + $0x340] ss:$16 sps:$4 sm:$0xff]   ;;  %v22224_v53 = vld [vmem:[%s23602_s18 + $0x364] ss:$16 sps:$4 sm:$0xff]  }
 0xb49   : > { %14260 = vmatprep.mubr.bf16.mxu0 %v12332_v38  ;;  %14366 = vmatprep.mubr.bf16.mxu1 %v12332_v38  ;;  %v28071_v4 = vpack.c.bf16 %v12324_v2, %v12320_v3  ;;  %v22225_v3 = vld [vmem:[%s23602_s18 + $0x368] ss:$16 sps:$4 sm:$0xff]   ;;  %v22230_v38 = vld [vmem:[%s23602_s18 + $0x384] ss:$16 sps:$4 sm:$0xff]   ;;  %v22233_v28 = vld [vmem:[%s23602_s18 + $0x38c] ss:$16 sps:$4 sm:$0xff]  }
 0xb4a   : > { %14261 = vmatmul.mubr.bf16.gmra.mrb[20].mxu0 %v12331_v50  ;;  %14367 = vmatmul.mubr.bf16.gmra.mrb[20].mxu1 %v12331_v50  ;;  %v22219_v50 = vld [vmem:[%s23602_s18 + $0x348] ss:$16 sps:$4 sm:$0xff]   ;;  %v22228_v2 = vld [vmem:[%s23602_s18 + $0x380] ss:$16 sps:$4 sm:$0xff]  }
 0xb4b   : > { %14276 = vmatpush1.bf16.msra.mxu0 %v22168_v14  ;;  %14382 = vmatpush1.bf16.msra.mxu1 %v22171_v42  ;;  %v12389_v31 = vpop.f32.mrb[8].mxu0 }
 0xb4c   : > { %14277 = vmatprep.subr.bf16.mxu0 %v22176_v54  ;;  %14383 = vmatprep.subr.bf16.mxu1 %v22179_v36  ;;  %v12391_v11 = vpop.f32.mrb[9].mxu0  ;;  %v22227_v54 = vld [vmem:[%s23602_s18 + $0x36c] ss:$16 sps:$4 sm:$0xff]   ;;  %v22222_v36 = vld [vmem:[%s23602_s18 + $0x360] ss:$16 sps:$4 sm:$0xff]  }
 0xb4d   : > { %v12393_v15 = vpop.f32.mrb[10].mxu0  ;;  %14303 = vmatprep.mubr.bf16.mxu0 %v12330_v45  ;;  %14409 = vmatprep.mubr.bf16.mxu1 %v12330_v45  ;;  %v12442_v19 = vpop.f32.mrb[8].mxu1  ;;  %v22221_v45 = vld [vmem:[%s23602_s18 + $0x34c] ss:$16 sps:$4 sm:$0xff]  }
 0xb4e   : > { %v28079_v22 = vpack.c.bf16 %v12393_v15, %v12389_v31  ;;  %v12395_v24 = vpop.f32.mrb[11].mxu0  ;;  %v12444_v18 = vpop.f32.mrb[9].mxu1  ;;  %v22237_v31 = vld [vmem:[%s23602_s18 + $0x3a8] ss:$16 sps:$4 sm:$0xff]  }
 0xb4f   : > { %14278 = vmatpush1.bf16.msra.mxu0 %v22174_v8  ;;  %14384 = vmatpush1.bf16.msra.mxu1 %v22177_v7  ;;  %v28083_v25 = vpack.c.bf16 %v12395_v24, %v12391_v11  ;;  %v12446_v23 = vpop.f32.mrb[10].mxu1  ;;  %v22231_v8 = vld [vmem:[%s23602_s18 + $0x388] ss:$16 sps:$4 sm:$0xff]   ;;  %v22236_v7 = vld [vmem:[%s23602_s18 + $0x3a4] ss:$16 sps:$4 sm:$0xff]  }
 0xb50   : > { %14279 = vmatprep.subr.bf16.mxu0 %v22182_v6  ;;  %14385 = vmatprep.subr.bf16.mxu1 %v22185_v5  ;;  %v28085_v58 = vpack.c.bf16 %v12446_v23, %v12442_v19  ;;  %v12448_v27 = vpop.f32.mrb[11].mxu1  ;;  %v22239_v6 = vld [vmem:[%s23602_s18 + $0x3ac] ss:$16 sps:$4 sm:$0xff]   ;;  %v22234_v5 = vld [vmem:[%s23602_s18 + $0x3a0] ss:$16 sps:$4 sm:$0xff]  }
 0xb51   : > { %v28089_v48 = vpack.c.bf16 %v12448_v27, %v12444_v18  ;;  %v22242_v11 = vld [vmem:[%s23602_s18 + $0x3c4] ss:$16 sps:$4 sm:$0xff]   ;;  %v22243_v15 = vld [vmem:[%s23602_s18 + $0x3c8] ss:$16 sps:$4 sm:$0xff]   ;;  %v22251_v24 = vld [vmem:[%s23602_s18 + $0x3ec] ss:$16 sps:$4 sm:$0xff]  }
 0xb52   : > { %v22248_v19 = vld [vmem:[%s23602_s18 + $0x3e4] ss:$16 sps:$4 sm:$0xff]   ;;  %v22257_v23 = vld [vmem:[%s23602_s18 + $0x80c] ss:$16 sps:$4 sm:$0xff]   ;;  %v22252_v27 = vld [vmem:[%s23602_s18 + $0x800] ss:$16 sps:$4 sm:$0xff]  }
 0xb53   : > { %14280 = vmatpush1.bf16.msra.mxu0 %v22180_v10  ;;  %14386 = vmatpush1.bf16.msra.mxu1 %v22183_v13  ;;  %v12399_v37 = vpop.f32.mrb[12].mxu0  ;;  %v22245_v10 = vld [vmem:[%s23602_s18 + $0x3cc] ss:$16 sps:$4 sm:$0xff]   ;;  %v22240_v13 = vld [vmem:[%s23602_s18 + $0x3c0] ss:$16 sps:$4 sm:$0xff]  }
 0xb54   : > { %14281 = vmatprep.subr.bf16.mxu0 %v22188_v21  ;;  %14387 = vmatprep.subr.bf16.mxu1 %v22191_v51  ;;  %v12401_v57 = vpop.f32.mrb[13].mxu0  ;;  %v22246_v21 = vld [vmem:[%s23602_s18 + $0x3e0] ss:$16 sps:$4 sm:$0xff]   ;;  %v22249_v51 = vld [vmem:[%s23602_s18 + $0x3e8] ss:$16 sps:$4 sm:$0xff]  }
 0xb55   : > { %v12452_v34 = vpop.f32.mrb[12].mxu1  ;;  %v12403_v29 = vpop.f32.mrb[14].mxu0  ;;  %v22254_v18 = vld [vmem:[%s23602_s18 + $0x804] ss:$16 sps:$4 sm:$0xff]  }
 0xb56   : > { %v12454_v44 = vpop.f32.mrb[13].mxu1  ;;  %v28109_v17 = vpack.c.bf16 %v12403_v29, %v12399_v37  ;;  %v12405_v0 = vpop.f32.mrb[15].mxu0  ;;  %v22285_v37 = vld [vmem:[%s23602_s18 + $0x8a8] ss:$16 sps:$4 sm:$0xff]   ;;  %v22296_v29 = vld [vmem:[%s23602_s18 + $0x8e4] ss:$16 sps:$4 sm:$0xff]  }
 0xb57   : > { %14282 = vmatpush1.bf16.msra.mxu0 %v22186_v33  ;;  %14388 = vmatpush1.bf16.msra.mxu1 %v22189_v52  ;;  %v12456_v26 = vpop.f32.mrb[14].mxu1  ;;  %v28111_v46 = vpack.c.bf16 %v12405_v0, %v12401_v57  ;;  %v22255_v33 = vld [vmem:[%s23602_s18 + $0x808] ss:$16 sps:$4 sm:$0xff]   ;;  %v22260_v52 = vld [vmem:[%s23602_s18 + $0x824] ss:$16 sps:$4 sm:$0xff]  }
 0xb58   : > { %14283 = vmatprep.subr.bf16.mxu0 %v22194_v9  ;;  %14389 = vmatprep.subr.bf16.mxu1 %v22197_v30  ;;  %v28113_v14 = vpack.c.bf16 %v12456_v26, %v12452_v34  ;;  %v12458_v42 = vpop.f32.mrb[15].mxu1  ;;  %v22263_v9 = vld [vmem:[%s23602_s18 + $0x82c] ss:$16 sps:$4 sm:$0xff]   ;;  %v22258_v30 = vld [vmem:[%s23602_s18 + $0x820] ss:$16 sps:$4 sm:$0xff]  }
 0xb59   : > { %v28115_v43 = vpack.c.bf16 %v12458_v42, %v12454_v44  ;;  %v22290_v57 = vld [vmem:[%s23602_s18 + $0x8c4] ss:$16 sps:$4 sm:$0xff]   ;;  %v22293_v34 = vld [vmem:[%s23602_s18 + $0x8cc] ss:$16 sps:$4 sm:$0xff]   ;;  %v22300_v42 = vld [vmem:[%s23602_s18 + $0x900] ss:$16 sps:$4 sm:$0xff]  }
 0xb5a   : > { %v22299_v44 = vld [vmem:[%s23602_s18 + $0x8ec] ss:$16 sps:$4 sm:$0xff]   ;;  %v22302_v0 = vld [vmem:[%s23602_s18 + $0x904] ss:$16 sps:$4 sm:$0xff]  }
 0xb5b   : > { %14284 = vmatpush1.bf16.msra.mxu0 %v22192_v55  ;;  %14390 = vmatpush1.bf16.msra.mxu1 %v22195_v32  ;;  %v22261_v55 = vld [vmem:[%s23602_s18 + $0x828] ss:$16 sps:$4 sm:$0xff]   ;;  %v22266_v32 = vld [vmem:[%s23602_s18 + $0x844] ss:$16 sps:$4 sm:$0xff]   ;;  %v22305_v26 = vld [vmem:[%s23602_s18 + $0x90c] ss:$16 sps:$4 sm:$0xff]  }
 0xb5c   : > { %14285 = vmatprep.subr.bf16.mxu0 %v22200_v47  ;;  %14391 = vmatprep.subr.bf16.mxu1 %v22203_v59  ;;  %v22269_v47 = vld [vmem:[%s23602_s18 + $0x84c] ss:$16 sps:$4 sm:$0xff]   ;;  %v22264_v59 = vld [vmem:[%s23602_s18 + $0x840] ss:$16 sps:$4 sm:$0xff]  }
 0xb5f   : > { %14286 = vmatpush1.bf16.msra.mxu0 %v22198_v63  ;;  %14392 = vmatpush1.bf16.msra.mxu1 %v22201_v60  ;;  %v22267_v63 = vld [vmem:[%s23602_s18 + $0x848] ss:$16 sps:$4 sm:$0xff]   ;;  %v22272_v60 = vld [vmem:[%s23602_s18 + $0x864] ss:$16 sps:$4 sm:$0xff]  }
 0xb60   : > { %14287 = vmatprep.subr.bf16.mxu0 %v22206_v56  ;;  %14393 = vmatprep.subr.bf16.mxu1 %v22209_v61  ;;  %v22270_v56 = vld [vmem:[%s23602_s18 + $0x860] ss:$16 sps:$4 sm:$0xff]   ;;  %v22278_v61 = vld [vmem:[%s23602_s18 + $0x884] ss:$16 sps:$4 sm:$0xff]  }
 0xb63   : > { %14288 = vmatpush1.bf16.msra.mxu0 %v22204_v35  ;;  %14394 = vmatpush1.bf16.msra.mxu1 %v22207_v62  ;;  %v22281_v35 = vld [vmem:[%s23602_s18 + $0x88c] ss:$16 sps:$4 sm:$0xff]   ;;  %v22276_v62 = vld [vmem:[%s23602_s18 + $0x880] ss:$16 sps:$4 sm:$0xff]  }
 0xb64   : > { %14289 = vmatprep.subr.bf16.mxu0 %v22212_v49  ;;  %14395 = vmatprep.subr.bf16.mxu1 %v22215_v12  ;;  %v22284_v49 = vld [vmem:[%s23602_s18 + $0x8a4] ss:$16 sps:$4 sm:$0xff]   ;;  %v22287_v12 = vld [vmem:[%s23602_s18 + $0x8ac] ss:$16 sps:$4 sm:$0xff]  }
 0xb67   : > { %14290 = vmatpush1.bf16.msra.mxu0 %v22210_v39  ;;  %14396 = vmatpush1.bf16.msra.mxu1 %v22213_v40  ;;  %v22288_v39 = vld [vmem:[%s23602_s18 + $0x8c0] ss:$16 sps:$4 sm:$0xff]   ;;  %v22291_v40 = vld [vmem:[%s23602_s18 + $0x8c8] ss:$16 sps:$4 sm:$0xff]  }
 0xb68   : > { %14291 = vmatprep.subr.bf16.mxu0 %v22218_v16  ;;  %14397 = vmatprep.subr.bf16.mxu1 %v22221_v45  ;;  %v22294_v16 = vld [vmem:[%s23602_s18 + $0x8e0] ss:$16 sps:$4 sm:$0xff]   ;;  %v22297_v45 = vld [vmem:[%s23602_s18 + $0x8e8] ss:$16 sps:$4 sm:$0xff]  }
 0xb6b   : > { %14292 = vmatpush1.bf16.msra.mxu0 %v22216_v20  ;;  %14398 = vmatpush1.bf16.msra.mxu1 %v22219_v50  ;;  %v22303_v20 = vld [vmem:[%s23602_s18 + $0x908] ss:$16 sps:$4 sm:$0xff]   ;;  %v22308_v50 = vld [vmem:[%s23602_s18 + $0x924] ss:$16 sps:$4 sm:$0xff]  }
 0xb6c   : > { %14293 = vmatprep.subr.bf16.mxu0 %v22224_v53  ;;  %14399 = vmatprep.subr.bf16.mxu1 %v22227_v54  ;;  %v22311_v53 = vld [vmem:[%s23602_s18 + $0x92c] ss:$16 sps:$4 sm:$0xff]   ;;  %v22306_v54 = vld [vmem:[%s23602_s18 + $0x920] ss:$16 sps:$4 sm:$0xff]  }
 0xb6f   : > { %14294 = vmatpush1.bf16.msra.mxu0 %v22222_v36  ;;  %14400 = vmatpush1.bf16.msra.mxu1 %v22225_v3  ;;  %v22309_v36 = vld [vmem:[%s23602_s18 + $0x928] ss:$16 sps:$4 sm:$0xff]   ;;  %v22314_v3 = vld [vmem:[%s23602_s18 + $0x944] ss:$16 sps:$4 sm:$0xff]  }
 0xb70   : > { %14295 = vmatprep.subr.bf16.mxu0 %v22230_v38  ;;  %14401 = vmatprep.subr.bf16.mxu1 %v22233_v28  ;;  %v22317_v38 = vld [vmem:[%s23602_s18 + $0x94c] ss:$16 sps:$4 sm:$0xff]   ;;  %v22312_v28 = vld [vmem:[%s23602_s18 + $0x940] ss:$16 sps:$4 sm:$0xff]  }
 0xb73   : > { %14296 = vmatpush1.bf16.msra.mxu0 %v22228_v2  ;;  %14402 = vmatpush1.bf16.msra.mxu1 %v22231_v8  ;;  %v22315_v2 = vld [vmem:[%s23602_s18 + $0x948] ss:$16 sps:$4 sm:$0xff]   ;;  %v22320_v8 = vld [vmem:[%s23602_s18 + $0x964] ss:$16 sps:$4 sm:$0xff]  }
 0xb74   : > { %14297 = vmatprep.subr.bf16.mxu0 %v22236_v7  ;;  %14403 = vmatprep.subr.bf16.mxu1 %v22239_v6  ;;  %v22323_v7 = vld [vmem:[%s23602_s18 + $0x96c] ss:$16 sps:$4 sm:$0xff]   ;;  %v22318_v6 = vld [vmem:[%s23602_s18 + $0x960] ss:$16 sps:$4 sm:$0xff]  }
 0xb77   : > { %14298 = vmatpush1.bf16.msra.mxu0 %v22234_v5  ;;  %14404 = vmatpush1.bf16.msra.mxu1 %v22237_v31  ;;  %v22321_v5 = vld [vmem:[%s23602_s18 + $0x968] ss:$16 sps:$4 sm:$0xff]   ;;  %v22326_v31 = vld [vmem:[%s23602_s18 + $0x984] ss:$16 sps:$4 sm:$0xff]  }
 0xb78   : > { %14299 = vmatprep.subr.bf16.mxu0 %v22242_v11  ;;  %14405 = vmatprep.subr.bf16.mxu1 %v22245_v10  ;;  %v22329_v11 = vld [vmem:[%s23602_s18 + $0x98c] ss:$16 sps:$4 sm:$0xff]   ;;  %v22324_v10 = vld [vmem:[%s23602_s18 + $0x980] ss:$16 sps:$4 sm:$0xff]  }
 0xb7b   : > { %14300 = vmatpush1.bf16.msra.mxu0 %v22240_v13  ;;  %14406 = vmatpush1.bf16.msra.mxu1 %v22243_v15  ;;  %v22327_v13 = vld [vmem:[%s23602_s18 + $0x988] ss:$16 sps:$4 sm:$0xff]   ;;  %v22332_v15 = vld [vmem:[%s23602_s18 + $0x9a4] ss:$16 sps:$4 sm:$0xff]  }
 0xb7c   : > { %14301 = vmatprep.subr.bf16.mxu0 %v22248_v19  ;;  %14407 = vmatprep.subr.bf16.mxu1 %v22251_v24  ;;  %v22335_v19 = vld [vmem:[%s23602_s18 + $0x9ac] ss:$16 sps:$4 sm:$0xff]   ;;  %v22330_v24 = vld [vmem:[%s23602_s18 + $0x9a0] ss:$16 sps:$4 sm:$0xff]  }
 0xb7f   : > { %14302 = vmatpush1.bf16.msra.mxu0 %v22246_v21  ;;  %14408 = vmatpush1.bf16.msra.mxu1 %v22249_v51  ;;  %v22333_v21 = vld [vmem:[%s23602_s18 + $0x9a8] ss:$16 sps:$4 sm:$0xff]   ;;  %v22338_v51 = vld [vmem:[%s23602_s18 + $0x9c4] ss:$16 sps:$4 sm:$0xff]  }
 0xb80   : > { %15199 = vmatprep.subr.bf16.mxu0 %v22254_v18  ;;  %15305 = vmatprep.subr.bf16.mxu1 %v22257_v23  ;;  %v22341_v18 = vld [vmem:[%s23602_s18 + $0x9cc] ss:$16 sps:$4 sm:$0xff]   ;;  %v22336_v23 = vld [vmem:[%s23602_s18 + $0x9c0] ss:$16 sps:$4 sm:$0xff]  }
 0xb82   : > { %14304 = vmatmul.mubr.bf16.vlgmr.msra.gmra.mrb[16].mxu0 %v28059_v41  ;;  %14410 = vmatmul.mubr.bf16.vlgmr.msra.gmra.mrb[16].mxu1 %v28059_v41  ;;  %v22275_v41 = vld [vmem:[%s23602_s18 + $0x86c] ss:$16 sps:$4 sm:$0xff]  }
 0xb83   : > { %15200 = vmatpush1.bf16.msra.mxu0 %v22252_v27  ;;  %15306 = vmatpush1.bf16.msra.mxu1 %v22255_v33  ;;  %v22339_v27 = vld [vmem:[%s23602_s18 + $0x9c8] ss:$16 sps:$4 sm:$0xff]   ;;  %v22344_v33 = vld [vmem:[%s23602_s18 + $0x9e4] ss:$16 sps:$4 sm:$0xff]  }
 0xb84   : > { %15201 = vmatprep.subr.bf16.mxu0 %v22260_v52  ;;  %15307 = vmatprep.subr.bf16.mxu1 %v22263_v9  ;;  %v22347_v52 = vld [vmem:[%s23602_s18 + $0x9ec] ss:$16 sps:$4 sm:$0xff]   ;;  %v22342_v9 = vld [vmem:[%s23602_s18 + $0x9e0] ss:$16 sps:$4 sm:$0xff]  }
 0xb85   : > { %14313 = vmatprep.mubr.bf16.mxu0 %v28071_v4  ;;  %14419 = vmatprep.mubr.bf16.mxu1 %v28071_v4  ;;  %v22273_v4 = vld [vmem:[%s23602_s18 + $0x868] ss:$16 sps:$4 sm:$0xff]  }
 0xb87   : > { %15202 = vmatpush1.bf16.msra.mxu0 %v22258_v30  ;;  %15308 = vmatpush1.bf16.msra.mxu1 %v22261_v55  ;;  %v22345_v30 = vld [vmem:[%s23602_s18 + $0x9e8] ss:$16 sps:$4 sm:$0xff]   ;;  %v22350_v55 = vld [vmem:[%s23602_s18 + $0xa04] ss:$16 sps:$4 sm:$0xff]  }
 0xb88   : > { %15203 = vmatprep.subr.bf16.mxu0 %v22266_v32  ;;  %15309 = vmatprep.subr.bf16.mxu1 %v22269_v47  ;;  %v22353_v32 = vld [vmem:[%s23602_s18 + $0xa0c] ss:$16 sps:$4 sm:$0xff]   ;;  %v22348_v47 = vld [vmem:[%s23602_s18 + $0xa00] ss:$16 sps:$4 sm:$0xff]  }
 0xb8a   : > { %14314 = vmatmul.mubr.bf16.gmra.mrb[20].mxu0 %v28069_v1  ;;  %14420 = vmatmul.mubr.bf16.gmra.mrb[20].mxu1 %v28069_v1  ;;  %v22279_v1 = vld [vmem:[%s23602_s18 + $0x888] ss:$16 sps:$4 sm:$0xff]  }
 0xb8b   : > { %15204 = vmatpush1.bf16.msra.mxu0 %v22264_v59  ;;  %15231 = vmatprep.mubr.bf16.mxu0 %v28083_v25  ;;  %v22351_v59 = vld [vmem:[%s23602_s18 + $0xa08] ss:$16 sps:$4 sm:$0xff]  }
 0xb8c   : > { %15310 = vmatpush1.bf16.msra.mxu1 %v22267_v63  ;;  %15337 = vmatprep.mubr.bf16.mxu1 %v28083_v25  ;;  %v22282_v25 = vld [vmem:[%s23602_s18 + $0x8a0] ss:$16 sps:$4 sm:$0xff]   ;;  %v22356_v63 = vld [vmem:[%s23602_s18 + $0xa24] ss:$16 sps:$4 sm:$0xff]  }
 0xb8d   : > { %15205 = vmatprep.subr.bf16.mxu0 %v22272_v60  ;;  %15311 = vmatprep.subr.bf16.mxu1 %v22275_v41  ;;  %v22359_v60 = vld [vmem:[%s23602_s18 + $0xa2c] ss:$16 sps:$4 sm:$0xff]   ;;  %v22354_v41 = vld [vmem:[%s23602_s18 + $0xa20] ss:$16 sps:$4 sm:$0xff]  }
 0xb8f   : > { %15206 = vmatpush1.bf16.msra.mxu0 %v22270_v56  ;;  %v22357_v56 = vld [vmem:[%s23602_s18 + $0xa28] ss:$16 sps:$4 sm:$0xff]  }
 0xb90   : > { %15312 = vmatpush1.bf16.msra.mxu1 %v22273_v4  ;;  %15207 = vmatprep.subr.bf16.mxu0 %v22278_v61  ;;  %v22362_v4 = vld [vmem:[%s23602_s18 + $0xa44] ss:$16 sps:$4 sm:$0xff]   ;;  %v22365_v61 = vld [vmem:[%s23602_s18 + $0xa4c] ss:$16 sps:$4 sm:$0xff]  }
 0xb91   : > { %15313 = vmatprep.subr.bf16.mxu1 %v22281_v35  ;;  %v22360_v35 = vld [vmem:[%s23602_s18 + $0xa40] ss:$16 sps:$4 sm:$0xff]  }
 0xb93   : > { %15208 = vmatpush1.bf16.msra.mxu0 %v22276_v62  ;;  %v22368_v62 = vld [vmem:[%s23602_s18 + $0xa64] ss:$16 sps:$4 sm:$0xff]  }
 0xb94   : > { %15314 = vmatpush1.bf16.msra.mxu1 %v22279_v1  ;;  %15209 = vmatprep.subr.bf16.mxu0 %v22284_v49  ;;  %v22366_v1 = vld [vmem:[%s23602_s18 + $0xa60] ss:$16 sps:$4 sm:$0xff]   ;;  %v22369_v49 = vld [vmem:[%s23602_s18 + $0xa68] ss:$16 sps:$4 sm:$0xff]  }
 0xb95   : > { %15315 = vmatprep.subr.bf16.mxu1 %v22287_v12  ;;  %v22374_v12 = vld [vmem:[%s23602_s18 + $0xa84] ss:$16 sps:$4 sm:$0xff]  }
 0xb97   : > { %15210 = vmatpush1.bf16.msra.mxu0 %v22282_v25  ;;  %v22377_v25 = vld [vmem:[%s23602_s18 + $0xa8c] ss:$16 sps:$4 sm:$0xff]  }
 0xb98   : > { %15316 = vmatpush1.bf16.msra.mxu1 %v22285_v37  ;;  %15211 = vmatprep.subr.bf16.mxu0 %v22290_v57  ;;  %v22375_v37 = vld [vmem:[%s23602_s18 + $0xa88] ss:$16 sps:$4 sm:$0xff]   ;;  %v22380_v57 = vld [vmem:[%s23602_s18 + $0xaa4] ss:$16 sps:$4 sm:$0xff]  }
 0xb99   : > { %15317 = vmatprep.subr.bf16.mxu1 %v22293_v34  ;;  %v22378_v34 = vld [vmem:[%s23602_s18 + $0xaa0] ss:$16 sps:$4 sm:$0xff]  }
 0xb9b   : > { %15212 = vmatpush1.bf16.msra.mxu0 %v22288_v39  ;;  %v22381_v39 = vld [vmem:[%s23602_s18 + $0xaa8] ss:$16 sps:$4 sm:$0xff]  }
 0xb9c   : > { %15318 = vmatpush1.bf16.msra.mxu1 %v22291_v40  ;;  %15213 = vmatprep.subr.bf16.mxu0 %v22296_v29  ;;  %v22386_v40 = vld [vmem:[%s23602_s18 + $0xac4] ss:$16 sps:$4 sm:$0xff]   ;;  %v22389_v29 = vld [vmem:[%s23602_s18 + $0xacc] ss:$16 sps:$4 sm:$0xff]  }
 0xb9d   : > { %15319 = vmatprep.subr.bf16.mxu1 %v22299_v44  ;;  %v22384_v44 = vld [vmem:[%s23602_s18 + $0xac0] ss:$16 sps:$4 sm:$0xff]  }
 0xb9f   : > { %15214 = vmatpush1.bf16.msra.mxu0 %v22294_v16  ;;  %v22387_v16 = vld [vmem:[%s23602_s18 + $0xac8] ss:$16 sps:$4 sm:$0xff]  }
 0xba0   : > { %15320 = vmatpush1.bf16.msra.mxu1 %v22297_v45  ;;  %15215 = vmatprep.subr.bf16.mxu0 %v22302_v0  ;;  %v22392_v45 = vld [vmem:[%s23602_s18 + $0xae4] ss:$16 sps:$4 sm:$0xff]   ;;  %v22395_v0 = vld [vmem:[%s23602_s18 + $0xaec] ss:$16 sps:$4 sm:$0xff]  }
 0xba1   : > { %15321 = vmatprep.subr.bf16.mxu1 %v22305_v26  ;;  %v22390_v26 = vld [vmem:[%s23602_s18 + $0xae0] ss:$16 sps:$4 sm:$0xff]  }
 0xba3   : > { %15216 = vmatpush1.bf16.msra.mxu0 %v22300_v42  ;;  %v22393_v42 = vld [vmem:[%s23602_s18 + $0xae8] ss:$16 sps:$4 sm:$0xff]  }
 0xba4   : > { %15322 = vmatpush1.bf16.msra.mxu1 %v22303_v20  ;;  %15217 = vmatprep.subr.bf16.mxu0 %v22308_v50  ;;  %v22398_v20 = vld [vmem:[%s23602_s18 + $0xb04] ss:$16 sps:$4 sm:$0xff]   ;;  %v22401_v50 = vld [vmem:[%s23602_s18 + $0xb0c] ss:$16 sps:$4 sm:$0xff]  }
 0xba5   : > { %15323 = vmatprep.subr.bf16.mxu1 %v22311_v53  ;;  %v22396_v53 = vld [vmem:[%s23602_s18 + $0xb00] ss:$16 sps:$4 sm:$0xff]  }
 0xba7   : > { %15218 = vmatpush1.bf16.msra.mxu0 %v22306_v54  ;;  %v22399_v54 = vld [vmem:[%s23602_s18 + $0xb08] ss:$16 sps:$4 sm:$0xff]  }
 0xba8   : > { %15324 = vmatpush1.bf16.msra.mxu1 %v22309_v36  ;;  %15219 = vmatprep.subr.bf16.mxu0 %v22314_v3  ;;  %v22404_v36 = vld [vmem:[%s23602_s18 + $0xb24] ss:$16 sps:$4 sm:$0xff]   ;;  %v22407_v3 = vld [vmem:[%s23602_s18 + $0xb2c] ss:$16 sps:$4 sm:$0xff]  }
 0xba9   : > { %15325 = vmatprep.subr.bf16.mxu1 %v22317_v38  ;;  %v22402_v38 = vld [vmem:[%s23602_s18 + $0xb20] ss:$16 sps:$4 sm:$0xff]  }
 0xbab   : > { %15220 = vmatpush1.bf16.msra.mxu0 %v22312_v28  ;;  %v22405_v28 = vld [vmem:[%s23602_s18 + $0xb28] ss:$16 sps:$4 sm:$0xff]  }
 0xbac   : > { %15326 = vmatpush1.bf16.msra.mxu1 %v22315_v2  ;;  %15221 = vmatprep.subr.bf16.mxu0 %v22320_v8  ;;  %v22410_v2 = vld [vmem:[%s23602_s18 + $0xb44] ss:$16 sps:$4 sm:$0xff]   ;;  %v22413_v8 = vld [vmem:[%s23602_s18 + $0xb4c] ss:$16 sps:$4 sm:$0xff]  }
 0xbad   : > { %15327 = vmatprep.subr.bf16.mxu1 %v22323_v7  ;;  %v22408_v7 = vld [vmem:[%s23602_s18 + $0xb40] ss:$16 sps:$4 sm:$0xff]  }
 0xbaf   : > { %15222 = vmatpush1.bf16.msra.mxu0 %v22318_v6  ;;  %v22411_v6 = vld [vmem:[%s23602_s18 + $0xb48] ss:$16 sps:$4 sm:$0xff]  }
 0xbb0   : > { %15328 = vmatpush1.bf16.msra.mxu1 %v22321_v5  ;;  %15223 = vmatprep.subr.bf16.mxu0 %v22326_v31  ;;  %v22416_v5 = vld [vmem:[%s23602_s18 + $0xb64] ss:$16 sps:$4 sm:$0xff]   ;;  %v22419_v31 = vld [vmem:[%s23602_s18 + $0xb6c] ss:$16 sps:$4 sm:$0xff]  }
 0xbb1   : > { %15329 = vmatprep.subr.bf16.mxu1 %v22329_v11  ;;  %v22414_v11 = vld [vmem:[%s23602_s18 + $0xb60] ss:$16 sps:$4 sm:$0xff]  }
 0xbb3   : > { %15224 = vmatpush1.bf16.msra.mxu0 %v22324_v10  ;;  %v22417_v10 = vld [vmem:[%s23602_s18 + $0xb68] ss:$16 sps:$4 sm:$0xff]  }
 0xbb4   : > { %15330 = vmatpush1.bf16.msra.mxu1 %v22327_v13  ;;  %15225 = vmatprep.subr.bf16.mxu0 %v22332_v15  ;;  %v22422_v13 = vld [vmem:[%s23602_s18 + $0xb84] ss:$16 sps:$4 sm:$0xff]   ;;  %v22425_v15 = vld [vmem:[%s23602_s18 + $0xb8c] ss:$16 sps:$4 sm:$0xff]  }
 0xbb5   : > { %15331 = vmatprep.subr.bf16.mxu1 %v22335_v19  ;;  %v22420_v19 = vld [vmem:[%s23602_s18 + $0xb80] ss:$16 sps:$4 sm:$0xff]  }
 0xbb7   : > { %15226 = vmatpush1.bf16.msra.mxu0 %v22330_v24  ;;  %v22423_v24 = vld [vmem:[%s23602_s18 + $0xb88] ss:$16 sps:$4 sm:$0xff]  }
 0xbb8   : > { %15332 = vmatpush1.bf16.msra.mxu1 %v22333_v21  ;;  %15227 = vmatprep.subr.bf16.mxu0 %v22338_v51  ;;  %v22428_v21 = vld [vmem:[%s23602_s18 + $0xba4] ss:$16 sps:$4 sm:$0xff]   ;;  %v22431_v51 = vld [vmem:[%s23602_s18 + $0xbac] ss:$16 sps:$4 sm:$0xff]  }
 0xbb9   : > { %15333 = vmatprep.subr.bf16.mxu1 %v22341_v18  ;;  %v22426_v18 = vld [vmem:[%s23602_s18 + $0xba0] ss:$16 sps:$4 sm:$0xff]  }
 0xbbb   : > { %15228 = vmatpush1.bf16.msra.mxu0 %v22336_v23  ;;  %v22429_v23 = vld [vmem:[%s23602_s18 + $0xba8] ss:$16 sps:$4 sm:$0xff]  }
 0xbbc   : > { %15334 = vmatpush1.bf16.msra.mxu1 %v22339_v27  ;;  %15229 = vmatprep.subr.bf16.mxu0 %v22344_v33  ;;  %v22434_v27 = vld [vmem:[%s23602_s18 + $0xbc4] ss:$16 sps:$4 sm:$0xff]   ;;  %v22437_v33 = vld [vmem:[%s23602_s18 + $0xbcc] ss:$16 sps:$4 sm:$0xff]  }
 0xbbd   : > { %15335 = vmatprep.subr.bf16.mxu1 %v22347_v52  ;;  %v22432_v52 = vld [vmem:[%s23602_s18 + $0xbc0] ss:$16 sps:$4 sm:$0xff]  }
 0xbbf   : > { %15230 = vmatpush1.bf16.msra.mxu0 %v22342_v9  ;;  %v22435_v9 = vld [vmem:[%s23602_s18 + $0xbc8] ss:$16 sps:$4 sm:$0xff]  }
 0xbc0   : > { %15336 = vmatpush1.bf16.msra.mxu1 %v22345_v30  ;;  %15252 = vmatprep.subr.bf16.mxu0 %v22350_v55  ;;  %v22440_v30 = vld [vmem:[%s23602_s18 + $0xbe4] ss:$16 sps:$4 sm:$0xff]   ;;  %v22443_v55 = vld [vmem:[%s23602_s18 + $0xbec] ss:$16 sps:$4 sm:$0xff]  }
 0xbc1   : > { %15358 = vmatprep.subr.bf16.mxu1 %v22353_v32  ;;  %v22438_v32 = vld [vmem:[%s23602_s18 + $0xbe0] ss:$16 sps:$4 sm:$0xff]  }
 0xbc2   : > { %15232 = vmatmul.mubr.bf16.vlgmr.msra.gmra.mrb[16].mxu0 %v28079_v22 }
 0xbc3   : > { %15338 = vmatmul.mubr.bf16.vlgmr.msra.gmra.mrb[16].mxu1 %v28079_v22  ;;  %15241 = vmatprep.mubr.bf16.mxu0 %v28111_v46  ;;  %v22363_v22 = vld [vmem:[%s23602_s18 + $0xa48] ss:$16 sps:$4 sm:$0xff]  }
 0xbc4   : > { %15253 = vmatpush1.bf16.msra.mxu0 %v22348_v47  ;;  %15347 = vmatprep.mubr.bf16.mxu1 %v28111_v46  ;;  %v22371_v46 = vld [vmem:[%s23602_s18 + $0xa6c] ss:$16 sps:$4 sm:$0xff]   ;;  %v22441_v47 = vld [vmem:[%s23602_s18 + $0xbe8] ss:$16 sps:$4 sm:$0xff]  }
 0xbc5   : > { %15359 = vmatpush1.bf16.msra.mxu1 %v22351_v59  ;;  %15254 = vmatprep.subr.bf16.mxu0 %v22356_v63  ;;  %v22446_v59 = vld [vmem:[%s23600_s11 + $0x4] ss:$16 sps:$4 sm:$0xff]   ;;  %v22449_v63 = vld [vmem:[%s23600_s11 + $0xc] ss:$16 sps:$4 sm:$0xff]  }
 0xbc6   : > { %15360 = vmatprep.subr.bf16.mxu1 %v22359_v60  ;;  %v22444_v60 = vld [vmem:[%s23600_s11] ss:$16 sps:$4 sm:$0xff]  }
 0xbc8   : > { %15255 = vmatpush1.bf16.msra.mxu0 %v22354_v41  ;;  %v22447_v41 = vld [vmem:[%s23600_s11 + $0x8] ss:$16 sps:$4 sm:$0xff]  }
 0xbc9   : > { %15361 = vmatpush1.bf16.msra.mxu1 %v22357_v56  ;;  %15256 = vmatprep.subr.bf16.mxu0 %v22362_v4  ;;  %v22452_v56 = vld [vmem:[%s23600_s11 + $0x24] ss:$16 sps:$4 sm:$0xff]   ;;  %v22455_v4 = vld [vmem:[%s23600_s11 + $0x2c] ss:$16 sps:$4 sm:$0xff]  }
 0xbca   : > { %15242 = vmatmul.mubr.bf16.gmra.mrb[20].mxu0 %v28109_v17  ;;  %15362 = vmatprep.subr.bf16.mxu1 %v22365_v61  ;;  %v22450_v61 = vld [vmem:[%s23600_s11 + $0x20] ss:$16 sps:$4 sm:$0xff]  }
 0xbcb   : > { %15348 = vmatmul.mubr.bf16.gmra.mrb[20].mxu1 %v28109_v17  ;;  %15284 = vmatprep.mubr.bf16.mxu0 %v28089_v48  ;;  %v22372_v17 = vld [vmem:[%s23602_s18 + $0xa80] ss:$16 sps:$4 sm:$0xff]  }
 0xbcc   : > { %15257 = vmatpush1.bf16.msra.mxu0 %v22360_v35  ;;  %15390 = vmatprep.mubr.bf16.mxu1 %v28089_v48  ;;  %v22383_v48 = vld [vmem:[%s23602_s18 + $0xaac] ss:$16 sps:$4 sm:$0xff]   ;;  %v22453_v35 = vld [vmem:[%s23600_s11 + $0x28] ss:$16 sps:$4 sm:$0xff]  }
 0xbcd   : > { %15363 = vmatpush1.bf16.msra.mxu1 %v22363_v22  ;;  %15258 = vmatprep.subr.bf16.mxu0 %v22368_v62  ;;  %v22458_v22 = vld [vmem:[%s23600_s11 + $0x44] ss:$16 sps:$4 sm:$0xff]   ;;  %v22461_v62 = vld [vmem:[%s23600_s11 + $0x4c] ss:$16 sps:$4 sm:$0xff]  }
 0xbce   : > { %15364 = vmatprep.subr.bf16.mxu1 %v22371_v46  ;;  %v22456_v46 = vld [vmem:[%s23600_s11 + $0x40] ss:$16 sps:$4 sm:$0xff]  }
 0xbd0   : > { %15259 = vmatpush1.bf16.msra.mxu0 %v22366_v1  ;;  %v22467_v1 = vld [vmem:[%s23600_s11 + $0x6c] ss:$16 sps:$4 sm:$0xff]  }
 0xbd1   : > { %15365 = vmatpush1.bf16.msra.mxu1 %v22369_v49  ;;  %15260 = vmatprep.subr.bf16.mxu0 %v22374_v12  ;;  %v22462_v49 = vld [vmem:[%s23600_s11 + $0x60] ss:$16 sps:$4 sm:$0xff]   ;;  %v22465_v12 = vld [vmem:[%s23600_s11 + $0x68] ss:$16 sps:$4 sm:$0xff]  }
 0xbd2   : > { %15366 = vmatprep.subr.bf16.mxu1 %v22377_v25  ;;  %v22470_v25 = vld [vmem:[%s23600_s11 + $0x84] ss:$16 sps:$4 sm:$0xff]  }
 0xbd4   : > { %15261 = vmatpush1.bf16.msra.mxu0 %v22372_v17  ;;  %v22473_v17 = vld [vmem:[%s23600_s11 + $0x8c] ss:$16 sps:$4 sm:$0xff]  }
 0xbd5   : > { %15367 = vmatpush1.bf16.msra.mxu1 %v22375_v37  ;;  %15262 = vmatprep.subr.bf16.mxu0 %v22380_v57  ;;  %v22468_v37 = vld [vmem:[%s23600_s11 + $0x80] ss:$16 sps:$4 sm:$0xff]   ;;  %v22471_v57 = vld [vmem:[%s23600_s11 + $0x88] ss:$16 sps:$4 sm:$0xff]  }
 0xbd6   : > { %15368 = vmatprep.subr.bf16.mxu1 %v22383_v48  ;;  %v22479_v48 = vld [vmem:[%s23600_s11 + $0xac] ss:$16 sps:$4 sm:$0xff]  }
 0xbd8   : > { %15263 = vmatpush1.bf16.msra.mxu0 %v22378_v34  ;;  %v22474_v34 = vld [vmem:[%s23600_s11 + $0xa0] ss:$16 sps:$4 sm:$0xff]  }
 0xbd9   : > { %15369 = vmatpush1.bf16.msra.mxu1 %v22381_v39  ;;  %15264 = vmatprep.subr.bf16.mxu0 %v22386_v40  ;;  %v22477_v39 = vld [vmem:[%s23600_s11 + $0xa8] ss:$16 sps:$4 sm:$0xff]   ;;  %v22482_v40 = vld [vmem:[%s23600_s11 + $0xc4] ss:$16 sps:$4 sm:$0xff]  }
 0xbda   : > { %15370 = vmatprep.subr.bf16.mxu1 %v22389_v29  ;;  %v22485_v29 = vld [vmem:[%s23600_s11 + $0xcc] ss:$16 sps:$4 sm:$0xff]  }
 0xbdc   : > { %15265 = vmatpush1.bf16.msra.mxu0 %v22384_v44  ;;  %v22480_v44 = vld [vmem:[%s23600_s11 + $0xc0] ss:$16 sps:$4 sm:$0xff]  }
 0xbdd   : > { %15371 = vmatpush1.bf16.msra.mxu1 %v22387_v16  ;;  %15266 = vmatprep.subr.bf16.mxu0 %v22392_v45  ;;  %v22483_v16 = vld [vmem:[%s23600_s11 + $0xc8] ss:$16 sps:$4 sm:$0xff]   ;;  %v22488_v45 = vld [vmem:[%s23600_s11 + $0xe4] ss:$16 sps:$4 sm:$0xff]  }
 0xbde   : > { %15372 = vmatprep.subr.bf16.mxu1 %v22395_v0  ;;  %v22491_v0 = vld [vmem:[%s23600_s11 + $0xec] ss:$16 sps:$4 sm:$0xff]  }
 0xbe0   : > { %15267 = vmatpush1.bf16.msra.mxu0 %v22390_v26  ;;  %v22486_v26 = vld [vmem:[%s23600_s11 + $0xe0] ss:$16 sps:$4 sm:$0xff]  }
 0xbe1   : > { %15373 = vmatpush1.bf16.msra.mxu1 %v22393_v42  ;;  %15268 = vmatprep.subr.bf16.mxu0 %v22398_v20  ;;  %v22489_v42 = vld [vmem:[%s23600_s11 + $0xe8] ss:$16 sps:$4 sm:$0xff]   ;;  %v15429_v20 = vlaneseq }
 0xbe2   : > { %15374 = vmatprep.subr.bf16.mxu1 %v22401_v50 }
 0xbe3   : > { %v28321_v50 = vshrl.u32 %v15429_v20, 7 }
 0xbe4   : > { %15269 = vmatpush1.bf16.msra.mxu0 %v22396_v53 }
 0xbe5   : > { %15375 = vmatpush1.bf16.msra.mxu1 %v22399_v54  ;;  %15270 = vmatprep.subr.bf16.mxu0 %v22404_v36  ;;  %v15439_v53 = vsub.s32 2, %v28321_v50  ;;  %v28329_v54 = vld [vmem:[%s1303_s30] sm:$0xf] }
 0xbe6   : > { %15376 = vmatprep.subr.bf16.mxu1 %v22407_v3  ;;  %v22494_v3 = vld [vmem:[%s23600_s11 + $0x104] ss:$16 sps:$4 sm:$0xff]  }
 0xbe7   : > { %v28334_v36 = vrot.slane %v28329_v54, %v15439_v53 }
 0xbe8   : > { %15271 = vmatpush1.bf16.msra.mxu0 %v22402_v38  ;;  %v22497_v38 = vld [vmem:[%s23600_s11 + $0x10c] ss:$16 sps:$4 sm:$0xff]  }
 0xbe9   : > { %15377 = vmatpush1.bf16.msra.mxu1 %v22405_v28  ;;  %15272 = vmatprep.subr.bf16.mxu0 %v22410_v2  ;;  %v22492_v28 = vld [vmem:[%s23600_s11 + $0x100] ss:$16 sps:$4 sm:$0xff]   ;;  %v22495_v2 = vld [vmem:[%s23600_s11 + $0x108] ss:$16 sps:$4 sm:$0xff]  }
 0xbea   : > { %15378 = vmatprep.subr.bf16.mxu1 %v22413_v8  ;;  %v22500_v8 = vld [vmem:[%s23600_s11 + $0x124] ss:$16 sps:$4 sm:$0xff]  }
 0xbec   : > { %15273 = vmatpush1.bf16.msra.mxu0 %v22408_v7  ;;  %v22503_v7 = vld [vmem:[%s23600_s11 + $0x12c] ss:$16 sps:$4 sm:$0xff]  }
 0xbed   : > { %15379 = vmatpush1.bf16.msra.mxu1 %v22411_v6  ;;  %15274 = vmatprep.subr.bf16.mxu0 %v22416_v5  ;;  %v22498_v6 = vld [vmem:[%s23600_s11 + $0x120] ss:$16 sps:$4 sm:$0xff]   ;;  %v22501_v5 = vld [vmem:[%s23600_s11 + $0x128] ss:$16 sps:$4 sm:$0xff]  }
 0xbee   : > { %15380 = vmatprep.subr.bf16.mxu1 %v22419_v31  ;;  %v22506_v31 = vld [vmem:[%s23600_s11 + $0x144] ss:$16 sps:$4 sm:$0xff]  }
 0xbf0   : > { %15275 = vmatpush1.bf16.msra.mxu0 %v22414_v11  ;;  %v22509_v11 = vld [vmem:[%s23600_s11 + $0x14c] ss:$16 sps:$4 sm:$0xff]  }
 0xbf1   : > { %15381 = vmatpush1.bf16.msra.mxu1 %v22417_v10  ;;  %15276 = vmatprep.subr.bf16.mxu0 %v22422_v13  ;;  %v22504_v10 = vld [vmem:[%s23600_s11 + $0x140] ss:$16 sps:$4 sm:$0xff]   ;;  %v22507_v13 = vld [vmem:[%s23600_s11 + $0x148] ss:$16 sps:$4 sm:$0xff]  }
 0xbf2   : > { %15382 = vmatprep.subr.bf16.mxu1 %v22425_v15  ;;  %v22512_v15 = vld [vmem:[%s23600_s11 + $0x164] ss:$16 sps:$4 sm:$0xff]  }
 0xbf4   : > { %15277 = vmatpush1.bf16.msra.mxu0 %v22420_v19  ;;  %v22515_v19 = vld [vmem:[%s23600_s11 + $0x16c] ss:$16 sps:$4 sm:$0xff]  }
 0xbf5   : > { %15383 = vmatpush1.bf16.msra.mxu1 %v22423_v24  ;;  %15278 = vmatprep.subr.bf16.mxu0 %v22428_v21  ;;  %v22510_v24 = vld [vmem:[%s23600_s11 + $0x160] ss:$16 sps:$4 sm:$0xff]   ;;  %v22513_v21 = vld [vmem:[%s23600_s11 + $0x168] ss:$16 sps:$4 sm:$0xff]  }
 0xbf6   : > { %15384 = vmatprep.subr.bf16.mxu1 %v22431_v51  ;;  %v22518_v51 = vld [vmem:[%s23600_s11 + $0x184] ss:$16 sps:$4 sm:$0xff]  }
 0xbf8   : > { %15279 = vmatpush1.bf16.msra.mxu0 %v22426_v18  ;;  %v22521_v18 = vld [vmem:[%s23600_s11 + $0x18c] ss:$16 sps:$4 sm:$0xff]  }
 0xbf9   : > { %15385 = vmatpush1.bf16.msra.mxu1 %v22429_v23  ;;  %15280 = vmatprep.subr.bf16.mxu0 %v22434_v27  ;;  %v22516_v23 = vld [vmem:[%s23600_s11 + $0x180] ss:$16 sps:$4 sm:$0xff]   ;;  %v22519_v27 = vld [vmem:[%s23600_s11 + $0x188] ss:$16 sps:$4 sm:$0xff]  }
 0xbfa   : > { %15386 = vmatprep.subr.bf16.mxu1 %v22437_v33  ;;  %v22524_v33 = vld [vmem:[%s23600_s11 + $0x1a4] ss:$16 sps:$4 sm:$0xff]  }
 0xbfc   : > { %15281 = vmatpush1.bf16.msra.mxu0 %v22432_v52  ;;  %v22527_v52 = vld [vmem:[%s23600_s11 + $0x1ac] ss:$16 sps:$4 sm:$0xff]  }
 0xbfd   : > { %15387 = vmatpush1.bf16.msra.mxu1 %v22435_v9  ;;  %15282 = vmatprep.subr.bf16.mxu0 %v22440_v30  ;;  %v22522_v9 = vld [vmem:[%s23600_s11 + $0x1a0] ss:$16 sps:$4 sm:$0xff]   ;;  %v22525_v30 = vld [vmem:[%s23600_s11 + $0x1a8] ss:$16 sps:$4 sm:$0xff]  }
 0xbfe   : > { %15388 = vmatprep.subr.bf16.mxu1 %v22443_v55  ;;  %v22530_v55 = vld [vmem:[%s23600_s11 + $0x1c4] ss:$16 sps:$4 sm:$0xff]  }
 0xc00   : > { %15283 = vmatpush1.bf16.msra.mxu0 %v22438_v32  ;;  %v22533_v32 = vld [vmem:[%s23600_s11 + $0x1cc] ss:$16 sps:$4 sm:$0xff]  }
 0xc01   : > { %15389 = vmatpush1.bf16.msra.mxu1 %v22441_v47  ;;  %16326 = vmatprep.subr.bf16.mxu0 %v22446_v59  ;;  %v22528_v47 = vld [vmem:[%s23600_s11 + $0x1c0] ss:$16 sps:$4 sm:$0xff]   ;;  %v22531_v59 = vld [vmem:[%s23600_s11 + $0x1c8] ss:$16 sps:$4 sm:$0xff]  }
 0xc02   : > { %16408 = vmatprep.subr.bf16.mxu1 %v22449_v63  ;;  %v22534_v63 = vld [vmem:[%s23600_s11 + $0x1e0] ss:$16 sps:$4 sm:$0xff]  }
 0xc03   : > { %15285 = vmatmul.mubr.bf16.vlgmr.msra.gmra.mrb[16].mxu0 %v28085_v58 }
 0xc04   : > { %15391 = vmatmul.mubr.bf16.vlgmr.msra.gmra.mrb[16].mxu1 %v28085_v58  ;;  %15294 = vmatprep.mubr.bf16.mxu0 %v28115_v43  ;;  %v22459_v58 = vld [vmem:[%s23600_s11 + $0x48] ss:$16 sps:$4 sm:$0xff]  }
 0xc05   : > { %15400 = vmatprep.mubr.bf16.mxu1 %v28115_v43  ;;  %16327 = vmatpush1.bf16.msra.mxu0 %v22444_v60  ;;  %v22464_v43 = vld [vmem:[%s23600_s11 + $0x64] ss:$16 sps:$4 sm:$0xff]  }
 0xc06   : > { %16409 = vmatpush1.bf16.msra.mxu1 %v22447_v41  ;;  %16328 = vmatprep.subr.bf16.mxu0 %v22452_v56  ;;  %v22536_v60 = vld [vmem:[%s23600_s11 + $0x1e4] ss:$16 sps:$4 sm:$0xff]   ;;  %v22537_v41 = vld [vmem:[%s23600_s11 + $0x1e8] ss:$16 sps:$4 sm:$0xff]   ;;  %v22539_v56 = vld [vmem:[%s23600_s11 + $0x1ec] ss:$16 sps:$4 sm:$0xff]  }
 0xc07   : > { %16410 = vmatprep.subr.bf16.mxu1 %v22455_v4  ;;  %v22542_v4 = vld [vmem:[%s23600_s11 + $0x204] ss:$16 sps:$4 sm:$0xff]  }
 0xc09   : > { %16329 = vmatpush1.bf16.msra.mxu0 %v22450_v61  ;;  %v22545_v61 = vld [vmem:[%s23600_s11 + $0x20c] ss:$16 sps:$4 sm:$0xff]  }
 0xc0a   : > { %16411 = vmatpush1.bf16.msra.mxu1 %v22453_v35  ;;  %16330 = vmatprep.subr.bf16.mxu0 %v22458_v22  ;;  %v15431_v35 = vsub.s32 0, %v28321_v50  ;;  %v15435_v22 = vsub.s32 1, %v28321_v50 }
 0xc0b   : > { %15295 = vmatmul.mubr.bf16.gmra.mrb[20].mxu0 %v28113_v14  ;;  %16412 = vmatprep.subr.bf16.mxu1 %v22461_v62  ;;  %v15443_v62 = vsub.s32 3, %v28321_v50 }
 0xc0c   : > { %15401 = vmatmul.mubr.bf16.gmra.mrb[20].mxu1 %v28113_v14  ;;  %v22476_v14 = vld [vmem:[%s23600_s11 + $0xa4] ss:$16 sps:$4 sm:$0xff]  }
 0xc0d   : > { %16331 = vmatpush1.bf16.msra.mxu0 %v22456_v46  ;;  %v15432_v46 = vrot.slane %v28329_v54, %v15431_v35 }
 0xc0e   : > { %16413 = vmatpush1.bf16.msra.mxu1 %v22459_v58  ;;  %16332 = vmatprep.subr.bf16.mxu0 %v22464_v43  ;;  %v15436_v43 = vrot.slane %v28329_v54, %v15435_v22 }
 0xc0f   : > { %16414 = vmatprep.subr.bf16.mxu1 %v22467_v1 }
 0xc11   : > { %16333 = vmatpush1.bf16.msra.mxu0 %v22462_v49 }
 0xc12   : > { %16415 = vmatpush1.bf16.msra.mxu1 %v22465_v12  ;;  %16334 = vmatprep.subr.bf16.mxu0 %v22470_v25  ;;  %v15444_v12 = vrot.slane %v28329_v54, %v15443_v62 }
 0xc13   : > { %16416 = vmatprep.subr.bf16.mxu1 %v22473_v17 }
 0xc15   : > { %16335 = vmatpush1.bf16.msra.mxu0 %v22468_v37 }
 0xc16   : > { %16417 = vmatpush1.bf16.msra.mxu1 %v22471_v57  ;;  %16336 = vmatprep.subr.bf16.mxu0 %v22476_v14 }
 0xc17   : > { %16418 = vmatprep.subr.bf16.mxu1 %v22479_v48 }
 0xc19   : > { %16337 = vmatpush1.bf16.msra.mxu0 %v22474_v34 }
 0xc1a   : > { %16419 = vmatpush1.bf16.msra.mxu1 %v22477_v39  ;;  %16338 = vmatprep.subr.bf16.mxu0 %v22482_v40 }
 0xc1b   : > { %16420 = vmatprep.subr.bf16.mxu1 %v22485_v29 }
 0xc1d   : > { %16339 = vmatpush1.bf16.msra.mxu0 %v22480_v44 }
 0xc1e   : > { %16421 = vmatpush1.bf16.msra.mxu1 %v22483_v16  ;;  %16340 = vmatprep.subr.bf16.mxu0 %v22488_v45 }
 0xc1f   : > { %16422 = vmatprep.subr.bf16.mxu1 %v22491_v0 }
 0xc21   : > { %16341 = vmatpush1.bf16.msra.mxu0 %v22486_v26 }
 0xc22   : > { %16423 = vmatpush1.bf16.msra.mxu1 %v22489_v42  ;;  %16342 = vmatprep.subr.bf16.mxu0 %v22494_v3 }
 0xc23   : > { %16424 = vmatprep.subr.bf16.mxu1 %v22497_v38 }
 0xc25   : > { %16343 = vmatpush1.bf16.msra.mxu0 %v22492_v28 }
 0xc26   : > { %16425 = vmatpush1.bf16.msra.mxu1 %v22495_v2  ;;  %16344 = vmatprep.subr.bf16.mxu0 %v22500_v8 }
 0xc27   : > { %16426 = vmatprep.subr.bf16.mxu1 %v22503_v7 }
 0xc29   : > { %16345 = vmatpush1.bf16.msra.mxu0 %v22498_v6 }
 0xc2a   : > { %16427 = vmatpush1.bf16.msra.mxu1 %v22501_v5  ;;  %16346 = vmatprep.subr.bf16.mxu0 %v22506_v31 }
 0xc2b   : > { %16428 = vmatprep.subr.bf16.mxu1 %v22509_v11 }
 0xc2d   : > { %16347 = vmatpush1.bf16.msra.mxu0 %v22504_v10 }
 0xc2e   : > { %16429 = vmatpush1.bf16.msra.mxu1 %v22507_v13  ;;  %16348 = vmatprep.subr.bf16.mxu0 %v22512_v15 }
 0xc2f   : > { %16430 = vmatprep.subr.bf16.mxu1 %v22515_v19 }
 0xc31   : > { %16349 = vmatpush1.bf16.msra.mxu0 %v22510_v24 }
 0xc32   : > { %16431 = vmatpush1.bf16.msra.mxu1 %v22513_v21  ;;  %16350 = vmatprep.subr.bf16.mxu0 %v22518_v51 }
 0xc33   : > { %16432 = vmatprep.subr.bf16.mxu1 %v22521_v18 }
 0xc35   : > { %16351 = vmatpush1.bf16.msra.mxu0 %v22516_v23 }
 0xc36   : > { %16433 = vmatpush1.bf16.msra.mxu1 %v22519_v27  ;;  %16352 = vmatprep.subr.bf16.mxu0 %v22524_v33 }
 0xc37   : > { %16434 = vmatprep.subr.bf16.mxu1 %v22527_v52 }
 0xc39   : > { %16353 = vmatpush1.bf16.msra.mxu0 %v22522_v9 }
 0xc3a   : > { %16435 = vmatpush1.bf16.msra.mxu1 %v22525_v30  ;;  %16354 = vmatprep.subr.bf16.mxu0 %v22530_v55 }
 0xc3b   : > { %16436 = vmatprep.subr.bf16.mxu1 %v22533_v32 }
 0xc3d   : > { %16355 = vmatpush1.bf16.msra.mxu0 %v22528_v47 }
 0xc3e   : > { %16437 = vmatpush1.bf16.msra.mxu1 %v22531_v59  ;;  %16356 = vmatprep.subr.bf16.mxu0 %v22536_v60 }
 0xc3f   : > { %16438 = vmatprep.subr.bf16.mxu1 %v22539_v56 }
 0xc41   : > { %16357 = vmatpush1.bf16.msra.mxu0 %v22534_v63 }
 0xc42   : > { %16439 = vmatpush1.bf16.msra.mxu1 %v22537_v41  ;;  %16367 = vmatprep.subr.bf16.mxu0 %v22542_v4 }
 0xc43   : > { %16449 = vmatprep.subr.bf16.mxu1 %v22545_v61 }
 0xcd6   : > { %v15286_v58 = vpop.f32.mrb[16].mxu0 }
 0xcd7   : > { %v15392_v1 = vpop.f32.mrb[16].mxu1  ;;  %v15288_v49 = vpop.f32.mrb[17].mxu0  ;;  %v15449_v57 = vadd.f32 %v15432_v46, %v15286_v58 }
 0xcd8   : > { %v15451_v25 = vadd.f32 %v28334_v36, %v15392_v1  ;;  %v15394_v17 = vpop.f32.mrb[17].mxu1  ;;  %v15290_v37 = vpop.f32.mrb[18].mxu0  ;;  %v15450_v39 = vadd.f32 %v15436_v43, %v15288_v49 }
 0xcd9   : > { %v15453_v14 = vadd.f32 %v15432_v46, %v15290_v37  ;;  %v15396_v48 = vpop.f32.mrb[18].mxu1  ;;  %v15292_v34 = vpop.f32.mrb[19].mxu0  ;;  %v15452_v16 = vadd.f32 %v15444_v12, %v15394_v17 }
 0xcda   : > { %v15455_v40 = vadd.f32 %v28334_v36, %v15396_v48  ;;  %v15454_v29 = vadd.f32 %v15436_v43, %v15292_v34  ;;  %v15398_v44 = vpop.f32.mrb[19].mxu1 }
 0xcdb   : > { %v15465_v45 = vmax.f32 %v15449_v57, %v15453_v14  ;;  %v15456_v0 = vadd.f32 %v15444_v12, %v15398_v44 }
 0xcdc   : > { %v15479_v26 = vmax.f32 %v15451_v25, %v15455_v40  ;;  %v15472_v42 = vmax.f32 %v15450_v39, %v15454_v29 }
 0xcdd   : > { %v15466_v20 = vrot.slane %v15465_v45, 4  ;;  %v15486_v54 = vmax.f32 %v15452_v16, %v15456_v0 }
 0xcde   : > { %v15480_v3 = vrot.slane %v15479_v26, 4  ;;  %v15473_v38 = vrot.slane %v15472_v42, 4  ;;  %v15296_v28 = vpop.f32.mrb[20].mxu0 }
 0xcdf   : > { %v15467_v2 = vmax.f32 %v15465_v45, %v15466_v20  ;;  %v15487_v8 = vrot.slane %v15486_v54, 4  ;;  %v15457_v7 = vadd.f32 %v15432_v46, %v15296_v28  ;;  %v15402_v6 = vpop.f32.mrb[20].mxu1  ;;  %v15298_v5 = vpop.f32.mrb[21].mxu0 }
 0xce0   : > { %v15481_v31 = vmax.f32 %v15479_v26, %v15480_v3  ;;  %v15474_v11 = vmax.f32 %v15472_v42, %v15473_v38  ;;  %v15459_v10 = vadd.f32 %v28334_v36, %v15402_v6  ;;  %v15458_v13 = vadd.f32 %v15436_v43, %v15298_v5  ;;  %v15404_v15 = vpop.f32.mrb[21].mxu1  ;;  %v15300_v19 = vpop.f32.mrb[22].mxu0 }
 0xce1   : > { %v15468_v24 = vrot.slane %v15467_v2, 2  ;;  %v15488_v21 = vmax.f32 %v15486_v54, %v15487_v8  ;;  %v15460_v51 = vadd.f32 %v15444_v12, %v15404_v15  ;;  %v15461_v18 = vadd.f32 %v15432_v46, %v15300_v19  ;;  %v15406_v23 = vpop.f32.mrb[22].mxu1  ;;  %v15302_v27 = vpop.f32.mrb[23].mxu0 }
 0xce2   : > { %v15482_v33 = vrot.slane %v15481_v31, 2  ;;  %v15475_v52 = vrot.slane %v15474_v11, 2  ;;  %v15463_v9 = vadd.f32 %v28334_v36, %v15406_v23  ;;  %v15462_v30 = vadd.f32 %v15436_v43, %v15302_v27  ;;  %v15408_v55 = vpop.f32.mrb[23].mxu1 }
 0xce3   : > { %v15469_v32 = vmax.f32 %v15467_v2, %v15468_v24  ;;  %v15489_v47 = vrot.slane %v15488_v21, 2  ;;  %v15493_v59 = vmax.f32 %v15457_v7, %v15461_v18  ;;  %v15464_v63 = vadd.f32 %v15444_v12, %v15408_v55 }
 0xce4   : > { %v15483_v60 = vmax.f32 %v15481_v31, %v15482_v33  ;;  %v15476_v41 = vmax.f32 %v15474_v11, %v15475_v52  ;;  %v15507_v56 = vmax.f32 %v15459_v10, %v15463_v9  ;;  %v15500_v4 = vmax.f32 %v15458_v13, %v15462_v30 }
 0xce5   : > { %v15490_v61 = vmax.f32 %v15488_v21, %v15489_v47  ;;  %v15494_v58 = vrot.slane %v15493_v59, 4  ;;  %v15514_v1 = vmax.f32 %v15460_v51, %v15464_v63  ;;  %v15470_v25 = vrot.slane %v15469_v32, 1  ;;  %v22540_v63 = vld [vmem:[%s23600_s11 + $0x200] ss:$16 sps:$4 sm:$0xff]  }
 0xce6   : > { %v15508_v46 = vrot.slane %v15507_v56, 4  ;;  %v15501_v49 = vrot.slane %v15500_v4, 4  ;;  %v15484_v57 = vrot.slane %v15483_v60, 1  ;;  %v15477_v36 = vrot.slane %v15476_v41, 1 }
 0xce7   : > { %v15495_v17 = vmax.f32 %v15493_v59, %v15494_v58  ;;  %v15515_v37 = vrot.slane %v15514_v1, 4  ;;  %v15491_v48 = vrot.slane %v15490_v61, 1  ;;  %v15471_v29 = vmax.f32 %v15469_v32, %v15470_v25  ;;  %v22557_v25 = vld [vmem:[%s23600_s11 + $0x24c] ss:$16 sps:$4 sm:$0xff]  }
 0xce8   : > { %v15509_v43 = vmax.f32 %v15507_v56, %v15508_v46  ;;  %v15502_v14 = vmax.f32 %v15500_v4, %v15501_v49  ;;  %v15485_v45 = vmax.f32 %v15483_v60, %v15484_v57  ;;  %v15478_v0 = vmax.f32 %v15476_v41, %v15477_v36  ;;  %v22543_v60 = vld [vmem:[%s23600_s11 + $0x208] ss:$16 sps:$4 sm:$0xff]   ;;  %v22548_v4 = vld [vmem:[%s23600_s11 + $0x224] ss:$16 sps:$4 sm:$0xff]   ;;  %v22563_v36 = vld [vmem:[%s23600_s11 + $0x26c] ss:$16 sps:$4 sm:$0xff]  }
 0xce9   : > { %v15496_v34 = vrot.slane %v15495_v17, 2  ;;  %v15516_v39 = vmax.f32 %v15514_v1, %v15515_v37  ;;  %v15492_v20 = vmax.f32 %v15490_v61, %v15491_v48  ;;  %v15521_v2 = vpack.c.bf16 %v15471_v29, %v15471_v29  ;;  %v22551_v61 = vld [vmem:[%s23600_s11 + $0x22c] ss:$16 sps:$4 sm:$0xff]   ;;  %v22546_v1 = vld [vmem:[%s23600_s11 + $0x220] ss:$16 sps:$4 sm:$0xff]  }
 0xcea   : > { %v15510_v12 = vrot.slane %v15509_v43, 2  ;;  %v15503_v40 = vrot.slane %v15502_v14, 2  ;;  %v15523_v6 = vpack.c.bf16 %v15485_v45, %v15485_v45  ;;  %v15522_v5 = vpack.c.bf16 %v15478_v0, %v15478_v0  ;;  %v22549_v46 = vld [vmem:[%s23600_s11 + $0x228] ss:$16 sps:$4 sm:$0xff]   ;;  %v22554_v49 = vld [vmem:[%s23600_s11 + $0x244] ss:$16 sps:$4 sm:$0xff]  }
 0xceb   : > { %v15497_v44 = vmax.f32 %v15495_v17, %v15496_v34  ;;  %v15517_v16 = vrot.slane %v15516_v39, 2  ;;  %v15524_v10 = vpack.c.bf16 %v15492_v20, %v15492_v20  ;;  %v15665_v21 = vunpack.c.l.b16 %v15521_v2  ;;  %v22552_v17 = vld [vmem:[%s23600_s11 + $0x240] ss:$16 sps:$4 sm:$0xff]   ;;  %v22555_v37 = vld [vmem:[%s23600_s11 + $0x248] ss:$16 sps:$4 sm:$0xff]  }
 0xcec   : > { %v15511_v26 = vmax.f32 %v15509_v43, %v15510_v12  ;;  %v15504_v42 = vmax.f32 %v15502_v14, %v15503_v40  ;;  %v15667_v23 = vunpack.c.l.b16 %v15523_v6  ;;  %v15666_v33 = vunpack.c.l.b16 %v15522_v5  ;;  %v22560_v57 = vld [vmem:[%s23600_s11 + $0x264] ss:$16 sps:$4 sm:$0xff]   ;;  %v22558_v43 = vld [vmem:[%s23600_s11 + $0x260] ss:$16 sps:$4 sm:$0xff]   ;;  %v22561_v14 = vld [vmem:[%s23600_s11 + $0x268] ss:$16 sps:$4 sm:$0xff]  }
 0xced   : > { %v15498_v54 = vrot.slane %v15497_v44, 1  ;;  %v15518_v3 = vmax.f32 %v15516_v39, %v15517_v16  ;;  %v15668_v30 = vunpack.c.l.b16 %v15524_v10  ;;  %v22566_v48 = vld [vmem:[%s23600_s11 + $0x284] ss:$16 sps:$4 sm:$0xff]   ;;  %v22569_v34 = vld [vmem:[%s23600_s11 + $0x28c] ss:$16 sps:$4 sm:$0xff]  }
 0xcee   : > { %v15512_v38 = vrot.slane %v15511_v26, 1  ;;  %v15505_v28 = vrot.slane %v15504_v42, 1  ;;  %v22564_v39 = vld [vmem:[%s23600_s11 + $0x280] ss:$16 sps:$4 sm:$0xff]   ;;  %v22567_v12 = vld [vmem:[%s23600_s11 + $0x288] ss:$16 sps:$4 sm:$0xff]  }
 0xcef   : > { %v15499_v8 = vmax.f32 %v15497_v44, %v15498_v54  ;;  %v15519_v7 = vrot.slane %v15518_v3, 1  ;;  %v22572_v40 = vld [vmem:[%s23600_s11 + $0x2a4] ss:$16 sps:$4 sm:$0xff]   ;;  %v22575_v29 = vld [vmem:[%s23600_s11 + $0x2ac] ss:$16 sps:$4 sm:$0xff]  }
 0xcf0   : > { %v15513_v31 = vmax.f32 %v15511_v26, %v15512_v38  ;;  %v15506_v11 = vmax.f32 %v15504_v42, %v15505_v28  ;;  %v22570_v44 = vld [vmem:[%s23600_s11 + $0x2a0] ss:$16 sps:$4 sm:$0xff]   ;;  %v22573_v16 = vld [vmem:[%s23600_s11 + $0x2a8] ss:$16 sps:$4 sm:$0xff]   ;;  %v22578_v45 = vld [vmem:[%s23600_s11 + $0x2c4] ss:$16 sps:$4 sm:$0xff]  }
 0xcf1   : > { %v15525_v13 = vpack.c.bf16 %v15499_v8, %v15499_v8  ;;  %v15520_v15 = vmax.f32 %v15518_v3, %v15519_v7  ;;  %v22581_v0 = vld [vmem:[%s23600_s11 + $0x2cc] ss:$16 sps:$4 sm:$0xff]   ;;  %v22576_v26 = vld [vmem:[%s23600_s11 + $0x2c0] ss:$16 sps:$4 sm:$0xff]   ;;  %v22579_v42 = vld [vmem:[%s23600_s11 + $0x2c8] ss:$16 sps:$4 sm:$0xff]  }
 0xcf2   : > { %v15527_v19 = vpack.c.bf16 %v15513_v31, %v15513_v31  ;;  %v15526_v24 = vpack.c.bf16 %v15506_v11, %v15506_v11  ;;  %v22584_v20 = vld [vmem:[%s23600_s11 + $0x2e4] ss:$16 sps:$4 sm:$0xff]   ;;  %v22587_v54 = vld [vmem:[%s23600_s11 + $0x2ec] ss:$16 sps:$4 sm:$0xff]   ;;  %v22582_v3 = vld [vmem:[%s23600_s11 + $0x2e0] ss:$16 sps:$4 sm:$0xff]  }
 0xcf3   : > { %v15669_v51 = vunpack.c.l.b16 %v15525_v13  ;;  %v15528_v18 = vpack.c.bf16 %v15520_v15, %v15520_v15  ;;  %v22585_v38 = vld [vmem:[%s23600_s11 + $0x2e8] ss:$16 sps:$4 sm:$0xff]   ;;  %v22590_v28 = vld [vmem:[%s23600_s11 + $0x304] ss:$16 sps:$4 sm:$0xff]   ;;  %v22593_v2 = vld [vmem:[%s23600_s11 + $0x30c] ss:$16 sps:$4 sm:$0xff]  }
 0xcf4   : > { %v15671_v27 = vunpack.c.l.b16 %v15527_v19  ;;  %v15670_v52 = vunpack.c.l.b16 %v15526_v24  ;;  %v22588_v8 = vld [vmem:[%s23600_s11 + $0x300] ss:$16 sps:$4 sm:$0xff]   ;;  %v22591_v7 = vld [vmem:[%s23600_s11 + $0x308] ss:$16 sps:$4 sm:$0xff]   ;;  %v22596_v6 = vld [vmem:[%s23600_s11 + $0x324] ss:$16 sps:$4 sm:$0xff]  }
 0xcf5   : > { %v15674_v9 = vsel %vm15673_vm2, %v15669_v51, %v15665_v21  ;;  %v15672_v55 = vunpack.c.l.b16 %v15528_v18  ;;  %v22599_v5 = vld [vmem:[%s23600_s11 + $0x32c] ss:$16 sps:$4 sm:$0xff]   ;;  %v22594_v31 = vld [vmem:[%s23600_s11 + $0x320] ss:$16 sps:$4 sm:$0xff]   ;;  %v22597_v11 = vld [vmem:[%s23600_s11 + $0x328] ss:$16 sps:$4 sm:$0xff]  }
 0xcf6   : > { %v15675_v32 = vsel %vm15673_vm2, %v15670_v52, %v15666_v33  ;;  %v28389_v47 = vsel %vm15673_vm2, %v15671_v27, %v15667_v23  ;;  %v15678_v56 = vpack.c.b16 %v15674_v9, %v15674_v9  ;;  %v22602_v10 = vld [vmem:[%s23600_s11 + $0x344] ss:$16 sps:$4 sm:$0xff]   ;;  %v22605_v13 = vld [vmem:[%s23600_s11 + $0x34c] ss:$16 sps:$4 sm:$0xff]   ;;  %v22600_v15 = vld [vmem:[%s23600_s11 + $0x340] ss:$16 sps:$4 sm:$0xff]  }
 0xcf7   : > { %v15679_v59 = vpack.c.b16 %v15675_v32, %v15675_v32  ;;  %v15677_v41 = vsel %vm15673_vm2, %v15672_v55, %v15668_v30  ;;  %v22603_v19 = vld [vmem:[%s23600_s11 + $0x348] ss:$16 sps:$4 sm:$0xff]   ;;  %v22608_v24 = vld [vmem:[%s23600_s11 + $0x364] ss:$16 sps:$4 sm:$0xff]   ;;  %v22611_v21 = vld [vmem:[%s23600_s11 + $0x36c] ss:$16 sps:$4 sm:$0xff]  }
 0xcf8   : > { %v15681_v58 = vpack.c.b16 %v15677_v41, %v15677_v41  ;;  %v22606_v51 = vld [vmem:[%s23600_s11 + $0x360] ss:$16 sps:$4 sm:$0xff]   ;;  %v22609_v18 = vld [vmem:[%s23600_s11 + $0x368] ss:$16 sps:$4 sm:$0xff]   ;;  %v22614_v23 = vld [vmem:[%s23600_s11 + $0x384] ss:$16 sps:$4 sm:$0xff]  }
 0xcf9   : > { %16358 = vmatprep.mubr.bf16.mxu0 %v15679_v59  ;;  %16440 = vmatprep.mubr.bf16.mxu1 %v15679_v59  ;;  %v22617_v27 = vld [vmem:[%s23600_s11 + $0x38c] ss:$16 sps:$4 sm:$0xff]   ;;  %v22612_v33 = vld [vmem:[%s23600_s11 + $0x380] ss:$16 sps:$4 sm:$0xff]   ;;  %v22615_v52 = vld [vmem:[%s23600_s11 + $0x388] ss:$16 sps:$4 sm:$0xff]  }
 0xcfa   : > { %16359 = vmatmul.mubr.bf16.vlgmr.msra.gmra.mrb[24].mxu0 %v15678_v56  ;;  %16441 = vmatmul.mubr.bf16.vlgmr.msra.gmra.mrb[24].mxu1 %v15678_v56  ;;  %v22620_v9 = vld [vmem:[%s23600_s11 + $0x3a4] ss:$16 sps:$4 sm:$0xff]   ;;  %v22623_v30 = vld [vmem:[%s23600_s11 + $0x3ac] ss:$16 sps:$4 sm:$0xff]   ;;  %v22618_v55 = vld [vmem:[%s23600_s11 + $0x3a0] ss:$16 sps:$4 sm:$0xff]  }
 0xcfb   : > { %16368 = vmatpush1.bf16.msra.mxu0 %v22540_v63  ;;  %16450 = vmatpush1.bf16.msra.mxu1 %v22543_v60  ;;  %v22621_v32 = vld [vmem:[%s23600_s11 + $0x3a8] ss:$16 sps:$4 sm:$0xff]   ;;  %v22626_v59 = vld [vmem:[%s23600_s11 + $0x3c4] ss:$16 sps:$4 sm:$0xff]   ;;  %v22629_v63 = vld [vmem:[%s23600_s11 + $0x3cc] ss:$16 sps:$4 sm:$0xff]  }
 0xcfc   : > { %16399 = vmatprep.mubr.bf16.mxu0 %v15681_v58  ;;  %16481 = vmatprep.mubr.bf16.mxu1 %v15681_v58  ;;  %v22624_v60 = vld [vmem:[%s23600_s11 + $0x3c0] ss:$16 sps:$4 sm:$0xff]   ;;  %v22627_v41 = vld [vmem:[%s23600_s11 + $0x3c8] ss:$16 sps:$4 sm:$0xff]   ;;  %v22632_v56 = vld [vmem:[%s23600_s11 + $0x3e4] ss:$16 sps:$4 sm:$0xff]  }
 0xcfd   : > { %16369 = vmatprep.subr.bf16.mxu0 %v22548_v4  ;;  %16451 = vmatprep.subr.bf16.mxu1 %v22551_v61  ;;  %v22635_v4 = vld [vmem:[%s23600_s11 + $0x3ec] ss:$16 sps:$4 sm:$0xff]   ;;  %v22630_v61 = vld [vmem:[%s23600_s11 + $0x3e0] ss:$16 sps:$4 sm:$0xff]   ;;  %v22633_v58 = vld [vmem:[%s23600_s11 + $0x3e8] ss:$16 sps:$4 sm:$0xff]  }
 0xcff   : > { %16370 = vmatpush1.bf16.msra.mxu0 %v22546_v1  ;;  %16452 = vmatpush1.bf16.msra.mxu1 %v22549_v46  ;;  %v15680_v1 = vpack.c.b16 %v28389_v47, %v28389_v47 }
 0xd00   : > { %16371 = vmatprep.subr.bf16.mxu0 %v22554_v49  ;;  %16453 = vmatprep.subr.bf16.mxu1 %v22557_v25 }
 0xd03   : > { %16372 = vmatpush1.bf16.msra.mxu0 %v22552_v17  ;;  %16454 = vmatpush1.bf16.msra.mxu1 %v22555_v37 }
 0xd04   : > { %16373 = vmatprep.subr.bf16.mxu0 %v22560_v57  ;;  %16455 = vmatprep.subr.bf16.mxu1 %v22563_v36 }
 0xd07   : > { %16374 = vmatpush1.bf16.msra.mxu0 %v22558_v43  ;;  %16456 = vmatpush1.bf16.msra.mxu1 %v22561_v14  ;;  %v16493_v14 = vld [vmem:[%s28519_s14] sm:$0xf] (!%p16654_p10) }
 0xd08   : > { %16375 = vmatprep.subr.bf16.mxu0 %v22566_v48  ;;  %16457 = vmatprep.subr.bf16.mxu1 %v22569_v34  ;;  %v16498_v47 = vrot.slane (!%p16654_p10), %v16493_v14, %v15431_v35  ;;  %v16502_v48 = vrot.slane (!%p16654_p10), %v16493_v14, %v15435_v22  ;;  %v16506_v34 = vrot.slane (!%p16654_p10), %v16493_v14, %v15439_v53 }
 0xd0b   : > { %16376 = vmatpush1.bf16.msra.mxu0 %v22564_v39  ;;  %16458 = vmatpush1.bf16.msra.mxu1 %v22567_v12  ;;  %v16510_v39 = vrot.slane (!%p16654_p10), %v16493_v14, %v15443_v62  ;;  %v22695_v12 = vmov (!%p16654_p10), 1983009808  }
 0xd0c   : > { %16377 = vmatprep.subr.bf16.mxu0 %v22572_v40  ;;  %16459 = vmatprep.subr.bf16.mxu1 %v22575_v29  ;;  %v16526_v40 = vunpack.c.l.s4 (!%p16654_p10), %v22695_v12 }
 0xd0f   : > { %16378 = vmatpush1.bf16.msra.mxu0 %v22570_v44  ;;  %16460 = vmatpush1.bf16.msra.mxu1 %v22573_v16 }
 0xd10   : > { %16379 = vmatprep.subr.bf16.mxu0 %v22578_v45  ;;  %16461 = vmatprep.subr.bf16.mxu1 %v22581_v0  ;;  %v16527_v0 = vunpack.c.0.s8 (!%p16654_p10), %v16526_v40 }
 0xd12   : > { %v16530_v35 = vsub.s32 (!%p16654_p10), %v16527_v0, %v28321_v50 }
 0xd13   : > { %16380 = vmatpush1.bf16.msra.mxu0 %v22576_v26  ;;  %16462 = vmatpush1.bf16.msra.mxu1 %v22579_v42 }
 0xd14   : > { %16381 = vmatprep.subr.bf16.mxu0 %v22584_v20  ;;  %16463 = vmatprep.subr.bf16.mxu1 %v22587_v54 }
 0xd17   : > { %16382 = vmatpush1.bf16.msra.mxu0 %v22582_v3  ;;  %16464 = vmatpush1.bf16.msra.mxu1 %v22585_v38 }
 0xd18   : > { %16383 = vmatprep.subr.bf16.mxu0 %v22590_v28  ;;  %16465 = vmatprep.subr.bf16.mxu1 %v22593_v2 }
 0xd1b   : > { %16384 = vmatpush1.bf16.msra.mxu0 %v22588_v8  ;;  %16466 = vmatpush1.bf16.msra.mxu1 %v22591_v7 }
 0xd1c   : > { %16385 = vmatprep.subr.bf16.mxu0 %v22596_v6  ;;  %16467 = vmatprep.subr.bf16.mxu1 %v22599_v5 }
 0xd1f   : > { %16386 = vmatpush1.bf16.msra.mxu0 %v22594_v31  ;;  %16468 = vmatpush1.bf16.msra.mxu1 %v22597_v11 }
 0xd20   : > { %16387 = vmatprep.subr.bf16.mxu0 %v22602_v10  ;;  %16469 = vmatprep.subr.bf16.mxu1 %v22605_v13 }
 0xd23   : > { %16388 = vmatpush1.bf16.msra.mxu0 %v22600_v15  ;;  %16470 = vmatpush1.bf16.msra.mxu1 %v22603_v19 }
 0xd24   : > { %16389 = vmatprep.subr.bf16.mxu0 %v22608_v24  ;;  %16471 = vmatprep.subr.bf16.mxu1 %v22611_v21 }
 0xd27   : > { %16390 = vmatpush1.bf16.msra.mxu0 %v22606_v51  ;;  %16472 = vmatpush1.bf16.msra.mxu1 %v22609_v18 }
 0xd28   : > { %16391 = vmatprep.subr.bf16.mxu0 %v22614_v23  ;;  %16473 = vmatprep.subr.bf16.mxu1 %v22617_v27 }
 0xd2b   : > { %16392 = vmatpush1.bf16.msra.mxu0 %v22612_v33  ;;  %16474 = vmatpush1.bf16.msra.mxu1 %v22615_v52 }
 0xd2c   : > { %16393 = vmatprep.subr.bf16.mxu0 %v22620_v9  ;;  %16475 = vmatprep.subr.bf16.mxu1 %v22623_v30 }
 0xd2f   : > { %16394 = vmatpush1.bf16.msra.mxu0 %v22618_v55  ;;  %16476 = vmatpush1.bf16.msra.mxu1 %v22621_v32 }
 0xd30   : > { %16395 = vmatprep.subr.bf16.mxu0 %v22626_v59  ;;  %16477 = vmatprep.subr.bf16.mxu1 %v22629_v63 }
 0xd33   : > { %16396 = vmatpush1.bf16.msra.mxu0 %v22624_v60  ;;  %16478 = vmatpush1.bf16.msra.mxu1 %v22627_v41 }
 0xd34   : > { %16397 = vmatprep.subr.bf16.mxu0 %v22632_v56  ;;  %16479 = vmatprep.subr.bf16.mxu1 %v22635_v4 }
 0xd37   : > { %16398 = vmatpush1.bf16.msra.mxu0 %v22630_v61  ;;  %16480 = vmatpush1.bf16.msra.mxu1 %v22633_v58 }
 0xd3a   : > { %16400 = vmatmul.mubr.bf16.vlgmr.msra.gmra.mrb[24].mxu0 %v15680_v1  ;;  %16482 = vmatmul.mubr.bf16.vlgmr.msra.gmra.mrb[24].mxu1 %v15680_v1 }
 0xe0a   : > { %16492 = sbr.rel (%p16654_p10) target bundleno = 3608 (0xe18), region = 111 }
 0xe0d   : > { %v16401_v46 = vpop.f32.mrb[24].mxu0  ;;  %v16483_v49 = vpop.f32.mrb[24].mxu1 }
 0xe0e   : > { %v16403_v25 = vpop.f32.mrb[25].mxu0  ;;  %v16485_v17 = vpop.f32.mrb[25].mxu1  ;;  %v16515_v29 = vadd.f32 (!%p16654_p10), %v16498_v47, %v16401_v46  ;;  %v16517_v16 = vadd.f32 (!%p16654_p10), %v16506_v34, %v16483_v49 }
 0xe0f   : > { %v16405_v37 = vpop.f32.mrb[26].mxu0  ;;  %v16487_v57 = vpop.f32.mrb[26].mxu1  ;;  %v16516_v44 = vadd.f32 (!%p16654_p10), %v16502_v48, %v16403_v25  ;;  %v16518_v45 = vadd.f32 (!%p16654_p10), %v16510_v39, %v16485_v17 }
 0xe10   : > { %v16406_v36 = vpop.f32.mrb[27].mxu0  ;;  %v16488_v43 = vpop.f32.mrb[27].mxu1 }
 0xe11   : > { %v16523_v26 = vcombine.low %v16515_v29, %v16516_v44  ;;  %v16524_v42 = vcombine.low %v16517_v16, %v16518_v45 }
 0xe13   : > { %v16531_v20 = vrot.slane %v16523_v26, %v16530_v35  ;;  %v16538_v54 = vrot.slane %v16524_v42, %v16530_v35 }
 0xe15   : > { %v16539_v22 = vcombine.low %v16531_v20, %v16538_v54 }
 0xe17   : > { %16541 = vst [vmem:[#allocation4] sm:$0xff] %v16539_v22 }
 0xe18 PF: > { %p19548_p11 = scmp.eq.s32.totalorder %s22794_s21, 0 }
 0xe19   : > { %v22696_v53 = vmov (!%p19548_p11), 1983009808   ;;  %v16551_v3 = vcombine.low (!%p19548_p11), %v16401_v46, %v16403_v25  ;;  %v16552_v38 = vcombine.low (!%p19548_p11), %v16483_v49, %v16485_v17 }
 0xe1a   : > { %16545 = sbr.rel (%p19548_p11) target bundleno = 3623 (0xe27), region = 115  ;;  %v16554_v62 = vunpack.c.l.s4 (!%p19548_p11), %v22696_v53 }
 0xe1c   : > { %v16555_v28 = vunpack.c.0.s8 (!%p19548_p11), %v16554_v62 }
 0xe1e   : > { %v16558_v2 = vsub.s32 (!%p19548_p11), %v16555_v28, %v28321_v50  ;;  %v16546_v6 = vld [vmem:[#allocation4] sm:$0xff] (!%p19548_p11) }
 0xe20   : > { %v16559_v8 = vrot.slane (!%p19548_p11), %v16551_v3, %v16558_v2  ;;  %v16566_v7 = vrot.slane (!%p19548_p11), %v16552_v38, %v16558_v2 }
 0xe22   : > { %v16567_v5 = vcombine.low %v16559_v8, %v16566_v7 }
 0xe24   : > { %v16569_v31 = vadd.f32 %v16567_v5, %v16546_v6 }
 0xe26   : > { %16570 = vst [vmem:[#allocation4] sm:$0xff] %v16569_v31 }
 0xe27 PF: > { %p19945_p12 = scmp.eq.s32.totalorder %s22794_s21, 3  ;;  %s22697_s30 = smov [#allocation4]  }
 0xe28   : > { %s16578_s28 = sshll.u32 %s22697_s30, 4  ;;  %s16579_s28 = int_to_ptr.vmem [resolvable:$true] %s16578_s28 }
 0xe29   : > { %s22639_s27 = scalar_lea.vmem %s16579_s28, 128  ;;  %p22646_p2 = scmp.lt.s32.totalorder %s16579_s28, %s16579_s28 }
 0xe2a   : > { %p22640_p13 = scmp.ne.s32.totalorder %s16579_s28, %s22639_s27  ;;  %p22647_p3 = scmp.lt.s32.totalorder %s22639_s27, %s22639_s27 }
 0xe2c   : > { %p22641_p0 = pnand %p22640_p13, %p19945_p12  ;;  %p22648_p4 = por %p22647_p3, %p22646_p2 }
 0xe2e   : > { %p22642_p1 = pneg %p22641_p0 }
 0xe30   : > { %p22649_p5 = pnand %p22648_p4, %p22642_p1 }
 0xe32   : > { %22652 = shalt.err (!%p22649_p5)
}
 0xe33   : > { %s22653_s20 = scalar_lea.hbm %s28520_s15, 128 }
 0xe34   : > { %p22654_p6 = scmp.ne.s32.totalorder %s28520_s15, %s22653_s20  ;;  %p22659_p9 = scmp.lt.u32.totalorder %s22653_s20, %s28520_s15 }
 0xe36   : > { %p22655_p7 = pnand %p22654_p6, %p19945_p12 }
 0xe38   : > { %p22656_p8 = pneg %p22655_p7 }
 0xe3a   : > { %p22661_p10 = pnand %p22659_p9, %p22656_p8 }
 0xe3c   : > { %22664 = shalt.err (!%p22661_p10)
}
 0xe3d   : > { %19942 = dma.vmem_to_hbm [thread:$0]  (%p19945_p12), %s16579_s28, 128, %s28520_s15, [#allocation5]  }
 0xe3e   : > { %22678 = dma.done.wait (%p19945_p12), [#allocation5], 128  }
 0xe3f   : > { %22680 = vsyncadd (%p19945_p12), [#allocation5], 4294967168 }
 0xe40 PF: > { %s28526_s18 = sld [smem:[#allocation7_spill]]  ;;  %s28527_s19 = sld [smem:[#allocation8_spill]] }
 0xe41   : > { %p23_p11 = scmp.ge.s32.totalorder %s22797_s22, 6   ;;  %s28528_s20 = smov %s22797_s22 }
 0xe43   :  { %25 = sbr.rel (!%p23_p11) target bundleno = 4 (0x4), region = 163 }
 0xe4a   :  { %16591 = vsyncpa [#allocation5], 1 }
 0xe4b   :  { %16593 = vsyncpa [#allocation5 + $0x1], 1 }

</bundles_post_ra>
